<compile_context>
chip_gen: v5e
topology: v5e:2x2
jax: 0.10.0
libtpu: 0.0.40
codegen_flags: <defaults>
</compile_context>

<pallas_src>
import numpy as np
import jax
import jax.numpy as jnp
from jax import lax
from jax.experimental import pallas as pl
from jax.experimental.pallas import tpu as pltpu

BN_EPS = 1e-5
RRELU_SLOPE = (0.125 + 1.0 / 3.0) / 2.0   # F.rrelu(training=False) slope
PAD = 8                                   # halo rows above/below each frame


# --------------------------------------------------------------------------
# Structural constants (numpy, built once on the host)
# --------------------------------------------------------------------------

def _same_res_selector(W):
    S = np.zeros((3, W, W), np.float32)
    for b in range(3):
        for j in range(W):
            jp = j + b - 1
            if 0 <= jp < W:
                S[b, jp, j] = 1.0
    return S


def _upsample_selector(W):
    W2 = 2 * W
    S = np.zeros((3, W, W2), np.float32)
    for b in range(3):
        for j2 in range(W2):
            jb = j2 + b - 1
            if 0 <= jb < W2:
                S[b, jb // 2, j2] = 1.0
    return S


def _bands(sel, w):
    # sel: (3, Win, Wout); w: (3, 3, Cin, Cout)  ->  3 band matrices
    out = []
    for a in range(3):
        band = np.einsum('bpq,bcd->pcqd', sel, w[a])
        win, cin, wout, cout = band.shape
        out.append(np.ascontiguousarray(band.reshape(win * cin, wout * cout)))
    return out


def _group_mat(W, C):
    G = np.zeros((W * C, C), np.float32)
    for j in range(W):
        G[j * C:(j + 1) * C, :] = np.eye(C, dtype=np.float32)
    return G


def _row_mask(N, H):
    m = np.zeros((N * (H + 2),), np.float32)
    for n in range(N):
        m[n * (H + 2) + 1:n * (H + 2) + 1 + H] = 1.0
    return m


def _tile_bias(b, W):
    b = np.asarray(b, np.float32)
    return np.tile(b, (W,)).reshape(1, W * b.shape[0])


def _pool_lane_mat(C):
    # AdaptiveAvgPool2d((7,7)) on 8x8 == 2x2 window / stride 1; W-direction.
    P = np.zeros((8 * C, 7 * C), np.float32)
    for j in range(7):
        for c in range(C):
            P[j * C + c, j * C + c] += 0.25
            P[(j + 1) * C + c, j * C + c] += 0.25
    return P


def _pool_row_mat(N):
    # H-direction 2-tap sum + re-layout 10-row frame -> 9-row frame.
    M = np.zeros((N * 9, N * 10), np.float32)
    for n in range(N):
        for i in range(7):
            M[n * 9 + 1 + i, n * 10 + 1 + i] = 1.0
            M[n * 9 + 1 + i, n * 10 + 2 + i] = 1.0
    return M


def _place_linear(N):
    # scatter (N, z) linear output onto the data rows of the 1x1 frame
    P = np.zeros((N * 3, N), np.float32)
    for n in range(N):
        P[n * 3 + 1, n] = 1.0
    return P


def _interleave_mats(N, H):
    # place even/odd output rows (resolution H frame) into the 2H frame
    R = N * (H + 2)
    Rn = N * (2 * H + 2)
    Pe = np.zeros((Rn, R), np.float32)
    Po = np.zeros((Rn, R), np.float32)
    for n in range(N):
        for i in range(H):
            Pe[n * (2 * H + 2) + 1 + 2 * i, n * (H + 2) + 1 + i] = 1.0
            Po[n * (2 * H + 2) + 2 + 2 * i, n * (H + 2) + 1 + i] = 1.0
    return Pe, Po


# --------------------------------------------------------------------------
# Constant packer: many small matrices -> two lane-width-classed slabs
# --------------------------------------------------------------------------

class _Packer:
    WIDTHS = (32, 128)

    def __init__(self):
        self.rows = [0, 0]
        self.entries = []
        self.layout = {}

    def add(self, name, arr):
        arr = np.asarray(arr, np.float32)
        if arr.ndim == 1:
            arr = arr.reshape(1, -1)
        r, c = arr.shape
        if c > self.WIDTHS[-1]:
            raise ValueError('constant %s too wide: %d' % (name, c))
        slab = 0 if c <= self.WIDTHS[0] else 1
        off = self.rows[slab]
        self.entries.append((slab, off, arr))
        self.layout[name] = (slab, off, r, c)
        self.rows[slab] = off + ((r + 7) // 8) * 8   # keep offsets 8-aligned

    def finalize(self):
        slabs = []
        for i, w in enumerate(self.WIDTHS):
            slabs.append(np.zeros((max(self.rows[i], 8), w), np.float32))
        for slab, off, arr in self.entries:
            slabs[slab][off:off + arr.shape[0], :arr.shape[1]] = arr
        return [jnp.asarray(s) for s in slabs]


# --------------------------------------------------------------------------
# The fused decoder kernel
# --------------------------------------------------------------------------

def _build_decoder_kernel(N, layout, block_cfg):
    f32 = jnp.float32
    nblk = len(block_cfg)

    def kernel(*refs):
        x_ref, s32_ref, s128_ref, out_ref = refs[0], refs[1], refs[2], refs[3]
        scratch = refs[4:]
        xpads = scratch[0:2 * nblk:2]
        hpads = scratch[1:2 * nblk:2]
        f28 = scratch[2 * nblk]
        slabs = (s32_ref, s128_ref)

        def cst(name):
            s, off, r, c = layout[name]
            return slabs[s][off:off + r, 0:c]

        def dot(a, b):
            return jnp.dot(a, b, preferred_element_type=f32)

        def zero_halo(ref, R, L):
            # zero only the halo rows; data rows are written exactly once below
            ref[0:PAD, :] = jnp.zeros((PAD, L), f32)
            ref[PAD + R:PAD + R + PAD, :] = jnp.zeros((PAD, L), f32)

        for k, (H, W, Cin, Cmid, Cout) in enumerate(block_cfg):
            R = N * (H + 2)
            zero_halo(xpads[k], R, W * Cin)
            zero_halo(hpads[k], R, W * Cmid)
        H5, W5, _, _, Cout5 = block_cfg[-1]
        R6 = N * (2 * H5 + 2)
        L6 = 2 * W5 * Cout5
        zero_halo(f28, R6, L6)

        # ---- fused nn.Linear head -> 1x1xZ map on the block-1 frame ----
        h0 = dot(x_ref[...], cst('mw')) + cst('mb')
        xpads[0][PAD:PAD + N * (block_cfg[0][0] + 2), :] = dot(cst('place1'), h0)

        def res_up(k):
            H, W, Cin, Cmid, Cout = block_cfg[k]
            R = N * (H + 2)
            inv1 = 1.0 / float(N * H * W)
            inv2 = 1.0 / float(N * 4 * H * W)
            p = 'b%d_' % (k + 1)
            xpad, hpad = xpads[k], hpads[k]

            Xm = xpad[PAD - 1:PAD - 1 + R, :]
            X0 = xpad[PAD:PAD + R, :]
            Xp = xpad[PAD + 1:PAD + 1 + R, :]
            mrow = cst(p + 'mrow')          # (1, R)  data-row selector
            mcol = cst(p + 'mcol')          # (R, 1)

            # conv1 (3x3, same resolution) + bias
            c1 = (dot(Xm, cst(p + 'w1a')) + dot(X0, cst(p + 'w1b'))
                  + dot(Xp, cst(p + 'w1c')) + cst(p + 'bias1'))

            # BatchNorm1 (batch stats via MXU) + rrelu; zero the frame pad rows
            G1, G1T = cst(p + 'G1'), cst(p + 'G1T')
            s1 = dot(dot(mrow, c1), G1)
            q1 = dot(dot(mrow, c1 * c1), G1)
            m1 = s1 * inv1
            v1 = jnp.maximum(q1 * inv1 - m1 * m1, 0.0)
            sc1 = cst(p + 'g1') * lax.rsqrt(v1 + BN_EPS)
            sh1 = cst(p + 'be1') - m1 * sc1
            h1 = c1 * dot(sc1, G1T) + dot(sh1, G1T)
            h1 = jnp.where(h1 >= 0.0, h1, h1 * RRELU_SLOPE) * mcol
            hpad[PAD:PAD + R, :] = h1
            Hm = hpad[PAD - 1:PAD - 1 + R, :]
            H0 = hpad[PAD:PAD + R, :]
            Hp = hpad[PAD + 1:PAD + 1 + R, :]

            # 2x nearest upsample + conv2 (even / odd output rows)
            bias2 = cst(p + 'bias2')
            c2e = dot(Hm, cst(p + 'uA')) + dot(H0, cst(p + 'uB')) + bias2
            c2o = dot(H0, cst(p + 'uC')) + dot(Hp, cst(p + 'uD')) + bias2

            # skip path: 2x nearest upsample + conv3
            bias3 = cst(p + 'bias3')
            ske = dot(Xm, cst(p + 'sA')) + dot(X0, cst(p + 'sB')) + bias3
            sko = dot(X0, cst(p + 'sC')) + dot(Xp, cst(p + 'sD')) + bias3

            # BatchNorm2 + skip add + rrelu
            G2, G2T = cst(p + 'G2'), cst(p + 'G2T')
            sB = dot(dot(mrow, c2e) + dot(mrow, c2o), G2)
            qB = dot(dot(mrow, c2e * c2e) + dot(mrow, c2o * c2o), G2)
            m2 = sB * inv2
            v2 = jnp.maximum(qB * inv2 - m2 * m2, 0.0)
            sc2 = cst(p + 'g2') * lax.rsqrt(v2 + BN_EPS)
            sh2 = cst(p + 'be2') - m2 * sc2
            sc2r = dot(sc2, G2T)
            sh2r = dot(sh2, G2T)
            ye = c2e * sc2r + sh2r + ske
            yo = c2o * sc2r + sh2r + sko
            ye = jnp.where(ye >= 0.0, ye, ye * RRELU_SLOPE)
            yo = jnp.where(yo >= 0.0, yo, yo * RRELU_SLOPE)

            # interleave even/odd rows into the next (2H x 2W) frame; the
            # placement matrices only pick data rows, so pad rows stay zero.
            return dot(cst(p + 'Pe'), ye) + dot(cst(p + 'Po'), yo)

        frame = res_up(0)                                   # 1x1  -> 2x2
        xpads[1][PAD:PAD + frame.shape[0], :] = frame
        frame = res_up(1)                                   # 2x2  -> 4x4
        xpads[2][PAD:PAD + frame.shape[0], :] = frame
        frame = res_up(2)                                   # 4x4  -> 8x8
        # fused AdaptiveAvgPool2d((7,7)) on the 8x8 frame
        pooled = dot(dot(cst('m4'), frame), cst('pmat'))
        xpads[3][PAD:PAD + pooled.shape[0], :] = pooled
        frame = res_up(3)                                   # 7x7  -> 14x14
        xpads[4][PAD:PAD + frame.shape[0], :] = frame
        frame = res_up(4)                                   # 14x14 -> 28x28
        f28[PAD:PAD + frame.shape[0], :] = frame

        # fused final 3x3 conv6; output lanes zero-padded to 128 -> dense store
        Fm = f28[PAD - 1:PAD - 1 + R6, :]
        F0 = f28[PAD:PAD + R6, :]
        Fp = f28[PAD + 1:PAD + 1 + R6, :]
        out_ref[...] = (dot(Fm, cst('c6a')) + dot(F0, cst('c6b'))
                        + dot(Fp, cst('c6c')) + cst('bias6'))

    return kernel


# --------------------------------------------------------------------------
# Parameters, preparation and forward
# --------------------------------------------------------------------------

def init_params(key, channels=3, ch=8, z=16, hidden_dim=10):
    keys = iter(jax.random.split(key, 64))

    def conv_p(cin, cout):
        w = jax.random.normal(next(keys), (3, 3, cin, cout), jnp.float32)
        w = w * (1.0 / (9.0 * cin) ** 0.5)
        b = jax.random.normal(next(keys), (cout,), jnp.float32) * 0.01
        return w, b

    def res_p(cin, cout):
        w1, b1 = conv_p(cin, cout // 2)
        w2, b2 = conv_p(cout // 2, cout)
        w3, b3 = conv_p(cin, cout)
        return dict(w1=w1, b1=b1,
                    g1=jnp.ones((cout // 2,), jnp.float32),
                    be1=jnp.zeros((cout // 2,), jnp.float32),
                    w2=w2, b2=b2,
                    g2=jnp.ones((cout,), jnp.float32),
                    be2=jnp.zeros((cout,), jnp.float32),
                    w3=w3, b3=b3)

    params = dict(
        middle_w=jax.random.normal(next(keys), (hidden_dim, z), jnp.float32)
        * (1.0 / hidden_dim ** 0.5),
        middle_b=jax.random.normal(next(keys), (z,), jnp.float32) * 0.01,
        conv1=res_p(z, ch * 4),
        conv2=res_p(ch * 4, ch * 4),
        conv3=res_p(ch * 4, ch * 2),
        conv4=res_p(ch * 2, ch),
        conv5=res_p(ch, ch // 2),
    )
    w6, b6 = conv_p(ch // 2, channels)
    params['conv6_w'], params['conv6_b'] = w6, b6
    return params


def prepare_params(raw, N, channels=3, ch=8, z=16, hidden_dim=10):
    wide = 28
    block_cfg = [
        (1, 1, z, ch * 2, ch * 4),          # (H, W, Cin, Cmid, Cout)
        (2, 2, ch * 4, ch * 2, ch * 4),
        (4, 4, ch * 4, ch, ch * 2),
        (7, 7, ch * 2, ch // 2, ch),
        (14, 14, ch, ch // 4, ch // 2),
    ]
    res_keys = ['conv1', 'conv2', 'conv3', 'conv4', 'conv5']
    pk = _Packer()

    for k, ((H, W, Cin, Cmid, Cout), rk) in enumerate(zip(block_cfg, res_keys)):
        rp = {kk: np.asarray(v, np.float32) for kk, v in raw[rk].items()}
        p = 'b%d_' % (k + 1)
        b1 = _bands(_same_res_selector(W), rp['w1'])
        u = _bands(_upsample_selector(W), rp['w2'])
        s = _bands(_upsample_selector(W), rp['w3'])
        pk.add(p + 'w1a', b1[0]); pk.add(p + 'w1b', b1[1]); pk.add(p + 'w1c', b1[2])
        pk.add(p + 'bias1', _tile_bias(rp['b1'], W))
        G1 = _group_mat(W, Cmid)
        pk.add(p + 'G1', G1)
        pk.add(p + 'G1T', np.ascontiguousarray(G1.T))
        pk.add(p + 'g1', rp['g1'].reshape(1, -1))
        pk.add(p + 'be1', rp['be1'].reshape(1, -1))
        pk.add(p + 'uA', u[0]); pk.add(p + 'uB', u[1] + u[2])
        pk.add(p + 'uC', u[0] + u[1]); pk.add(p + 'uD', u[2])
        pk.add(p + 'bias2', _tile_bias(rp['b2'], 2 * W))
        pk.add(p + 'sA', s[0]); pk.add(p + 'sB', s[1] + s[2])
        pk.add(p + 'sC', s[0] + s[1]); pk.add(p + 'sD', s[2])
        pk.add(p + 'bias3', _tile_bias(rp['b3'], 2 * W))
        G2 = _group_mat(2 * W, Cout)
        pk.add(p + 'G2', G2)
        pk.add(p + 'G2T', np.ascontiguousarray(G2.T))
        pk.add(p + 'g2', rp['g2'].reshape(1, -1))
        pk.add(p + 'be2', rp['be2'].reshape(1, -1))
        mrow = _row_mask(N, H)
        pk.add(p + 'mrow', mrow.reshape(1, -1))
        pk.add(p + 'mcol', mrow.reshape(-1, 1))
        Pe, Po = _interleave_mats(N, H)
        pk.add(p + 'Pe', Pe)
        pk.add(p + 'Po', Po)

    pk.add('mw', np.asarray(raw['middle_w'], np.float32))
    pk.add('mb', np.asarray(raw['middle_b'], np.float32).reshape(1, -1))
    pk.add('place1', _place_linear(N))
    pk.add('m4', _pool_row_mat(N))
    pk.add('pmat', _pool_lane_mat(ch * 2))
    c6 = _bands(_same_res_selector(wide), np.asarray(raw['conv6_w'], np.float32))
    for nm, band in zip(('c6a', 'c6b', 'c6c'), c6):
        pad = np.zeros((band.shape[0], 128), np.float32)
        pad[:, :band.shape[1]] = band
        pk.add(nm, pad)
    b6 = np.zeros((1, 128), np.float32)
    b6[0, :wide * channels] = np.tile(np.asarray(raw['conv6_b'], np.float32), wide)
    pk.add('bias6', b6)

    slabs = pk.finalize()
    kernel = _build_decoder_kernel(N, pk.layout, block_cfg)

    scratch = []
    for (H, W, Cin, Cmid, Cout) in block_cfg:
        R = N * (H + 2)
        scratch.append(pltpu.VMEM((R + 2 * PAD, W * Cin), jnp.float32))
        scratch.append(pltpu.VMEM((R + 2 * PAD, W * Cmid), jnp.float32))
    H5, W5, _, _, Cout5 = block_cfg[-1]
    scratch.append(pltpu.VMEM((N * (2 * H5 + 2) + 2 * PAD, 2 * W5 * Cout5),
                              jnp.float32))

    return dict(kernel=kernel, slabs=slabs, scratch=scratch,
                wide=wide, channels=channels)


def decoder_forward(x, prep):
    N = x.shape[0]
    wide, channels = prep['wide'], prep['channels']
    operands = (x,) + tuple(prep['slabs'])
    # Whole decoder = one kernel launch.  grid=(1,): constants + scratch fit in
    # a few MiB of VMEM on every generation (v5e/v6e/v7x), so no tiling needed.
    # TODO(synk): for batches >> 2 on v7x, add a leading "parallel" batch axis
    # (requires cross-chunk BN-stat combine) to use both TensorCores.
    out2d = pl.pallas_call(
        prep['kernel'],
        out_shape=jax.ShapeDtypeStruct((N * (wide + 2), 128), jnp.float32),
        grid=(1,),
        in_specs=[pl.BlockSpec(a.shape, lambda i: (0, 0)) for a in operands],
        out_specs=pl.BlockSpec((N * (wide + 2), 128), lambda i: (0, 0)),
        scratch_shapes=prep['scratch'],
        compiler_params=pltpu.CompilerParams(
            dimension_semantics=("arbitrary",)),
    )(*operands)
    img = out2d[:, :wide * channels].reshape(N, wide + 2, wide, channels)
    img = img[:, 1:wide + 1]
    return jnp.transpose(img, (0, 3, 1, 2))     # NCHW, like PyTorch


# --------------------------------------------------------------------------
# Pure-JAX reference (same semantics) for the correctness check
# --------------------------------------------------------------------------

def _ref_conv(x, w_hwio, b):
    w = jnp.transpose(w_hwio, (3, 2, 0, 1))
    y = lax.conv_general_dilated(
        x, w, window_strides=(1, 1), padding=((1, 1), (1, 1)),
        dimension_numbers=('NCHW', 'OIHW', 'NCHW'),
        precision=lax.Precision.HIGHEST)
    return y + b.reshape(1, -1, 1, 1)


def _ref_bn(x, g, b):
    m = jnp.mean(x, axis=(0, 2, 3), keepdims=True)
    v = jnp.var(x, axis=(0, 2, 3), keepdims=True)          # biased
    return (x - m) * lax.rsqrt(v + BN_EPS) * g.reshape(1, -1, 1, 1) \
        + b.reshape(1, -1, 1, 1)


def _ref_rrelu(x):
    return jnp.where(x >= 0, x, x * RRELU_SLOPE)


def _ref_up2(x):
    return jnp.repeat(jnp.repeat(x, 2, axis=2), 2, axis=3)


def _ref_res_up(x, p):
    skip = _ref_conv(_ref_up2(x), p['w3'], p['b3'])
    h = _ref_rrelu(_ref_bn(_ref_conv(x, p['w1'], p['b1']), p['g1'], p['be1']))
    h = _ref_up2(h)
    h = _ref_bn(_ref_conv(h, p['w2'], p['b2']), p['g2'], p['be2'])
    return _ref_rrelu(h + skip)


def decoder_reference(x, raw):
    h = jnp.dot(x, raw['middle_w'], precision=lax.Precision.HIGHEST) \
        + raw['middle_b']
    h = h.reshape(x.shape[0], -1, 1, 1)
    h = _ref_res_up(h, raw['conv1'])
    h = _ref_res_up(h, raw['conv2'])
    h = _ref_res_up(h, raw['conv3'])
    h = 0.25 * (h[:, :, 0:7, 0:7] + h[:, :, 1:8, 0:7]
                + h[:, :, 0:7, 1:8] + h[:, :, 1:8, 1:8])    # AdaptiveAvgPool 7x7
    h = _ref_res_up(h, raw['conv4'])
    h = _ref_res_up(h, raw['conv5'])
    return _ref_conv(h, raw['conv6_w'], raw['conv6_b'])


# --------------------------------------------------------------------------
# main
# --------------------------------------------------------------------------

if __name__ == "__main__":
    # Decoder(channels=3, ch=8, z=16, hidden_dim=10, wide=28), batch=2
    B, hidden_dim = 2, 10
    channels, ch, z = 3, 8, 16

    key = jax.random.PRNGKey(0)
    pkey, xkey = jax.random.split(key)
    raw = init_params(pkey, channels=channels, ch=ch, z=z, hidden_dim=hidden_dim)
    prep = prepare_params(raw, N=B, channels=channels, ch=ch, z=z,
                          hidden_dim=hidden_dim)

    x = jax.random.normal(xkey, (B, hidden_dim), jnp.float32)

    fwd = jax.jit(lambda inp: decoder_forward(inp, prep))
    out = jax.block_until_ready(fwd(x))

    assert out.shape == (B, channels, 28, 28), out.shape
    assert out.dtype == jnp.float32
    assert bool(jnp.all(jnp.isfinite(out)))

    ref = jax.block_until_ready(jax.jit(lambda inp: decoder_reference(inp, raw))(x))
    np.testing.assert_allclose(np.asarray(out), np.asarray(ref),
                               rtol=3e-2, atol=3e-2)
    print("KERNEL_OK")
</pallas_src>

<mosaic_0001>
module attributes {stable_mosaic.version = 11 : i64} {
  func.func @kernel(%arg0: i32, %arg1: memref<2x10xf32, #tpu.memory_space<vmem>>, %arg2: memref<2712x32xf32, #tpu.memory_space<vmem>>, %arg3: memref<2952x128xf32, #tpu.memory_space<vmem>>, %arg4: memref<60x128xf32, #tpu.memory_space<vmem>>, %arg5: memref<22x16xf32, #tpu.memory_space<vmem>>, %arg6: memref<22x16xf32, #tpu.memory_space<vmem>>, %arg7: memref<24x64xf32, #tpu.memory_space<vmem>>, %arg8: memref<24x32xf32, #tpu.memory_space<vmem>>, %arg9: memref<28x128xf32, #tpu.memory_space<vmem>>, %arg10: memref<28x32xf32, #tpu.memory_space<vmem>>, %arg11: memref<34x112xf32, #tpu.memory_space<vmem>>, %arg12: memref<34x28xf32, #tpu.memory_space<vmem>>, %arg13: memref<48x112xf32, #tpu.memory_space<vmem>>, %arg14: memref<48x28xf32, #tpu.memory_space<vmem>>, %arg15: memref<76x112xf32, #tpu.memory_space<vmem>>) attributes {dimension_semantics = [#tpu.dimension_semantics<arbitrary>], iteration_bounds = array<i64: 1>, scalar_prefetch = 0 : i64, scratch_operands = 11 : i64, tpu.core_type = #tpu.core_type<tc>, window_params = [{pipeline_mode = #tpu.pipeline_mode<synchronous>, transform_indices = @transform_0, window_bounds = array<i64: 2, 10>}, {pipeline_mode = #tpu.pipeline_mode<synchronous>, transform_indices = @transform_1, window_bounds = array<i64: 2712, 32>}, {pipeline_mode = #tpu.pipeline_mode<synchronous>, transform_indices = @transform_2, window_bounds = array<i64: 2952, 128>}, {pipeline_mode = #tpu.pipeline_mode<synchronous>, transform_indices = @transform_3, window_bounds = array<i64: 60, 128>}]} {
    %cst = arith.constant 0.000000e+00 : f32
    %0 = vector.broadcast %cst : f32 to vector<8x16xf32>
    %c0 = arith.constant 0 : index
    %c0_0 = arith.constant 0 : index
    %1 = vector.load %arg5[%c0, %c0_0] : memref<22x16xf32, #tpu.memory_space<vmem>>, vector<8x16xf32>
    tpu.vector_store %arg5[%c0, %c0_0], %0 {strides = array<i32>} : memref<22x16xf32, #tpu.memory_space<vmem>>, vector<8x16xf32>,
    %cst_1 = arith.constant 0.000000e+00 : f32
    %2 = vector.broadcast %cst_1 : f32 to vector<8x16xf32>
    %c14 = arith.constant 14 : index
    %c0_2 = arith.constant 0 : index
    %3 = vector.load %arg5[%c14, %c0_2] : memref<22x16xf32, #tpu.memory_space<vmem>>, vector<8x16xf32>
    tpu.vector_store %arg5[%c14, %c0_2], %2 {strides = array<i32>} : memref<22x16xf32, #tpu.memory_space<vmem>>, vector<8x16xf32>,
    %cst_3 = arith.constant 0.000000e+00 : f32
    %4 = vector.broadcast %cst_3 : f32 to vector<8x16xf32>
    %c0_4 = arith.constant 0 : index
    %c0_5 = arith.constant 0 : index
    %5 = vector.load %arg6[%c0_4, %c0_5] : memref<22x16xf32, #tpu.memory_space<vmem>>, vector<8x16xf32>
    tpu.vector_store %arg6[%c0_4, %c0_5], %4 {strides = array<i32>} : memref<22x16xf32, #tpu.memory_space<vmem>>, vector<8x16xf32>,
    %cst_6 = arith.constant 0.000000e+00 : f32
    %6 = vector.broadcast %cst_6 : f32 to vector<8x16xf32>
    %c14_7 = arith.constant 14 : index
    %c0_8 = arith.constant 0 : index
    %7 = vector.load %arg6[%c14_7, %c0_8] : memref<22x16xf32, #tpu.memory_space<vmem>>, vector<8x16xf32>
    tpu.vector_store %arg6[%c14_7, %c0_8], %6 {strides = array<i32>} : memref<22x16xf32, #tpu.memory_space<vmem>>, vector<8x16xf32>,
    %cst_9 = arith.constant 0.000000e+00 : f32
    %8 = vector.broadcast %cst_9 : f32 to vector<8x64xf32>
    %c0_10 = arith.constant 0 : index
    %c0_11 = arith.constant 0 : index
    %9 = vector.load %arg7[%c0_10, %c0_11] : memref<24x64xf32, #tpu.memory_space<vmem>>, vector<8x64xf32>
    tpu.vector_store %arg7[%c0_10, %c0_11], %8 {strides = array<i32>} : memref<24x64xf32, #tpu.memory_space<vmem>>, vector<8x64xf32>,
    %cst_12 = arith.constant 0.000000e+00 : f32
    %10 = vector.broadcast %cst_12 : f32 to vector<8x64xf32>
    %c16 = arith.constant 16 : index
    %c0_13 = arith.constant 0 : index
    %11 = vector.load %arg7[%c16, %c0_13] : memref<24x64xf32, #tpu.memory_space<vmem>>, vector<8x64xf32>
    tpu.vector_store %arg7[%c16, %c0_13], %10 {strides = array<i32>} : memref<24x64xf32, #tpu.memory_space<vmem>>, vector<8x64xf32>,
    %cst_14 = arith.constant 0.000000e+00 : f32
    %12 = vector.broadcast %cst_14 : f32 to vector<8x32xf32>
    %c0_15 = arith.constant 0 : index
    %c0_16 = arith.constant 0 : index
    %13 = vector.load %arg8[%c0_15, %c0_16] : memref<24x32xf32, #tpu.memory_space<vmem>>, vector<8x32xf32>
    tpu.vector_store %arg8[%c0_15, %c0_16], %12 {strides = array<i32>} : memref<24x32xf32, #tpu.memory_space<vmem>>, vector<8x32xf32>,
    %cst_17 = arith.constant 0.000000e+00 : f32
    %14 = vector.broadcast %cst_17 : f32 to vector<8x32xf32>
    %c16_18 = arith.constant 16 : index
    %c0_19 = arith.constant 0 : index
    %15 = vector.load %arg8[%c16_18, %c0_19] : memref<24x32xf32, #tpu.memory_space<vmem>>, vector<8x32xf32>
    tpu.vector_store %arg8[%c16_18, %c0_19], %14 {strides = array<i32>} : memref<24x32xf32, #tpu.memory_space<vmem>>, vector<8x32xf32>,
    %cst_20 = arith.constant 0.000000e+00 : f32
    %16 = vector.broadcast %cst_20 : f32 to vector<8x128xf32>
    %c0_21 = arith.constant 0 : index
    %c0_22 = arith.constant 0 : index
    %17 = vector.load %arg9[%c0_21, %c0_22] : memref<28x128xf32, #tpu.memory_space<vmem>>, vector<8x128xf32>
    tpu.vector_store %arg9[%c0_21, %c0_22], %16 {strides = array<i32>} : memref<28x128xf32, #tpu.memory_space<vmem>>, vector<8x128xf32>,
    %cst_23 = arith.constant 0.000000e+00 : f32
    %18 = vector.broadcast %cst_23 : f32 to vector<8x128xf32>
    %c20 = arith.constant 20 : index
    %c0_24 = arith.constant 0 : index
    %19 = vector.load %arg9[%c20, %c0_24] : memref<28x128xf32, #tpu.memory_space<vmem>>, vector<8x128xf32>
    tpu.vector_store %arg9[%c20, %c0_24], %18 {strides = array<i32>} : memref<28x128xf32, #tpu.memory_space<vmem>>, vector<8x128xf32>,
    %cst_25 = arith.constant 0.000000e+00 : f32
    %20 = vector.broadcast %cst_25 : f32 to vector<8x32xf32>
    %c0_26 = arith.constant 0 : index
    %c0_27 = arith.constant 0 : index
    %21 = vector.load %arg10[%c0_26, %c0_27] : memref<28x32xf32, #tpu.memory_space<vmem>>, vector<8x32xf32>
    tpu.vector_store %arg10[%c0_26, %c0_27], %20 {strides = array<i32>} : memref<28x32xf32, #tpu.memory_space<vmem>>, vector<8x32xf32>,
    %cst_28 = arith.constant 0.000000e+00 : f32
    %22 = vector.broadcast %cst_28 : f32 to vector<8x32xf32>
    %c20_29 = arith.constant 20 : index
    %c0_30 = arith.constant 0 : index
    %23 = vector.load %arg10[%c20_29, %c0_30] : memref<28x32xf32, #tpu.memory_space<vmem>>, vector<8x32xf32>
    tpu.vector_store %arg10[%c20_29, %c0_30], %22 {strides = array<i32>} : memref<28x32xf32, #tpu.memory_space<vmem>>, vector<8x32xf32>,
    %cst_31 = arith.constant 0.000000e+00 : f32
    %24 = vector.broadcast %cst_31 : f32 to vector<8x112xf32>
    %c0_32 = arith.constant 0 : index
    %c0_33 = arith.constant 0 : index
    %25 = vector.load %arg11[%c0_32, %c0_33] : memref<34x112xf32, #tpu.memory_space<vmem>>, vector<8x112xf32>
    tpu.vector_store %arg11[%c0_32, %c0_33], %24 {strides = array<i32>} : memref<34x112xf32, #tpu.memory_space<vmem>>, vector<8x112xf32>,
    %cst_34 = arith.constant 0.000000e+00 : f32
    %26 = vector.broadcast %cst_34 : f32 to vector<8x112xf32>
    %c26 = arith.constant 26 : index
    %c0_35 = arith.constant 0 : index
    %27 = vector.load %arg11[%c26, %c0_35] : memref<34x112xf32, #tpu.memory_space<vmem>>, vector<8x112xf32>
    tpu.vector_store %arg11[%c26, %c0_35], %26 {strides = array<i32>} : memref<34x112xf32, #tpu.memory_space<vmem>>, vector<8x112xf32>,
    %cst_36 = arith.constant 0.000000e+00 : f32
    %28 = vector.broadcast %cst_36 : f32 to vector<8x28xf32>
    %c0_37 = arith.constant 0 : index
    %c0_38 = arith.constant 0 : index
    %29 = vector.load %arg12[%c0_37, %c0_38] : memref<34x28xf32, #tpu.memory_space<vmem>>, vector<8x28xf32>
    tpu.vector_store %arg12[%c0_37, %c0_38], %28 {strides = array<i32>} : memref<34x28xf32, #tpu.memory_space<vmem>>, vector<8x28xf32>,
    %cst_39 = arith.constant 0.000000e+00 : f32
    %30 = vector.broadcast %cst_39 : f32 to vector<8x28xf32>
    %c26_40 = arith.constant 26 : index
    %c0_41 = arith.constant 0 : index
    %31 = vector.load %arg12[%c26_40, %c0_41] : memref<34x28xf32, #tpu.memory_space<vmem>>, vector<8x28xf32>
    tpu.vector_store %arg12[%c26_40, %c0_41], %30 {strides = array<i32>} : memref<34x28xf32, #tpu.memory_space<vmem>>, vector<8x28xf32>,
    %cst_42 = arith.constant 0.000000e+00 : f32
    %32 = vector.broadcast %cst_42 : f32 to vector<8x112xf32>
    %c0_43 = arith.constant 0 : index
    %c0_44 = arith.constant 0 : index
    %33 = vector.load %arg13[%c0_43, %c0_44] : memref<48x112xf32, #tpu.memory_space<vmem>>, vector<8x112xf32>
    tpu.vector_store %arg13[%c0_43, %c0_44], %32 {strides = array<i32>} : memref<48x112xf32, #tpu.memory_space<vmem>>, vector<8x112xf32>,
    %cst_45 = arith.constant 0.000000e+00 : f32
    %34 = vector.broadcast %cst_45 : f32 to vector<8x112xf32>
    %c40 = arith.constant 40 : index
    %c0_46 = arith.constant 0 : index
    %35 = vector.load %arg13[%c40, %c0_46] : memref<48x112xf32, #tpu.memory_space<vmem>>, vector<8x112xf32>
    tpu.vector_store %arg13[%c40, %c0_46], %34 {strides = array<i32>} : memref<48x112xf32, #tpu.memory_space<vmem>>, vector<8x112xf32>,
    %cst_47 = arith.constant 0.000000e+00 : f32
    %36 = vector.broadcast %cst_47 : f32 to vector<8x28xf32>
    %c0_48 = arith.constant 0 : index
    %c0_49 = arith.constant 0 : index
    %37 = vector.load %arg14[%c0_48, %c0_49] : memref<48x28xf32, #tpu.memory_space<vmem>>, vector<8x28xf32>
    tpu.vector_store %arg14[%c0_48, %c0_49], %36 {strides = array<i32>} : memref<48x28xf32, #tpu.memory_space<vmem>>, vector<8x28xf32>,
    %cst_50 = arith.constant 0.000000e+00 : f32
    %38 = vector.broadcast %cst_50 : f32 to vector<8x28xf32>
    %c40_51 = arith.constant 40 : index
    %c0_52 = arith.constant 0 : index
    %39 = vector.load %arg14[%c40_51, %c0_52] : memref<48x28xf32, #tpu.memory_space<vmem>>, vector<8x28xf32>
    tpu.vector_store %arg14[%c40_51, %c0_52], %38 {strides = array<i32>} : memref<48x28xf32, #tpu.memory_space<vmem>>, vector<8x28xf32>,
    %cst_53 = arith.constant 0.000000e+00 : f32
    %40 = vector.broadcast %cst_53 : f32 to vector<8x112xf32>
    %c0_54 = arith.constant 0 : index
    %c0_55 = arith.constant 0 : index
    %41 = vector.load %arg15[%c0_54, %c0_55] : memref<76x112xf32, #tpu.memory_space<vmem>>, vector<8x112xf32>
    tpu.vector_store %arg15[%c0_54, %c0_55], %40 {strides = array<i32>} : memref<76x112xf32, #tpu.memory_space<vmem>>, vector<8x112xf32>,
    %cst_56 = arith.constant 0.000000e+00 : f32
    %42 = vector.broadcast %cst_56 : f32 to vector<8x112xf32>
    %c68 = arith.constant 68 : index
    %c0_57 = arith.constant 0 : index
    %43 = vector.load %arg15[%c68, %c0_57] : memref<76x112xf32, #tpu.memory_space<vmem>>, vector<8x112xf32>
    tpu.vector_store %arg15[%c68, %c0_57], %42 {strides = array<i32>} : memref<76x112xf32, #tpu.memory_space<vmem>>, vector<8x112xf32>,
    %c0_58 = arith.constant 0 : index
    %c0_59 = arith.constant 0 : index
    %44 = vector.load %arg1[%c0_58, %c0_59] : memref<2x10xf32, #tpu.memory_space<vmem>>, vector<2x10xf32>
    %c2656 = arith.constant 2656 : index
    %c0_60 = arith.constant 0 : index
    %45 = vector.load %arg2[%c2656, %c0_60] : memref<2712x32xf32, #tpu.memory_space<vmem>>, vector<10x16xf32>
    %cst_61 = arith.constant dense<0.000000e+00> : vector<2x16xf32>
    %46 = tpu.matmul %44, %45, %cst_61 {dimension_numbers = #tpu.dot_dimension_numbers<[1], [0], [0], [1], [0, 0, 1, 1], [], []>} : vector<2x10xf32>, vector<10x16xf32>, vector<2x16xf32> -> vector<2x16xf32>
    %c2672 = arith.constant 2672 : index
    %c0_62 = arith.constant 0 : index
    %47 = vector.load %arg2[%c2672, %c0_62] : memref<2712x32xf32, #tpu.memory_space<vmem>>, vector<1x16xf32>
    %48 = vector.broadcast %47 : vector<1x16xf32> to vector<2x16xf32>
    %49 = arith.addf %46, %48 : vector<2x16xf32>
    %c2680 = arith.constant 2680 : index
    %c0_63 = arith.constant 0 : index
    %50 = vector.load %arg2[%c2680, %c0_63] : memref<2712x32xf32, #tpu.memory_space<vmem>>, vector<6x2xf32>
    %cst_64 = arith.constant dense<0.000000e+00> : vector<6x16xf32>
    %51 = tpu.matmul %50, %49, %cst_64 {dimension_numbers = #tpu.dot_dimension_numbers<[1], [0], [0], [1], [0, 0, 1, 1], [], []>} : vector<6x2xf32>, vector<2x16xf32>, vector<6x16xf32> -> vector<6x16xf32>
    %c8 = arith.constant 8 : index
    %c0_65 = arith.constant 0 : index
    %52 = vector.load %arg5[%c8, %c0_65] : memref<22x16xf32, #tpu.memory_space<vmem>>, vector<6x16xf32>
    tpu.vector_store %arg5[%c8, %c0_65], %51 {strides = array<i32>} : memref<22x16xf32, #tpu.memory_space<vmem>>, vector<6x16xf32>,
    %c7 = arith.constant 7 : index
    %c0_66 = arith.constant 0 : index
    %53 = vector.load %arg5[%c7, %c0_66] : memref<22x16xf32, #tpu.memory_space<vmem>>, vector<6x16xf32>
    %c8_67 = arith.constant 8 : index
    %c0_68 = arith.constant 0 : index
    %54 = vector.load %arg5[%c8_67, %c0_68] : memref<22x16xf32, #tpu.memory_space<vmem>>, vector<6x16xf32>
    %c9 = arith.constant 9 : index
    %c0_69 = arith.constant 0 : index
    %55 = vector.load %arg5[%c9, %c0_69] : memref<22x16xf32, #tpu.memory_space<vmem>>, vector<6x16xf32>
    %c184 = arith.constant 184 : index
    %c0_70 = arith.constant 0 : index
    %56 = vector.load %arg2[%c184, %c0_70] : memref<2712x32xf32, #tpu.memory_space<vmem>>, vector<1x6xf32>
    %c192 = arith.constant 192 : index
    %c0_71 = arith.constant 0 : index
    %57 = vector.load %arg2[%c192, %c0_71] : memref<2712x32xf32, #tpu.memory_space<vmem>>, vector<6x1xf32>
    %c0_72 = arith.constant 0 : index
    %c0_73 = arith.constant 0 : index
    %58 = vector.load %arg2[%c0_72, %c0_73] : memref<2712x32xf32, #tpu.memory_space<vmem>>, vector<16x16xf32>
    %cst_74 = arith.constant dense<0.000000e+00> : vector<6x16xf32>
    %59 = tpu.matmul %53, %58, %cst_74 {dimension_numbers = #tpu.dot_dimension_numbers<[1], [0], [0], [1], [0, 0, 1, 1], [], []>} : vector<6x16xf32>, vector<16x16xf32>, vector<6x16xf32> -> vector<6x16xf32>
    %c16_75 = arith.constant 16 : index
    %c0_76 = arith.constant 0 : index
    %60 = vector.load %arg2[%c16_75, %c0_76] : memref<2712x32xf32, #tpu.memory_space<vmem>>, vector<16x16xf32>
    %cst_77 = arith.constant dense<0.000000e+00> : vector<6x16xf32>
    %61 = tpu.matmul %54, %60, %cst_77 {dimension_numbers = #tpu.dot_dimension_numbers<[1], [0], [0], [1], [0, 0, 1, 1], [], []>} : vector<6x16xf32>, vector<16x16xf32>, vector<6x16xf32> -> vector<6x16xf32>
    %62 = arith.addf %59, %61 : vector<6x16xf32>
    %c32 = arith.constant 32 : index
    %c0_78 = arith.constant 0 : index
    %63 = vector.load %arg2[%c32, %c0_78] : memref<2712x32xf32, #tpu.memory_space<vmem>>, vector<16x16xf32>
    %cst_79 = arith.constant dense<0.000000e+00> : vector<6x16xf32>
    %64 = tpu.matmul %55, %63, %cst_79 {dimension_numbers = #tpu.dot_dimension_numbers<[1], [0], [0], [1], [0, 0, 1, 1], [], []>} : vector<6x16xf32>, vector<16x16xf32>, vector<6x16xf32> -> vector<6x16xf32>
    %65 = arith.addf %62, %64 : vector<6x16xf32>
    %c48 = arith.constant 48 : index
    %c0_80 = arith.constant 0 : index
    %66 = vector.load %arg2[%c48, %c0_80] : memref<2712x32xf32, #tpu.memory_space<vmem>>, vector<1x16xf32>
    %67 = vector.broadcast %66 : vector<1x16xf32> to vector<6x16xf32>
    %68 = arith.addf %65, %67 : vector<6x16xf32>
    %c56 = arith.constant 56 : index
    %c0_81 = arith.constant 0 : index
    %69 = vector.load %arg2[%c56, %c0_81] : memref<2712x32xf32, #tpu.memory_space<vmem>>, vector<16x16xf32>
    %c72 = arith.constant 72 : index
    %c0_82 = arith.constant 0 : index
    %70 = vector.load %arg2[%c72, %c0_82] : memref<2712x32xf32, #tpu.memory_space<vmem>>, vector<16x16xf32>
    %cst_83 = arith.constant dense<0.000000e+00> : vector<1x16xf32>
    %71 = tpu.matmul %56, %68, %cst_83 {dimension_numbers = #tpu.dot_dimension_numbers<[1], [0], [0], [1], [0, 0, 1, 1], [], []>} : vector<1x6xf32>, vector<6x16xf32>, vector<1x16xf32> -> vector<1x16xf32>
    %cst_84 = arith.constant dense<0.000000e+00> : vector<1x16xf32>
    %72 = tpu.matmul %71, %69, %cst_84 {dimension_numbers = #tpu.dot_dimension_numbers<[1], [0], [0], [1], [0, 0, 1, 1], [], []>} : vector<1x16xf32>, vector<16x16xf32>, vector<1x16xf32> -> vector<1x16xf32>
    %73 = arith.mulf %68, %68 : vector<6x16xf32>
    %cst_85 = arith.constant dense<0.000000e+00> : vector<1x16xf32>
    %74 = tpu.matmul %56, %73, %cst_85 {dimension_numbers = #tpu.dot_dimension_numbers<[1], [0], [0], [1], [0, 0, 1, 1], [], []>} : vector<1x6xf32>, vector<6x16xf32>, vector<1x16xf32> -> vector<1x16xf32>
    %cst_86 = arith.constant dense<0.000000e+00> : vector<1x16xf32>
    %75 = tpu.matmul %74, %69, %cst_86 {dimension_numbers = #tpu.dot_dimension_numbers<[1], [0], [0], [1], [0, 0, 1, 1], [], []>} : vector<1x16xf32>, vector<16x16xf32>, vector<1x16xf32> -> vector<1x16xf32>
    %cst_87 = arith.constant 5.000000e-01 : f32
    %76 = vector.broadcast %cst_87 : f32 to vector<1x16xf32>
    %77 = arith.mulf %72, %76 : vector<1x16xf32>
    %cst_88 = arith.constant 5.000000e-01 : f32
    %78 = vector.broadcast %cst_88 : f32 to vector<1x16xf32>
    %79 = arith.mulf %75, %78 : vector<1x16xf32>
    %80 = arith.mulf %77, %77 : vector<1x16xf32>
    %81 = arith.subf %79, %80 : vector<1x16xf32>
    %cst_89 = arith.constant 0.000000e+00 : f32
    %82 = vector.broadcast %cst_89 : f32 to vector<1x16xf32>
    %83 = arith.maximumf %81, %82 : vector<1x16xf32>
    %c88 = arith.constant 88 : index
    %c0_90 = arith.constant 0 : index
    %84 = vector.load %arg2[%c88, %c0_90] : memref<2712x32xf32, #tpu.memory_space<vmem>>, vector<1x16xf32>
    %cst_91 = arith.constant 9.99999974E-6 : f32
    %85 = vector.broadcast %cst_91 : f32 to vector<1x16xf32>
    %86 = arith.addf %83, %85 : vector<1x16xf32>
    %87 = math.rsqrt %86 : vector<1x16xf32>
    %88 = arith.mulf %84, %87 : vector<1x16xf32>
    %c96 = arith.constant 96 : index
    %c0_92 = arith.constant 0 : index
    %89 = vector.load %arg2[%c96, %c0_92] : memref<2712x32xf32, #tpu.memory_space<vmem>>, vector<1x16xf32>
    %90 = arith.mulf %77, %88 : vector<1x16xf32>
    %91 = arith.subf %89, %90 : vector<1x16xf32>
    %cst_93 = arith.constant dense<0.000000e+00> : vector<1x16xf32>
    %92 = tpu.matmul %88, %70, %cst_93 {dimension_numbers = #tpu.dot_dimension_numbers<[1], [0], [0], [1], [0, 0, 1, 1], [], []>} : vector<1x16xf32>, vector<16x16xf32>, vector<1x16xf32> -> vector<1x16xf32>
    %93 = vector.broadcast %92 : vector<1x16xf32> to vector<6x16xf32>
    %94 = arith.mulf %68, %93 : vector<6x16xf32>
    %cst_94 = arith.constant dense<0.000000e+00> : vector<1x16xf32>
    %95 = tpu.matmul %91, %70, %cst_94 {dimension_numbers = #tpu.dot_dimension_numbers<[1], [0], [0], [1], [0, 0, 1, 1], [], []>} : vector<1x16xf32>, vector<16x16xf32>, vector<1x16xf32> -> vector<1x16xf32>
    %96 = vector.broadcast %95 : vector<1x16xf32> to vector<6x16xf32>
    %97 = arith.addf %94, %96 : vector<6x16xf32>
    %cst_95 = arith.constant 0.000000e+00 : f32
    %98 = vector.broadcast %cst_95 : f32 to vector<6x16xf32>
    %99 = arith.cmpf oge, %97, %98 : vector<6x16xf32>
    %cst_96 = arith.constant 0.229166672 : f32
    %100 = vector.broadcast %cst_96 : f32 to vector<6x16xf32>
    %101 = arith.mulf %97, %100 : vector<6x16xf32>
    %102 = arith.select %99, %97, %101 : vector<6x16xi1>, vector<6x16xf32>
    %103 = vector.broadcast %57 : vector<6x1xf32> to vector<6x16xf32>
    %104 = arith.mulf %102, %103 : vector<6x16xf32>
    %c8_97 = arith.constant 8 : index
    %c0_98 = arith.constant 0 : index
    %105 = vector.load %arg6[%c8_97, %c0_98] : memref<22x16xf32, #tpu.memory_space<vmem>>, vector<6x16xf32>
    tpu.vector_store %arg6[%c8_97, %c0_98], %104 {strides = array<i32>} : memref<22x16xf32, #tpu.memory_space<vmem>>, vector<6x16xf32>,
    %c7_99 = arith.constant 7 : index
    %c0_100 = arith.constant 0 : index
    %106 = vector.load %arg6[%c7_99, %c0_100] : memref<22x16xf32, #tpu.memory_space<vmem>>, vector<6x16xf32>
    %c8_101 = arith.constant 8 : index
    %c0_102 = arith.constant 0 : index
    %107 = vector.load %arg6[%c8_101, %c0_102] : memref<22x16xf32, #tpu.memory_space<vmem>>, vector<6x16xf32>
    %c9_103 = arith.constant 9 : index
    %c0_104 = arith.constant 0 : index
    %108 = vector.load %arg6[%c9_103, %c0_104] : memref<22x16xf32, #tpu.memory_space<vmem>>, vector<6x16xf32>
    %c64 = arith.constant 64 : index
    %c0_105 = arith.constant 0 : index
    %109 = vector.load %arg3[%c64, %c0_105] : memref<2952x128xf32, #tpu.memory_space<vmem>>, vector<1x64xf32>
    %c0_106 = arith.constant 0 : index
    %c0_107 = arith.constant 0 : index
    %110 = vector.load %arg3[%c0_106, %c0_107] : memref<2952x128xf32, #tpu.memory_space<vmem>>, vector<16x64xf32>
    %cst_108 = arith.constant dense<0.000000e+00> : vector<6x64xf32>
    %111 = tpu.matmul %106, %110, %cst_108 {dimension_numbers = #tpu.dot_dimension_numbers<[1], [0], [0], [1], [0, 0, 1, 1], [], []>} : vector<6x16xf32>, vector<16x64xf32>, vector<6x64xf32> -> vector<6x64xf32>
    %c16_109 = arith.constant 16 : index
    %c0_110 = arith.constant 0 : index
    %112 = vector.load %arg3[%c16_109, %c0_110] : memref<2952x128xf32, #tpu.memory_space<vmem>>, vector<16x64xf32>
    %cst_111 = arith.constant dense<0.000000e+00> : vector<6x64xf32>
    %113 = tpu.matmul %107, %112, %cst_111 {dimension_numbers = #tpu.dot_dimension_numbers<[1], [0], [0], [1], [0, 0, 1, 1], [], []>} : vector<6x16xf32>, vector<16x64xf32>, vector<6x64xf32> -> vector<6x64xf32>
    %114 = arith.addf %111, %113 : vector<6x64xf32>
    %115 = vector.broadcast %109 : vector<1x64xf32> to vector<6x64xf32>
    %116 = arith.addf %114, %115 : vector<6x64xf32>
    %c32_112 = arith.constant 32 : index
    %c0_113 = arith.constant 0 : index
    %117 = vector.load %arg3[%c32_112, %c0_113] : memref<2952x128xf32, #tpu.memory_space<vmem>>, vector<16x64xf32>
    %cst_114 = arith.constant dense<0.000000e+00> : vector<6x64xf32>
    %118 = tpu.matmul %107, %117, %cst_114 {dimension_numbers = #tpu.dot_dimension_numbers<[1], [0], [0], [1], [0, 0, 1, 1], [], []>} : vector<6x16xf32>, vector<16x64xf32>, vector<6x64xf32> -> vector<6x64xf32>
    %c48_115 = arith.constant 48 : index
    %c0_116 = arith.constant 0 : index
    %119 = vector.load %arg3[%c48_115, %c0_116] : memref<2952x128xf32, #tpu.memory_space<vmem>>, vector<16x64xf32>
    %cst_117 = arith.constant dense<0.000000e+00> : vector<6x64xf32>
    %120 = tpu.matmul %108, %119, %cst_117 {dimension_numbers = #tpu.dot_dimension_numbers<[1], [0], [0], [1], [0, 0, 1, 1], [], []>} : vector<6x16xf32>, vector<16x64xf32>, vector<6x64xf32> -> vector<6x64xf32>
    %121 = arith.addf %118, %120 : vector<6x64xf32>
    %122 = vector.broadcast %109 : vector<1x64xf32> to vector<6x64xf32>
    %123 = arith.addf %121, %122 : vector<6x64xf32>
    %c136 = arith.constant 136 : index
    %c0_118 = arith.constant 0 : index
    %124 = vector.load %arg3[%c136, %c0_118] : memref<2952x128xf32, #tpu.memory_space<vmem>>, vector<1x64xf32>
    %c72_119 = arith.constant 72 : index
    %c0_120 = arith.constant 0 : index
    %125 = vector.load %arg3[%c72_119, %c0_120] : memref<2952x128xf32, #tpu.memory_space<vmem>>, vector<16x64xf32>
    %cst_121 = arith.constant dense<0.000000e+00> : vector<6x64xf32>
    %126 = tpu.matmul %53, %125, %cst_121 {dimension_numbers = #tpu.dot_dimension_numbers<[1], [0], [0], [1], [0, 0, 1, 1], [], []>} : vector<6x16xf32>, vector<16x64xf32>, vector<6x64xf32> -> vector<6x64xf32>
    %c88_122 = arith.constant 88 : index
    %c0_123 = arith.constant 0 : index
    %127 = vector.load %arg3[%c88_122, %c0_123] : memref<2952x128xf32, #tpu.memory_space<vmem>>, vector<16x64xf32>
    %cst_124 = arith.constant dense<0.000000e+00> : vector<6x64xf32>
    %128 = tpu.matmul %54, %127, %cst_124 {dimension_numbers = #tpu.dot_dimension_numbers<[1], [0], [0], [1], [0, 0, 1, 1], [], []>} : vector<6x16xf32>, vector<16x64xf32>, vector<6x64xf32> -> vector<6x64xf32>
    %129 = arith.addf %126, %128 : vector<6x64xf32>
    %130 = vector.broadcast %124 : vector<1x64xf32> to vector<6x64xf32>
    %131 = arith.addf %129, %130 : vector<6x64xf32>
    %c104 = arith.constant 104 : index
    %c0_125 = arith.constant 0 : index
    %132 = vector.load %arg3[%c104, %c0_125] : memref<2952x128xf32, #tpu.memory_space<vmem>>, vector<16x64xf32>
    %cst_126 = arith.constant dense<0.000000e+00> : vector<6x64xf32>
    %133 = tpu.matmul %54, %132, %cst_126 {dimension_numbers = #tpu.dot_dimension_numbers<[1], [0], [0], [1], [0, 0, 1, 1], [], []>} : vector<6x16xf32>, vector<16x64xf32>, vector<6x64xf32> -> vector<6x64xf32>
    %c120 = arith.constant 120 : index
    %c0_127 = arith.constant 0 : index
    %134 = vector.load %arg3[%c120, %c0_127] : memref<2952x128xf32, #tpu.memory_space<vmem>>, vector<16x64xf32>
    %cst_128 = arith.constant dense<0.000000e+00> : vector<6x64xf32>
    %135 = tpu.matmul %55, %134, %cst_128 {dimension_numbers = #tpu.dot_dimension_numbers<[1], [0], [0], [1], [0, 0, 1, 1], [], []>} : vector<6x16xf32>, vector<16x64xf32>, vector<6x64xf32> -> vector<6x64xf32>
    %136 = arith.addf %133, %135 : vector<6x64xf32>
    %137 = vector.broadcast %124 : vector<1x64xf32> to vector<6x64xf32>
    %138 = arith.addf %136, %137 : vector<6x64xf32>
    %c104_129 = arith.constant 104 : index
    %c0_130 = arith.constant 0 : index
    %139 = vector.load %arg2[%c104_129, %c0_130] : memref<2712x32xf32, #tpu.memory_space<vmem>>, vector<64x32xf32>
    %c144 = arith.constant 144 : index
    %c0_131 = arith.constant 0 : index
    %140 = vector.load %arg3[%c144, %c0_131] : memref<2952x128xf32, #tpu.memory_space<vmem>>, vector<32x64xf32>
    %cst_132 = arith.constant dense<0.000000e+00> : vector<1x64xf32>
    %141 = tpu.matmul %56, %116, %cst_132 {dimension_numbers = #tpu.dot_dimension_numbers<[1], [0], [0], [1], [0, 0, 1, 1], [], []>} : vector<1x6xf32>, vector<6x64xf32>, vector<1x64xf32> -> vector<1x64xf32>
    %cst_133 = arith.constant dense<0.000000e+00> : vector<1x64xf32>
    %142 = tpu.matmul %56, %123, %cst_133 {dimension_numbers = #tpu.dot_dimension_numbers<[1], [0], [0], [1], [0, 0, 1, 1], [], []>} : vector<1x6xf32>, vector<6x64xf32>, vector<1x64xf32> -> vector<1x64xf32>
    %143 = arith.addf %141, %142 : vector<1x64xf32>
    %cst_134 = arith.constant dense<0.000000e+00> : vector<1x32xf32>
    %144 = tpu.matmul %143, %139, %cst_134 {dimension_numbers = #tpu.dot_dimension_numbers<[1], [0], [0], [1], [0, 0, 1, 1], [], []>} : vector<1x64xf32>, vector<64x32xf32>, vector<1x32xf32> -> vector<1x32xf32>
    %145 = arith.mulf %116, %116 : vector<6x64xf32>
    %cst_135 = arith.constant dense<0.000000e+00> : vector<1x64xf32>
    %146 = tpu.matmul %56, %145, %cst_135 {dimension_numbers = #tpu.dot_dimension_numbers<[1], [0], [0], [1], [0, 0, 1, 1], [], []>} : vector<1x6xf32>, vector<6x64xf32>, vector<1x64xf32> -> vector<1x64xf32>
    %147 = arith.mulf %123, %123 : vector<6x64xf32>
    %cst_136 = arith.constant dense<0.000000e+00> : vector<1x64xf32>
    %148 = tpu.matmul %56, %147, %cst_136 {dimension_numbers = #tpu.dot_dimension_numbers<[1], [0], [0], [1], [0, 0, 1, 1], [], []>} : vector<1x6xf32>, vector<6x64xf32>, vector<1x64xf32> -> vector<1x64xf32>
    %149 = arith.addf %146, %148 : vector<1x64xf32>
    %cst_137 = arith.constant dense<0.000000e+00> : vector<1x32xf32>
    %150 = tpu.matmul %149, %139, %cst_137 {dimension_numbers = #tpu.dot_dimension_numbers<[1], [0], [0], [1], [0, 0, 1, 1], [], []>} : vector<1x64xf32>, vector<64x32xf32>, vector<1x32xf32> -> vector<1x32xf32>
    %cst_138 = arith.constant 1.250000e-01 : f32
    %151 = vector.broadcast %cst_138 : f32 to vector<1x32xf32>
    %152 = arith.mulf %144, %151 : vector<1x32xf32>
    %cst_139 = arith.constant 1.250000e-01 : f32
    %153 = vector.broadcast %cst_139 : f32 to vector<1x32xf32>
    %154 = arith.mulf %150, %153 : vector<1x32xf32>
    %155 = arith.mulf %152, %152 : vector<1x32xf32>
    %156 = arith.subf %154, %155 : vector<1x32xf32>
    %cst_140 = arith.constant 0.000000e+00 : f32
    %157 = vector.broadcast %cst_140 : f32 to vector<1x32xf32>
    %158 = arith.maximumf %156, %157 : vector<1x32xf32>
    %c168 = arith.constant 168 : index
    %c0_141 = arith.constant 0 : index
    %159 = vector.load %arg2[%c168, %c0_141] : memref<2712x32xf32, #tpu.memory_space<vmem>>, vector<1x32xf32>
    %cst_142 = arith.constant 9.99999974E-6 : f32
    %160 = vector.broadcast %cst_142 : f32 to vector<1x32xf32>
    %161 = arith.addf %158, %160 : vector<1x32xf32>
    %162 = math.rsqrt %161 : vector<1x32xf32>
    %163 = arith.mulf %159, %162 : vector<1x32xf32>
    %c176 = arith.constant 176 : index
    %c0_143 = arith.constant 0 : index
    %164 = vector.load %arg2[%c176, %c0_143] : memref<2712x32xf32, #tpu.memory_space<vmem>>, vector<1x32xf32>
    %165 = arith.mulf %152, %163 : vector<1x32xf32>
    %166 = arith.subf %164, %165 : vector<1x32xf32>
    %cst_144 = arith.constant dense<0.000000e+00> : vector<1x64xf32>
    %167 = tpu.matmul %163, %140, %cst_144 {dimension_numbers = #tpu.dot_dimension_numbers<[1], [0], [0], [1], [0, 0, 1, 1], [], []>} : vector<1x32xf32>, vector<32x64xf32>, vector<1x64xf32> -> vector<1x64xf32>
    %cst_145 = arith.constant dense<0.000000e+00> : vector<1x64xf32>
    %168 = tpu.matmul %166, %140, %cst_145 {dimension_numbers = #tpu.dot_dimension_numbers<[1], [0], [0], [1], [0, 0, 1, 1], [], []>} : vector<1x32xf32>, vector<32x64xf32>, vector<1x64xf32> -> vector<1x64xf32>
    %169 = vector.broadcast %167 : vector<1x64xf32> to vector<6x64xf32>
    %170 = arith.mulf %116, %169 : vector<6x64xf32>
    %171 = vector.broadcast %168 : vector<1x64xf32> to vector<6x64xf32>
    %172 = arith.addf %170, %171 : vector<6x64xf32>
    %173 = arith.addf %172, %131 : vector<6x64xf32>
    %174 = vector.broadcast %167 : vector<1x64xf32> to vector<6x64xf32>
    %175 = arith.mulf %123, %174 : vector<6x64xf32>
    %176 = vector.broadcast %168 : vector<1x64xf32> to vector<6x64xf32>
    %177 = arith.addf %175, %176 : vector<6x64xf32>
    %178 = arith.addf %177, %138 : vector<6x64xf32>
    %cst_146 = arith.constant 0.000000e+00 : f32
    %179 = vector.broadcast %cst_146 : f32 to vector<6x64xf32>
    %180 = arith.cmpf oge, %173, %179 : vector<6x64xf32>
    %cst_147 = arith.constant 0.229166672 : f32
    %181 = vector.broadcast %cst_147 : f32 to vector<6x64xf32>
    %182 = arith.mulf %173, %181 : vector<6x64xf32>
    %183 = arith.select %180, %173, %182 : vector<6x64xi1>, vector<6x64xf32>
    %cst_148 = arith.constant 0.000000e+00 : f32
    %184 = vector.broadcast %cst_148 : f32 to vector<6x64xf32>
    %185 = arith.cmpf oge, %178, %184 : vector<6x64xf32>
    %cst_149 = arith.constant 0.229166672 : f32
    %186 = vector.broadcast %cst_149 : f32 to vector<6x64xf32>
    %187 = arith.mulf %178, %186 : vector<6x64xf32>
    %188 = arith.select %185, %178, %187 : vector<6x64xi1>, vector<6x64xf32>
    %c200 = arith.constant 200 : index
    %c0_150 = arith.constant 0 : index
    %189 = vector.load %arg2[%c200, %c0_150] : memref<2712x32xf32, #tpu.memory_space<vmem>>, vector<8x6xf32>
    %cst_151 = arith.constant dense<0.000000e+00> : vector<8x64xf32>
    %190 = tpu.matmul %189, %183, %cst_151 {dimension_numbers = #tpu.dot_dimension_numbers<[1], [0], [0], [1], [0, 0, 1, 1], [], []>} : vector<8x6xf32>, vector<6x64xf32>, vector<8x64xf32> -> vector<8x64xf32>
    %c208 = arith.constant 208 : index
    %c0_152 = arith.constant 0 : index
    %191 = vector.load %arg2[%c208, %c0_152] : memref<2712x32xf32, #tpu.memory_space<vmem>>, vector<8x6xf32>
    %cst_153 = arith.constant dense<0.000000e+00> : vector<8x64xf32>
    %192 = tpu.matmul %191, %188, %cst_153 {dimension_numbers = #tpu.dot_dimension_numbers<[1], [0], [0], [1], [0, 0, 1, 1], [], []>} : vector<8x6xf32>, vector<6x64xf32>, vector<8x64xf32> -> vector<8x64xf32>
    %193 = arith.addf %190, %192 : vector<8x64xf32>
    %c8_154 = arith.constant 8 : index
    %c0_155 = arith.constant 0 : index
    %194 = vector.load %arg7[%c8_154, %c0_155] : memref<24x64xf32, #tpu.memory_space<vmem>>, vector<8x64xf32>
    tpu.vector_store %arg7[%c8_154, %c0_155], %193 {strides = array<i32>} : memref<24x64xf32, #tpu.memory_space<vmem>>, vector<8x64xf32>,
    %c7_156 = arith.constant 7 : index
    %c0_157 = arith.constant 0 : index
    %195 = vector.load %arg7[%c7_156, %c0_157] : memref<24x64xf32, #tpu.memory_space<vmem>>, vector<8x64xf32>
    %c8_158 = arith.constant 8 : index
    %c0_159 = arith.constant 0 : index
    %196 = vector.load %arg7[%c8_158, %c0_159] : memref<24x64xf32, #tpu.memory_space<vmem>>, vector<8x64xf32>
    %c9_160 = arith.constant 9 : index
    %c0_161 = arith.constant 0 : index
    %197 = vector.load %arg7[%c9_160, %c0_161] : memref<24x64xf32, #tpu.memory_space<vmem>>, vector<8x64xf32>
    %c624 = arith.constant 624 : index
    %c0_162 = arith.constant 0 : index
    %198 = vector.load %arg2[%c624, %c0_162] : memref<2712x32xf32, #tpu.memory_space<vmem>>, vector<1x8xf32>
    %c632 = arith.constant 632 : index
    %c0_163 = arith.constant 0 : index
    %199 = vector.load %arg2[%c632, %c0_163] : memref<2712x32xf32, #tpu.memory_space<vmem>>, vector<8x1xf32>
    %c216 = arith.constant 216 : index
    %c0_164 = arith.constant 0 : index
    %200 = vector.load %arg2[%c216, %c0_164] : memref<2712x32xf32, #tpu.memory_space<vmem>>, vector<64x32xf32>
    %cst_165 = arith.constant dense<0.000000e+00> : vector<8x32xf32>
    %201 = tpu.matmul %195, %200, %cst_165 {dimension_numbers = #tpu.dot_dimension_numbers<[1], [0], [0], [1], [0, 0, 1, 1], [], []>} : vector<8x64xf32>, vector<64x32xf32>, vector<8x32xf32> -> vector<8x32xf32>
    %c280 = arith.constant 280 : index
    %c0_166 = arith.constant 0 : index
    %202 = vector.load %arg2[%c280, %c0_166] : memref<2712x32xf32, #tpu.memory_space<vmem>>, vector<64x32xf32>
    %cst_167 = arith.constant dense<0.000000e+00> : vector<8x32xf32>
    %203 = tpu.matmul %196, %202, %cst_167 {dimension_numbers = #tpu.dot_dimension_numbers<[1], [0], [0], [1], [0, 0, 1, 1], [], []>} : vector<8x64xf32>, vector<64x32xf32>, vector<8x32xf32> -> vector<8x32xf32>
    %204 = arith.addf %201, %203 : vector<8x32xf32>
    %c344 = arith.constant 344 : index
    %c0_168 = arith.constant 0 : index
    %205 = vector.load %arg2[%c344, %c0_168] : memref<2712x32xf32, #tpu.memory_space<vmem>>, vector<64x32xf32>
    %cst_169 = arith.constant dense<0.000000e+00> : vector<8x32xf32>
    %206 = tpu.matmul %197, %205, %cst_169 {dimension_numbers = #tpu.dot_dimension_numbers<[1], [0], [0], [1], [0, 0, 1, 1], [], []>} : vector<8x64xf32>, vector<64x32xf32>, vector<8x32xf32> -> vector<8x32xf32>
    %207 = arith.addf %204, %206 : vector<8x32xf32>
    %c408 = arith.constant 408 : index
    %c0_170 = arith.constant 0 : index
    %208 = vector.load %arg2[%c408, %c0_170] : memref<2712x32xf32, #tpu.memory_space<vmem>>, vector<1x32xf32>
    %209 = vector.broadcast %208 : vector<1x32xf32> to vector<8x32xf32>
    %210 = arith.addf %207, %209 : vector<8x32xf32>
    %c416 = arith.constant 416 : index
    %c0_171 = arith.constant 0 : index
    %211 = vector.load %arg2[%c416, %c0_171] : memref<2712x32xf32, #tpu.memory_space<vmem>>, vector<32x16xf32>
    %c448 = arith.constant 448 : index
    %c0_172 = arith.constant 0 : index
    %212 = vector.load %arg2[%c448, %c0_172] : memref<2712x32xf32, #tpu.memory_space<vmem>>, vector<16x32xf32>
    %cst_173 = arith.constant dense<0.000000e+00> : vector<1x32xf32>
    %213 = tpu.matmul %198, %210, %cst_173 {dimension_numbers = #tpu.dot_dimension_numbers<[1], [0], [0], [1], [0, 0, 1, 1], [], []>} : vector<1x8xf32>, vector<8x32xf32>, vector<1x32xf32> -> vector<1x32xf32>
    %cst_174 = arith.constant dense<0.000000e+00> : vector<1x16xf32>
    %214 = tpu.matmul %213, %211, %cst_174 {dimension_numbers = #tpu.dot_dimension_numbers<[1], [0], [0], [1], [0, 0, 1, 1], [], []>} : vector<1x32xf32>, vector<32x16xf32>, vector<1x16xf32> -> vector<1x16xf32>
    %215 = arith.mulf %210, %210 : vector<8x32xf32>
    %cst_175 = arith.constant dense<0.000000e+00> : vector<1x32xf32>
    %216 = tpu.matmul %198, %215, %cst_175 {dimension_numbers = #tpu.dot_dimension_numbers<[1], [0], [0], [1], [0, 0, 1, 1], [], []>} : vector<1x8xf32>, vector<8x32xf32>, vector<1x32xf32> -> vector<1x32xf32>
    %cst_176 = arith.constant dense<0.000000e+00> : vector<1x16xf32>
    %217 = tpu.matmul %216, %211, %cst_176 {dimension_numbers = #tpu.dot_dimension_numbers<[1], [0], [0], [1], [0, 0, 1, 1], [], []>} : vector<1x32xf32>, vector<32x16xf32>, vector<1x16xf32> -> vector<1x16xf32>
    %cst_177 = arith.constant 1.250000e-01 : f32
    %218 = vector.broadcast %cst_177 : f32 to vector<1x16xf32>
    %219 = arith.mulf %214, %218 : vector<1x16xf32>
    %cst_178 = arith.constant 1.250000e-01 : f32
    %220 = vector.broadcast %cst_178 : f32 to vector<1x16xf32>
    %221 = arith.mulf %217, %220 : vector<1x16xf32>
    %222 = arith.mulf %219, %219 : vector<1x16xf32>
    %223 = arith.subf %221, %222 : vector<1x16xf32>
    %cst_179 = arith.constant 0.000000e+00 : f32
    %224 = vector.broadcast %cst_179 : f32 to vector<1x16xf32>
    %225 = arith.maximumf %223, %224 : vector<1x16xf32>
    %c464 = arith.constant 464 : index
    %c0_180 = arith.constant 0 : index
    %226 = vector.load %arg2[%c464, %c0_180] : memref<2712x32xf32, #tpu.memory_space<vmem>>, vector<1x16xf32>
    %cst_181 = arith.constant 9.99999974E-6 : f32
    %227 = vector.broadcast %cst_181 : f32 to vector<1x16xf32>
    %228 = arith.addf %225, %227 : vector<1x16xf32>
    %229 = math.rsqrt %228 : vector<1x16xf32>
    %230 = arith.mulf %226, %229 : vector<1x16xf32>
    %c472 = arith.constant 472 : index
    %c0_182 = arith.constant 0 : index
    %231 = vector.load %arg2[%c472, %c0_182] : memref<2712x32xf32, #tpu.memory_space<vmem>>, vector<1x16xf32>
    %232 = arith.mulf %219, %230 : vector<1x16xf32>
    %233 = arith.subf %231, %232 : vector<1x16xf32>
    %cst_183 = arith.constant dense<0.000000e+00> : vector<1x32xf32>
    %234 = tpu.matmul %230, %212, %cst_183 {dimension_numbers = #tpu.dot_dimension_numbers<[1], [0], [0], [1], [0, 0, 1, 1], [], []>} : vector<1x16xf32>, vector<16x32xf32>, vector<1x32xf32> -> vector<1x32xf32>
    %235 = vector.broadcast %234 : vector<1x32xf32> to vector<8x32xf32>
    %236 = arith.mulf %210, %235 : vector<8x32xf32>
    %cst_184 = arith.constant dense<0.000000e+00> : vector<1x32xf32>
    %237 = tpu.matmul %233, %212, %cst_184 {dimension_numbers = #tpu.dot_dimension_numbers<[1], [0], [0], [1], [0, 0, 1, 1], [], []>} : vector<1x16xf32>, vector<16x32xf32>, vector<1x32xf32> -> vector<1x32xf32>
    %238 = vector.broadcast %237 : vector<1x32xf32> to vector<8x32xf32>
    %239 = arith.addf %236, %238 : vector<8x32xf32>
    %cst_185 = arith.constant 0.000000e+00 : f32
    %240 = vector.broadcast %cst_185 : f32 to vector<8x32xf32>
    %241 = arith.cmpf oge, %239, %240 : vector<8x32xf32>
    %cst_186 = arith.constant 0.229166672 : f32
    %242 = vector.broadcast %cst_186 : f32 to vector<8x32xf32>
    %243 = arith.mulf %239, %242 : vector<8x32xf32>
    %244 = arith.select %241, %239, %243 : vector<8x32xi1>, vector<8x32xf32>
    %245 = vector.broadcast %199 : vector<8x1xf32> to vector<8x32xf32>
    %246 = arith.mulf %244, %245 : vector<8x32xf32>
    %c8_187 = arith.constant 8 : index
    %c0_188 = arith.constant 0 : index
    %247 = vector.load %arg8[%c8_187, %c0_188] : memref<24x32xf32, #tpu.memory_space<vmem>>, vector<8x32xf32>
    tpu.vector_store %arg8[%c8_187, %c0_188], %246 {strides = array<i32>} : memref<24x32xf32, #tpu.memory_space<vmem>>, vector<8x32xf32>,
    %c7_189 = arith.constant 7 : index
    %c0_190 = arith.constant 0 : index
    %248 = vector.load %arg8[%c7_189, %c0_190] : memref<24x32xf32, #tpu.memory_space<vmem>>, vector<8x32xf32>
    %c8_191 = arith.constant 8 : index
    %c0_192 = arith.constant 0 : index
    %249 = vector.load %arg8[%c8_191, %c0_192] : memref<24x32xf32, #tpu.memory_space<vmem>>, vector<8x32xf32>
    %c9_193 = arith.constant 9 : index
    %c0_194 = arith.constant 0 : index
    %250 = vector.load %arg8[%c9_193, %c0_194] : memref<24x32xf32, #tpu.memory_space<vmem>>, vector<8x32xf32>
    %c304 = arith.constant 304 : index
    %c0_195 = arith.constant 0 : index
    %251 = vector.load %arg3[%c304, %c0_195] : memref<2952x128xf32, #tpu.memory_space<vmem>>, vector<1x128xf32>
    %c176_196 = arith.constant 176 : index
    %c0_197 = arith.constant 0 : index
    %252 = vector.load %arg3[%c176_196, %c0_197] : memref<2952x128xf32, #tpu.memory_space<vmem>>, vector<32x128xf32>
    %cst_198 = arith.constant dense<0.000000e+00> : vector<8x128xf32>
    %253 = tpu.matmul %248, %252, %cst_198 {dimension_numbers = #tpu.dot_dimension_numbers<[1], [0], [0], [1], [0, 0, 1, 1], [], []>} : vector<8x32xf32>, vector<32x128xf32>, vector<8x128xf32> -> vector<8x128xf32>
    %c208_199 = arith.constant 208 : index
    %c0_200 = arith.constant 0 : index
    %254 = vector.load %arg3[%c208_199, %c0_200] : memref<2952x128xf32, #tpu.memory_space<vmem>>, vector<32x128xf32>
    %cst_201 = arith.constant dense<0.000000e+00> : vector<8x128xf32>
    %255 = tpu.matmul %249, %254, %cst_201 {dimension_numbers = #tpu.dot_dimension_numbers<[1], [0], [0], [1], [0, 0, 1, 1], [], []>} : vector<8x32xf32>, vector<32x128xf32>, vector<8x128xf32> -> vector<8x128xf32>
    %256 = arith.addf %253, %255 : vector<8x128xf32>
    %257 = vector.broadcast %251 : vector<1x128xf32> to vector<8x128xf32>
    %258 = arith.addf %256, %257 : vector<8x128xf32>
    %c240 = arith.constant 240 : index
    %c0_202 = arith.constant 0 : index
    %259 = vector.load %arg3[%c240, %c0_202] : memref<2952x128xf32, #tpu.memory_space<vmem>>, vector<32x128xf32>
    %cst_203 = arith.constant dense<0.000000e+00> : vector<8x128xf32>
    %260 = tpu.matmul %249, %259, %cst_203 {dimension_numbers = #tpu.dot_dimension_numbers<[1], [0], [0], [1], [0, 0, 1, 1], [], []>} : vector<8x32xf32>, vector<32x128xf32>, vector<8x128xf32> -> vector<8x128xf32>
    %c272 = arith.constant 272 : index
    %c0_204 = arith.constant 0 : index
    %261 = vector.load %arg3[%c272, %c0_204] : memref<2952x128xf32, #tpu.memory_space<vmem>>, vector<32x128xf32>
    %cst_205 = arith.constant dense<0.000000e+00> : vector<8x128xf32>
    %262 = tpu.matmul %250, %261, %cst_205 {dimension_numbers = #tpu.dot_dimension_numbers<[1], [0], [0], [1], [0, 0, 1, 1], [], []>} : vector<8x32xf32>, vector<32x128xf32>, vector<8x128xf32> -> vector<8x128xf32>
    %263 = arith.addf %260, %262 : vector<8x128xf32>
    %264 = vector.broadcast %251 : vector<1x128xf32> to vector<8x128xf32>
    %265 = arith.addf %263, %264 : vector<8x128xf32>
    %c568 = arith.constant 568 : index
    %c0_206 = arith.constant 0 : index
    %266 = vector.load %arg3[%c568, %c0_206] : memref<2952x128xf32, #tpu.memory_space<vmem>>, vector<1x128xf32>
    %c312 = arith.constant 312 : index
    %c0_207 = arith.constant 0 : index
    %267 = vector.load %arg3[%c312, %c0_207] : memref<2952x128xf32, #tpu.memory_space<vmem>>, vector<64x128xf32>
    %cst_208 = arith.constant dense<0.000000e+00> : vector<8x128xf32>
    %268 = tpu.matmul %195, %267, %cst_208 {dimension_numbers = #tpu.dot_dimension_numbers<[1], [0], [0], [1], [0, 0, 1, 1], [], []>} : vector<8x64xf32>, vector<64x128xf32>, vector<8x128xf32> -> vector<8x128xf32>
    %c376 = arith.constant 376 : index
    %c0_209 = arith.constant 0 : index
    %269 = vector.load %arg3[%c376, %c0_209] : memref<2952x128xf32, #tpu.memory_space<vmem>>, vector<64x128xf32>
    %cst_210 = arith.constant dense<0.000000e+00> : vector<8x128xf32>
    %270 = tpu.matmul %196, %269, %cst_210 {dimension_numbers = #tpu.dot_dimension_numbers<[1], [0], [0], [1], [0, 0, 1, 1], [], []>} : vector<8x64xf32>, vector<64x128xf32>, vector<8x128xf32> -> vector<8x128xf32>
    %271 = arith.addf %268, %270 : vector<8x128xf32>
    %272 = vector.broadcast %266 : vector<1x128xf32> to vector<8x128xf32>
    %273 = arith.addf %271, %272 : vector<8x128xf32>
    %c440 = arith.constant 440 : index
    %c0_211 = arith.constant 0 : index
    %274 = vector.load %arg3[%c440, %c0_211] : memref<2952x128xf32, #tpu.memory_space<vmem>>, vector<64x128xf32>
    %cst_212 = arith.constant dense<0.000000e+00> : vector<8x128xf32>
    %275 = tpu.matmul %196, %274, %cst_212 {dimension_numbers = #tpu.dot_dimension_numbers<[1], [0], [0], [1], [0, 0, 1, 1], [], []>} : vector<8x64xf32>, vector<64x128xf32>, vector<8x128xf32> -> vector<8x128xf32>
    %c504 = arith.constant 504 : index
    %c0_213 = arith.constant 0 : index
    %276 = vector.load %arg3[%c504, %c0_213] : memref<2952x128xf32, #tpu.memory_space<vmem>>, vector<64x128xf32>
    %cst_214 = arith.constant dense<0.000000e+00> : vector<8x128xf32>
    %277 = tpu.matmul %197, %276, %cst_214 {dimension_numbers = #tpu.dot_dimension_numbers<[1], [0], [0], [1], [0, 0, 1, 1], [], []>} : vector<8x64xf32>, vector<64x128xf32>, vector<8x128xf32> -> vector<8x128xf32>
    %278 = arith.addf %275, %277 : vector<8x128xf32>
    %279 = vector.broadcast %266 : vector<1x128xf32> to vector<8x128xf32>
    %280 = arith.addf %278, %279 : vector<8x128xf32>
    %c480 = arith.constant 480 : index
    %c0_215 = arith.constant 0 : index
    %281 = vector.load %arg2[%c480, %c0_215] : memref<2712x32xf32, #tpu.memory_space<vmem>>, vector<128x32xf32>
    %c576 = arith.constant 576 : index
    %c0_216 = arith.constant 0 : index
    %282 = vector.load %arg3[%c576, %c0_216] : memref<2952x128xf32, #tpu.memory_space<vmem>>, vector<32x128xf32>
    %cst_217 = arith.constant dense<0.000000e+00> : vector<1x128xf32>
    %283 = tpu.matmul %198, %258, %cst_217 {dimension_numbers = #tpu.dot_dimension_numbers<[1], [0], [0], [1], [0, 0, 1, 1], [], []>} : vector<1x8xf32>, vector<8x128xf32>, vector<1x128xf32> -> vector<1x128xf32>
    %cst_218 = arith.constant dense<0.000000e+00> : vector<1x128xf32>
    %284 = tpu.matmul %198, %265, %cst_218 {dimension_numbers = #tpu.dot_dimension_numbers<[1], [0], [0], [1], [0, 0, 1, 1], [], []>} : vector<1x8xf32>, vector<8x128xf32>, vector<1x128xf32> -> vector<1x128xf32>
    %285 = arith.addf %283, %284 : vector<1x128xf32>
    %cst_219 = arith.constant dense<0.000000e+00> : vector<1x32xf32>
    %286 = tpu.matmul %285, %281, %cst_219 {dimension_numbers = #tpu.dot_dimension_numbers<[1], [0], [0], [1], [0, 0, 1, 1], [], []>} : vector<1x128xf32>, vector<128x32xf32>, vector<1x32xf32> -> vector<1x32xf32>
    %287 = arith.mulf %258, %258 : vector<8x128xf32>
    %cst_220 = arith.constant dense<0.000000e+00> : vector<1x128xf32>
    %288 = tpu.matmul %198, %287, %cst_220 {dimension_numbers = #tpu.dot_dimension_numbers<[1], [0], [0], [1], [0, 0, 1, 1], [], []>} : vector<1x8xf32>, vector<8x128xf32>, vector<1x128xf32> -> vector<1x128xf32>
    %289 = arith.mulf %265, %265 : vector<8x128xf32>
    %cst_221 = arith.constant dense<0.000000e+00> : vector<1x128xf32>
    %290 = tpu.matmul %198, %289, %cst_221 {dimension_numbers = #tpu.dot_dimension_numbers<[1], [0], [0], [1], [0, 0, 1, 1], [], []>} : vector<1x8xf32>, vector<8x128xf32>, vector<1x128xf32> -> vector<1x128xf32>
    %291 = arith.addf %288, %290 : vector<1x128xf32>
    %cst_222 = arith.constant dense<0.000000e+00> : vector<1x32xf32>
    %292 = tpu.matmul %291, %281, %cst_222 {dimension_numbers = #tpu.dot_dimension_numbers<[1], [0], [0], [1], [0, 0, 1, 1], [], []>} : vector<1x128xf32>, vector<128x32xf32>, vector<1x32xf32> -> vector<1x32xf32>
    %cst_223 = arith.constant 3.125000e-02 : f32
    %293 = vector.broadcast %cst_223 : f32 to vector<1x32xf32>
    %294 = arith.mulf %286, %293 : vector<1x32xf32>
    %cst_224 = arith.constant 3.125000e-02 : f32
    %295 = vector.broadcast %cst_224 : f32 to vector<1x32xf32>
    %296 = arith.mulf %292, %295 : vector<1x32xf32>
    %297 = arith.mulf %294, %294 : vector<1x32xf32>
    %298 = arith.subf %296, %297 : vector<1x32xf32>
    %cst_225 = arith.constant 0.000000e+00 : f32
    %299 = vector.broadcast %cst_225 : f32 to vector<1x32xf32>
    %300 = arith.maximumf %298, %299 : vector<1x32xf32>
    %c608 = arith.constant 608 : index
    %c0_226 = arith.constant 0 : index
    %301 = vector.load %arg2[%c608, %c0_226] : memref<2712x32xf32, #tpu.memory_space<vmem>>, vector<1x32xf32>
    %cst_227 = arith.constant 9.99999974E-6 : f32
    %302 = vector.broadcast %cst_227 : f32 to vector<1x32xf32>
    %303 = arith.addf %300, %302 : vector<1x32xf32>
    %304 = math.rsqrt %303 : vector<1x32xf32>
    %305 = arith.mulf %301, %304 : vector<1x32xf32>
    %c616 = arith.constant 616 : index
    %c0_228 = arith.constant 0 : index
    %306 = vector.load %arg2[%c616, %c0_228] : memref<2712x32xf32, #tpu.memory_space<vmem>>, vector<1x32xf32>
    %307 = arith.mulf %294, %305 : vector<1x32xf32>
    %308 = arith.subf %306, %307 : vector<1x32xf32>
    %cst_229 = arith.constant dense<0.000000e+00> : vector<1x128xf32>
    %309 = tpu.matmul %305, %282, %cst_229 {dimension_numbers = #tpu.dot_dimension_numbers<[1], [0], [0], [1], [0, 0, 1, 1], [], []>} : vector<1x32xf32>, vector<32x128xf32>, vector<1x128xf32> -> vector<1x128xf32>
    %cst_230 = arith.constant dense<0.000000e+00> : vector<1x128xf32>
    %310 = tpu.matmul %308, %282, %cst_230 {dimension_numbers = #tpu.dot_dimension_numbers<[1], [0], [0], [1], [0, 0, 1, 1], [], []>} : vector<1x32xf32>, vector<32x128xf32>, vector<1x128xf32> -> vector<1x128xf32>
    %311 = vector.broadcast %309 : vector<1x128xf32> to vector<8x128xf32>
    %312 = arith.mulf %258, %311 : vector<8x128xf32>
    %313 = vector.broadcast %310 : vector<1x128xf32> to vector<8x128xf32>
    %314 = arith.addf %312, %313 : vector<8x128xf32>
    %315 = arith.addf %314, %273 : vector<8x128xf32>
    %316 = vector.broadcast %309 : vector<1x128xf32> to vector<8x128xf32>
    %317 = arith.mulf %265, %316 : vector<8x128xf32>
    %318 = vector.broadcast %310 : vector<1x128xf32> to vector<8x128xf32>
    %319 = arith.addf %317, %318 : vector<8x128xf32>
    %320 = arith.addf %319, %280 : vector<8x128xf32>
    %cst_231 = arith.constant 0.000000e+00 : f32
    %321 = vector.broadcast %cst_231 : f32 to vector<8x128xf32>
    %322 = arith.cmpf oge, %315, %321 : vector<8x128xf32>
    %cst_232 = arith.constant 0.229166672 : f32
    %323 = vector.broadcast %cst_232 : f32 to vector<8x128xf32>
    %324 = arith.mulf %315, %323 : vector<8x128xf32>
    %325 = arith.select %322, %315, %324 : vector<8x128xi1>, vector<8x128xf32>
    %cst_233 = arith.constant 0.000000e+00 : f32
    %326 = vector.broadcast %cst_233 : f32 to vector<8x128xf32>
    %327 = arith.cmpf oge, %320, %326 : vector<8x128xf32>
    %cst_234 = arith.constant 0.229166672 : f32
    %328 = vector.broadcast %cst_234 : f32 to vector<8x128xf32>
    %329 = arith.mulf %320, %328 : vector<8x128xf32>
    %330 = arith.select %327, %320, %329 : vector<8x128xi1>, vector<8x128xf32>
    %c640 = arith.constant 640 : index
    %c0_235 = arith.constant 0 : index
    %331 = vector.load %arg2[%c640, %c0_235] : memref<2712x32xf32, #tpu.memory_space<vmem>>, vector<12x8xf32>
    %cst_236 = arith.constant dense<0.000000e+00> : vector<12x128xf32>
    %332 = tpu.matmul %331, %325, %cst_236 {dimension_numbers = #tpu.dot_dimension_numbers<[1], [0], [0], [1], [0, 0, 1, 1], [], []>} : vector<12x8xf32>, vector<8x128xf32>, vector<12x128xf32> -> vector<12x128xf32>
    %c656 = arith.constant 656 : index
    %c0_237 = arith.constant 0 : index
    %333 = vector.load %arg2[%c656, %c0_237] : memref<2712x32xf32, #tpu.memory_space<vmem>>, vector<12x8xf32>
    %cst_238 = arith.constant dense<0.000000e+00> : vector<12x128xf32>
    %334 = tpu.matmul %333, %330, %cst_238 {dimension_numbers = #tpu.dot_dimension_numbers<[1], [0], [0], [1], [0, 0, 1, 1], [], []>} : vector<12x8xf32>, vector<8x128xf32>, vector<12x128xf32> -> vector<12x128xf32>
    %335 = arith.addf %332, %334 : vector<12x128xf32>
    %c8_239 = arith.constant 8 : index
    %c0_240 = arith.constant 0 : index
    %336 = vector.load %arg9[%c8_239, %c0_240] : memref<28x128xf32, #tpu.memory_space<vmem>>, vector<12x128xf32>
    tpu.vector_store %arg9[%c8_239, %c0_240], %335 {strides = array<i32>} : memref<28x128xf32, #tpu.memory_space<vmem>>, vector<12x128xf32>,
    %c7_241 = arith.constant 7 : index
    %c0_242 = arith.constant 0 : index
    %337 = vector.load %arg9[%c7_241, %c0_242] : memref<28x128xf32, #tpu.memory_space<vmem>>, vector<12x128xf32>
    %c8_243 = arith.constant 8 : index
    %c0_244 = arith.constant 0 : index
    %338 = vector.load %arg9[%c8_243, %c0_244] : memref<28x128xf32, #tpu.memory_space<vmem>>, vector<12x128xf32>
    %c9_245 = arith.constant 9 : index
    %c0_246 = arith.constant 0 : index
    %339 = vector.load %arg9[%c9_245, %c0_246] : memref<28x128xf32, #tpu.memory_space<vmem>>, vector<12x128xf32>
    %c1264 = arith.constant 1264 : index
    %c0_247 = arith.constant 0 : index
    %340 = vector.load %arg2[%c1264, %c0_247] : memref<2712x32xf32, #tpu.memory_space<vmem>>, vector<1x12xf32>
    %c1272 = arith.constant 1272 : index
    %c0_248 = arith.constant 0 : index
    %341 = vector.load %arg2[%c1272, %c0_248] : memref<2712x32xf32, #tpu.memory_space<vmem>>, vector<12x1xf32>
    %c672 = arith.constant 672 : index
    %c0_249 = arith.constant 0 : index
    %342 = vector.load %arg2[%c672, %c0_249] : memref<2712x32xf32, #tpu.memory_space<vmem>>, vector<128x32xf32>
    %cst_250 = arith.constant dense<0.000000e+00> : vector<12x32xf32>
    %343 = tpu.matmul %337, %342, %cst_250 {dimension_numbers = #tpu.dot_dimension_numbers<[1], [0], [0], [1], [0, 0, 1, 1], [], []>} : vector<12x128xf32>, vector<128x32xf32>, vector<12x32xf32> -> vector<12x32xf32>
    %c800 = arith.constant 800 : index
    %c0_251 = arith.constant 0 : index
    %344 = vector.load %arg2[%c800, %c0_251] : memref<2712x32xf32, #tpu.memory_space<vmem>>, vector<128x32xf32>
    %cst_252 = arith.constant dense<0.000000e+00> : vector<12x32xf32>
    %345 = tpu.matmul %338, %344, %cst_252 {dimension_numbers = #tpu.dot_dimension_numbers<[1], [0], [0], [1], [0, 0, 1, 1], [], []>} : vector<12x128xf32>, vector<128x32xf32>, vector<12x32xf32> -> vector<12x32xf32>
    %346 = arith.addf %343, %345 : vector<12x32xf32>
    %c928 = arith.constant 928 : index
    %c0_253 = arith.constant 0 : index
    %347 = vector.load %arg2[%c928, %c0_253] : memref<2712x32xf32, #tpu.memory_space<vmem>>, vector<128x32xf32>
    %cst_254 = arith.constant dense<0.000000e+00> : vector<12x32xf32>
    %348 = tpu.matmul %339, %347, %cst_254 {dimension_numbers = #tpu.dot_dimension_numbers<[1], [0], [0], [1], [0, 0, 1, 1], [], []>} : vector<12x128xf32>, vector<128x32xf32>, vector<12x32xf32> -> vector<12x32xf32>
    %349 = arith.addf %346, %348 : vector<12x32xf32>
    %c1056 = arith.constant 1056 : index
    %c0_255 = arith.constant 0 : index
    %350 = vector.load %arg2[%c1056, %c0_255] : memref<2712x32xf32, #tpu.memory_space<vmem>>, vector<1x32xf32>
    %351 = vector.broadcast %350 : vector<1x32xf32> to vector<12x32xf32>
    %352 = arith.addf %349, %351 : vector<12x32xf32>
    %c1064 = arith.constant 1064 : index
    %c0_256 = arith.constant 0 : index
    %353 = vector.load %arg2[%c1064, %c0_256] : memref<2712x32xf32, #tpu.memory_space<vmem>>, vector<32x8xf32>
    %c1096 = arith.constant 1096 : index
    %c0_257 = arith.constant 0 : index
    %354 = vector.load %arg2[%c1096, %c0_257] : memref<2712x32xf32, #tpu.memory_space<vmem>>, vector<8x32xf32>
    %cst_258 = arith.constant dense<0.000000e+00> : vector<1x32xf32>
    %355 = tpu.matmul %340, %352, %cst_258 {dimension_numbers = #tpu.dot_dimension_numbers<[1], [0], [0], [1], [0, 0, 1, 1], [], []>} : vector<1x12xf32>, vector<12x32xf32>, vector<1x32xf32> -> vector<1x32xf32>
    %cst_259 = arith.constant dense<0.000000e+00> : vector<1x8xf32>
    %356 = tpu.matmul %355, %353, %cst_259 {dimension_numbers = #tpu.dot_dimension_numbers<[1], [0], [0], [1], [0, 0, 1, 1], [], []>} : vector<1x32xf32>, vector<32x8xf32>, vector<1x8xf32> -> vector<1x8xf32>
    %357 = arith.mulf %352, %352 : vector<12x32xf32>
    %cst_260 = arith.constant dense<0.000000e+00> : vector<1x32xf32>
    %358 = tpu.matmul %340, %357, %cst_260 {dimension_numbers = #tpu.dot_dimension_numbers<[1], [0], [0], [1], [0, 0, 1, 1], [], []>} : vector<1x12xf32>, vector<12x32xf32>, vector<1x32xf32> -> vector<1x32xf32>
    %cst_261 = arith.constant dense<0.000000e+00> : vector<1x8xf32>
    %359 = tpu.matmul %358, %353, %cst_261 {dimension_numbers = #tpu.dot_dimension_numbers<[1], [0], [0], [1], [0, 0, 1, 1], [], []>} : vector<1x32xf32>, vector<32x8xf32>, vector<1x8xf32> -> vector<1x8xf32>
    %cst_262 = arith.constant 3.125000e-02 : f32
    %360 = vector.broadcast %cst_262 : f32 to vector<1x8xf32>
    %361 = arith.mulf %356, %360 : vector<1x8xf32>
    %cst_263 = arith.constant 3.125000e-02 : f32
    %362 = vector.broadcast %cst_263 : f32 to vector<1x8xf32>
    %363 = arith.mulf %359, %362 : vector<1x8xf32>
    %364 = arith.mulf %361, %361 : vector<1x8xf32>
    %365 = arith.subf %363, %364 : vector<1x8xf32>
    %cst_264 = arith.constant 0.000000e+00 : f32
    %366 = vector.broadcast %cst_264 : f32 to vector<1x8xf32>
    %367 = arith.maximumf %365, %366 : vector<1x8xf32>
    %c1104 = arith.constant 1104 : index
    %c0_265 = arith.constant 0 : index
    %368 = vector.load %arg2[%c1104, %c0_265] : memref<2712x32xf32, #tpu.memory_space<vmem>>, vector<1x8xf32>
    %cst_266 = arith.constant 9.99999974E-6 : f32
    %369 = vector.broadcast %cst_266 : f32 to vector<1x8xf32>
    %370 = arith.addf %367, %369 : vector<1x8xf32>
    %371 = math.rsqrt %370 : vector<1x8xf32>
    %372 = arith.mulf %368, %371 : vector<1x8xf32>
    %c1112 = arith.constant 1112 : index
    %c0_267 = arith.constant 0 : index
    %373 = vector.load %arg2[%c1112, %c0_267] : memref<2712x32xf32, #tpu.memory_space<vmem>>, vector<1x8xf32>
    %374 = arith.mulf %361, %372 : vector<1x8xf32>
    %375 = arith.subf %373, %374 : vector<1x8xf32>
    %cst_268 = arith.constant dense<0.000000e+00> : vector<1x32xf32>
    %376 = tpu.matmul %372, %354, %cst_268 {dimension_numbers = #tpu.dot_dimension_numbers<[1], [0], [0], [1], [0, 0, 1, 1], [], []>} : vector<1x8xf32>, vector<8x32xf32>, vector<1x32xf32> -> vector<1x32xf32>
    %377 = vector.broadcast %376 : vector<1x32xf32> to vector<12x32xf32>
    %378 = arith.mulf %352, %377 : vector<12x32xf32>
    %cst_269 = arith.constant dense<0.000000e+00> : vector<1x32xf32>
    %379 = tpu.matmul %375, %354, %cst_269 {dimension_numbers = #tpu.dot_dimension_numbers<[1], [0], [0], [1], [0, 0, 1, 1], [], []>} : vector<1x8xf32>, vector<8x32xf32>, vector<1x32xf32> -> vector<1x32xf32>
    %380 = vector.broadcast %379 : vector<1x32xf32> to vector<12x32xf32>
    %381 = arith.addf %378, %380 : vector<12x32xf32>
    %cst_270 = arith.constant 0.000000e+00 : f32
    %382 = vector.broadcast %cst_270 : f32 to vector<12x32xf32>
    %383 = arith.cmpf oge, %381, %382 : vector<12x32xf32>
    %cst_271 = arith.constant 0.229166672 : f32
    %384 = vector.broadcast %cst_271 : f32 to vector<12x32xf32>
    %385 = arith.mulf %381, %384 : vector<12x32xf32>
    %386 = arith.select %383, %381, %385 : vector<12x32xi1>, vector<12x32xf32>
    %387 = vector.broadcast %341 : vector<12x1xf32> to vector<12x32xf32>
    %388 = arith.mulf %386, %387 : vector<12x32xf32>
    %c8_272 = arith.constant 8 : index
    %c0_273 = arith.constant 0 : index
    %389 = vector.load %arg10[%c8_272, %c0_273] : memref<28x32xf32, #tpu.memory_space<vmem>>, vector<12x32xf32>
    tpu.vector_store %arg10[%c8_272, %c0_273], %388 {strides = array<i32>} : memref<28x32xf32, #tpu.memory_space<vmem>>, vector<12x32xf32>,
    %c7_274 = arith.constant 7 : index
    %c0_275 = arith.constant 0 : index
    %390 = vector.load %arg10[%c7_274, %c0_275] : memref<28x32xf32, #tpu.memory_space<vmem>>, vector<12x32xf32>
    %c8_276 = arith.constant 8 : index
    %c0_277 = arith.constant 0 : index
    %391 = vector.load %arg10[%c8_276, %c0_277] : memref<28x32xf32, #tpu.memory_space<vmem>>, vector<12x32xf32>
    %c9_278 = arith.constant 9 : index
    %c0_279 = arith.constant 0 : index
    %392 = vector.load %arg10[%c9_278, %c0_279] : memref<28x32xf32, #tpu.memory_space<vmem>>, vector<12x32xf32>
    %c736 = arith.constant 736 : index
    %c0_280 = arith.constant 0 : index
    %393 = vector.load %arg3[%c736, %c0_280] : memref<2952x128xf32, #tpu.memory_space<vmem>>, vector<1x128xf32>
    %c608_281 = arith.constant 608 : index
    %c0_282 = arith.constant 0 : index
    %394 = vector.load %arg3[%c608_281, %c0_282] : memref<2952x128xf32, #tpu.memory_space<vmem>>, vector<32x128xf32>
    %cst_283 = arith.constant dense<0.000000e+00> : vector<12x128xf32>
    %395 = tpu.matmul %390, %394, %cst_283 {dimension_numbers = #tpu.dot_dimension_numbers<[1], [0], [0], [1], [0, 0, 1, 1], [], []>} : vector<12x32xf32>, vector<32x128xf32>, vector<12x128xf32> -> vector<12x128xf32>
    %c640_284 = arith.constant 640 : index
    %c0_285 = arith.constant 0 : index
    %396 = vector.load %arg3[%c640_284, %c0_285] : memref<2952x128xf32, #tpu.memory_space<vmem>>, vector<32x128xf32>
    %cst_286 = arith.constant dense<0.000000e+00> : vector<12x128xf32>
    %397 = tpu.matmul %391, %396, %cst_286 {dimension_numbers = #tpu.dot_dimension_numbers<[1], [0], [0], [1], [0, 0, 1, 1], [], []>} : vector<12x32xf32>, vector<32x128xf32>, vector<12x128xf32> -> vector<12x128xf32>
    %398 = arith.addf %395, %397 : vector<12x128xf32>
    %399 = vector.broadcast %393 : vector<1x128xf32> to vector<12x128xf32>
    %400 = arith.addf %398, %399 : vector<12x128xf32>
    %c672_287 = arith.constant 672 : index
    %c0_288 = arith.constant 0 : index
    %401 = vector.load %arg3[%c672_287, %c0_288] : memref<2952x128xf32, #tpu.memory_space<vmem>>, vector<32x128xf32>
    %cst_289 = arith.constant dense<0.000000e+00> : vector<12x128xf32>
    %402 = tpu.matmul %391, %401, %cst_289 {dimension_numbers = #tpu.dot_dimension_numbers<[1], [0], [0], [1], [0, 0, 1, 1], [], []>} : vector<12x32xf32>, vector<32x128xf32>, vector<12x128xf32> -> vector<12x128xf32>
    %c704 = arith.constant 704 : index
    %c0_290 = arith.constant 0 : index
    %403 = vector.load %arg3[%c704, %c0_290] : memref<2952x128xf32, #tpu.memory_space<vmem>>, vector<32x128xf32>
    %cst_291 = arith.constant dense<0.000000e+00> : vector<12x128xf32>
    %404 = tpu.matmul %392, %403, %cst_291 {dimension_numbers = #tpu.dot_dimension_numbers<[1], [0], [0], [1], [0, 0, 1, 1], [], []>} : vector<12x32xf32>, vector<32x128xf32>, vector<12x128xf32> -> vector<12x128xf32>
    %405 = arith.addf %402, %404 : vector<12x128xf32>
    %406 = vector.broadcast %393 : vector<1x128xf32> to vector<12x128xf32>
    %407 = arith.addf %405, %406 : vector<12x128xf32>
    %c1256 = arith.constant 1256 : index
    %c0_292 = arith.constant 0 : index
    %408 = vector.load %arg3[%c1256, %c0_292] : memref<2952x128xf32, #tpu.memory_space<vmem>>, vector<1x128xf32>
    %c744 = arith.constant 744 : index
    %c0_293 = arith.constant 0 : index
    %409 = vector.load %arg3[%c744, %c0_293] : memref<2952x128xf32, #tpu.memory_space<vmem>>, vector<128x128xf32>
    %cst_294 = arith.constant dense<0.000000e+00> : vector<12x128xf32>
    %410 = tpu.matmul %337, %409, %cst_294 {dimension_numbers = #tpu.dot_dimension_numbers<[1], [0], [0], [1], [0, 0, 1, 1], [], []>} : vector<12x128xf32>, vector<128x128xf32>, vector<12x128xf32> -> vector<12x128xf32>
    %c872 = arith.constant 872 : index
    %c0_295 = arith.constant 0 : index
    %411 = vector.load %arg3[%c872, %c0_295] : memref<2952x128xf32, #tpu.memory_space<vmem>>, vector<128x128xf32>
    %cst_296 = arith.constant dense<0.000000e+00> : vector<12x128xf32>
    %412 = tpu.matmul %338, %411, %cst_296 {dimension_numbers = #tpu.dot_dimension_numbers<[1], [0], [0], [1], [0, 0, 1, 1], [], []>} : vector<12x128xf32>, vector<128x128xf32>, vector<12x128xf32> -> vector<12x128xf32>
    %413 = arith.addf %410, %412 : vector<12x128xf32>
    %414 = vector.broadcast %408 : vector<1x128xf32> to vector<12x128xf32>
    %415 = arith.addf %413, %414 : vector<12x128xf32>
    %c1000 = arith.constant 1000 : index
    %c0_297 = arith.constant 0 : index
    %416 = vector.load %arg3[%c1000, %c0_297] : memref<2952x128xf32, #tpu.memory_space<vmem>>, vector<128x128xf32>
    %cst_298 = arith.constant dense<0.000000e+00> : vector<12x128xf32>
    %417 = tpu.matmul %338, %416, %cst_298 {dimension_numbers = #tpu.dot_dimension_numbers<[1], [0], [0], [1], [0, 0, 1, 1], [], []>} : vector<12x128xf32>, vector<128x128xf32>, vector<12x128xf32> -> vector<12x128xf32>
    %c1128 = arith.constant 1128 : index
    %c0_299 = arith.constant 0 : index
    %418 = vector.load %arg3[%c1128, %c0_299] : memref<2952x128xf32, #tpu.memory_space<vmem>>, vector<128x128xf32>
    %cst_300 = arith.constant dense<0.000000e+00> : vector<12x128xf32>
    %419 = tpu.matmul %339, %418, %cst_300 {dimension_numbers = #tpu.dot_dimension_numbers<[1], [0], [0], [1], [0, 0, 1, 1], [], []>} : vector<12x128xf32>, vector<128x128xf32>, vector<12x128xf32> -> vector<12x128xf32>
    %420 = arith.addf %417, %419 : vector<12x128xf32>
    %421 = vector.broadcast %408 : vector<1x128xf32> to vector<12x128xf32>
    %422 = arith.addf %420, %421 : vector<12x128xf32>
    %c1120 = arith.constant 1120 : index
    %c0_301 = arith.constant 0 : index
    %423 = vector.load %arg2[%c1120, %c0_301] : memref<2712x32xf32, #tpu.memory_space<vmem>>, vector<128x16xf32>
    %c1264_302 = arith.constant 1264 : index
    %c0_303 = arith.constant 0 : index
    %424 = vector.load %arg3[%c1264_302, %c0_303] : memref<2952x128xf32, #tpu.memory_space<vmem>>, vector<16x128xf32>
    %cst_304 = arith.constant dense<0.000000e+00> : vector<1x128xf32>
    %425 = tpu.matmul %340, %400, %cst_304 {dimension_numbers = #tpu.dot_dimension_numbers<[1], [0], [0], [1], [0, 0, 1, 1], [], []>} : vector<1x12xf32>, vector<12x128xf32>, vector<1x128xf32> -> vector<1x128xf32>
    %cst_305 = arith.constant dense<0.000000e+00> : vector<1x128xf32>
    %426 = tpu.matmul %340, %407, %cst_305 {dimension_numbers = #tpu.dot_dimension_numbers<[1], [0], [0], [1], [0, 0, 1, 1], [], []>} : vector<1x12xf32>, vector<12x128xf32>, vector<1x128xf32> -> vector<1x128xf32>
    %427 = arith.addf %425, %426 : vector<1x128xf32>
    %cst_306 = arith.constant dense<0.000000e+00> : vector<1x16xf32>
    %428 = tpu.matmul %427, %423, %cst_306 {dimension_numbers = #tpu.dot_dimension_numbers<[1], [0], [0], [1], [0, 0, 1, 1], [], []>} : vector<1x128xf32>, vector<128x16xf32>, vector<1x16xf32> -> vector<1x16xf32>
    %429 = arith.mulf %400, %400 : vector<12x128xf32>
    %cst_307 = arith.constant dense<0.000000e+00> : vector<1x128xf32>
    %430 = tpu.matmul %340, %429, %cst_307 {dimension_numbers = #tpu.dot_dimension_numbers<[1], [0], [0], [1], [0, 0, 1, 1], [], []>} : vector<1x12xf32>, vector<12x128xf32>, vector<1x128xf32> -> vector<1x128xf32>
    %431 = arith.mulf %407, %407 : vector<12x128xf32>
    %cst_308 = arith.constant dense<0.000000e+00> : vector<1x128xf32>
    %432 = tpu.matmul %340, %431, %cst_308 {dimension_numbers = #tpu.dot_dimension_numbers<[1], [0], [0], [1], [0, 0, 1, 1], [], []>} : vector<1x12xf32>, vector<12x128xf32>, vector<1x128xf32> -> vector<1x128xf32>
    %433 = arith.addf %430, %432 : vector<1x128xf32>
    %cst_309 = arith.constant dense<0.000000e+00> : vector<1x16xf32>
    %434 = tpu.matmul %433, %423, %cst_309 {dimension_numbers = #tpu.dot_dimension_numbers<[1], [0], [0], [1], [0, 0, 1, 1], [], []>} : vector<1x128xf32>, vector<128x16xf32>, vector<1x16xf32> -> vector<1x16xf32>
    %cst_310 = arith.constant 7.812500e-03 : f32
    %435 = vector.broadcast %cst_310 : f32 to vector<1x16xf32>
    %436 = arith.mulf %428, %435 : vector<1x16xf32>
    %cst_311 = arith.constant 7.812500e-03 : f32
    %437 = vector.broadcast %cst_311 : f32 to vector<1x16xf32>
    %438 = arith.mulf %434, %437 : vector<1x16xf32>
    %439 = arith.mulf %436, %436 : vector<1x16xf32>
    %440 = arith.subf %438, %439 : vector<1x16xf32>
    %cst_312 = arith.constant 0.000000e+00 : f32
    %441 = vector.broadcast %cst_312 : f32 to vector<1x16xf32>
    %442 = arith.maximumf %440, %441 : vector<1x16xf32>
    %c1248 = arith.constant 1248 : index
    %c0_313 = arith.constant 0 : index
    %443 = vector.load %arg2[%c1248, %c0_313] : memref<2712x32xf32, #tpu.memory_space<vmem>>, vector<1x16xf32>
    %cst_314 = arith.constant 9.99999974E-6 : f32
    %444 = vector.broadcast %cst_314 : f32 to vector<1x16xf32>
    %445 = arith.addf %442, %444 : vector<1x16xf32>
    %446 = math.rsqrt %445 : vector<1x16xf32>
    %447 = arith.mulf %443, %446 : vector<1x16xf32>
    %c1256_315 = arith.constant 1256 : index
    %c0_316 = arith.constant 0 : index
    %448 = vector.load %arg2[%c1256_315, %c0_316] : memref<2712x32xf32, #tpu.memory_space<vmem>>, vector<1x16xf32>
    %449 = arith.mulf %436, %447 : vector<1x16xf32>
    %450 = arith.subf %448, %449 : vector<1x16xf32>
    %cst_317 = arith.constant dense<0.000000e+00> : vector<1x128xf32>
    %451 = tpu.matmul %447, %424, %cst_317 {dimension_numbers = #tpu.dot_dimension_numbers<[1], [0], [0], [1], [0, 0, 1, 1], [], []>} : vector<1x16xf32>, vector<16x128xf32>, vector<1x128xf32> -> vector<1x128xf32>
    %cst_318 = arith.constant dense<0.000000e+00> : vector<1x128xf32>
    %452 = tpu.matmul %450, %424, %cst_318 {dimension_numbers = #tpu.dot_dimension_numbers<[1], [0], [0], [1], [0, 0, 1, 1], [], []>} : vector<1x16xf32>, vector<16x128xf32>, vector<1x128xf32> -> vector<1x128xf32>
    %453 = vector.broadcast %451 : vector<1x128xf32> to vector<12x128xf32>
    %454 = arith.mulf %400, %453 : vector<12x128xf32>
    %455 = vector.broadcast %452 : vector<1x128xf32> to vector<12x128xf32>
    %456 = arith.addf %454, %455 : vector<12x128xf32>
    %457 = arith.addf %456, %415 : vector<12x128xf32>
    %458 = vector.broadcast %451 : vector<1x128xf32> to vector<12x128xf32>
    %459 = arith.mulf %407, %458 : vector<12x128xf32>
    %460 = vector.broadcast %452 : vector<1x128xf32> to vector<12x128xf32>
    %461 = arith.addf %459, %460 : vector<12x128xf32>
    %462 = arith.addf %461, %422 : vector<12x128xf32>
    %cst_319 = arith.constant 0.000000e+00 : f32
    %463 = vector.broadcast %cst_319 : f32 to vector<12x128xf32>
    %464 = arith.cmpf oge, %457, %463 : vector<12x128xf32>
    %cst_320 = arith.constant 0.229166672 : f32
    %465 = vector.broadcast %cst_320 : f32 to vector<12x128xf32>
    %466 = arith.mulf %457, %465 : vector<12x128xf32>
    %467 = arith.select %464, %457, %466 : vector<12x128xi1>, vector<12x128xf32>
    %cst_321 = arith.constant 0.000000e+00 : f32
    %468 = vector.broadcast %cst_321 : f32 to vector<12x128xf32>
    %469 = arith.cmpf oge, %462, %468 : vector<12x128xf32>
    %cst_322 = arith.constant 0.229166672 : f32
    %470 = vector.broadcast %cst_322 : f32 to vector<12x128xf32>
    %471 = arith.mulf %462, %470 : vector<12x128xf32>
    %472 = arith.select %469, %462, %471 : vector<12x128xi1>, vector<12x128xf32>
    %c1288 = arith.constant 1288 : index
    %c0_323 = arith.constant 0 : index
    %473 = vector.load %arg2[%c1288, %c0_323] : memref<2712x32xf32, #tpu.memory_space<vmem>>, vector<20x12xf32>
    %cst_324 = arith.constant dense<0.000000e+00> : vector<20x128xf32>
    %474 = tpu.matmul %473, %467, %cst_324 {dimension_numbers = #tpu.dot_dimension_numbers<[1], [0], [0], [1], [0, 0, 1, 1], [], []>} : vector<20x12xf32>, vector<12x128xf32>, vector<20x128xf32> -> vector<20x128xf32>
    %c1312 = arith.constant 1312 : index
    %c0_325 = arith.constant 0 : index
    %475 = vector.load %arg2[%c1312, %c0_325] : memref<2712x32xf32, #tpu.memory_space<vmem>>, vector<20x12xf32>
    %cst_326 = arith.constant dense<0.000000e+00> : vector<20x128xf32>
    %476 = tpu.matmul %475, %472, %cst_326 {dimension_numbers = #tpu.dot_dimension_numbers<[1], [0], [0], [1], [0, 0, 1, 1], [], []>} : vector<20x12xf32>, vector<12x128xf32>, vector<20x128xf32> -> vector<20x128xf32>
    %477 = arith.addf %474, %476 : vector<20x128xf32>
    %c2688 = arith.constant 2688 : index
    %c0_327 = arith.constant 0 : index
    %478 = vector.load %arg2[%c2688, %c0_327] : memref<2712x32xf32, #tpu.memory_space<vmem>>, vector<18x20xf32>
    %cst_328 = arith.constant dense<0.000000e+00> : vector<18x128xf32>
    %479 = tpu.matmul %478, %477, %cst_328 {dimension_numbers = #tpu.dot_dimension_numbers<[1], [0], [0], [1], [0, 0, 1, 1], [], []>} : vector<18x20xf32>, vector<20x128xf32>, vector<18x128xf32> -> vector<18x128xf32>
    %c2480 = arith.constant 2480 : index
    %c0_329 = arith.constant 0 : index
    %480 = vector.load %arg3[%c2480, %c0_329] : memref<2952x128xf32, #tpu.memory_space<vmem>>, vector<128x112xf32>
    %cst_330 = arith.constant dense<0.000000e+00> : vector<18x112xf32>
    %481 = tpu.matmul %479, %480, %cst_330 {dimension_numbers = #tpu.dot_dimension_numbers<[1], [0], [0], [1], [0, 0, 1, 1], [], []>} : vector<18x128xf32>, vector<128x112xf32>, vector<18x112xf32> -> vector<18x112xf32>
    %c8_331 = arith.constant 8 : index
    %c0_332 = arith.constant 0 : index
    %482 = vector.load %arg11[%c8_331, %c0_332] : memref<34x112xf32, #tpu.memory_space<vmem>>, vector<18x112xf32>
    tpu.vector_store %arg11[%c8_331, %c0_332], %481 {strides = array<i32>} : memref<34x112xf32, #tpu.memory_space<vmem>>, vector<18x112xf32>,
    %c7_333 = arith.constant 7 : index
    %c0_334 = arith.constant 0 : index
    %483 = vector.load %arg11[%c7_333, %c0_334] : memref<34x112xf32, #tpu.memory_space<vmem>>, vector<18x112xf32>
    %c8_335 = arith.constant 8 : index
    %c0_336 = arith.constant 0 : index
    %484 = vector.load %arg11[%c8_335, %c0_336] : memref<34x112xf32, #tpu.memory_space<vmem>>, vector<18x112xf32>
    %c9_337 = arith.constant 9 : index
    %c0_338 = arith.constant 0 : index
    %485 = vector.load %arg11[%c9_337, %c0_338] : memref<34x112xf32, #tpu.memory_space<vmem>>, vector<18x112xf32>
    %c1864 = arith.constant 1864 : index
    %c0_339 = arith.constant 0 : index
    %486 = vector.load %arg2[%c1864, %c0_339] : memref<2712x32xf32, #tpu.memory_space<vmem>>, vector<1x18xf32>
    %c1872 = arith.constant 1872 : index
    %c0_340 = arith.constant 0 : index
    %487 = vector.load %arg2[%c1872, %c0_340] : memref<2712x32xf32, #tpu.memory_space<vmem>>, vector<18x1xf32>
    %c1336 = arith.constant 1336 : index
    %c0_341 = arith.constant 0 : index
    %488 = vector.load %arg2[%c1336, %c0_341] : memref<2712x32xf32, #tpu.memory_space<vmem>>, vector<112x28xf32>
    %cst_342 = arith.constant dense<0.000000e+00> : vector<18x28xf32>
    %489 = tpu.matmul %483, %488, %cst_342 {dimension_numbers = #tpu.dot_dimension_numbers<[1], [0], [0], [1], [0, 0, 1, 1], [], []>} : vector<18x112xf32>, vector<112x28xf32>, vector<18x28xf32> -> vector<18x28xf32>
    %c1448 = arith.constant 1448 : index
    %c0_343 = arith.constant 0 : index
    %490 = vector.load %arg2[%c1448, %c0_343] : memref<2712x32xf32, #tpu.memory_space<vmem>>, vector<112x28xf32>
    %cst_344 = arith.constant dense<0.000000e+00> : vector<18x28xf32>
    %491 = tpu.matmul %484, %490, %cst_344 {dimension_numbers = #tpu.dot_dimension_numbers<[1], [0], [0], [1], [0, 0, 1, 1], [], []>} : vector<18x112xf32>, vector<112x28xf32>, vector<18x28xf32> -> vector<18x28xf32>
    %492 = arith.addf %489, %491 : vector<18x28xf32>
    %c1560 = arith.constant 1560 : index
    %c0_345 = arith.constant 0 : index
    %493 = vector.load %arg2[%c1560, %c0_345] : memref<2712x32xf32, #tpu.memory_space<vmem>>, vector<112x28xf32>
    %cst_346 = arith.constant dense<0.000000e+00> : vector<18x28xf32>
    %494 = tpu.matmul %485, %493, %cst_346 {dimension_numbers = #tpu.dot_dimension_numbers<[1], [0], [0], [1], [0, 0, 1, 1], [], []>} : vector<18x112xf32>, vector<112x28xf32>, vector<18x28xf32> -> vector<18x28xf32>
    %495 = arith.addf %492, %494 : vector<18x28xf32>
    %c1672 = arith.constant 1672 : index
    %c0_347 = arith.constant 0 : index
    %496 = vector.load %arg2[%c1672, %c0_347] : memref<2712x32xf32, #tpu.memory_space<vmem>>, vector<1x28xf32>
    %497 = vector.broadcast %496 : vector<1x28xf32> to vector<18x28xf32>
    %498 = arith.addf %495, %497 : vector<18x28xf32>
    %c1680 = arith.constant 1680 : index
    %c0_348 = arith.constant 0 : index
    %499 = vector.load %arg2[%c1680, %c0_348] : memref<2712x32xf32, #tpu.memory_space<vmem>>, vector<28x4xf32>
    %c1712 = arith.constant 1712 : index
    %c0_349 = arith.constant 0 : index
    %500 = vector.load %arg2[%c1712, %c0_349] : memref<2712x32xf32, #tpu.memory_space<vmem>>, vector<4x28xf32>
    %cst_350 = arith.constant dense<0.000000e+00> : vector<1x28xf32>
    %501 = tpu.matmul %486, %498, %cst_350 {dimension_numbers = #tpu.dot_dimension_numbers<[1], [0], [0], [1], [0, 0, 1, 1], [], []>} : vector<1x18xf32>, vector<18x28xf32>, vector<1x28xf32> -> vector<1x28xf32>
    %cst_351 = arith.constant dense<0.000000e+00> : vector<1x4xf32>
    %502 = tpu.matmul %501, %499, %cst_351 {dimension_numbers = #tpu.dot_dimension_numbers<[1], [0], [0], [1], [0, 0, 1, 1], [], []>} : vector<1x28xf32>, vector<28x4xf32>, vector<1x4xf32> -> vector<1x4xf32>
    %503 = arith.mulf %498, %498 : vector<18x28xf32>
    %cst_352 = arith.constant dense<0.000000e+00> : vector<1x28xf32>
    %504 = tpu.matmul %486, %503, %cst_352 {dimension_numbers = #tpu.dot_dimension_numbers<[1], [0], [0], [1], [0, 0, 1, 1], [], []>} : vector<1x18xf32>, vector<18x28xf32>, vector<1x28xf32> -> vector<1x28xf32>
    %cst_353 = arith.constant dense<0.000000e+00> : vector<1x4xf32>
    %505 = tpu.matmul %504, %499, %cst_353 {dimension_numbers = #tpu.dot_dimension_numbers<[1], [0], [0], [1], [0, 0, 1, 1], [], []>} : vector<1x28xf32>, vector<28x4xf32>, vector<1x4xf32> -> vector<1x4xf32>
    %cst_354 = arith.constant 0.0102040814 : f32
    %506 = vector.broadcast %cst_354 : f32 to vector<1x4xf32>
    %507 = arith.mulf %502, %506 : vector<1x4xf32>
    %cst_355 = arith.constant 0.0102040814 : f32
    %508 = vector.broadcast %cst_355 : f32 to vector<1x4xf32>
    %509 = arith.mulf %505, %508 : vector<1x4xf32>
    %510 = arith.mulf %507, %507 : vector<1x4xf32>
    %511 = arith.subf %509, %510 : vector<1x4xf32>
    %cst_356 = arith.constant 0.000000e+00 : f32
    %512 = vector.broadcast %cst_356 : f32 to vector<1x4xf32>
    %513 = arith.maximumf %511, %512 : vector<1x4xf32>
    %c1720 = arith.constant 1720 : index
    %c0_357 = arith.constant 0 : index
    %514 = vector.load %arg2[%c1720, %c0_357] : memref<2712x32xf32, #tpu.memory_space<vmem>>, vector<1x4xf32>
    %cst_358 = arith.constant 9.99999974E-6 : f32
    %515 = vector.broadcast %cst_358 : f32 to vector<1x4xf32>
    %516 = arith.addf %513, %515 : vector<1x4xf32>
    %517 = math.rsqrt %516 : vector<1x4xf32>
    %518 = arith.mulf %514, %517 : vector<1x4xf32>
    %c1728 = arith.constant 1728 : index
    %c0_359 = arith.constant 0 : index
    %519 = vector.load %arg2[%c1728, %c0_359] : memref<2712x32xf32, #tpu.memory_space<vmem>>, vector<1x4xf32>
    %520 = arith.mulf %507, %518 : vector<1x4xf32>
    %521 = arith.subf %519, %520 : vector<1x4xf32>
    %cst_360 = arith.constant dense<0.000000e+00> : vector<1x28xf32>
    %522 = tpu.matmul %518, %500, %cst_360 {dimension_numbers = #tpu.dot_dimension_numbers<[1], [0], [0], [1], [0, 0, 1, 1], [], []>} : vector<1x4xf32>, vector<4x28xf32>, vector<1x28xf32> -> vector<1x28xf32>
    %523 = vector.broadcast %522 : vector<1x28xf32> to vector<18x28xf32>
    %524 = arith.mulf %498, %523 : vector<18x28xf32>
    %cst_361 = arith.constant dense<0.000000e+00> : vector<1x28xf32>
    %525 = tpu.matmul %521, %500, %cst_361 {dimension_numbers = #tpu.dot_dimension_numbers<[1], [0], [0], [1], [0, 0, 1, 1], [], []>} : vector<1x4xf32>, vector<4x28xf32>, vector<1x28xf32> -> vector<1x28xf32>
    %526 = vector.broadcast %525 : vector<1x28xf32> to vector<18x28xf32>
    %527 = arith.addf %524, %526 : vector<18x28xf32>
    %cst_362 = arith.constant 0.000000e+00 : f32
    %528 = vector.broadcast %cst_362 : f32 to vector<18x28xf32>
    %529 = arith.cmpf oge, %527, %528 : vector<18x28xf32>
    %cst_363 = arith.constant 0.229166672 : f32
    %530 = vector.broadcast %cst_363 : f32 to vector<18x28xf32>
    %531 = arith.mulf %527, %530 : vector<18x28xf32>
    %532 = arith.select %529, %527, %531 : vector<18x28xi1>, vector<18x28xf32>
    %533 = vector.broadcast %487 : vector<18x1xf32> to vector<18x28xf32>
    %534 = arith.mulf %532, %533 : vector<18x28xf32>
    %c8_364 = arith.constant 8 : index
    %c0_365 = arith.constant 0 : index
    %535 = vector.load %arg12[%c8_364, %c0_365] : memref<34x28xf32, #tpu.memory_space<vmem>>, vector<18x28xf32>
    tpu.vector_store %arg12[%c8_364, %c0_365], %534 {strides = array<i32>} : memref<34x28xf32, #tpu.memory_space<vmem>>, vector<18x28xf32>,
    %c7_366 = arith.constant 7 : index
    %c0_367 = arith.constant 0 : index
    %536 = vector.load %arg12[%c7_366, %c0_367] : memref<34x28xf32, #tpu.memory_space<vmem>>, vector<18x28xf32>
    %c8_368 = arith.constant 8 : index
    %c0_369 = arith.constant 0 : index
    %537 = vector.load %arg12[%c8_368, %c0_369] : memref<34x28xf32, #tpu.memory_space<vmem>>, vector<18x28xf32>
    %c9_370 = arith.constant 9 : index
    %c0_371 = arith.constant 0 : index
    %538 = vector.load %arg12[%c9_370, %c0_371] : memref<34x28xf32, #tpu.memory_space<vmem>>, vector<18x28xf32>
    %c1408 = arith.constant 1408 : index
    %c0_372 = arith.constant 0 : index
    %539 = vector.load %arg3[%c1408, %c0_372] : memref<2952x128xf32, #tpu.memory_space<vmem>>, vector<1x112xf32>
    %c1280 = arith.constant 1280 : index
    %c0_373 = arith.constant 0 : index
    %540 = vector.load %arg3[%c1280, %c0_373] : memref<2952x128xf32, #tpu.memory_space<vmem>>, vector<28x112xf32>
    %cst_374 = arith.constant dense<0.000000e+00> : vector<18x112xf32>
    %541 = tpu.matmul %536, %540, %cst_374 {dimension_numbers = #tpu.dot_dimension_numbers<[1], [0], [0], [1], [0, 0, 1, 1], [], []>} : vector<18x28xf32>, vector<28x112xf32>, vector<18x112xf32> -> vector<18x112xf32>
    %c1312_375 = arith.constant 1312 : index
    %c0_376 = arith.constant 0 : index
    %542 = vector.load %arg3[%c1312_375, %c0_376] : memref<2952x128xf32, #tpu.memory_space<vmem>>, vector<28x112xf32>
    %cst_377 = arith.constant dense<0.000000e+00> : vector<18x112xf32>
    %543 = tpu.matmul %537, %542, %cst_377 {dimension_numbers = #tpu.dot_dimension_numbers<[1], [0], [0], [1], [0, 0, 1, 1], [], []>} : vector<18x28xf32>, vector<28x112xf32>, vector<18x112xf32> -> vector<18x112xf32>
    %544 = arith.addf %541, %543 : vector<18x112xf32>
    %545 = vector.broadcast %539 : vector<1x112xf32> to vector<18x112xf32>
    %546 = arith.addf %544, %545 : vector<18x112xf32>
    %c1344 = arith.constant 1344 : index
    %c0_378 = arith.constant 0 : index
    %547 = vector.load %arg3[%c1344, %c0_378] : memref<2952x128xf32, #tpu.memory_space<vmem>>, vector<28x112xf32>
    %cst_379 = arith.constant dense<0.000000e+00> : vector<18x112xf32>
    %548 = tpu.matmul %537, %547, %cst_379 {dimension_numbers = #tpu.dot_dimension_numbers<[1], [0], [0], [1], [0, 0, 1, 1], [], []>} : vector<18x28xf32>, vector<28x112xf32>, vector<18x112xf32> -> vector<18x112xf32>
    %c1376 = arith.constant 1376 : index
    %c0_380 = arith.constant 0 : index
    %549 = vector.load %arg3[%c1376, %c0_380] : memref<2952x128xf32, #tpu.memory_space<vmem>>, vector<28x112xf32>
    %cst_381 = arith.constant dense<0.000000e+00> : vector<18x112xf32>
    %550 = tpu.matmul %538, %549, %cst_381 {dimension_numbers = #tpu.dot_dimension_numbers<[1], [0], [0], [1], [0, 0, 1, 1], [], []>} : vector<18x28xf32>, vector<28x112xf32>, vector<18x112xf32> -> vector<18x112xf32>
    %551 = arith.addf %548, %550 : vector<18x112xf32>
    %552 = vector.broadcast %539 : vector<1x112xf32> to vector<18x112xf32>
    %553 = arith.addf %551, %552 : vector<18x112xf32>
    %c1864_382 = arith.constant 1864 : index
    %c0_383 = arith.constant 0 : index
    %554 = vector.load %arg3[%c1864_382, %c0_383] : memref<2952x128xf32, #tpu.memory_space<vmem>>, vector<1x112xf32>
    %c1416 = arith.constant 1416 : index
    %c0_384 = arith.constant 0 : index
    %555 = vector.load %arg3[%c1416, %c0_384] : memref<2952x128xf32, #tpu.memory_space<vmem>>, vector<112x112xf32>
    %cst_385 = arith.constant dense<0.000000e+00> : vector<18x112xf32>
    %556 = tpu.matmul %483, %555, %cst_385 {dimension_numbers = #tpu.dot_dimension_numbers<[1], [0], [0], [1], [0, 0, 1, 1], [], []>} : vector<18x112xf32>, vector<112x112xf32>, vector<18x112xf32> -> vector<18x112xf32>
    %c1528 = arith.constant 1528 : index
    %c0_386 = arith.constant 0 : index
    %557 = vector.load %arg3[%c1528, %c0_386] : memref<2952x128xf32, #tpu.memory_space<vmem>>, vector<112x112xf32>
    %cst_387 = arith.constant dense<0.000000e+00> : vector<18x112xf32>
    %558 = tpu.matmul %484, %557, %cst_387 {dimension_numbers = #tpu.dot_dimension_numbers<[1], [0], [0], [1], [0, 0, 1, 1], [], []>} : vector<18x112xf32>, vector<112x112xf32>, vector<18x112xf32> -> vector<18x112xf32>
    %559 = arith.addf %556, %558 : vector<18x112xf32>
    %560 = vector.broadcast %554 : vector<1x112xf32> to vector<18x112xf32>
    %561 = arith.addf %559, %560 : vector<18x112xf32>
    %c1640 = arith.constant 1640 : index
    %c0_388 = arith.constant 0 : index
    %562 = vector.load %arg3[%c1640, %c0_388] : memref<2952x128xf32, #tpu.memory_space<vmem>>, vector<112x112xf32>
    %cst_389 = arith.constant dense<0.000000e+00> : vector<18x112xf32>
    %563 = tpu.matmul %484, %562, %cst_389 {dimension_numbers = #tpu.dot_dimension_numbers<[1], [0], [0], [1], [0, 0, 1, 1], [], []>} : vector<18x112xf32>, vector<112x112xf32>, vector<18x112xf32> -> vector<18x112xf32>
    %c1752 = arith.constant 1752 : index
    %c0_390 = arith.constant 0 : index
    %564 = vector.load %arg3[%c1752, %c0_390] : memref<2952x128xf32, #tpu.memory_space<vmem>>, vector<112x112xf32>
    %cst_391 = arith.constant dense<0.000000e+00> : vector<18x112xf32>
    %565 = tpu.matmul %485, %564, %cst_391 {dimension_numbers = #tpu.dot_dimension_numbers<[1], [0], [0], [1], [0, 0, 1, 1], [], []>} : vector<18x112xf32>, vector<112x112xf32>, vector<18x112xf32> -> vector<18x112xf32>
    %566 = arith.addf %563, %565 : vector<18x112xf32>
    %567 = vector.broadcast %554 : vector<1x112xf32> to vector<18x112xf32>
    %568 = arith.addf %566, %567 : vector<18x112xf32>
    %c1736 = arith.constant 1736 : index
    %c0_392 = arith.constant 0 : index
    %569 = vector.load %arg2[%c1736, %c0_392] : memref<2712x32xf32, #tpu.memory_space<vmem>>, vector<112x8xf32>
    %c1872_393 = arith.constant 1872 : index
    %c0_394 = arith.constant 0 : index
    %570 = vector.load %arg3[%c1872_393, %c0_394] : memref<2952x128xf32, #tpu.memory_space<vmem>>, vector<8x112xf32>
    %cst_395 = arith.constant dense<0.000000e+00> : vector<1x112xf32>
    %571 = tpu.matmul %486, %546, %cst_395 {dimension_numbers = #tpu.dot_dimension_numbers<[1], [0], [0], [1], [0, 0, 1, 1], [], []>} : vector<1x18xf32>, vector<18x112xf32>, vector<1x112xf32> -> vector<1x112xf32>
    %cst_396 = arith.constant dense<0.000000e+00> : vector<1x112xf32>
    %572 = tpu.matmul %486, %553, %cst_396 {dimension_numbers = #tpu.dot_dimension_numbers<[1], [0], [0], [1], [0, 0, 1, 1], [], []>} : vector<1x18xf32>, vector<18x112xf32>, vector<1x112xf32> -> vector<1x112xf32>
    %573 = arith.addf %571, %572 : vector<1x112xf32>
    %cst_397 = arith.constant dense<0.000000e+00> : vector<1x8xf32>
    %574 = tpu.matmul %573, %569, %cst_397 {dimension_numbers = #tpu.dot_dimension_numbers<[1], [0], [0], [1], [0, 0, 1, 1], [], []>} : vector<1x112xf32>, vector<112x8xf32>, vector<1x8xf32> -> vector<1x8xf32>
    %575 = arith.mulf %546, %546 : vector<18x112xf32>
    %cst_398 = arith.constant dense<0.000000e+00> : vector<1x112xf32>
    %576 = tpu.matmul %486, %575, %cst_398 {dimension_numbers = #tpu.dot_dimension_numbers<[1], [0], [0], [1], [0, 0, 1, 1], [], []>} : vector<1x18xf32>, vector<18x112xf32>, vector<1x112xf32> -> vector<1x112xf32>
    %577 = arith.mulf %553, %553 : vector<18x112xf32>
    %cst_399 = arith.constant dense<0.000000e+00> : vector<1x112xf32>
    %578 = tpu.matmul %486, %577, %cst_399 {dimension_numbers = #tpu.dot_dimension_numbers<[1], [0], [0], [1], [0, 0, 1, 1], [], []>} : vector<1x18xf32>, vector<18x112xf32>, vector<1x112xf32> -> vector<1x112xf32>
    %579 = arith.addf %576, %578 : vector<1x112xf32>
    %cst_400 = arith.constant dense<0.000000e+00> : vector<1x8xf32>
    %580 = tpu.matmul %579, %569, %cst_400 {dimension_numbers = #tpu.dot_dimension_numbers<[1], [0], [0], [1], [0, 0, 1, 1], [], []>} : vector<1x112xf32>, vector<112x8xf32>, vector<1x8xf32> -> vector<1x8xf32>
    %cst_401 = arith.constant 0.00255102036 : f32
    %581 = vector.broadcast %cst_401 : f32 to vector<1x8xf32>
    %582 = arith.mulf %574, %581 : vector<1x8xf32>
    %cst_402 = arith.constant 0.00255102036 : f32
    %583 = vector.broadcast %cst_402 : f32 to vector<1x8xf32>
    %584 = arith.mulf %580, %583 : vector<1x8xf32>
    %585 = arith.mulf %582, %582 : vector<1x8xf32>
    %586 = arith.subf %584, %585 : vector<1x8xf32>
    %cst_403 = arith.constant 0.000000e+00 : f32
    %587 = vector.broadcast %cst_403 : f32 to vector<1x8xf32>
    %588 = arith.maximumf %586, %587 : vector<1x8xf32>
    %c1848 = arith.constant 1848 : index
    %c0_404 = arith.constant 0 : index
    %589 = vector.load %arg2[%c1848, %c0_404] : memref<2712x32xf32, #tpu.memory_space<vmem>>, vector<1x8xf32>
    %cst_405 = arith.constant 9.99999974E-6 : f32
    %590 = vector.broadcast %cst_405 : f32 to vector<1x8xf32>
    %591 = arith.addf %588, %590 : vector<1x8xf32>
    %592 = math.rsqrt %591 : vector<1x8xf32>
    %593 = arith.mulf %589, %592 : vector<1x8xf32>
    %c1856 = arith.constant 1856 : index
    %c0_406 = arith.constant 0 : index
    %594 = vector.load %arg2[%c1856, %c0_406] : memref<2712x32xf32, #tpu.memory_space<vmem>>, vector<1x8xf32>
    %595 = arith.mulf %582, %593 : vector<1x8xf32>
    %596 = arith.subf %594, %595 : vector<1x8xf32>
    %cst_407 = arith.constant dense<0.000000e+00> : vector<1x112xf32>
    %597 = tpu.matmul %593, %570, %cst_407 {dimension_numbers = #tpu.dot_dimension_numbers<[1], [0], [0], [1], [0, 0, 1, 1], [], []>} : vector<1x8xf32>, vector<8x112xf32>, vector<1x112xf32> -> vector<1x112xf32>
    %cst_408 = arith.constant dense<0.000000e+00> : vector<1x112xf32>
    %598 = tpu.matmul %596, %570, %cst_408 {dimension_numbers = #tpu.dot_dimension_numbers<[1], [0], [0], [1], [0, 0, 1, 1], [], []>} : vector<1x8xf32>, vector<8x112xf32>, vector<1x112xf32> -> vector<1x112xf32>
    %599 = vector.broadcast %597 : vector<1x112xf32> to vector<18x112xf32>
    %600 = arith.mulf %546, %599 : vector<18x112xf32>
    %601 = vector.broadcast %598 : vector<1x112xf32> to vector<18x112xf32>
    %602 = arith.addf %600, %601 : vector<18x112xf32>
    %603 = arith.addf %602, %561 : vector<18x112xf32>
    %604 = vector.broadcast %597 : vector<1x112xf32> to vector<18x112xf32>
    %605 = arith.mulf %553, %604 : vector<18x112xf32>
    %606 = vector.broadcast %598 : vector<1x112xf32> to vector<18x112xf32>
    %607 = arith.addf %605, %606 : vector<18x112xf32>
    %608 = arith.addf %607, %568 : vector<18x112xf32>
    %cst_409 = arith.constant 0.000000e+00 : f32
    %609 = vector.broadcast %cst_409 : f32 to vector<18x112xf32>
    %610 = arith.cmpf oge, %603, %609 : vector<18x112xf32>
    %cst_410 = arith.constant 0.229166672 : f32
    %611 = vector.broadcast %cst_410 : f32 to vector<18x112xf32>
    %612 = arith.mulf %603, %611 : vector<18x112xf32>
    %613 = arith.select %610, %603, %612 : vector<18x112xi1>, vector<18x112xf32>
    %cst_411 = arith.constant 0.000000e+00 : f32
    %614 = vector.broadcast %cst_411 : f32 to vector<18x112xf32>
    %615 = arith.cmpf oge, %608, %614 : vector<18x112xf32>
    %cst_412 = arith.constant 0.229166672 : f32
    %616 = vector.broadcast %cst_412 : f32 to vector<18x112xf32>
    %617 = arith.mulf %608, %616 : vector<18x112xf32>
    %618 = arith.select %615, %608, %617 : vector<18x112xi1>, vector<18x112xf32>
    %c1896 = arith.constant 1896 : index
    %c0_413 = arith.constant 0 : index
    %619 = vector.load %arg2[%c1896, %c0_413] : memref<2712x32xf32, #tpu.memory_space<vmem>>, vector<32x18xf32>
    %cst_414 = arith.constant dense<0.000000e+00> : vector<32x112xf32>
    %620 = tpu.matmul %619, %613, %cst_414 {dimension_numbers = #tpu.dot_dimension_numbers<[1], [0], [0], [1], [0, 0, 1, 1], [], []>} : vector<32x18xf32>, vector<18x112xf32>, vector<32x112xf32> -> vector<32x112xf32>
    %c1928 = arith.constant 1928 : index
    %c0_415 = arith.constant 0 : index
    %621 = vector.load %arg2[%c1928, %c0_415] : memref<2712x32xf32, #tpu.memory_space<vmem>>, vector<32x18xf32>
    %cst_416 = arith.constant dense<0.000000e+00> : vector<32x112xf32>
    %622 = tpu.matmul %621, %618, %cst_416 {dimension_numbers = #tpu.dot_dimension_numbers<[1], [0], [0], [1], [0, 0, 1, 1], [], []>} : vector<32x18xf32>, vector<18x112xf32>, vector<32x112xf32> -> vector<32x112xf32>
    %623 = arith.addf %620, %622 : vector<32x112xf32>
    %c8_417 = arith.constant 8 : index
    %c0_418 = arith.constant 0 : index
    %624 = vector.load %arg13[%c8_417, %c0_418] : memref<48x112xf32, #tpu.memory_space<vmem>>, vector<32x112xf32>
    tpu.vector_store %arg13[%c8_417, %c0_418], %623 {strides = array<i32>} : memref<48x112xf32, #tpu.memory_space<vmem>>, vector<32x112xf32>,
    %c7_419 = arith.constant 7 : index
    %c0_420 = arith.constant 0 : index
    %625 = vector.load %arg13[%c7_419, %c0_420] : memref<48x112xf32, #tpu.memory_space<vmem>>, vector<32x112xf32>
    %c8_421 = arith.constant 8 : index
    %c0_422 = arith.constant 0 : index
    %626 = vector.load %arg13[%c8_421, %c0_422] : memref<48x112xf32, #tpu.memory_space<vmem>>, vector<32x112xf32>
    %c9_423 = arith.constant 9 : index
    %c0_424 = arith.constant 0 : index
    %627 = vector.load %arg13[%c9_423, %c0_424] : memref<48x112xf32, #tpu.memory_space<vmem>>, vector<32x112xf32>
    %c2488 = arith.constant 2488 : index
    %c0_425 = arith.constant 0 : index
    %628 = vector.load %arg2[%c2488, %c0_425] : memref<2712x32xf32, #tpu.memory_space<vmem>>, vector<1x32xf32>
    %c2496 = arith.constant 2496 : index
    %c0_426 = arith.constant 0 : index
    %629 = vector.load %arg2[%c2496, %c0_426] : memref<2712x32xf32, #tpu.memory_space<vmem>>, vector<32x1xf32>
    %c1960 = arith.constant 1960 : index
    %c0_427 = arith.constant 0 : index
    %630 = vector.load %arg2[%c1960, %c0_427] : memref<2712x32xf32, #tpu.memory_space<vmem>>, vector<112x28xf32>
    %cst_428 = arith.constant dense<0.000000e+00> : vector<32x28xf32>
    %631 = tpu.matmul %625, %630, %cst_428 {dimension_numbers = #tpu.dot_dimension_numbers<[1], [0], [0], [1], [0, 0, 1, 1], [], []>} : vector<32x112xf32>, vector<112x28xf32>, vector<32x28xf32> -> vector<32x28xf32>
    %c2072 = arith.constant 2072 : index
    %c0_429 = arith.constant 0 : index
    %632 = vector.load %arg2[%c2072, %c0_429] : memref<2712x32xf32, #tpu.memory_space<vmem>>, vector<112x28xf32>
    %cst_430 = arith.constant dense<0.000000e+00> : vector<32x28xf32>
    %633 = tpu.matmul %626, %632, %cst_430 {dimension_numbers = #tpu.dot_dimension_numbers<[1], [0], [0], [1], [0, 0, 1, 1], [], []>} : vector<32x112xf32>, vector<112x28xf32>, vector<32x28xf32> -> vector<32x28xf32>
    %634 = arith.addf %631, %633 : vector<32x28xf32>
    %c2184 = arith.constant 2184 : index
    %c0_431 = arith.constant 0 : index
    %635 = vector.load %arg2[%c2184, %c0_431] : memref<2712x32xf32, #tpu.memory_space<vmem>>, vector<112x28xf32>
    %cst_432 = arith.constant dense<0.000000e+00> : vector<32x28xf32>
    %636 = tpu.matmul %627, %635, %cst_432 {dimension_numbers = #tpu.dot_dimension_numbers<[1], [0], [0], [1], [0, 0, 1, 1], [], []>} : vector<32x112xf32>, vector<112x28xf32>, vector<32x28xf32> -> vector<32x28xf32>
    %637 = arith.addf %634, %636 : vector<32x28xf32>
    %c2296 = arith.constant 2296 : index
    %c0_433 = arith.constant 0 : index
    %638 = vector.load %arg2[%c2296, %c0_433] : memref<2712x32xf32, #tpu.memory_space<vmem>>, vector<1x28xf32>
    %639 = vector.broadcast %638 : vector<1x28xf32> to vector<32x28xf32>
    %640 = arith.addf %637, %639 : vector<32x28xf32>
    %c2304 = arith.constant 2304 : index
    %c0_434 = arith.constant 0 : index
    %641 = vector.load %arg2[%c2304, %c0_434] : memref<2712x32xf32, #tpu.memory_space<vmem>>, vector<28x2xf32>
    %c2336 = arith.constant 2336 : index
    %c0_435 = arith.constant 0 : index
    %642 = vector.load %arg2[%c2336, %c0_435] : memref<2712x32xf32, #tpu.memory_space<vmem>>, vector<2x28xf32>
    %cst_436 = arith.constant dense<0.000000e+00> : vector<1x28xf32>
    %643 = tpu.matmul %628, %640, %cst_436 {dimension_numbers = #tpu.dot_dimension_numbers<[1], [0], [0], [1], [0, 0, 1, 1], [], []>} : vector<1x32xf32>, vector<32x28xf32>, vector<1x28xf32> -> vector<1x28xf32>
    %cst_437 = arith.constant dense<0.000000e+00> : vector<1x2xf32>
    %644 = tpu.matmul %643, %641, %cst_437 {dimension_numbers = #tpu.dot_dimension_numbers<[1], [0], [0], [1], [0, 0, 1, 1], [], []>} : vector<1x28xf32>, vector<28x2xf32>, vector<1x2xf32> -> vector<1x2xf32>
    %645 = arith.mulf %640, %640 : vector<32x28xf32>
    %cst_438 = arith.constant dense<0.000000e+00> : vector<1x28xf32>
    %646 = tpu.matmul %628, %645, %cst_438 {dimension_numbers = #tpu.dot_dimension_numbers<[1], [0], [0], [1], [0, 0, 1, 1], [], []>} : vector<1x32xf32>, vector<32x28xf32>, vector<1x28xf32> -> vector<1x28xf32>
    %cst_439 = arith.constant dense<0.000000e+00> : vector<1x2xf32>
    %647 = tpu.matmul %646, %641, %cst_439 {dimension_numbers = #tpu.dot_dimension_numbers<[1], [0], [0], [1], [0, 0, 1, 1], [], []>} : vector<1x28xf32>, vector<28x2xf32>, vector<1x2xf32> -> vector<1x2xf32>
    %cst_440 = arith.constant 0.00255102036 : f32
    %648 = vector.broadcast %cst_440 : f32 to vector<1x2xf32>
    %649 = arith.mulf %644, %648 : vector<1x2xf32>
    %cst_441 = arith.constant 0.00255102036 : f32
    %650 = vector.broadcast %cst_441 : f32 to vector<1x2xf32>
    %651 = arith.mulf %647, %650 : vector<1x2xf32>
    %652 = arith.mulf %649, %649 : vector<1x2xf32>
    %653 = arith.subf %651, %652 : vector<1x2xf32>
    %cst_442 = arith.constant 0.000000e+00 : f32
    %654 = vector.broadcast %cst_442 : f32 to vector<1x2xf32>
    %655 = arith.maximumf %653, %654 : vector<1x2xf32>
    %c2344 = arith.constant 2344 : index
    %c0_443 = arith.constant 0 : index
    %656 = vector.load %arg2[%c2344, %c0_443] : memref<2712x32xf32, #tpu.memory_space<vmem>>, vector<1x2xf32>
    %cst_444 = arith.constant 9.99999974E-6 : f32
    %657 = vector.broadcast %cst_444 : f32 to vector<1x2xf32>
    %658 = arith.addf %655, %657 : vector<1x2xf32>
    %659 = math.rsqrt %658 : vector<1x2xf32>
    %660 = arith.mulf %656, %659 : vector<1x2xf32>
    %c2352 = arith.constant 2352 : index
    %c0_445 = arith.constant 0 : index
    %661 = vector.load %arg2[%c2352, %c0_445] : memref<2712x32xf32, #tpu.memory_space<vmem>>, vector<1x2xf32>
    %662 = arith.mulf %649, %660 : vector<1x2xf32>
    %663 = arith.subf %661, %662 : vector<1x2xf32>
    %cst_446 = arith.constant dense<0.000000e+00> : vector<1x28xf32>
    %664 = tpu.matmul %660, %642, %cst_446 {dimension_numbers = #tpu.dot_dimension_numbers<[1], [0], [0], [1], [0, 0, 1, 1], [], []>} : vector<1x2xf32>, vector<2x28xf32>, vector<1x28xf32> -> vector<1x28xf32>
    %665 = vector.broadcast %664 : vector<1x28xf32> to vector<32x28xf32>
    %666 = arith.mulf %640, %665 : vector<32x28xf32>
    %cst_447 = arith.constant dense<0.000000e+00> : vector<1x28xf32>
    %667 = tpu.matmul %663, %642, %cst_447 {dimension_numbers = #tpu.dot_dimension_numbers<[1], [0], [0], [1], [0, 0, 1, 1], [], []>} : vector<1x2xf32>, vector<2x28xf32>, vector<1x28xf32> -> vector<1x28xf32>
    %668 = vector.broadcast %667 : vector<1x28xf32> to vector<32x28xf32>
    %669 = arith.addf %666, %668 : vector<32x28xf32>
    %cst_448 = arith.constant 0.000000e+00 : f32
    %670 = vector.broadcast %cst_448 : f32 to vector<32x28xf32>
    %671 = arith.cmpf oge, %669, %670 : vector<32x28xf32>
    %cst_449 = arith.constant 0.229166672 : f32
    %672 = vector.broadcast %cst_449 : f32 to vector<32x28xf32>
    %673 = arith.mulf %669, %672 : vector<32x28xf32>
    %674 = arith.select %671, %669, %673 : vector<32x28xi1>, vector<32x28xf32>
    %675 = vector.broadcast %629 : vector<32x1xf32> to vector<32x28xf32>
    %676 = arith.mulf %674, %675 : vector<32x28xf32>
    %c8_450 = arith.constant 8 : index
    %c0_451 = arith.constant 0 : index
    %677 = vector.load %arg14[%c8_450, %c0_451] : memref<48x28xf32, #tpu.memory_space<vmem>>, vector<32x28xf32>
    tpu.vector_store %arg14[%c8_450, %c0_451], %676 {strides = array<i32>} : memref<48x28xf32, #tpu.memory_space<vmem>>, vector<32x28xf32>,
    %c7_452 = arith.constant 7 : index
    %c0_453 = arith.constant 0 : index
    %678 = vector.load %arg14[%c7_452, %c0_453] : memref<48x28xf32, #tpu.memory_space<vmem>>, vector<32x28xf32>
    %c8_454 = arith.constant 8 : index
    %c0_455 = arith.constant 0 : index
    %679 = vector.load %arg14[%c8_454, %c0_455] : memref<48x28xf32, #tpu.memory_space<vmem>>, vector<32x28xf32>
    %c9_456 = arith.constant 9 : index
    %c0_457 = arith.constant 0 : index
    %680 = vector.load %arg14[%c9_456, %c0_457] : memref<48x28xf32, #tpu.memory_space<vmem>>, vector<32x28xf32>
    %c2008 = arith.constant 2008 : index
    %c0_458 = arith.constant 0 : index
    %681 = vector.load %arg3[%c2008, %c0_458] : memref<2952x128xf32, #tpu.memory_space<vmem>>, vector<1x112xf32>
    %c1880 = arith.constant 1880 : index
    %c0_459 = arith.constant 0 : index
    %682 = vector.load %arg3[%c1880, %c0_459] : memref<2952x128xf32, #tpu.memory_space<vmem>>, vector<28x112xf32>
    %cst_460 = arith.constant dense<0.000000e+00> : vector<32x112xf32>
    %683 = tpu.matmul %678, %682, %cst_460 {dimension_numbers = #tpu.dot_dimension_numbers<[1], [0], [0], [1], [0, 0, 1, 1], [], []>} : vector<32x28xf32>, vector<28x112xf32>, vector<32x112xf32> -> vector<32x112xf32>
    %c1912 = arith.constant 1912 : index
    %c0_461 = arith.constant 0 : index
    %684 = vector.load %arg3[%c1912, %c0_461] : memref<2952x128xf32, #tpu.memory_space<vmem>>, vector<28x112xf32>
    %cst_462 = arith.constant dense<0.000000e+00> : vector<32x112xf32>
    %685 = tpu.matmul %679, %684, %cst_462 {dimension_numbers = #tpu.dot_dimension_numbers<[1], [0], [0], [1], [0, 0, 1, 1], [], []>} : vector<32x28xf32>, vector<28x112xf32>, vector<32x112xf32> -> vector<32x112xf32>
    %686 = arith.addf %683, %685 : vector<32x112xf32>
    %687 = vector.broadcast %681 : vector<1x112xf32> to vector<32x112xf32>
    %688 = arith.addf %686, %687 : vector<32x112xf32>
    %c1944 = arith.constant 1944 : index
    %c0_463 = arith.constant 0 : index
    %689 = vector.load %arg3[%c1944, %c0_463] : memref<2952x128xf32, #tpu.memory_space<vmem>>, vector<28x112xf32>
    %cst_464 = arith.constant dense<0.000000e+00> : vector<32x112xf32>
    %690 = tpu.matmul %679, %689, %cst_464 {dimension_numbers = #tpu.dot_dimension_numbers<[1], [0], [0], [1], [0, 0, 1, 1], [], []>} : vector<32x28xf32>, vector<28x112xf32>, vector<32x112xf32> -> vector<32x112xf32>
    %c1976 = arith.constant 1976 : index
    %c0_465 = arith.constant 0 : index
    %691 = vector.load %arg3[%c1976, %c0_465] : memref<2952x128xf32, #tpu.memory_space<vmem>>, vector<28x112xf32>
    %cst_466 = arith.constant dense<0.000000e+00> : vector<32x112xf32>
    %692 = tpu.matmul %680, %691, %cst_466 {dimension_numbers = #tpu.dot_dimension_numbers<[1], [0], [0], [1], [0, 0, 1, 1], [], []>} : vector<32x28xf32>, vector<28x112xf32>, vector<32x112xf32> -> vector<32x112xf32>
    %693 = arith.addf %690, %692 : vector<32x112xf32>
    %694 = vector.broadcast %681 : vector<1x112xf32> to vector<32x112xf32>
    %695 = arith.addf %693, %694 : vector<32x112xf32>
    %c2464 = arith.constant 2464 : index
    %c0_467 = arith.constant 0 : index
    %696 = vector.load %arg3[%c2464, %c0_467] : memref<2952x128xf32, #tpu.memory_space<vmem>>, vector<1x112xf32>
    %c2016 = arith.constant 2016 : index
    %c0_468 = arith.constant 0 : index
    %697 = vector.load %arg3[%c2016, %c0_468] : memref<2952x128xf32, #tpu.memory_space<vmem>>, vector<112x112xf32>
    %cst_469 = arith.constant dense<0.000000e+00> : vector<32x112xf32>
    %698 = tpu.matmul %625, %697, %cst_469 {dimension_numbers = #tpu.dot_dimension_numbers<[1], [0], [0], [1], [0, 0, 1, 1], [], []>} : vector<32x112xf32>, vector<112x112xf32>, vector<32x112xf32> -> vector<32x112xf32>
    %c2128 = arith.constant 2128 : index
    %c0_470 = arith.constant 0 : index
    %699 = vector.load %arg3[%c2128, %c0_470] : memref<2952x128xf32, #tpu.memory_space<vmem>>, vector<112x112xf32>
    %cst_471 = arith.constant dense<0.000000e+00> : vector<32x112xf32>
    %700 = tpu.matmul %626, %699, %cst_471 {dimension_numbers = #tpu.dot_dimension_numbers<[1], [0], [0], [1], [0, 0, 1, 1], [], []>} : vector<32x112xf32>, vector<112x112xf32>, vector<32x112xf32> -> vector<32x112xf32>
    %701 = arith.addf %698, %700 : vector<32x112xf32>
    %702 = vector.broadcast %696 : vector<1x112xf32> to vector<32x112xf32>
    %703 = arith.addf %701, %702 : vector<32x112xf32>
    %c2240 = arith.constant 2240 : index
    %c0_472 = arith.constant 0 : index
    %704 = vector.load %arg3[%c2240, %c0_472] : memref<2952x128xf32, #tpu.memory_space<vmem>>, vector<112x112xf32>
    %cst_473 = arith.constant dense<0.000000e+00> : vector<32x112xf32>
    %705 = tpu.matmul %626, %704, %cst_473 {dimension_numbers = #tpu.dot_dimension_numbers<[1], [0], [0], [1], [0, 0, 1, 1], [], []>} : vector<32x112xf32>, vector<112x112xf32>, vector<32x112xf32> -> vector<32x112xf32>
    %c2352_474 = arith.constant 2352 : index
    %c0_475 = arith.constant 0 : index
    %706 = vector.load %arg3[%c2352_474, %c0_475] : memref<2952x128xf32, #tpu.memory_space<vmem>>, vector<112x112xf32>
    %cst_476 = arith.constant dense<0.000000e+00> : vector<32x112xf32>
    %707 = tpu.matmul %627, %706, %cst_476 {dimension_numbers = #tpu.dot_dimension_numbers<[1], [0], [0], [1], [0, 0, 1, 1], [], []>} : vector<32x112xf32>, vector<112x112xf32>, vector<32x112xf32> -> vector<32x112xf32>
    %708 = arith.addf %705, %707 : vector<32x112xf32>
    %709 = vector.broadcast %696 : vector<1x112xf32> to vector<32x112xf32>
    %710 = arith.addf %708, %709 : vector<32x112xf32>
    %c2360 = arith.constant 2360 : index
    %c0_477 = arith.constant 0 : index
    %711 = vector.load %arg2[%c2360, %c0_477] : memref<2712x32xf32, #tpu.memory_space<vmem>>, vector<112x4xf32>
    %c2472 = arith.constant 2472 : index
    %c0_478 = arith.constant 0 : index
    %712 = vector.load %arg3[%c2472, %c0_478] : memref<2952x128xf32, #tpu.memory_space<vmem>>, vector<4x112xf32>
    %cst_479 = arith.constant dense<0.000000e+00> : vector<1x112xf32>
    %713 = tpu.matmul %628, %688, %cst_479 {dimension_numbers = #tpu.dot_dimension_numbers<[1], [0], [0], [1], [0, 0, 1, 1], [], []>} : vector<1x32xf32>, vector<32x112xf32>, vector<1x112xf32> -> vector<1x112xf32>
    %cst_480 = arith.constant dense<0.000000e+00> : vector<1x112xf32>
    %714 = tpu.matmul %628, %695, %cst_480 {dimension_numbers = #tpu.dot_dimension_numbers<[1], [0], [0], [1], [0, 0, 1, 1], [], []>} : vector<1x32xf32>, vector<32x112xf32>, vector<1x112xf32> -> vector<1x112xf32>
    %715 = arith.addf %713, %714 : vector<1x112xf32>
    %cst_481 = arith.constant dense<0.000000e+00> : vector<1x4xf32>
    %716 = tpu.matmul %715, %711, %cst_481 {dimension_numbers = #tpu.dot_dimension_numbers<[1], [0], [0], [1], [0, 0, 1, 1], [], []>} : vector<1x112xf32>, vector<112x4xf32>, vector<1x4xf32> -> vector<1x4xf32>
    %717 = arith.mulf %688, %688 : vector<32x112xf32>
    %cst_482 = arith.constant dense<0.000000e+00> : vector<1x112xf32>
    %718 = tpu.matmul %628, %717, %cst_482 {dimension_numbers = #tpu.dot_dimension_numbers<[1], [0], [0], [1], [0, 0, 1, 1], [], []>} : vector<1x32xf32>, vector<32x112xf32>, vector<1x112xf32> -> vector<1x112xf32>
    %719 = arith.mulf %695, %695 : vector<32x112xf32>
    %cst_483 = arith.constant dense<0.000000e+00> : vector<1x112xf32>
    %720 = tpu.matmul %628, %719, %cst_483 {dimension_numbers = #tpu.dot_dimension_numbers<[1], [0], [0], [1], [0, 0, 1, 1], [], []>} : vector<1x32xf32>, vector<32x112xf32>, vector<1x112xf32> -> vector<1x112xf32>
    %721 = arith.addf %718, %720 : vector<1x112xf32>
    %cst_484 = arith.constant dense<0.000000e+00> : vector<1x4xf32>
    %722 = tpu.matmul %721, %711, %cst_484 {dimension_numbers = #tpu.dot_dimension_numbers<[1], [0], [0], [1], [0, 0, 1, 1], [], []>} : vector<1x112xf32>, vector<112x4xf32>, vector<1x4xf32> -> vector<1x4xf32>
    %cst_485 = arith.constant 6.37755089E-4 : f32
    %723 = vector.broadcast %cst_485 : f32 to vector<1x4xf32>
    %724 = arith.mulf %716, %723 : vector<1x4xf32>
    %cst_486 = arith.constant 6.37755089E-4 : f32
    %725 = vector.broadcast %cst_486 : f32 to vector<1x4xf32>
    %726 = arith.mulf %722, %725 : vector<1x4xf32>
    %727 = arith.mulf %724, %724 : vector<1x4xf32>
    %728 = arith.subf %726, %727 : vector<1x4xf32>
    %cst_487 = arith.constant 0.000000e+00 : f32
    %729 = vector.broadcast %cst_487 : f32 to vector<1x4xf32>
    %730 = arith.maximumf %728, %729 : vector<1x4xf32>
    %c2472_488 = arith.constant 2472 : index
    %c0_489 = arith.constant 0 : index
    %731 = vector.load %arg2[%c2472_488, %c0_489] : memref<2712x32xf32, #tpu.memory_space<vmem>>, vector<1x4xf32>
    %cst_490 = arith.constant 9.99999974E-6 : f32
    %732 = vector.broadcast %cst_490 : f32 to vector<1x4xf32>
    %733 = arith.addf %730, %732 : vector<1x4xf32>
    %734 = math.rsqrt %733 : vector<1x4xf32>
    %735 = arith.mulf %731, %734 : vector<1x4xf32>
    %c2480_491 = arith.constant 2480 : index
    %c0_492 = arith.constant 0 : index
    %736 = vector.load %arg2[%c2480_491, %c0_492] : memref<2712x32xf32, #tpu.memory_space<vmem>>, vector<1x4xf32>
    %737 = arith.mulf %724, %735 : vector<1x4xf32>
    %738 = arith.subf %736, %737 : vector<1x4xf32>
    %cst_493 = arith.constant dense<0.000000e+00> : vector<1x112xf32>
    %739 = tpu.matmul %735, %712, %cst_493 {dimension_numbers = #tpu.dot_dimension_numbers<[1], [0], [0], [1], [0, 0, 1, 1], [], []>} : vector<1x4xf32>, vector<4x112xf32>, vector<1x112xf32> -> vector<1x112xf32>
    %cst_494 = arith.constant dense<0.000000e+00> : vector<1x112xf32>
    %740 = tpu.matmul %738, %712, %cst_494 {dimension_numbers = #tpu.dot_dimension_numbers<[1], [0], [0], [1], [0, 0, 1, 1], [], []>} : vector<1x4xf32>, vector<4x112xf32>, vector<1x112xf32> -> vector<1x112xf32>
    %741 = vector.broadcast %739 : vector<1x112xf32> to vector<32x112xf32>
    %742 = arith.mulf %688, %741 : vector<32x112xf32>
    %743 = vector.broadcast %740 : vector<1x112xf32> to vector<32x112xf32>
    %744 = arith.addf %742, %743 : vector<32x112xf32>
    %745 = arith.addf %744, %703 : vector<32x112xf32>
    %746 = vector.broadcast %739 : vector<1x112xf32> to vector<32x112xf32>
    %747 = arith.mulf %695, %746 : vector<32x112xf32>
    %748 = vector.broadcast %740 : vector<1x112xf32> to vector<32x112xf32>
    %749 = arith.addf %747, %748 : vector<32x112xf32>
    %750 = arith.addf %749, %710 : vector<32x112xf32>
    %cst_495 = arith.constant 0.000000e+00 : f32
    %751 = vector.broadcast %cst_495 : f32 to vector<32x112xf32>
    %752 = arith.cmpf oge, %745, %751 : vector<32x112xf32>
    %cst_496 = arith.constant 0.229166672 : f32
    %753 = vector.broadcast %cst_496 : f32 to vector<32x112xf32>
    %754 = arith.mulf %745, %753 : vector<32x112xf32>
    %755 = arith.select %752, %745, %754 : vector<32x112xi1>, vector<32x112xf32>
    %cst_497 = arith.constant 0.000000e+00 : f32
    %756 = vector.broadcast %cst_497 : f32 to vector<32x112xf32>
    %757 = arith.cmpf oge, %750, %756 : vector<32x112xf32>
    %cst_498 = arith.constant 0.229166672 : f32
    %758 = vector.broadcast %cst_498 : f32 to vector<32x112xf32>
    %759 = arith.mulf %750, %758 : vector<32x112xf32>
    %760 = arith.select %757, %750, %759 : vector<32x112xi1>, vector<32x112xf32>
    %c2528 = arith.constant 2528 : index
    %c0_499 = arith.constant 0 : index
    %761 = vector.load %arg2[%c2528, %c0_499] : memref<2712x32xf32, #tpu.memory_space<vmem>>, vector<60x32xf32>
    %cst_500 = arith.constant dense<0.000000e+00> : vector<60x112xf32>
    %762 = tpu.matmul %761, %755, %cst_500 {dimension_numbers = #tpu.dot_dimension_numbers<[1], [0], [0], [1], [0, 0, 1, 1], [], []>} : vector<60x32xf32>, vector<32x112xf32>, vector<60x112xf32> -> vector<60x112xf32>
    %c2592 = arith.constant 2592 : index
    %c0_501 = arith.constant 0 : index
    %763 = vector.load %arg2[%c2592, %c0_501] : memref<2712x32xf32, #tpu.memory_space<vmem>>, vector<60x32xf32>
    %cst_502 = arith.constant dense<0.000000e+00> : vector<60x112xf32>
    %764 = tpu.matmul %763, %760, %cst_502 {dimension_numbers = #tpu.dot_dimension_numbers<[1], [0], [0], [1], [0, 0, 1, 1], [], []>} : vector<60x32xf32>, vector<32x112xf32>, vector<60x112xf32> -> vector<60x112xf32>
    %765 = arith.addf %762, %764 : vector<60x112xf32>
    %c8_503 = arith.constant 8 : index
    %c0_504 = arith.constant 0 : index
    %766 = vector.load %arg15[%c8_503, %c0_504] : memref<76x112xf32, #tpu.memory_space<vmem>>, vector<60x112xf32>
    tpu.vector_store %arg15[%c8_503, %c0_504], %765 {strides = array<i32>} : memref<76x112xf32, #tpu.memory_space<vmem>>, vector<60x112xf32>,
    %c7_505 = arith.constant 7 : index
    %c0_506 = arith.constant 0 : index
    %767 = vector.load %arg15[%c7_505, %c0_506] : memref<76x112xf32, #tpu.memory_space<vmem>>, vector<60x112xf32>
    %c8_507 = arith.constant 8 : index
    %c0_508 = arith.constant 0 : index
    %768 = vector.load %arg15[%c8_507, %c0_508] : memref<76x112xf32, #tpu.memory_space<vmem>>, vector<60x112xf32>
    %c9_509 = arith.constant 9 : index
    %c0_510 = arith.constant 0 : index
    %769 = vector.load %arg15[%c9_509, %c0_510] : memref<76x112xf32, #tpu.memory_space<vmem>>, vector<60x112xf32>
    %c2608 = arith.constant 2608 : index
    %c0_511 = arith.constant 0 : index
    %770 = vector.load %arg3[%c2608, %c0_511] : memref<2952x128xf32, #tpu.memory_space<vmem>>, vector<112x128xf32>
    %cst_512 = arith.constant dense<0.000000e+00> : vector<60x128xf32>
    %771 = tpu.matmul %767, %770, %cst_512 {dimension_numbers = #tpu.dot_dimension_numbers<[1], [0], [0], [1], [0, 0, 1, 1], [], []>} : vector<60x112xf32>, vector<112x128xf32>, vector<60x128xf32> -> vector<60x128xf32>
    %c2720 = arith.constant 2720 : index
    %c0_513 = arith.constant 0 : index
    %772 = vector.load %arg3[%c2720, %c0_513] : memref<2952x128xf32, #tpu.memory_space<vmem>>, vector<112x128xf32>
    %cst_514 = arith.constant dense<0.000000e+00> : vector<60x128xf32>
    %773 = tpu.matmul %768, %772, %cst_514 {dimension_numbers = #tpu.dot_dimension_numbers<[1], [0], [0], [1], [0, 0, 1, 1], [], []>} : vector<60x112xf32>, vector<112x128xf32>, vector<60x128xf32> -> vector<60x128xf32>
    %774 = arith.addf %771, %773 : vector<60x128xf32>
    %c2832 = arith.constant 2832 : index
    %c0_515 = arith.constant 0 : index
    %775 = vector.load %arg3[%c2832, %c0_515] : memref<2952x128xf32, #tpu.memory_space<vmem>>, vector<112x128xf32>
    %cst_516 = arith.constant dense<0.000000e+00> : vector<60x128xf32>
    %776 = tpu.matmul %769, %775, %cst_516 {dimension_numbers = #tpu.dot_dimension_numbers<[1], [0], [0], [1], [0, 0, 1, 1], [], []>} : vector<60x112xf32>, vector<112x128xf32>, vector<60x128xf32> -> vector<60x128xf32>
    %777 = arith.addf %774, %776 : vector<60x128xf32>
    %c2944 = arith.constant 2944 : index
    %c0_517 = arith.constant 0 : index
    %778 = vector.load %arg3[%c2944, %c0_517] : memref<2952x128xf32, #tpu.memory_space<vmem>>, vector<1x128xf32>
    %779 = vector.broadcast %778 : vector<1x128xf32> to vector<60x128xf32>
    %780 = arith.addf %777, %779 : vector<60x128xf32>
    %c0_518 = arith.constant 0 : index
    %c0_519 = arith.constant 0 : index
    %781 = vector.load %arg4[%c0_518, %c0_519] : memref<60x128xf32, #tpu.memory_space<vmem>>, vector<60x128xf32>
    tpu.vector_store %arg4[%c0_518, %c0_519], %780 {strides = array<i32>} : memref<60x128xf32, #tpu.memory_space<vmem>>, vector<60x128xf32>,
    return
  }
  func.func @transform_0(%arg0: i32) -> (i32, i32) {
    %c0_i32 = arith.constant 0 : i32
    %c0_i32_0 = arith.constant 0 : i32
    %c0_i32_1 = arith.constant 0 : i32
    return %c0_i32, %c0_i32_0 : i32, i32
  }
  func.func @transform_1(%arg0: i32) -> (i32, i32) {
    %c0_i32 = arith.constant 0 : i32
    %c0_i32_0 = arith.constant 0 : i32
    %c0_i32_1 = arith.constant 0 : i32
    return %c0_i32, %c0_i32_0 : i32, i32
  }
  func.func @transform_2(%arg0: i32) -> (i32, i32) {
    %c0_i32 = arith.constant 0 : i32
    %c0_i32_0 = arith.constant 0 : i32
    %c0_i32_1 = arith.constant 0 : i32
    return %c0_i32, %c0_i32_0 : i32, i32
  }
  func.func @transform_3(%arg0: i32) -> (i32, i32) {
    %c0_i32 = arith.constant 0 : i32
    %c0_i32_0 = arith.constant 0 : i32
    %c0_i32_1 = arith.constant 0 : i32
    return %c0_i32, %c0_i32_0 : i32, i32
  }
}

</mosaic_0001>

<bundles_post_ra>
// kernel: _lambda_.1
= control target key start
LH: loop header
LB: loop body
LE: loop exit
PB: predicated region body
PF: predicated region fallthrough
CT: control target
= control target key end

     0   :  { %8 = vsyncpa [#allocation14], 0  ;;  %s6587_s0 = inlined_call_operand.hbm [shape: f32[2,10], index: 0, kind: input, shape index: {}]   ;;  %s6588_s1 = inlined_call_operand.hbm [shape: f32[2712,32], index: 1, kind: input, shape index: {}]   ;;  %s6589_s2 = inlined_call_operand.hbm [shape: f32[2952,128], index: 2, kind: input, shape index: {}]   ;;  %s6590_s3 = inlined_call_operand.vmem [shape: f32[60,128], index: 3, kind: output, shape index: {}]  }
   0x1   :  { %9 = vsyncpa [#allocation16], 0  ;;  %s25_s14 = sshll.u32 %s6588_s1, 4  ;;  %s5756_s15 = smov [#allocation15]   ;;  %s26_s14 = int_to_ptr.hbm [resolvable:$true] %s25_s14 }
   0x2   :  { %s27_s16 = sshll.u32 %s5756_s15, 4  ;;  %s15_s19 = sshll.u32 %s6587_s0, 4  ;;  %s28_s16 = int_to_ptr.vmem [resolvable:$true] %s27_s16  ;;  %s16_s19 = int_to_ptr.hbm [resolvable:$true] %s15_s19 }
   0x3   :  { %s5757_s20 = smov 128   ;;  %s5758_s21 = smov 8  }
   0x4   :  { %33 = dma.hbm_to_vmem [thread:$0]  %s26_s14, 43392, %s28_s16, [#allocation16], %s5757_s20, %s5757_s20, %s5758_s21  }
   0x5   :  { %s5759_s22 = smov [#allocation13]   ;;  %s38_s26 = sshll.u32 %s6589_s2, 4  ;;  %s39_s26 = int_to_ptr.hbm [resolvable:$true] %s38_s26 }
   0x6   :  { %s17_s23 = sshll.u32 %s5759_s22, 4  ;;  %s5760_s1 = smov [#allocation17]   ;;  %s18_s23 = int_to_ptr.vmem [resolvable:$true] %s17_s23 }
   0x7   :  { %20 = dma.hbm_to_vmem [thread:$0]  %s16_s19, 32, %s18_s23, [#allocation14]  }
   0x8   :  { %s40_s27 = sshll.u32 %s5760_s1, 4  ;;  %s41_s27 = int_to_ptr.vmem [resolvable:$true] %s40_s27 }
   0x9   :  { %46 = dma.hbm_to_vmem [thread:$0]  %s39_s26, 47232, %s41_s27, [#allocation16], %s5757_s20, %s5757_s20, %s5758_s21  }
   0xa   :  { %5752 = dma.done.wait [#allocation14], 32  }
   0xb   :  { %5753 = vsyncadd [#allocation14], 4294967264 }
   0xc   :  { %5754 = dma.done.wait [#allocation16], 90624  }
   0xd   :  { %5755 = vsyncadd [#allocation16], 4294876672  ;;  %vm95_vm0 = vcmask 1041408   ;;  %v88_v0 = vld [vmem:[#allocation15 + $0xa68] sm:$0x3]  ;;  %v87_v1 = vld [vmem:[#allocation15 + $0xa60] sm:$0xff] }
   0xe   :  { %vm91_vm1 = vcmask 80896   ;;  %5349 = vmatpush.msk.msra.mxu0 %vm95_vm0, %v88_v0  ;;  %v86_v2 = vld [vmem:[#allocation13] sm:$0x3]  ;;  %v5642_v3 = vld [vmem:[#allocation15 + $0xa70] ss:$0 sm:$0xff]  ;;  %vm120_vm2 = vcmask 15360  }
   0xf   :  { %v119_v6 = vld [vmem:[#allocation15 + $0xa78] sm:$0x3f]  ;;  %vm59_vm3 = vcmask 130048   ;;  %v155_v8 = vld [vmem:[#allocation15 + $0x8] sm:$0xff]  ;;  %v5761_v10 = vmov 0.0   ;;  %v156_v11 = vld [vmem:[#allocation15 + $0x10] sm:$0xff] }
  0x10   :  { %114 = vmatpush.msra.mxu0 %v87_v1  ;;  %v157_v7 = vld [vmem:[#allocation15 + $0x18] sm:$0xff]  ;;  %v205_v9 = vld [vmem:[#allocation15 + $0x28] sm:$0xff]  ;;  %60 = vst.msk [vmem:[#allocation2] sm:$0xff] %vm59_vm3, %v5761_v10  ;;  %198 = vmatpush.msra.mxu3 %v155_v8  ;;  %v154_v12 = vld [vmem:[#allocation15] sm:$0xff]  ;;  %vm147_vm4 = vcmask 128000   ;;  %vm241_vm5 = vcmask 1045504  }
  0x11   :  { %5350 = vmatmul.msk.f32.vlgmr.msra.gmra.mxu0 %vm91_vm1, %v86_v2  ;;  %175 = vmatpush.msra.mxu2 %v157_v7  ;;  %v204_v13 = vld [vmem:[#allocation15 + $0x20] sm:$0xff]  ;;  %61 = vst.msk [vmem:[#allocation2 + $0xe] sm:$0xff] %vm59_vm3, %v5761_v10  ;;  %v5643_v22 = vld [vmem:[#allocation15 + $0x30] ss:$0 sm:$0xff]  ;;  %v5820_v26 = vld [vmem:[#allocation15 + $0xb8] sm:$0x1] }
  0x12   :  { %223 = vmatpush.msra.mxu1 %v205_v9  ;;  %62 = vst.msk [vmem:[#allocation3] sm:$0xff] %vm59_vm3, %v5761_v10  ;;  %199 = vmatpush.msra.mxu3 %v154_v12  ;;  %v234_v18 = vld [vmem:[#allocation15 + $0x40] sm:$0xff]  ;;  %vm237_vm6 = vcmask 48128   ;;  %v233_v28 = vld [vmem:[#allocation15 + $0x38] sm:$0xff]  ;;  %v236_v31 = vld [vmem:[#allocation15 + $0x50] sm:$0xff]  ;;  %v5762_v35 = vmov 0  }
  0x13   :  { %176 = vmatpush.msra.mxu2 %v156_v11  ;;  %63 = vst.msk [vmem:[#allocation3 + $0xe] sm:$0xff] %vm59_vm3, %v5761_v10  ;;  %v235_v32 = vld [vmem:[#allocation15 + $0x48] sm:$0xff]  ;;  %v153_v33 = vld [vmem:[#allocation15 + $0xc0] sm:$0x3f]  ;;  %5639 = vset.pattern.permute.xlu0 %v5762_v35  ;;  %v904_v41 = vld [vmem:[#allocation15 + $0x278] sm:$0xff]  ;;  %vm64_vm11 = vcmask 523264  }
  0x14   :  { %224 = vmatpush.msra.mxu1 %v204_v13  ;;  %70 = vst [vmem:[#allocation6] sm:$0xff] %v5761_v10  ;;  %5640 = vset.pattern.permute.xlu1 %v5762_v35  ;;  %v2754_v44 = vld [vmem:[#allocation15 + $0x760] sm:$0x3]  ;;  %v3850_v49 = vld [vmem:[#allocation15 + $0x9d0] sm:$0xff]  ;;  %v340_v52 = vld [vmem:[#allocation15 + $0x58] sm:$0x1] }
  0x15   :  { %71 = vst [vmem:[#allocation6 + $0x14] sm:$0xff] %v5761_v10  ;;  %282 = vmatpush.msrb.mxu2 %v234_v18  ;;  %411 = vperm.xlu0 %5639, %v153_v33   ;;  %v353_v55 = vld [vmem:[#allocation15 + $0x60] sm:$0x1]  ;;  %v423_v58 = vld [vmem:[#allocation17 + $0x18] sm:$0xff]  ;;  %v422_v62 = vld [vmem:[#allocation17 + $0x10] sm:$0xff]  ;;  %vm67_vm12 = vcmask 261120  }
  0x16   :  { %329 = vmatpush.msrb.mxu1 %v234_v18  ;;  %5641 = vset.pattern.permute.xlu2 %v5762_v35  ;;  %v421_v59 = vld [vmem:[#allocation17 + $0x8] sm:$0xff]  ;;  %v475_v60 = vld [vmem:[#allocation17 + $0x38] sm:$0xff]  ;;  %v420_v63 = vld [vmem:[#allocation17] sm:$0xff]  ;;  %65 = vst.msk [vmem:[#allocation4] sm:$0xff] %vm64_vm11, %v5761_v10 }
  0x17   :  { %283 = vmatpush.msrb.mxu2 %v233_v28  ;;  %v473_v61 = vld [vmem:[#allocation17 + $0x28] sm:$0xff]  ;;  %v474_v0 = vld [vmem:[#allocation17 + $0x30] sm:$0xff]  ;;  %v472_v1 = vld [vmem:[#allocation17 + $0x20] sm:$0xff]  ;;  %66 = vst.msk [vmem:[#allocation4 + $0x10] sm:$0xff] %vm64_vm11, %v5761_v10 }
  0x18   :  { %330 = vmatpush.msrb.mxu1 %v233_v28  ;;  %v524_v2 = vld [vmem:[#allocation17 + $0x60] sm:$0xff]  ;;  %v521_v7 = vld [vmem:[#allocation17 + $0x48] sm:$0xff]  ;;  %v569_v8 = vld [vmem:[#allocation17 + $0x78] sm:$0xff]  ;;  %68 = vst.msk [vmem:[#allocation5] sm:$0xff] %vm67_vm12, %v5761_v10 }
  0x19   :  { %v567_v9 = vld [vmem:[#allocation17 + $0x68] sm:$0xff]  ;;  %v614_v33 = vld [vmem:[#allocation15 + $0x78] sm:$0xff]  ;;  %69 = vst.msk [vmem:[#allocation5 + $0x10] sm:$0xff] %vm67_vm12, %v5761_v10 }
  0x1a   :  { %72 = vst.msk [vmem:[#allocation7] sm:$0xff] %vm67_vm12, %v5761_v10 }
  0x1b   :  { %73 = vst.msk [vmem:[#allocation7 + $0x14] sm:$0xff] %vm67_vm12, %v5761_v10  ;;  %v782_v10 = vld [vmem:[#allocation15 + $0xb0] sm:$0x1] }
  0x1d   :  { %1175 = vperm.xlu0 %5639, %v904_v41  }
  0x25   :  { %3117 = vperm.xlu0 %5639, %v2754_v44  }
  0x2d   :  { %4232 = vperm.xlu0 %5639, %v3850_v49  }
  0x8e   :  { %v116_v4 = vpop.f32.mrf.mxu0 }
  0x8f   :  { %v117_v5 = vadd.f32 %v5642_v3, %v116_v4  ;;  %v522_v3 = vld [vmem:[#allocation17 + $0x50] sm:$0xff]  ;;  %v570_v4 = vld [vmem:[#allocation17 + $0x80] sm:$0xff] }
  0x91   :  { %5351 = vmatpush.msk.msrb.mxu0 %vm95_vm0, %v117_v5  ;;  %v568_v5 = vld [vmem:[#allocation17 + $0x70] sm:$0xff] }
  0x92   :  { %5352 = vmatmul.msk.f32.vlgmr.msrb.gmra.mxu0 %vm120_vm2, %v119_v6  ;;  %v523_v6 = vld [vmem:[#allocation17 + $0x58] sm:$0xff] }
 0x10f   :  { %v144_v14 = vpop.f32.mrf.mxu0 }
 0x110   :  { %148 = vst.msk [vmem:[#allocation2 + $0x8] sm:$0x3f] %vm147_vm4, %v144_v14 }
 0x117   :  { %v5806_v15 = vld [vmem:[#allocation2 + $0x8] sm:$0x3f] }
 0x118   :  { %v5808_v16 = vld [vmem:[#allocation2 + $0x7] sm:$0x3f]  ;;  %5353 = vmatmul.msk.f32.vlgmr.msra.gmra.mxu2 %vm59_vm3, %v5806_v15 }
 0x119   :  { %v5810_v17 = vld [vmem:[#allocation2 + $0x9] sm:$0x3f]  ;;  %5354 = vmatmul.msk.f32.vlgmr.msra.gmra.mxu3 %vm59_vm3, %v5808_v16  ;;  %398 = vmatpush.msra.mxu2 %v236_v31 }
 0x11a   :  { %5355 = vmatmul.msk.f32.vlgmr.msra.gmra.mxu1 %vm59_vm3, %v5810_v17 }
 0x11b   :  { %399 = vmatpush.msra.mxu2 %v235_v32  ;;  %464 = vmatpush.msra.mxu1 %v421_v59 }
 0x11d   :  { %465 = vmatpush.msra.mxu1 %v420_v63 }
 0x197   :  { %v226_v23 = vpop.f32.mrf.mxu1 }
 0x19b   :  { %v178_v19 = vpop.f32.mrf.mxu2 }
 0x19c   :  { %v201_v20 = vpop.f32.mrf.mxu3 }
 0x19d   :  { %v202_v21 = vadd.f32 %v201_v20, %v178_v19 }
 0x19f   :  { %v229_v24 = vadd.f32 %v226_v23, %v202_v21  ;;  %v412_v21 = vpop.permute.xlu0 %411 }
 0x1a1   :  { %v5818_v25 = vadd.f32 %v5643_v22, %v229_v24 }
 0x1a3   :  { %5356 = vmatpush.msk.msra.mxu0 %vm241_vm5, %v5818_v25  ;;  %v288_v27 = vmul.f32 %v5818_v25, %v5818_v25 }
 0x1a4   :  { %5357 = vmatmul.msk.f32.vlgmr.msra.gmra.mxu0 %vm237_vm6, %v5820_v26 }
 0x1a5   :  { %5359 = vmatpush.msk.msrb.mxu3 %vm241_vm5, %v288_v27  ;;  %373 = vmatpush.msrb.mxu0 %v236_v31  ;;  %v616_v31 = vld [vmem:[#allocation15 + $0x88] sm:$0xff] }
 0x1a6   :  { %5360 = vmatmul.msk.f32.vlgmr.msrb.gmra.mxu3 %vm237_vm6, %v5820_v26 }
 0x1a7   :  { %374 = vmatpush.msrb.mxu0 %v235_v32  ;;  %441 = vmatpush.msra.mxu3 %v423_v58  ;;  %v615_v32 = vld [vmem:[#allocation15 + $0x80] sm:$0xff] }
 0x1a9   :  { %493 = vmatpush.msra.mxu0 %v475_v60  ;;  %442 = vmatpush.msra.mxu3 %v422_v62 }
 0x1ab   :  { %494 = vmatpush.msra.mxu0 %v474_v0  ;;  %539 = vmatpush.msrb.mxu3 %v524_v2 }
 0x1ad   :  { %540 = vmatpush.msrb.mxu3 %v523_v6 }
 0x221   :  { %v262_v29 = vpop.f32.mrf.mxu0 }
 0x222   :  { %5358 = vmatmul.msk.f32.vlgmr.msrb.gmra.mxu2 %vm59_vm3, %v262_v29  ;;  %v618_v29 = vld [vmem:[#allocation15 + $0x98] sm:$0xff] }
 0x223   :  { %513 = vmatpush.msrb.mxu2 %v473_v61 }
 0x225   :  { %514 = vmatpush.msrb.mxu2 %v472_v1 }
 0x229   :  { %v309_v30 = vpop.f32.mrf.mxu3 }
 0x22a   :  { %5361 = vmatmul.msk.f32.vlgmr.msrb.gmra.mxu1 %vm59_vm3, %v309_v30  ;;  %v617_v30 = vld [vmem:[#allocation15 + $0x90] sm:$0xff] }
 0x22b   :  { %559 = vmatpush.msrb.mxu1 %v522_v3 }
 0x22d   :  { %560 = vmatpush.msrb.mxu1 %v521_v7  ;;  %v769_v7 = vld [vmem:[#allocation15 + $0xa8] sm:$0x1] }
 0x2a5   :  { %v285_v34 = vpop.f32.mrf.mxu2 }
 0x2a6   :  { %v335_v36 = vmul.f32 0.5, %v285_v34  ;;  %v5644_v34 = vld [vmem:[#allocation17 + $0x40] ss:$0 sm:$0xff] }
 0x2a7   :  { %v332_v37 = vpop.f32.mrf.mxu1 }
 0x2a8   :  { %v337_v38 = vmul.f32 %v335_v36, %v335_v36  ;;  %v336_v39 = vmul.f32 0.5, %v332_v37 }
 0x2aa   :  { %v338_v40 = vsub.f32 %v336_v39, %v337_v38 }
 0x2ac   :  { %v339_v42 = vmax.f32 %v338_v40, 0.0 }
 0x2ae   :  { %v341_v43 = vadd.f32 1e-05, %v339_v42  ;;  %v613_v42 = vld [vmem:[#allocation15 + $0x70] sm:$0xff] }
 0x2b0   :  { %5659 = vrsqrt.f32 %v341_v43  ;;  %vm348_vm8 = vweird.f32 %v341_v43 }
 0x2b6   :  { %v5660_v45 = vpop.eup %5659 }
 0x2b7   :  { %v343_v46 = vmul.f32 %v5660_v45, %v341_v43  ;;  %vm349_vm7 = vweird.f32 %v5660_v45  ;;  %v612_v43 = vld [vmem:[#allocation15 + $0x68] sm:$0xff] }
 0x2b8   :  { %vm350_vm9 = vmor %vm348_vm8, %vm349_vm7 }
 0x2b9   :  { %v344_v47 = vmul.f32 %v5660_v45, %v343_v46 }
 0x2bb   :  { %v345_v48 = vmul.f32 0.5, %v344_v47 }
 0x2bd   :  { %v346_v50 = vsub.f32 1.5, %v345_v48 }
 0x2bf   :  { %v347_v51 = vmul.f32 %v5660_v45, %v346_v50 }
 0x2c1   :  { %v351_v53 = vsel %vm350_vm9, %v5660_v45, %v347_v51 }
 0x2c2   :  { %v352_v54 = vmul.f32 %v351_v53, %v340_v52  ;;  %v623_v53 = vld [vmem:[#allocation17 + $0xa8] sm:$0xff] }
 0x2c4   :  { %5362 = vmatmul.msk.f32.vlgmr.msrb.gmra.mxu0 %vm59_vm3, %v352_v54  ;;  %v354_v56 = vmul.f32 %v352_v54, %v335_v36  ;;  %v622_v54 = vld [vmem:[#allocation17 + $0xa0] sm:$0xff] }
 0x2c5   :  { %585 = vmatpush.msrb.mxu0 %v570_v4 }
 0x2c6   :  { %v355_v57 = vsub.f32 %v353_v55, %v354_v56  ;;  %v621_v55 = vld [vmem:[#allocation17 + $0x98] sm:$0xff] }
 0x2c7   :  { %586 = vmatpush.msrb.mxu0 %v569_v8 }
 0x2c8   :  { %5363 = vmatmul.msk.f32.vlgmr.msra.gmra.mxu2 %vm59_vm3, %v355_v57  ;;  %v620_v57 = vld [vmem:[#allocation17 + $0x90] sm:$0xff] }
 0x2c9   :  { %605 = vmatpush.msra.mxu2 %v568_v5 }
 0x2cb   :  { %606 = vmatpush.msra.mxu2 %v567_v9 }
 0x341   :  { %v376_v11 = vpop.f32.mrf.mxu0 }
 0x342   :  { %v379_v12 = vperm.slane %v376_v11, 0 }
 0x344   :  { %v380_v14 = vmul.f32 %v379_v12, %v5818_v25  ;;  %v619_v25 = vld [vmem:[#allocation15 + $0xa0] sm:$0xff] }
 0x34b   :  { %v401_v13 = vpop.f32.mrf.mxu2 }
 0x34c   :  { %v404_v18 = vperm.slane %v401_v13, 0  ;;  %v920_v13 = vld [vmem:[#allocation15 + $0x150] sm:$0xff] }
 0x34e   :  { %v405_v19 = vadd.f32 %v404_v18, %v380_v14  ;;  %v912_v14 = vld [vmem:[#allocation15 + $0x110] sm:$0xff]  ;;  %v919_v18 = vld [vmem:[#allocation15 + $0x148] sm:$0xff] }
 0x350   :  { %vm406_vm10 = vcmp.ge.f32.partialorder %v405_v19, 0.0  ;;  %v407_v20 = vmul.f32 0.22916667, %v405_v19 }
 0x352   :  { %v408_v22 = vsel %vm406_vm10, %v405_v19, %v407_v20  ;;  %v911_v19 = vld [vmem:[#allocation15 + $0x108] sm:$0xff] }
 0x353   :  { %v414_v23 = vmul.f32 %v412_v21, %v408_v22 }
 0x355   :  { %415 = vst.msk [vmem:[#allocation3 + $0x8] sm:$0x3f] %vm147_vm4, %v414_v23  ;;  %v5645_v23 = vld [vmem:[#allocation17 + $0x88] ss:$0 sm:$0xff] }
 0x35c   :  { %v417_v24 = vld [vmem:[#allocation3 + $0x8] sm:$0x3f] }
 0x35d   :  { %v416_v27 = vld [vmem:[#allocation3 + $0x7] sm:$0x3f]  ;;  %5364 = vmatmul.msk.f32.vlgmr.msra.gmra.mxu3 %vm59_vm3, %v417_v24  ;;  %5367 = vmatmul.msk.f32.vlgmr.msrb.gmra.mxu2 %vm59_vm3, %v417_v24 }
 0x35e   :  { %v418_v28 = vld [vmem:[#allocation3 + $0x9] sm:$0x3f]  ;;  %5365 = vmatmul.msk.f32.vlgmr.msra.gmra.mxu1 %vm59_vm3, %v416_v27 }
 0x35f   :  { %5366 = vmatmul.msk.f32.vlgmr.msra.gmra.mxu0 %vm59_vm3, %v418_v28 }
 0x360   :  { %681 = vmatpush.msra.mxu0 %v619_v25 }
 0x362   :  { %682 = vmatpush.msra.mxu0 %v618_v29 }
 0x364   :  { %683 = vmatpush.msra.mxu0 %v617_v30 }
 0x365   :  { %5368 = vmatmul.msk.f32.vlgmr.msrb.gmra.mxu3 %vm59_vm3, %v5806_v15  ;;  %5371 = vmatmul.msk.f32.vlgmr.msra.gmra.mxu2 %vm59_vm3, %v5806_v15 }
 0x366   :  { %5369 = vmatmul.msk.f32.vlgmr.msrb.gmra.mxu1 %vm59_vm3, %v5808_v16  ;;  %684 = vmatpush.msra.mxu0 %v616_v31 }
 0x367   :  { %5370 = vmatmul.msk.f32.vlgmr.msrb.gmra.mxu0 %vm59_vm3, %v5810_v17 }
 0x368   :  { %685 = vmatpush.msra.mxu0 %v615_v32 }
 0x36a   :  { %686 = vmatpush.msra.mxu0 %v614_v33 }
 0x36c   :  { %687 = vmatpush.msra.mxu0 %v613_v42 }
 0x36e   :  { %688 = vmatpush.msra.mxu0 %v612_v43 }
 0x3db   :  { %v467_v16 = vpop.f32.mrf.mxu1 }
 0x3dc   :  { %v496_v36 = vpop.f32.mrf.mxu0 }
 0x3e0   :  { %v444_v35 = vpop.f32.mrf.mxu3  ;;  %v516_v37 = vpop.f32.mrf.mxu2 }
 0x3e1   :  { %v468_v17 = vadd.f32 %v467_v16, %v444_v35  ;;  %v517_v38 = vadd.f32 %v516_v37, %v496_v36  ;;  %v846_v37 = vld [vmem:[#allocation15 + $0xd0] sm:$0xff] }
 0x3e3   :  { %v5849_v15 = vadd.f32 %v5644_v34, %v468_v17  ;;  %v5851_v39 = vadd.f32 %v5644_v34, %v517_v38  ;;  %v5875_v44 = vpop.f32.mrf.mxu1  ;;  %v845_v17 = vld [vmem:[#allocation15 + $0xc8] sm:$0xff] }
 0x3e4   :  { %v588_v52 = vpop.f32.mrf.mxu0 }
 0x3e5   :  { %v693_v40 = vmul.f32 %v5849_v15, %v5849_v15  ;;  %5374 = vmatpush.msk.msra.mxu1 %vm241_vm5, %v5849_v15  ;;  %v694_v41 = vmul.f32 %v5851_v39, %v5851_v39  ;;  %5372 = vmatpush.msk.msra.mxu3 %vm241_vm5, %v5851_v39 }
 0x3e6   :  { %5375 = vmatmul.msk.f32.vlgmr.msra.gmra.mxu1 %vm237_vm6, %v5820_v26  ;;  %5373 = vmatmul.msk.f32.vlgmr.msra.gmra.mxu3 %vm237_vm6, %v5820_v26 }
 0x3e7   :  { %752 = vmatpush.msrb.mxu1 %v619_v25  ;;  %5377 = vmatpush.msk.msrb.mxu2 %vm241_vm5, %v694_v41  ;;  %v974_v41 = vld [vmem:[#allocation15 + $0x190] sm:$0xff] }
 0x3e8   :  { %5379 = vmatpush.msk.msrb.mxu3 %vm241_vm5, %v693_v40  ;;  %5378 = vmatmul.msk.f32.vlgmr.msrb.gmra.mxu2 %vm237_vm6, %v5820_v26  ;;  %v5877_v45 = vpop.f32.mrf.mxu3 }
 0x3e9   :  { %753 = vmatpush.msrb.mxu1 %v618_v29  ;;  %800 = vmatpush.msra.mxu2 %v623_v53  ;;  %v563_v22 = vadd.f32 %v5875_v44, %v5877_v45  ;;  %v917_v44 = vld [vmem:[#allocation15 + $0x138] sm:$0xff] }
 0x3ea   :  { %823 = vmatpush.msra.mxu3 %v623_v53  ;;  %v909_v45 = vld [vmem:[#allocation15 + $0xf8] sm:$0xff]  ;;  %v906_v53 = vld [vmem:[#allocation15 + $0xe0] sm:$0xff] }
 0x3eb   :  { %754 = vmatpush.msrb.mxu1 %v617_v30  ;;  %801 = vmatpush.msra.mxu2 %v622_v54  ;;  %v566_v30 = vadd.f32 %v5645_v23, %v563_v22 }
 0x3ec   :  { %824 = vmatpush.msra.mxu3 %v622_v54  ;;  %v968_v54 = vld [vmem:[#allocation15 + $0x160] sm:$0xff] }
 0x3ed   :  { %755 = vmatpush.msrb.mxu1 %v616_v31  ;;  %802 = vmatpush.msra.mxu2 %v621_v55 }
 0x3ee   :  { %5380 = vmatmul.msk.f32.vlgmr.msrb.gmra.mxu3 %vm237_vm6, %v5820_v26  ;;  %v5879_v26 = vpop.f32.mrf.mxu2 }
 0x3ef   :  { %756 = vmatpush.msrb.mxu1 %v615_v32  ;;  %825 = vmatpush.msra.mxu3 %v621_v55  ;;  %v609_v24 = vadd.f32 %v5879_v26, %v588_v52  ;;  %v971_v26 = vld [vmem:[#allocation15 + $0x178] sm:$0xff]  ;;  %v914_v52 = vld [vmem:[#allocation15 + $0x120] sm:$0xff] }
 0x3f0   :  { %803 = vmatpush.msra.mxu2 %v620_v57  ;;  %v913_v55 = vld [vmem:[#allocation15 + $0x118] sm:$0xff] }
 0x3f1   :  { %757 = vmatpush.msrb.mxu1 %v614_v33  ;;  %826 = vmatpush.msra.mxu3 %v620_v57  ;;  %v611_v31 = vadd.f32 %v5645_v23, %v609_v24  ;;  %v967_v57 = vld [vmem:[#allocation15 + $0x158] sm:$0xff] }
 0x3f3   :  { %758 = vmatpush.msrb.mxu1 %v613_v42  ;;  %932 = vmatpush.msrb.mxu3 %v920_v13  ;;  %v910_v42 = vld [vmem:[#allocation15 + $0x100] sm:$0xff] }
 0x3f5   :  { %759 = vmatpush.msrb.mxu1 %v612_v43  ;;  %933 = vmatpush.msrb.mxu3 %v919_v18  ;;  %v972_v43 = vld [vmem:[#allocation15 + $0x180] sm:$0xff]  ;;  %v1007_v18 = vld [vmem:[#allocation15 + $0x1c8] sm:$0xff] }
 0x3f7   :  { %955 = vmatpush.msra.mxu1 %v912_v14 }
 0x3f9   :  { %956 = vmatpush.msra.mxu1 %v911_v19  ;;  %v1006_v19 = vld [vmem:[#allocation15 + $0x1c0] sm:$0xff] }
 0x3fb   :  { %957 = vmatpush.msra.mxu1 %v910_v42  ;;  %v1190_v42 = vld [vmem:[#allocation17 + $0xe0] sm:$0xff] }
 0x3fd   :  { %958 = vmatpush.msra.mxu1 %v909_v45  ;;  %v1242_v45 = vld [vmem:[#allocation17 + $0x100] sm:$0xff] }
 0x463   :  { %v667_v46 = vpop.f32.mrf.mxu1 }
 0x469   :  { %v644_v47 = vpop.f32.mrf.mxu3 }
 0x46a   :  { %v668_v48 = vadd.f32 %v667_v46, %v644_v47  ;;  %v916_v46 = vld [vmem:[#allocation15 + $0x130] sm:$0xff] }
 0x46b   :  { %v715_v49 = vpop.f32.mrf.mxu2  ;;  %v908_v47 = vld [vmem:[#allocation15 + $0xf0] sm:$0xff] }
 0x46c   :  { %5376 = vmatmul.msk.f32.vlgmr.msra.gmra.mxu0 %vm64_vm11, %v668_v48  ;;  %v970_v48 = vld [vmem:[#allocation15 + $0x170] sm:$0xff]  ;;  %959 = vmatpush.msra.mxu1 %v908_v47 }
 0x46d   :  { %v1245_v47 = vld [vmem:[#allocation17 + $0x118] sm:$0xff] }
 0x471   :  { %v738_v50 = vpop.f32.mrf.mxu3 }
 0x472   :  { %v739_v51 = vadd.f32 %v738_v50, %v715_v49  ;;  %v915_v49 = vld [vmem:[#allocation15 + $0x128] sm:$0xff] }
 0x473   :  { %v907_v50 = vld [vmem:[#allocation15 + $0xe8] sm:$0xff] }
 0x474   :  { %5381 = vmatmul.msk.f32.vlgmr.msrb.gmra.mxu1 %vm64_vm11, %v739_v51  ;;  %v969_v51 = vld [vmem:[#allocation15 + $0x168] sm:$0xff] }
 0x475   :  { %960 = vmatpush.msra.mxu1 %v907_v50  ;;  %v1184_v50 = vld [vmem:[#allocation17 + $0xb0] sm:$0xff] }
 0x477   :  { %961 = vmatpush.msra.mxu1 %v906_v53  ;;  %v1308_v53 = vld [vmem:[#allocation17 + $0x1b0] sm:$0xff] }
 0x4e9   :  { %v690_v56 = vpop.f32.mrf.mxu0 }
 0x4ea   :  { %v764_v58 = vmul.f32 0.125, %v690_v56  ;;  %v905_v56 = vld [vmem:[#allocation15 + $0xd8] sm:$0xff] }
 0x4eb   :  { %962 = vmatpush.msra.mxu1 %v905_v56  ;;  %v1358_v56 = vld [vmem:[#allocation17 + $0x1f0] sm:$0xff] }
 0x4ec   :  { %v766_v60 = vmul.f32 %v764_v58, %v764_v58 }
 0x4f1   :  { %v761_v59 = vpop.f32.mrf.mxu1 }
 0x4f2   :  { %v765_v61 = vmul.f32 0.125, %v761_v59 }
 0x4f4   :  { %v767_v62 = vsub.f32 %v765_v61, %v766_v60 }
 0x4f6   :  { %v768_v63 = vmax.f32 %v767_v62, 0.0 }
 0x4f8   :  { %v770_v0 = vadd.f32 1e-05, %v768_v63 }
 0x4fa   :  { %5661 = vrsqrt.f32 %v770_v0  ;;  %vm777_vm14 = vweird.f32 %v770_v0 }
 0x500   :  { %v5662_v1 = vpop.eup %5661 }
 0x501   :  { %v772_v2 = vmul.f32 %v5662_v1, %v770_v0  ;;  %vm778_vm13 = vweird.f32 %v5662_v1  ;;  %v1005_v0 = vld [vmem:[#allocation15 + $0x1b8] sm:$0xff] }
 0x502   :  { %vm779_vm15 = vmor %vm777_vm14, %vm778_vm13  ;;  %1091 = vmatpush.msrb.mxu1 %v1005_v0 }
 0x503   :  { %v773_v3 = vmul.f32 %v5662_v1, %v772_v2  ;;  %v1003_v2 = vld [vmem:[#allocation15 + $0x1a8] sm:$0xff] }
 0x505   :  { %v774_v4 = vmul.f32 0.5, %v773_v3 }
 0x507   :  { %v775_v5 = vsub.f32 1.5, %v774_v4 }
 0x509   :  { %v776_v6 = vmul.f32 %v5662_v1, %v775_v5 }
 0x50b   :  { %v780_v8 = vsel %vm779_vm15, %v5662_v1, %v776_v6  ;;  %v1004_v1 = vld [vmem:[#allocation15 + $0x1b0] sm:$0xff]  ;;  %v5646_v6 = vld [vmem:[#allocation15 + $0x198] ss:$0 sm:$0xff] }
 0x50c   :  { %v781_v9 = vmul.f32 %v780_v8, %v769_v7  ;;  %1092 = vmatpush.msrb.mxu1 %v1004_v1 }
 0x50e   :  { %5382 = vmatmul.msk.f32.vlgmr.msra.gmra.mxu2 %vm67_vm12, %v781_v9  ;;  %v783_v11 = vmul.f32 %v781_v9, %v764_v58  ;;  %1093 = vmatpush.msrb.mxu1 %v1003_v2 }
 0x510   :  { %v784_v12 = vsub.f32 %v782_v10, %v783_v11  ;;  %v5917_v10 = vld [vmem:[#allocation15 + $0x270] sm:$0x1] }
 0x512   :  { %5383 = vmatmul.msk.f32.vlgmr.msra.gmra.mxu3 %vm67_vm12, %v784_v12  ;;  %v1002_v12 = vld [vmem:[#allocation15 + $0x1a0] sm:$0xff] }
 0x513   :  { %1094 = vmatpush.msrb.mxu1 %v1002_v12 }
 0x591   :  { %v805_v20 = vpop.f32.mrf.mxu2 }
 0x592   :  { %v831_v21 = vperm.slane %v805_v20, 0 }
 0x594   :  { %v832_v28 = vmul.f32 %v831_v21, %v5849_v15  ;;  %v836_v25 = vmul.f32 %v831_v21, %v5851_v39  ;;  %v973_v15 = vld [vmem:[#allocation15 + $0x188] sm:$0xff]  ;;  %v918_v39 = vld [vmem:[#allocation15 + $0x140] sm:$0xff] }
 0x595   :  { %v828_v27 = vpop.f32.mrf.mxu3  ;;  %934 = vmatpush.msrb.mxu3 %v918_v39  ;;  %v1243_v39 = vld [vmem:[#allocation17 + $0x108] sm:$0xff] }
 0x596   :  { %v833_v29 = vperm.slane %v828_v27, 0 }
 0x597   :  { %935 = vmatpush.msrb.mxu3 %v917_v44  ;;  %v1246_v44 = vld [vmem:[#allocation17 + $0x120] sm:$0xff] }
 0x598   :  { %v834_v32 = vadd.f32 %v833_v29, %v832_v28  ;;  %v837_v33 = vadd.f32 %v836_v25, %v833_v29 }
 0x599   :  { %936 = vmatpush.msrb.mxu3 %v916_v46  ;;  %v1185_v46 = vld [vmem:[#allocation17 + $0xb8] sm:$0xff] }
 0x59a   :  { %v835_v34 = vadd.f32 %v834_v32, %v566_v30  ;;  %v838_v16 = vadd.f32 %v837_v33, %v611_v31 }
 0x59b   :  { %937 = vmatpush.msrb.mxu3 %v915_v49  ;;  %v1188_v49 = vld [vmem:[#allocation17 + $0xd0] sm:$0xff] }
 0x59c   :  { %vm842_vm1 = vcmp.ge.f32.partialorder %v838_v16, 0.0  ;;  %v843_v35 = vmul.f32 0.22916667, %v838_v16  ;;  %vm839_vm4 = vcmp.ge.f32.partialorder %v835_v34, 0.0  ;;  %v840_v36 = vmul.f32 0.22916667, %v835_v34 }
 0x59d   :  { %938 = vmatpush.msrb.mxu3 %v914_v52  ;;  %v1240_v52 = vld [vmem:[#allocation17 + $0xf0] sm:$0xff] }
 0x59e   :  { %v844_v38 = vsel %vm842_vm1, %v838_v16, %v843_v35  ;;  %v841_v40 = vsel %vm839_vm4, %v835_v34, %v840_v36  ;;  %v1104_v16 = vld [vmem:[#allocation15 + $0x1d0] sm:$0x1]  ;;  %vm1836_vm1 = vcmask 1043456   ;;  %vm1832_vm4 = vcmask 97280  }
 0x59f   :  { %5384 = vmatpush.msk.msrb.mxu0 %vm241_vm5, %v844_v38  ;;  %5386 = vmatpush.msk.msrb.mxu2 %vm241_vm5, %v841_v40  ;;  %vm1008_vm5 = vcmask 64512   ;;  %v1191_v40 = vld [vmem:[#allocation17 + $0xe8] sm:$0xff] }
 0x5a0   :  { %5387 = vmatmul.msk.f32.vlgmr.msrb.gmra.mxu2 %vm237_vm6, %v845_v17  ;;  %5385 = vmatmul.msk.f32.vlgmr.msrb.gmra.mxu0 %vm237_vm6, %v846_v37  ;;  %v1117_v17 = vld [vmem:[#allocation15 + $0x1d8] sm:$0x1] }
 0x5a1   :  { %986 = vmatpush.msra.mxu0 %v974_v41  ;;  %939 = vmatpush.msrb.mxu3 %v913_v55  ;;  %v1187_v41 = vld [vmem:[#allocation17 + $0xc8] sm:$0xff]  ;;  %v1366_v55 = vld [vmem:[#allocation17 + $0x230] sm:$0xff] }
 0x5a3   :  { %987 = vmatpush.msra.mxu0 %v973_v15  ;;  %v1247_v15 = vld [vmem:[#allocation17 + $0x128] sm:$0xff] }
 0x5a5   :  { %988 = vmatpush.msra.mxu0 %v972_v43  ;;  %v1186_v43 = vld [vmem:[#allocation17 + $0xc0] sm:$0xff] }
 0x5a7   :  { %989 = vmatpush.msra.mxu0 %v971_v26  ;;  %v1189_v26 = vld [vmem:[#allocation17 + $0xd8] sm:$0xff] }
 0x5a9   :  { %990 = vmatpush.msra.mxu0 %v970_v48  ;;  %v1241_v48 = vld [vmem:[#allocation17 + $0xf8] sm:$0xff] }
 0x5ab   :  { %991 = vmatpush.msra.mxu0 %v969_v51  ;;  %v1244_v51 = vld [vmem:[#allocation17 + $0x110] sm:$0xff] }
 0x5ad   :  { %992 = vmatpush.msra.mxu0 %v968_v54  ;;  %v1300_v54 = vld [vmem:[#allocation17 + $0x170] sm:$0xff] }
 0x5af   :  { %993 = vmatpush.msra.mxu0 %v967_v57  ;;  %v1307_v57 = vld [vmem:[#allocation17 + $0x1a8] sm:$0xff] }
 0x5b1   :  { %1137 = vmatpush.msrb.mxu0 %v1007_v18 }
 0x5b3   :  { %1138 = vmatpush.msrb.mxu0 %v1006_v19 }
 0x61d   :  { %v870_v58 = vpop.f32.mrf.mxu0 }
 0x623   :  { %v896_v59 = vpop.f32.mrf.mxu2 }
 0x624   :  { %v897_v60 = vadd.f32 %v896_v59, %v870_v58  ;;  %v1299_v58 = vld [vmem:[#allocation17 + $0x168] sm:$0xff] }
 0x625   :  { %v1365_v59 = vld [vmem:[#allocation17 + $0x228] sm:$0xff] }
 0x626   :  { %899 = vst.msk [vmem:[#allocation4 + $0x8] sm:$0xff] %vm64_vm11, %v897_v60  ;;  %v1357_v60 = vld [vmem:[#allocation17 + $0x1e8] sm:$0xff] }
 0x62d   :  { %v5903_v61 = vld [vmem:[#allocation4 + $0x8] sm:$0xff] }
 0x62e   :  { %v5905_v62 = vld [vmem:[#allocation4 + $0x7] sm:$0xff]  ;;  %5388 = vmatmul.msk.f32.vlgmr.msrb.gmra.mxu3 %vm64_vm11, %v5903_v61 }
 0x62f   :  { %v5907_v63 = vld [vmem:[#allocation4 + $0x9] sm:$0xff]  ;;  %5389 = vmatmul.msk.f32.vlgmr.msra.gmra.mxu1 %vm64_vm11, %v5905_v62 }
 0x630   :  { %5390 = vmatmul.msk.f32.vlgmr.msra.gmra.mxu0 %vm64_vm11, %v5907_v63  ;;  %1230 = vmatpush.msra.mxu1 %v1187_v41 }
 0x631   :  { %1263 = vmatpush.msra.mxu0 %v1247_v15  ;;  %v1422_v15 = vld [vmem:[#allocation15 + $0x250] sm:$0xff] }
 0x632   :  { %1231 = vmatpush.msra.mxu1 %v1186_v43  ;;  %v1419_v43 = vld [vmem:[#allocation15 + $0x238] sm:$0xff] }
 0x633   :  { %1264 = vmatpush.msra.mxu0 %v1246_v44  ;;  %v1418_v44 = vld [vmem:[#allocation15 + $0x230] sm:$0xff] }
 0x634   :  { %1232 = vmatpush.msra.mxu1 %v1185_v46  ;;  %v1414_v46 = vld [vmem:[#allocation15 + $0x210] sm:$0xff] }
 0x635   :  { %1265 = vmatpush.msra.mxu0 %v1245_v47 }
 0x636   :  { %1233 = vmatpush.msra.mxu1 %v1184_v50 }
 0x637   :  { %1266 = vmatpush.msra.mxu0 %v1244_v51  ;;  %v1413_v51 = vld [vmem:[#allocation15 + $0x208] sm:$0xff] }
 0x6ac   :  { %v964_v3 = vpop.f32.mrf.mxu1 }
 0x6ad   :  { %v995_v7 = vpop.f32.mrf.mxu0 }
 0x6b1   :  { %v941_v4 = vpop.f32.mrf.mxu3 }
 0x6b2   :  { %v965_v5 = vadd.f32 %v964_v3, %v941_v4  ;;  %v1356_v3 = vld [vmem:[#allocation17 + $0x1e0] sm:$0xff]  ;;  %v1305_v4 = vld [vmem:[#allocation17 + $0x198] sm:$0xff] }
 0x6b4   :  { %v998_v8 = vadd.f32 %v995_v7, %v965_v5  ;;  %v1297_v5 = vld [vmem:[#allocation17 + $0x158] sm:$0xff] }
 0x6b5   :  { %v1355_v7 = vld [vmem:[#allocation17 + $0x1d8] sm:$0xff] }
 0x6b6   :  { %v5915_v9 = vadd.f32 %v5646_v6, %v998_v8  ;;  %v1363_v6 = vld [vmem:[#allocation17 + $0x218] sm:$0xff]  ;;  %v1304_v8 = vld [vmem:[#allocation17 + $0x190] sm:$0xff] }
 0x6b8   :  { %1027 = vmatpush.msra.mxu2 %v5915_v9  ;;  %v1055_v11 = vmul.f32 %v5915_v9, %v5915_v9 }
 0x6b9   :  { %5391 = vmatmul.msk.f32.vlgmr.msra.gmra.mxu2 %vm1008_vm5, %v5917_v10 }
 0x6ba   :  { %1071 = vmatpush.msra.mxu3 %v1055_v11  ;;  %1047 = vmatpush.msrb.mxu2 %v1005_v0  ;;  %v1306_v0 = vld [vmem:[#allocation17 + $0x1a0] sm:$0xff]  ;;  %v1296_v11 = vld [vmem:[#allocation17 + $0x150] sm:$0xff] }
 0x6bb   :  { %5393 = vmatmul.msk.f32.vlgmr.msra.gmra.mxu3 %vm1008_vm5, %v5917_v10 }
 0x6bc   :  { %1048 = vmatpush.msrb.mxu2 %v1004_v1  ;;  %1207 = vmatpush.msrb.mxu3 %v1191_v40  ;;  %v1298_v1 = vld [vmem:[#allocation17 + $0x160] sm:$0xff] }
 0x6be   :  { %1049 = vmatpush.msrb.mxu2 %v1003_v2  ;;  %1208 = vmatpush.msrb.mxu3 %v1190_v42  ;;  %v1364_v2 = vld [vmem:[#allocation17 + $0x220] sm:$0xff]  ;;  %v1420_v42 = vld [vmem:[#allocation15 + $0x240] sm:$0xff] }
 0x6c0   :  { %1050 = vmatpush.msrb.mxu2 %v1002_v12  ;;  %1209 = vmatpush.msrb.mxu3 %v1189_v26  ;;  %v1362_v12 = vld [vmem:[#allocation17 + $0x210] sm:$0xff]  ;;  %v1415_v26 = vld [vmem:[#allocation15 + $0x218] sm:$0xff] }
 0x6c2   :  { %1162 = vmatpush.msra.mxu2 %v1007_v18  ;;  %1210 = vmatpush.msrb.mxu3 %v1188_v49  ;;  %v1295_v18 = vld [vmem:[#allocation17 + $0x148] sm:$0xff] }
 0x6c4   :  { %1163 = vmatpush.msra.mxu2 %v1006_v19  ;;  %1317 = vmatpush.msra.mxu3 %v1308_v53  ;;  %v1361_v19 = vld [vmem:[#allocation17 + $0x208] sm:$0xff] }
 0x6c6   :  { %1318 = vmatpush.msra.mxu3 %v1307_v57  ;;  %v1412_v57 = vld [vmem:[#allocation15 + $0x200] sm:$0xff] }
 0x6c8   :  { %1319 = vmatpush.msra.mxu3 %v1306_v0  ;;  %v1408_v0 = vld [vmem:[#allocation15 + $0x1e0] sm:$0xff] }
 0x6ca   :  { %1320 = vmatpush.msra.mxu3 %v1305_v4 }
 0x6cc   :  { %1321 = vmatpush.msra.mxu3 %v1304_v8 }
 0x73c   :  { %v1029_v13 = vpop.f32.mrf.mxu2 }
 0x73d   :  { %5392 = vmatmul.msk.f32.vlgmr.msrb.gmra.mxu2 %vm67_vm12, %v1029_v13  ;;  %v1354_v13 = vld [vmem:[#allocation17 + $0x1d0] sm:$0xff] }
 0x73e   :  { %v1073_v14 = vpop.f32.mrf.mxu3  ;;  %1283 = vmatpush.msrb.mxu2 %v1243_v39  ;;  %v1421_v39 = vld [vmem:[#allocation15 + $0x248] sm:$0xff] }
 0x73f   :  { %5394 = vmatmul.msk.f32.vlgmr.msrb.gmra.mxu1 %vm67_vm12, %v1073_v14  ;;  %v1303_v14 = vld [vmem:[#allocation17 + $0x188] sm:$0xff] }
 0x740   :  { %1284 = vmatpush.msrb.mxu2 %v1242_v45  ;;  %1337 = vmatpush.msrb.mxu1 %v1300_v54  ;;  %v1417_v45 = vld [vmem:[#allocation15 + $0x228] sm:$0xff] }
 0x741   :  { %1322 = vmatpush.msra.mxu3 %v1303_v14  ;;  %v1425_v14 = vld [vmem:[#allocation17 + $0x248] sm:$0xff] }
 0x742   :  { %1285 = vmatpush.msrb.mxu2 %v1241_v48  ;;  %1338 = vmatpush.msrb.mxu1 %v1299_v58  ;;  %v1411_v58 = vld [vmem:[#allocation15 + $0x1f8] sm:$0xff] }
 0x744   :  { %1286 = vmatpush.msrb.mxu2 %v1240_v52  ;;  %1339 = vmatpush.msrb.mxu1 %v1298_v1 }
 0x746   :  { %1340 = vmatpush.msrb.mxu1 %v1297_v5 }
 0x748   :  { %1341 = vmatpush.msrb.mxu1 %v1296_v11 }
 0x74a   :  { %1342 = vmatpush.msrb.mxu1 %v1295_v18 }
 0x7bc   :  { %v1096_v20 = vpop.f32.mrf.mxu1 }
 0x7bd   :  { %v1100_v23 = vmul.f32 0.125, %v1096_v20  ;;  %v1353_v20 = vld [vmem:[#allocation17 + $0x1c8] sm:$0xff] }
 0x7c0   :  { %v1052_v21 = vpop.f32.mrf.mxu2 }
 0x7c1   :  { %v1099_v22 = vmul.f32 0.125, %v1052_v21  ;;  %v1302_v21 = vld [vmem:[#allocation17 + $0x180] sm:$0xff] }
 0x7c2   :  { %1323 = vmatpush.msra.mxu3 %v1302_v21 }
 0x7c3   :  { %v1101_v24 = vmul.f32 %v1099_v22, %v1099_v22 }
 0x7c5   :  { %v1102_v27 = vsub.f32 %v1100_v23, %v1101_v24  ;;  %v1360_v23 = vld [vmem:[#allocation17 + $0x200] sm:$0xff] }
 0x7c6   :  { %v1352_v24 = vld [vmem:[#allocation17 + $0x1c0] sm:$0xff] }
 0x7c7   :  { %v1103_v28 = vmax.f32 %v1102_v27, 0.0  ;;  %v1301_v27 = vld [vmem:[#allocation17 + $0x178] sm:$0xff] }
 0x7c8   :  { %1324 = vmatpush.msra.mxu3 %v1301_v27 }
 0x7c9   :  { %v1105_v25 = vadd.f32 1e-05, %v1103_v28  ;;  %v1293_v28 = vld [vmem:[#allocation17 + $0x138] sm:$0xff] }
 0x7cb   :  { %5663 = vrsqrt.f32 %v1105_v25  ;;  %vm1112_vm7 = vweird.f32 %v1105_v25 }
 0x7d1   :  { %v5664_v29 = vpop.eup %5663 }
 0x7d2   :  { %v1107_v30 = vmul.f32 %v5664_v29, %v1105_v25  ;;  %vm1113_vm6 = vweird.f32 %v5664_v29  ;;  %v1359_v25 = vld [vmem:[#allocation17 + $0x1f8] sm:$0xff] }
 0x7d3   :  { %vm1114_vm8 = vmor %vm1112_vm7, %vm1113_vm6 }
 0x7d4   :  { %v1108_v31 = vmul.f32 %v5664_v29, %v1107_v30 }
 0x7d6   :  { %v1109_v32 = vmul.f32 0.5, %v1108_v31 }
 0x7d8   :  { %v1110_v33 = vsub.f32 1.5, %v1109_v32 }
 0x7da   :  { %v1111_v34 = vmul.f32 %v5664_v29, %v1110_v33 }
 0x7dc   :  { %v1115_v35 = vsel %vm1114_vm8, %v5664_v29, %v1111_v34  ;;  %v1351_v29 = vld [vmem:[#allocation17 + $0x1b8] sm:$0xff] }
 0x7dd   :  { %v1116_v36 = vmul.f32 %v1115_v35, %v1104_v16 }
 0x7df   :  { %5395 = vmatmul.msk.f32.vlgmr.msrb.gmra.mxu0 %vm59_vm3, %v1116_v36  ;;  %v1118_v37 = vmul.f32 %v1116_v36, %v1099_v22  ;;  %v1294_v22 = vld [vmem:[#allocation17 + $0x140] sm:$0xff]  ;;  %v1176_v36 = vpop.permute.xlu0 %1175 }
 0x7e0   :  { %1375 = vmatpush.msrb.mxu0 %v1366_v55  ;;  %1343 = vmatpush.msrb.mxu1 %v1294_v22 }
 0x7e1   :  { %v1119_v38 = vsub.f32 %v1117_v17, %v1118_v37 }
 0x7e2   :  { %1376 = vmatpush.msrb.mxu0 %v1365_v59  ;;  %1344 = vmatpush.msrb.mxu1 %v1293_v28  ;;  %v1410_v59 = vld [vmem:[#allocation15 + $0x1f0] sm:$0xff] }
 0x7e3   :  { %5396 = vmatmul.msk.f32.vlgmr.msra.gmra.mxu2 %vm59_vm3, %v1119_v38 }
 0x7e4   :  { %1395 = vmatpush.msra.mxu2 %v1358_v56  ;;  %1377 = vmatpush.msrb.mxu0 %v1364_v2 }
 0x7e6   :  { %1396 = vmatpush.msra.mxu2 %v1357_v60  ;;  %1378 = vmatpush.msrb.mxu0 %v1363_v6  ;;  %v1409_v60 = vld [vmem:[#allocation15 + $0x1e8] sm:$0xff] }
 0x7e8   :  { %1397 = vmatpush.msra.mxu2 %v1356_v3  ;;  %1379 = vmatpush.msrb.mxu0 %v1362_v12  ;;  %v1427_v12 = vld [vmem:[#allocation17 + $0x258] sm:$0xff] }
 0x7ea   :  { %1398 = vmatpush.msra.mxu2 %v1355_v7  ;;  %1380 = vmatpush.msrb.mxu0 %v1361_v19  ;;  %v1424_v19 = vld [vmem:[#allocation17 + $0x240] sm:$0xff] }
 0x7ec   :  { %1399 = vmatpush.msra.mxu2 %v1354_v13  ;;  %1381 = vmatpush.msrb.mxu0 %v1360_v23  ;;  %v1426_v13 = vld [vmem:[#allocation17 + $0x250] sm:$0xff] }
 0x7ee   :  { %1400 = vmatpush.msra.mxu2 %v1353_v20  ;;  %1382 = vmatpush.msrb.mxu0 %v1359_v25 }
 0x7f0   :  { %1401 = vmatpush.msra.mxu2 %v1352_v24 }
 0x7f2   :  { %1402 = vmatpush.msra.mxu2 %v1351_v29 }
 0x85c   :  { %v1140_v30 = vpop.f32.mrf.mxu0 }
 0x85d   :  { %v1143_v31 = vperm.slane %v1140_v30, 0 }
 0x85f   :  { %v1144_v33 = vmul.f32 %v1143_v31, %v5915_v9  ;;  %v1423_v9 = vld [vmem:[#allocation15 + $0x258] sm:$0xff] }
 0x866   :  { %v1165_v32 = vpop.f32.mrf.mxu2 }
 0x867   :  { %v1168_v34 = vperm.slane %v1165_v32, 0 }
 0x869   :  { %v1169_v16 = vadd.f32 %v1168_v34, %v1144_v33  ;;  %v1555_v34 = vld [vmem:[#allocation15 + $0x260] sm:$0x1] }
 0x86b   :  { %vm1170_vm9 = vcmp.ge.f32.partialorder %v1169_v16, 0.0  ;;  %v1171_v35 = vmul.f32 0.22916667, %v1169_v16 }
 0x86d   :  { %v1172_v17 = vsel %vm1170_vm9, %v1169_v16, %v1171_v35 }
 0x86e   :  { %v1178_v37 = vmul.f32 %v1176_v36, %v1172_v17  ;;  %v1568_v36 = vld [vmem:[#allocation15 + $0x268] sm:$0x1] }
 0x870   :  { %1179 = vst.msk [vmem:[#allocation5 + $0x8] sm:$0xff] %vm67_vm12, %v1178_v37 }
 0x877   :  { %v1181_v38 = vld [vmem:[#allocation5 + $0x8] sm:$0xff] }
 0x878   :  { %v1180_v40 = vld [vmem:[#allocation5 + $0x7] sm:$0xff]  ;;  %5397 = vmatmul.msk.f32.vlgmr.msrb.gmra.mxu3 %vm67_vm12, %v1181_v38  ;;  %5400 = vmatmul.msk.f32.vlgmr.msrb.gmra.mxu2 %vm67_vm12, %v1181_v38 }
 0x879   :  { %v1182_v41 = vld [vmem:[#allocation5 + $0x9] sm:$0xff]  ;;  %5398 = vmatmul.msk.f32.vlgmr.msra.gmra.mxu1 %vm67_vm12, %v1180_v40 }
 0x87a   :  { %5399 = vmatmul.msk.f32.vlgmr.msra.gmra.mxu0 %vm67_vm12, %v1182_v41 }
 0x87b   :  { %1468 = vmatpush.msra.mxu0 %v1423_v9 }
 0x87d   :  { %1469 = vmatpush.msra.mxu0 %v1422_v15 }
 0x87f   :  { %1470 = vmatpush.msra.mxu0 %v1421_v39 }
 0x880   :  { %5401 = vmatmul.msk.f32.vlgmr.msra.gmra.mxu3 %vm64_vm11, %v5903_v61  ;;  %5404 = vmatmul.msk.f32.vlgmr.msra.gmra.mxu2 %vm64_vm11, %v5903_v61 }
 0x881   :  { %5402 = vmatmul.msk.f32.vlgmr.msrb.gmra.mxu1 %vm64_vm11, %v5905_v62  ;;  %1471 = vmatpush.msra.mxu0 %v1420_v42  ;;  %v1416_v62 = vld [vmem:[#allocation15 + $0x220] sm:$0xff] }
 0x882   :  { %5403 = vmatmul.msk.f32.vlgmr.msrb.gmra.mxu0 %vm64_vm11, %v5907_v63  ;;  %v5647_v63 = vld [vmem:[#allocation17 + $0x130] ss:$0 sm:$0xff] }
 0x883   :  { %1472 = vmatpush.msra.mxu0 %v1419_v43 }
 0x885   :  { %1473 = vmatpush.msra.mxu0 %v1418_v44 }
 0x887   :  { %1474 = vmatpush.msra.mxu0 %v1417_v45 }
 0x889   :  { %1475 = vmatpush.msra.mxu0 %v1416_v62 }
 0x88b   :  { %1476 = vmatpush.msra.mxu0 %v1415_v26 }
 0x88d   :  { %1477 = vmatpush.msra.mxu0 %v1414_v46 }
 0x88f   :  { %1478 = vmatpush.msra.mxu0 %v1413_v51 }
 0x891   :  { %1479 = vmatpush.msra.mxu0 %v1412_v57 }
 0x893   :  { %1480 = vmatpush.msra.mxu0 %v1411_v58 }
 0x895   :  { %1481 = vmatpush.msra.mxu0 %v1410_v59 }
 0x897   :  { %1482 = vmatpush.msra.mxu0 %v1409_v60 }
 0x899   :  { %1483 = vmatpush.msra.mxu0 %v1408_v0 }
 0x8f6   :  { %v1235_v61 = vpop.f32.mrf.mxu1 }
 0x8f7   :  { %v1268_v48 = vpop.f32.mrf.mxu0 }
 0x8fb   :  { %v1212_v47 = vpop.f32.mrf.mxu3  ;;  %v1288_v50 = vpop.f32.mrf.mxu2 }
 0x8fc   :  { %v1236_v49 = vadd.f32 %v1235_v61, %v1212_v47  ;;  %v1289_v52 = vadd.f32 %v1288_v50, %v1268_v48  ;;  %v1796_v61 = vld [vmem:[#allocation15 + $0x410] sm:$0xff] }
 0x8fe   :  { %v5944_v53 = vadd.f32 %v5647_v63, %v1236_v49  ;;  %v5946_v54 = vadd.f32 %v5647_v63, %v1289_v52  ;;  %v1346_v1 = vpop.f32.mrf.mxu1  ;;  %v1795_v49 = vld [vmem:[#allocation15 + $0x408] sm:$0xff]  ;;  %v1633_v52 = vld [vmem:[#allocation15 + $0x290] sm:$0xff] }
 0x8ff   :  { %v1384_v11 = vpop.f32.mrf.mxu0 }
 0x900   :  { %1463 = vmatpush.msra.mxu1 %v5944_v53  ;;  %v1488_v55 = vmul.f32 %v5944_v53, %v5944_v53  ;;  %1443 = vmatpush.msrb.mxu3 %v5946_v54  ;;  %v1489_v56 = vmul.f32 %v5946_v54, %v5946_v54 }
 0x901   :  { %5406 = vmatmul.msk.f32.vlgmr.msra.gmra.mxu1 %vm1008_vm5, %v5917_v10  ;;  %5405 = vmatmul.msk.f32.vlgmr.msrb.gmra.mxu3 %vm1008_vm5, %v5917_v10 }
 0x902   :  { %1530 = vmatpush.msrb.mxu1 %v1423_v9  ;;  %1505 = vmatpush.msrb.mxu2 %v1489_v56  ;;  %v5648_v9 = vld [vmem:[#allocation17 + $0x238] ss:$0 sm:$0xff] }
 0x903   :  { %1525 = vmatpush.msra.mxu3 %v1488_v55  ;;  %5407 = vmatmul.msk.f32.vlgmr.msrb.gmra.mxu2 %vm1008_vm5, %v5917_v10  ;;  %v1326_v2 = vpop.f32.mrf.mxu3  ;;  %v1404_v3 = vpop.f32.mrf.mxu2 }
 0x904   :  { %1531 = vmatpush.msrb.mxu1 %v1422_v15  ;;  %1586 = vmatpush.msra.mxu2 %v1427_v12  ;;  %v1347_v41 = vadd.f32 %v1346_v1, %v1326_v2  ;;  %v1405_v15 = vadd.f32 %v1404_v3, %v1384_v11  ;;  %v1732_v1 = vld [vmem:[#allocation15 + $0x380] sm:$0xff]  ;;  %v1634_v2 = vld [vmem:[#allocation15 + $0x298] sm:$0xf]  ;;  %v1632_v3 = vld [vmem:[#allocation15 + $0x288] sm:$0xf] }
 0x905   :  { %1609 = vmatpush.msrb.mxu3 %v1427_v12  ;;  %v1725_v11 = vld [vmem:[#allocation15 + $0x348] sm:$0xff]  ;;  %v1724_v12 = vld [vmem:[#allocation15 + $0x340] sm:$0xff] }
 0x906   :  { %1532 = vmatpush.msrb.mxu1 %v1421_v39  ;;  %1587 = vmatpush.msra.mxu2 %v1426_v13 }
 0x907   :  { %1610 = vmatpush.msrb.mxu3 %v1426_v13  ;;  %v1723_v13 = vld [vmem:[#allocation15 + $0x338] sm:$0xff] }
 0x908   :  { %1533 = vmatpush.msrb.mxu1 %v1420_v42  ;;  %1588 = vmatpush.msra.mxu2 %v1425_v14 }
 0x909   :  { %5408 = vmatmul.msk.f32.vlgmr.msra.gmra.mxu3 %vm1008_vm5, %v5917_v10 }
 0x90a   :  { %1534 = vmatpush.msrb.mxu1 %v1419_v43  ;;  %1611 = vmatpush.msrb.mxu3 %v1425_v14  ;;  %v1722_v14 = vld [vmem:[#allocation15 + $0x330] sm:$0xff] }
 0x90b   :  { %1589 = vmatpush.msra.mxu2 %v1424_v19 }
 0x90c   :  { %1535 = vmatpush.msrb.mxu1 %v1418_v44  ;;  %1612 = vmatpush.msrb.mxu3 %v1424_v19  ;;  %v1720_v19 = vld [vmem:[#allocation15 + $0x320] sm:$0xff] }
 0x90e   :  { %1536 = vmatpush.msrb.mxu1 %v1417_v45  ;;  %v1797_v45 = vld [vmem:[#allocation15 + $0x418] sm:$0xff] }
 0x90f   :  { %1798 = vmatpush.msrb.mxu0 %v1797_v45 }
 0x910   :  { %1537 = vmatpush.msrb.mxu1 %v1416_v62  ;;  %v1350_v62 = vadd.f32 %v5648_v9, %v1347_v41  ;;  %v1782_v41 = vld [vmem:[#allocation15 + $0x3a0] sm:$0xff] }
 0x911   :  { %1799 = vmatpush.msrb.mxu0 %v1796_v61 }
 0x912   :  { %1538 = vmatpush.msrb.mxu1 %v1415_v26  ;;  %v1407_v26 = vadd.f32 %v5648_v9, %v1405_v15  ;;  %v1707_v9 = vld [vmem:[#allocation15 + $0x2b8] sm:$0xff]  ;;  %v1706_v15 = vld [vmem:[#allocation15 + $0x2b0] sm:$0xff] }
 0x913   :  { %1800 = vmatpush.msrb.mxu0 %v1795_v49 }
 0x914   :  { %1539 = vmatpush.msrb.mxu1 %v1414_v46 }
 0x916   :  { %1540 = vmatpush.msrb.mxu1 %v1413_v51 }
 0x918   :  { %1541 = vmatpush.msrb.mxu1 %v1412_v57  ;;  %v1735_v57 = vld [vmem:[#allocation15 + $0x398] sm:$0xff] }
 0x91a   :  { %1542 = vmatpush.msrb.mxu1 %v1411_v58  ;;  %v1734_v58 = vld [vmem:[#allocation15 + $0x390] sm:$0xff] }
 0x91c   :  { %1543 = vmatpush.msrb.mxu1 %v1410_v59  ;;  %v1793_v59 = vld [vmem:[#allocation15 + $0x3f8] sm:$0xff] }
 0x91e   :  { %1544 = vmatpush.msrb.mxu1 %v1409_v60  ;;  %v1733_v60 = vld [vmem:[#allocation15 + $0x388] sm:$0xff] }
 0x920   :  { %1545 = vmatpush.msrb.mxu1 %v1408_v0  ;;  %v1792_v0 = vld [vmem:[#allocation15 + $0x3f0] sm:$0xff] }
 0x97e   :  { %v1465_v10 = vpop.f32.mrf.mxu1 }
 0x984   :  { %v1445_v4 = vpop.f32.mrf.mxu3 }
 0x985   :  { %v1466_v5 = vadd.f32 %v1465_v10, %v1445_v4  ;;  %v1731_v10 = vld [vmem:[#allocation15 + $0x378] sm:$0xff]  ;;  %v1730_v4 = vld [vmem:[#allocation15 + $0x370] sm:$0xff] }
 0x986   :  { %v1507_v6 = vpop.f32.mrf.mxu2 }
 0x987   :  { %1484 = vmatmul.f32.vlgmr.msra.gmra.mxu0 %v1466_v5  ;;  %v1729_v5 = vld [vmem:[#allocation15 + $0x368] sm:$0xff] }
 0x98c   :  { %v1527_v7 = vpop.f32.mrf.mxu3 }
 0x98d   :  { %v1528_v8 = vadd.f32 %v1527_v7, %v1507_v6  ;;  %v1728_v6 = vld [vmem:[#allocation15 + $0x360] sm:$0xff]  ;;  %v1727_v7 = vld [vmem:[#allocation15 + $0x358] sm:$0xff] }
 0x98f   :  { %1546 = vmatmul.f32.vlgmr.msrb.gmra.mxu1 %v1528_v8  ;;  %v1726_v8 = vld [vmem:[#allocation15 + $0x350] sm:$0xff] }
 0xa04   :  { %v1485_v18 = vpop.f32.mrf.mxu0 }
 0xa05   :  { %v1550_v20 = vmul.f32 0.03125, %v1485_v18  ;;  %v1721_v18 = vld [vmem:[#allocation15 + $0x328] sm:$0xff] }
 0xa07   :  { %v1552_v22 = vmul.f32 %v1550_v20, %v1550_v20 }
 0xa0c   :  { %v1547_v21 = vpop.f32.mrf.mxu1 }
 0xa0d   :  { %v1551_v23 = vmul.f32 0.03125, %v1547_v21  ;;  %v1718_v21 = vld [vmem:[#allocation15 + $0x310] sm:$0xff] }
 0xa0f   :  { %v1553_v24 = vsub.f32 %v1551_v23, %v1552_v22  ;;  %v1717_v22 = vld [vmem:[#allocation15 + $0x308] sm:$0xff] }
 0xa10   :  { %v1791_v23 = vld [vmem:[#allocation15 + $0x3e8] sm:$0xff] }
 0xa11   :  { %v1554_v27 = vmax.f32 %v1553_v24, 0.0  ;;  %v1716_v24 = vld [vmem:[#allocation15 + $0x300] sm:$0xff] }
 0xa13   :  { %v1556_v28 = vadd.f32 1e-05, %v1554_v27  ;;  %v1790_v27 = vld [vmem:[#allocation15 + $0x3e0] sm:$0xff] }
 0xa15   :  { %5665 = vrsqrt.f32 %v1556_v28  ;;  %vm1563_vm11 = vweird.f32 %v1556_v28 }
 0xa1b   :  { %v5666_v25 = vpop.eup %5665 }
 0xa1c   :  { %v1558_v29 = vmul.f32 %v5666_v25, %v1556_v28  ;;  %vm1564_vm10 = vweird.f32 %v5666_v25  ;;  %v1715_v28 = vld [vmem:[#allocation15 + $0x2f8] sm:$0xff] }
 0xa1d   :  { %vm1565_vm13 = vmor %vm1563_vm11, %vm1564_vm10  ;;  %vm2023_vm11 = vcmask 257024  }
 0xa1e   :  { %v1559_v30 = vmul.f32 %v5666_v25, %v1558_v29  ;;  %v1714_v29 = vld [vmem:[#allocation15 + $0x2f0] sm:$0xff] }
 0xa20   :  { %v1560_v31 = vmul.f32 0.5, %v1559_v30  ;;  %v1788_v30 = vld [vmem:[#allocation15 + $0x3d0] sm:$0xff] }
 0xa22   :  { %v1561_v32 = vsub.f32 1.5, %v1560_v31  ;;  %v1713_v31 = vld [vmem:[#allocation15 + $0x2e8] sm:$0xff] }
 0xa24   :  { %v1562_v33 = vmul.f32 %v5666_v25, %v1561_v32  ;;  %v1787_v32 = vld [vmem:[#allocation15 + $0x3c8] sm:$0xff] }
 0xa26   :  { %v1566_v16 = vsel %vm1565_vm13, %v5666_v25, %v1562_v33  ;;  %v1789_v25 = vld [vmem:[#allocation15 + $0x3d8] sm:$0xff]  ;;  %v1712_v33 = vld [vmem:[#allocation15 + $0x2e0] sm:$0xff] }
 0xa27   :  { %v1567_v35 = vmul.f32 %v1566_v16, %v1555_v34  ;;  %v1786_v34 = vld [vmem:[#allocation15 + $0x3c0] sm:$0xff]  ;;  %v1711_v16 = vld [vmem:[#allocation15 + $0x2d8] sm:$0xff] }
 0xa29   :  { %5409 = vmatmul.msk.f32.vlgmr.msra.gmra.mxu2 %vm67_vm12, %v1567_v35  ;;  %v1569_v17 = vmul.f32 %v1567_v35, %v1550_v20  ;;  %v1719_v20 = vld [vmem:[#allocation15 + $0x318] sm:$0xff] }
 0xa2a   :  { %v1785_v35 = vld [vmem:[#allocation15 + $0x3b8] sm:$0xff] }
 0xa2b   :  { %v1570_v37 = vsub.f32 %v1568_v36, %v1569_v17  ;;  %v1710_v36 = vld [vmem:[#allocation15 + $0x2d0] sm:$0xff] }
 0xa2c   :  { %v1784_v17 = vld [vmem:[#allocation15 + $0x3b0] sm:$0xff] }
 0xa2d   :  { %5410 = vmatmul.msk.f32.vlgmr.msrb.gmra.mxu3 %vm67_vm12, %v1570_v37  ;;  %v1709_v37 = vld [vmem:[#allocation15 + $0x2c8] sm:$0xff] }
 0xaac   :  { %v1591_v38 = vpop.f32.mrf.mxu2 }
 0xaad   :  { %v1617_v40 = vperm.slane %v1591_v38, 0  ;;  %v1783_v38 = vld [vmem:[#allocation15 + $0x3a8] sm:$0xff] }
 0xaaf   :  { %v1618_v42 = vmul.f32 %v1617_v40, %v5944_v53  ;;  %v1622_v43 = vmul.f32 %v1617_v40, %v5946_v54  ;;  %v1631_v53 = vld [vmem:[#allocation15 + $0x280] sm:$0xff] }
 0xab0   :  { %v1614_v39 = vpop.f32.mrf.mxu3  ;;  %v1794_v54 = vld [vmem:[#allocation15 + $0x400] sm:$0xff] }
 0xab1   :  { %v1619_v44 = vperm.slane %v1614_v39, 0  ;;  %1801 = vmatpush.msrb.mxu0 %v1794_v54  ;;  %v1708_v40 = vld [vmem:[#allocation15 + $0x2c0] sm:$0xff]  ;;  %v1705_v39 = vld [vmem:[#allocation15 + $0x2a8] sm:$0xff] }
 0xab3   :  { %v1620_v63 = vadd.f32 %v1619_v44, %v1618_v42  ;;  %v1623_v46 = vadd.f32 %v1622_v43, %v1619_v44  ;;  %1802 = vmatpush.msrb.mxu0 %v1793_v59  ;;  %v1704_v42 = vld [vmem:[#allocation15 + $0x2a0] sm:$0xff] }
 0xab5   :  { %v1621_v47 = vadd.f32 %v1620_v63, %v1350_v62  ;;  %v1624_v48 = vadd.f32 %v1623_v46, %v1407_v26  ;;  %1803 = vmatpush.msrb.mxu0 %v1792_v0 }
 0xab7   :  { %vm1628_vm14 = vcmp.ge.f32.partialorder %v1624_v48, 0.0  ;;  %v1629_v50 = vmul.f32 0.22916667, %v1624_v48  ;;  %vm1625_vm15 = vcmp.ge.f32.partialorder %v1621_v47, 0.0  ;;  %v1626_v51 = vmul.f32 0.22916667, %v1621_v47  ;;  %1804 = vmatpush.msrb.mxu0 %v1791_v23 }
 0xab9   :  { %v1630_v55 = vsel %vm1628_vm14, %v1624_v48, %v1629_v50  ;;  %v1627_v56 = vsel %vm1625_vm15, %v1621_v47, %v1626_v51  ;;  %1805 = vmatpush.msrb.mxu0 %v1790_v27 }
 0xaba   :  { %1656 = vmatpush.msrb.mxu2 %v1630_v55  ;;  %1685 = vmatpush.msra.mxu3 %v1627_v56 }
 0xabb   :  { %5411 = vmatmul.msk.f32.vlgmr.msrb.gmra.mxu2 %vm1008_vm5, %v1633_v52  ;;  %5413 = vmatmul.msk.f32.vlgmr.msra.gmra.mxu3 %vm1008_vm5, %v1631_v53 }
 0xabc   :  { %1736 = vmatpush.msra.mxu2 %v1735_v57  ;;  %1806 = vmatpush.msrb.mxu0 %v1789_v25 }
 0xabe   :  { %1737 = vmatpush.msra.mxu2 %v1734_v58  ;;  %1807 = vmatpush.msrb.mxu0 %v1788_v30 }
 0xac0   :  { %1738 = vmatpush.msra.mxu2 %v1733_v60  ;;  %1808 = vmatpush.msrb.mxu0 %v1787_v32  ;;  %v5649_v60 = vld [vmem:[#allocation15 + $0x420] ss:$0 sm:$0xff] }
 0xac2   :  { %1739 = vmatpush.msra.mxu2 %v1732_v1  ;;  %1809 = vmatpush.msrb.mxu0 %v1786_v34 }
 0xac3   :  { %5412 = vmatmul.msk.f32.gmra.mxu2 %vm1008_vm5, %v1634_v2  ;;  %5414 = vmatmul.msk.f32.gmra.mxu3 %vm1008_vm5, %v1632_v3  ;;  %v5995_v2 = vld [vmem:[#allocation15 + $0x4f0] sm:$0x1]  ;;  %v1830_v3 = vld [vmem:[#allocation15 + $0x440] sm:$0xff] }
 0xac4   :  { %1740 = vmatpush.msra.mxu2 %v1731_v10  ;;  %1810 = vmatpush.msrb.mxu0 %v1785_v35  ;;  %v1829_v10 = vld [vmem:[#allocation15 + $0x438] sm:$0xff] }
 0xac6   :  { %1741 = vmatpush.msra.mxu2 %v1730_v4  ;;  %1811 = vmatpush.msrb.mxu0 %v1784_v17  ;;  %v1828_v4 = vld [vmem:[#allocation15 + $0x430] sm:$0xff]  ;;  %v1949_v17 = vld [vmem:[#allocation15 + $0x458] sm:$0x1] }
 0xac8   :  { %1742 = vmatpush.msra.mxu2 %v1729_v5  ;;  %1812 = vmatpush.msrb.mxu0 %v1783_v38  ;;  %v1827_v5 = vld [vmem:[#allocation15 + $0x428] sm:$0xff] }
 0xaca   :  { %1743 = vmatpush.msra.mxu2 %v1728_v6  ;;  %1813 = vmatpush.msrb.mxu0 %v1782_v41  ;;  %v2035_v41 = vld [vmem:[#allocation17 + $0x278] sm:$0xff] }
 0xacc   :  { %1744 = vmatpush.msra.mxu2 %v1727_v7  ;;  %2087 = vmatpush.msra.mxu0 %v2035_v41  ;;  %v2185_v41 = vld [vmem:[#allocation17 + $0x390] sm:$0xff] }
 0xace   :  { %1745 = vmatpush.msra.mxu2 %v1726_v8 }
 0xad0   :  { %1746 = vmatpush.msra.mxu2 %v1725_v11 }
 0xad2   :  { %1747 = vmatpush.msra.mxu2 %v1724_v12 }
 0xad4   :  { %1748 = vmatpush.msra.mxu2 %v1723_v13  ;;  %v1702_v13 = vld [vmem:[#allocation15 + $0x4f8] sm:$0xff] }
 0xad5   :  { %2012 = vperm.xlu1 %5640, %v1702_v13   ;;  %v2257_v13 = vld [vmem:[#allocation17 + $0x448] sm:$0xff] }
 0xad6   :  { %1749 = vmatpush.msra.mxu2 %v1722_v14  ;;  %v1831_v14 = vld [vmem:[#allocation15 + $0x448] sm:$0xff] }
 0xad7   :  { %1996 = vmatpush.msrb.mxu3 %v1831_v14 }
 0xad8   :  { %1750 = vmatpush.msra.mxu2 %v1721_v18 }
 0xada   :  { %1751 = vmatpush.msra.mxu2 %v1720_v19  ;;  %v1703_v19 = vld [vmem:[#allocation15 + $0x500] sm:$0xf] }
 0xadc   :  { %1759 = vmatpush.msrb.mxu2 %v1719_v20 }
 0xadd   :  { %2017 = vperm.xlu1 %5640, %v1703_v19   ;;  %v2272_v19 = vld [vmem:[#allocation17 + $0x4c0] sm:$0xff] }
 0xade   :  { %1760 = vmatpush.msrb.mxu2 %v1718_v21 }
 0xae0   :  { %1761 = vmatpush.msrb.mxu2 %v1717_v22 }
 0xae2   :  { %1762 = vmatpush.msrb.mxu2 %v1716_v24 }
 0xae4   :  { %1763 = vmatpush.msrb.mxu2 %v1715_v28  ;;  %v3848_v28 = vld [vmem:[#allocation15 + $0x9c0] sm:$0xff] }
 0xae5   :  { %4222 = vperm.xlu1 %5640, %v3848_v28   ;;  %v2173_v28 = vld [vmem:[#allocation17 + $0x330] sm:$0xff] }
 0xae6   :  { %1764 = vmatpush.msrb.mxu2 %v1714_v29  ;;  %v3851_v29 = vld [vmem:[#allocation15 + $0x9d8] sm:$0xff] }
 0xae8   :  { %1765 = vmatpush.msrb.mxu2 %v1713_v31 }
 0xaea   :  { %1766 = vmatpush.msrb.mxu2 %v1712_v33 }
 0xaec   :  { %1767 = vmatpush.msrb.mxu2 %v1711_v16  ;;  %v1936_v16 = vld [vmem:[#allocation15 + $0x450] sm:$0x1] }
 0xaed   :  { %4237 = vperm.xlu1 %5640, %v3851_v29   ;;  %v2254_v29 = vld [vmem:[#allocation17 + $0x430] sm:$0xff] }
 0xaee   :  { %1768 = vmatpush.msrb.mxu2 %v1710_v36 }
 0xaf0   :  { %1769 = vmatpush.msrb.mxu2 %v1709_v37 }
 0xaf2   :  { %1770 = vmatpush.msrb.mxu2 %v1708_v40  ;;  %v2039_v40 = vld [vmem:[#allocation17 + $0x298] sm:$0xff] }
 0xaf4   :  { %1771 = vmatpush.msrb.mxu2 %v1707_v9  ;;  %v2108_v9 = vld [vmem:[#allocation17 + $0x2d8] sm:$0xff] }
 0xaf6   :  { %1772 = vmatpush.msrb.mxu2 %v1706_v15  ;;  %v2104_v15 = vld [vmem:[#allocation17 + $0x2b8] sm:$0xff] }
 0xaf7   :  { %2150 = vmatpush.msra.mxu3 %v2104_v15  ;;  %v2266_v15 = vld [vmem:[#allocation17 + $0x490] sm:$0xff] }
 0xaf8   :  { %1773 = vmatpush.msrb.mxu2 %v1705_v39  ;;  %v2038_v39 = vld [vmem:[#allocation17 + $0x290] sm:$0xff] }
 0xafa   :  { %1774 = vmatpush.msrb.mxu2 %v1704_v42  ;;  %v2034_v42 = vld [vmem:[#allocation17 + $0x270] sm:$0xff] }
 0xafb   :  { %2088 = vmatpush.msra.mxu0 %v2034_v42  ;;  %v2184_v42 = vld [vmem:[#allocation17 + $0x388] sm:$0xff] }
 0xb3e   :  { %v1658_v43 = vpop.f32.mrf.mxu2  ;;  %v1687_v44 = vpop.f32.mrf.mxu3 }
 0xb3f   :  { %v5970_v45 = vadd.f32 %v1687_v44, %v1658_v43  ;;  %v2107_v43 = vld [vmem:[#allocation17 + $0x2d0] sm:$0xff] }
 0xb40   :  { %v2103_v44 = vld [vmem:[#allocation17 + $0x2b0] sm:$0xff] }
 0xb41   :  { %1693 = vst [vmem:[#allocation6 + $0x8] sm:$0xff] %v5970_v45  ;;  %1752 = vmatmul.f32.vlgmr.msra.gmra.mxu2 %v5970_v45  ;;  %2151 = vmatpush.msra.mxu3 %v2103_v44  ;;  %v2265_v44 = vld [vmem:[#allocation17 + $0x488] sm:$0xff] }
 0xb42   :  { %1970 = vmatpush.msra.mxu2 %v1831_v14  ;;  %v2191_v14 = vld [vmem:[#allocation17 + $0x3c0] sm:$0xff] }
 0xb46   :  { %v1661_v62 = vpop.f32.mrf.mxu2  ;;  %v1690_v26 = vpop.f32.mrf.mxu3 }
 0xb47   :  { %v1691_v63 = vadd.f32 %v1690_v26, %v1661_v62  ;;  %v2037_v62 = vld [vmem:[#allocation17 + $0x288] sm:$0xff] }
 0xb48   :  { %v5980_v47 = vld [vmem:[#allocation6 + $0x7] sm:$0xff] }
 0xb49   :  { %1694 = vst [vmem:[#allocation6 + $0x10] sm:$0xf] %v1691_v63  ;;  %v2033_v26 = vld [vmem:[#allocation17 + $0x268] sm:$0xff] }
 0xb4a   :  { %v2106_v63 = vld [vmem:[#allocation17 + $0x2c8] sm:$0xff]  ;;  %2089 = vmatpush.msra.mxu0 %v2033_v26  ;;  %v2183_v26 = vld [vmem:[#allocation17 + $0x380] sm:$0xff] }
 0xb50   :  { %v5974_v46 = vld [vmem:[#allocation6 + $0x10] sm:$0xf] }
 0xb51   :  { %v5976_v61 = vld [vmem:[#allocation6 + $0x9] sm:$0xff]  ;;  %1755 = vmatmul.f32.gmra.mxu2 %v5974_v46  ;;  %v5982_v48 = vld [vmem:[#allocation6 + $0x11] sm:$0xf] }
 0xb52   :  { %1814 = vmatmul.f32.vlgmr.msrb.gmra.mxu0 %v5976_v61  ;;  %v5986_v49 = vld [vmem:[#allocation6 + $0xf] sm:$0xf] }
 0xb59   :  { %1775 = vmatmul.f32.vlgmr.msrb.gmra.mxu2 %v5980_v47 }
 0xb5a   :  { %1817 = vmatmul.f32.gmra.mxu0 %v5982_v48  ;;  %2127 = vmatpush.msrb.mxu2 %v2108_v9  ;;  %v2169_v9 = vld [vmem:[#allocation17 + $0x310] sm:$0xff] }
 0xb5c   :  { %2128 = vmatpush.msrb.mxu2 %v2107_v43  ;;  %v2168_v43 = vld [vmem:[#allocation17 + $0x308] sm:$0xff] }
 0xb5e   :  { %2129 = vmatpush.msrb.mxu2 %v2106_v63  ;;  %v2167_v63 = vld [vmem:[#allocation17 + $0x300] sm:$0xff] }
 0xb61   :  { %1778 = vmatmul.f32.gmra.mxu2 %v5986_v49 }
 0xbc4   :  { %v1753_v50 = vpop.f32.mrf.mxu2 }
 0xbcf   :  { %v1815_v52 = vpop.f32.mrf.mxu0 }
 0xbd4   :  { %v1756_v51 = vpop.f32.mrf.mxu2 }
 0xbd7   :  { %v1818_v57 = vpop.f32.mrf.mxu0 }
 0xbdc   :  { %v1776_v53 = vpop.f32.mrf.mxu2 }
 0xbdd   :  { %v1777_v54 = vadd.f32 %v1776_v53, %v1753_v50  ;;  %v2102_v50 = vld [vmem:[#allocation17 + $0x2a8] sm:$0xff]  ;;  %v2105_v53 = vld [vmem:[#allocation17 + $0x2c0] sm:$0xff] }
 0xbde   :  { %2152 = vmatpush.msra.mxu3 %v2102_v50  ;;  %2130 = vmatpush.msrb.mxu2 %v2105_v53  ;;  %v2264_v50 = vld [vmem:[#allocation17 + $0x480] sm:$0xff]  ;;  %v2182_v53 = vld [vmem:[#allocation17 + $0x378] sm:$0xff] }
 0xbdf   :  { %v1821_v58 = vadd.f32 %v1815_v52, %v1777_v54  ;;  %v2032_v52 = vld [vmem:[#allocation17 + $0x260] sm:$0xff] }
 0xbe0   :  { %2090 = vmatpush.msra.mxu0 %v2032_v52  ;;  %v2101_v54 = vld [vmem:[#allocation17 + $0x2a0] sm:$0xff] }
 0xbe1   :  { %v5993_v1 = vadd.f32 %v5649_v60, %v1821_v58  ;;  %2153 = vmatpush.msra.mxu3 %v2101_v54  ;;  %v2260_v58 = vld [vmem:[#allocation17 + $0x460] sm:$0xff]  ;;  %v2166_v54 = vld [vmem:[#allocation17 + $0x2f8] sm:$0xff] }
 0xbe2   :  { %v2248_v52 = vld [vmem:[#allocation17 + $0x400] sm:$0xff] }
 0xbe3   :  { %v1883_v7 = vmul.f32 %v5993_v1, %v5993_v1 }
 0xbe4   :  { %v1779_v55 = vpop.f32.mrf.mxu2 }
 0xbe5   :  { %v1780_v56 = vadd.f32 %v1779_v55, %v1756_v51  ;;  %v2036_v51 = vld [vmem:[#allocation17 + $0x280] sm:$0xff] }
 0xbe6   :  { %v2195_v55 = vld [vmem:[#allocation17 + $0x3e0] sm:$0xff] }
 0xbe7   :  { %v1822_v59 = vadd.f32 %v1818_v57, %v1780_v56  ;;  %v2179_v56 = vld [vmem:[#allocation17 + $0x360] sm:$0xff] }
 0xbe8   :  { %v2276_v57 = vld [vmem:[#allocation17 + $0x4e0] sm:$0xff]  ;;  %2219 = vmatpush.msrb.mxu0 %v2179_v56 }
 0xbe9   :  { %v5989_v0 = vadd.f32 %v5649_v60, %v1822_v59  ;;  %v2194_v59 = vld [vmem:[#allocation17 + $0x3d8] sm:$0xff] }
 0xbea   :  { %v2178_v60 = vld [vmem:[#allocation17 + $0x358] sm:$0xff] }
 0xbeb   :  { %5415 = vmatpush.msk.msra.mxu1 %vm1836_vm1, %v5989_v0  ;;  %v1884_v6 = vmul.f32 %v5989_v0, %v5989_v0  ;;  %2220 = vmatpush.msrb.mxu0 %v2178_v60  ;;  %v2165_v60 = vld [vmem:[#allocation17 + $0x2f0] sm:$0xff] }
 0xbed   :  { %1855 = vmatpush.msra.mxu1 %v5993_v1 }
 0xbee   :  { %5416 = vmatmul.msk.f32.vlgmr.msra.gmra.mxu1 %vm1832_vm4, %v5995_v2 }
 0xbef   :  { %1875 = vmatpush.msrb.mxu1 %v1830_v3 }
 0xbf1   :  { %1876 = vmatpush.msrb.mxu1 %v1829_v10 }
 0xbf3   :  { %1877 = vmatpush.msrb.mxu1 %v1828_v4 }
 0xbf5   :  { %1878 = vmatpush.msrb.mxu1 %v1827_v5 }
 0xbf7   :  { %5418 = vmatpush.msk.msra.mxu1 %vm1836_vm1, %v1884_v6  ;;  %v2274_v6 = vld [vmem:[#allocation17 + $0x4d0] sm:$0xff] }
 0xbf9   :  { %1903 = vmatpush.msra.mxu1 %v1883_v7  ;;  %v2258_v7 = vld [vmem:[#allocation17 + $0x450] sm:$0xff] }
 0xc6b   :  { %v1857_v8 = vpop.f32.mrf.mxu1 }
 0xc6c   :  { %5417 = vmatmul.msk.f32.vlgmr.msrb.gmra.mxu1 %vm67_vm12, %v1857_v8  ;;  %v2192_v8 = vld [vmem:[#allocation17 + $0x3c8] sm:$0xff] }
 0xc6d   :  { %1923 = vmatpush.msrb.mxu1 %v1830_v3  ;;  %v2275_v3 = vld [vmem:[#allocation17 + $0x4d8] sm:$0xff] }
 0xc6f   :  { %1924 = vmatpush.msrb.mxu1 %v1829_v10  ;;  %v2259_v10 = vld [vmem:[#allocation17 + $0x458] sm:$0xff] }
 0xc71   :  { %1925 = vmatpush.msrb.mxu1 %v1828_v4  ;;  %v2193_v4 = vld [vmem:[#allocation17 + $0x3d0] sm:$0xff] }
 0xc73   :  { %1926 = vmatpush.msrb.mxu1 %v1827_v5  ;;  %v2177_v5 = vld [vmem:[#allocation17 + $0x350] sm:$0xff] }
 0xc74   :  { %5419 = vmatmul.msk.f32.vlgmr.msra.gmra.mxu1 %vm1832_vm4, %v5995_v2  ;;  %2221 = vmatpush.msrb.mxu0 %v2177_v5  ;;  %v2180_v5 = vld [vmem:[#allocation17 + $0x368] sm:$0xff] }
 0xc75   :  { %2058 = vmatpush.msra.mxu1 %v2039_v40  ;;  %v2251_v40 = vld [vmem:[#allocation17 + $0x418] sm:$0xff] }
 0xc77   :  { %2059 = vmatpush.msra.mxu1 %v2038_v39  ;;  %v2250_v39 = vld [vmem:[#allocation17 + $0x410] sm:$0xff] }
 0xc79   :  { %2060 = vmatpush.msra.mxu1 %v2037_v62  ;;  %v2249_v62 = vld [vmem:[#allocation17 + $0x408] sm:$0xff] }
 0xc7b   :  { %2061 = vmatpush.msra.mxu1 %v2036_v51 }
 0xce9   :  { %v1880_v11 = vpop.f32.mrf.mxu1 }
 0xcea   :  { %v1931_v18 = vmul.f32 0.03125, %v1880_v11  ;;  %v2176_v11 = vld [vmem:[#allocation17 + $0x348] sm:$0xff] }
 0xceb   :  { %2222 = vmatpush.msrb.mxu0 %v2176_v11 }
 0xcec   :  { %v1933_v21 = vmul.f32 %v1931_v18, %v1931_v18 }
 0xcf1   :  { %v1905_v12 = vpop.f32.mrf.mxu1 }
 0xcf2   :  { %5420 = vmatmul.msk.f32.vlgmr.msrb.gmra.mxu1 %vm67_vm12, %v1905_v12  ;;  %v2273_v12 = vld [vmem:[#allocation17 + $0x4c8] sm:$0xff] }
 0xcf3   :  { %2196 = vmatpush.msrb.mxu1 %v2195_v55  ;;  %v2013_v55 = vpop.permute.xlu1 %2012 }
 0xcf5   :  { %2197 = vmatpush.msrb.mxu1 %v2194_v59  ;;  %v2181_v59 = vld [vmem:[#allocation17 + $0x370] sm:$0xff] }
 0xcf7   :  { %2198 = vmatpush.msrb.mxu1 %v2193_v4 }
 0xcf9   :  { %2199 = vmatpush.msrb.mxu1 %v2192_v8 }
 0xcfb   :  { %2200 = vmatpush.msrb.mxu1 %v2191_v14 }
 0xd6f   :  { %v1928_v20 = vpop.f32.mrf.mxu1 }
 0xd70   :  { %v1932_v22 = vmul.f32 0.03125, %v1928_v20  ;;  %v2256_v20 = vld [vmem:[#allocation17 + $0x440] sm:$0xff] }
 0xd72   :  { %v1934_v23 = vsub.f32 %v1932_v22, %v1933_v21  ;;  %v2190_v21 = vld [vmem:[#allocation17 + $0x3b8] sm:$0xff] }
 0xd73   :  { %v2174_v22 = vld [vmem:[#allocation17 + $0x338] sm:$0xff]  ;;  %2201 = vmatpush.msrb.mxu1 %v2190_v21 }
 0xd74   :  { %v1935_v24 = vmax.f32 %v1934_v23, 0.0  ;;  %v2271_v23 = vld [vmem:[#allocation17 + $0x4b8] sm:$0xff] }
 0xd76   :  { %v1937_v27 = vadd.f32 1e-05, %v1935_v24  ;;  %v2255_v24 = vld [vmem:[#allocation17 + $0x438] sm:$0xff] }
 0xd78   :  { %5667 = vrsqrt.f32 %v1937_v27  ;;  %vm1944_vm7 = vweird.f32 %v1937_v27 }
 0xd7e   :  { %v5668_v25 = vpop.eup %5667 }
 0xd7f   :  { %v1939_v30 = vmul.f32 %v5668_v25, %v1937_v27  ;;  %vm1945_vm6 = vweird.f32 %v5668_v25  ;;  %v2189_v27 = vld [vmem:[#allocation17 + $0x3b0] sm:$0xff] }
 0xd80   :  { %vm1946_vm8 = vmor %vm1944_vm7, %vm1945_vm6  ;;  %2202 = vmatpush.msrb.mxu1 %v2189_v27 }
 0xd81   :  { %v1940_v31 = vmul.f32 %v5668_v25, %v1939_v30  ;;  %v2188_v30 = vld [vmem:[#allocation17 + $0x3a8] sm:$0xff] }
 0xd82   :  { %2203 = vmatpush.msrb.mxu1 %v2188_v30 }
 0xd83   :  { %v1941_v32 = vmul.f32 0.5, %v1940_v31  ;;  %v2172_v31 = vld [vmem:[#allocation17 + $0x328] sm:$0xff] }
 0xd85   :  { %v1942_v33 = vsub.f32 1.5, %v1941_v32  ;;  %v2269_v32 = vld [vmem:[#allocation17 + $0x4a8] sm:$0xff] }
 0xd87   :  { %v1943_v34 = vmul.f32 %v5668_v25, %v1942_v33  ;;  %v2253_v33 = vld [vmem:[#allocation17 + $0x428] sm:$0xff] }
 0xd89   :  { %v1947_v35 = vsel %vm1946_vm8, %v5668_v25, %v1943_v34  ;;  %v2270_v25 = vld [vmem:[#allocation17 + $0x4b0] sm:$0xff]  ;;  %v2187_v34 = vld [vmem:[#allocation17 + $0x3a0] sm:$0xff] }
 0xd8a   :  { %v1948_v36 = vmul.f32 %v1947_v35, %v1936_v16  ;;  %v2171_v16 = vld [vmem:[#allocation17 + $0x320] sm:$0xff]  ;;  %2204 = vmatpush.msrb.mxu1 %v2187_v34  ;;  %v2339_v34 = vld [vmem:[#allocation15 + $0x4d0] sm:$0xff] }
 0xd8b   :  { %v2268_v35 = vld [vmem:[#allocation17 + $0x4a0] sm:$0xff] }
 0xd8c   :  { %5421 = vmatmul.msk.f32.vlgmr.msra.gmra.mxu2 %vm1008_vm5, %v1948_v36  ;;  %v1950_v37 = vmul.f32 %v1948_v36, %v1931_v18  ;;  %v2175_v18 = vld [vmem:[#allocation17 + $0x340] sm:$0xff] }
 0xd8d   :  { %2277 = vmatpush.msra.mxu2 %v2276_v57  ;;  %2223 = vmatpush.msrb.mxu0 %v2175_v18  ;;  %v2252_v36 = vld [vmem:[#allocation17 + $0x420] sm:$0xff]  ;;  %v2263_v57 = vld [vmem:[#allocation17 + $0x478] sm:$0xff] }
 0xd8e   :  { %v1951_v38 = vsub.f32 %v1949_v17, %v1950_v37  ;;  %v2186_v17 = vld [vmem:[#allocation17 + $0x398] sm:$0xff] }
 0xd8f   :  { %2278 = vmatpush.msra.mxu2 %v2275_v3  ;;  %2224 = vmatpush.msrb.mxu0 %v2174_v22  ;;  %v2170_v37 = vld [vmem:[#allocation17 + $0x318] sm:$0xff]  ;;  %v2262_v3 = vld [vmem:[#allocation17 + $0x470] sm:$0xff] }
 0xd90   :  { %5422 = vmatmul.msk.f32.vlgmr.msrb.gmra.mxu3 %vm1008_vm5, %v1951_v38  ;;  %v2267_v38 = vld [vmem:[#allocation17 + $0x498] sm:$0xff]  ;;  %2205 = vmatpush.msrb.mxu1 %v2186_v17  ;;  %v2336_v17 = vld [vmem:[#allocation15 + $0x4b8] sm:$0xff] }
 0xd91   :  { %2300 = vmatpush.msrb.mxu3 %v2260_v58  ;;  %2279 = vmatpush.msra.mxu2 %v2274_v6  ;;  %v2247_v58 = vld [vmem:[#allocation17 + $0x3f8] sm:$0xff]  ;;  %v2164_v6 = vld [vmem:[#allocation17 + $0x2e8] sm:$0xff] }
 0xd92   :  { %2225 = vmatpush.msrb.mxu0 %v2173_v28  ;;  %2206 = vmatpush.msrb.mxu1 %v2185_v41 }
 0xd93   :  { %2301 = vmatpush.msrb.mxu3 %v2259_v10  ;;  %2280 = vmatpush.msra.mxu2 %v2273_v12  ;;  %v2246_v10 = vld [vmem:[#allocation17 + $0x3f0] sm:$0xff]  ;;  %v2261_v12 = vld [vmem:[#allocation17 + $0x468] sm:$0xff] }
 0xd94   :  { %2226 = vmatpush.msrb.mxu0 %v2172_v31  ;;  %2207 = vmatpush.msrb.mxu1 %v2184_v42 }
 0xd95   :  { %2302 = vmatpush.msrb.mxu3 %v2258_v7  ;;  %2281 = vmatpush.msra.mxu2 %v2272_v19 }
 0xd96   :  { %2227 = vmatpush.msrb.mxu0 %v2171_v16  ;;  %2208 = vmatpush.msrb.mxu1 %v2183_v26  ;;  %v2338_v16 = vld [vmem:[#allocation15 + $0x4c8] sm:$0xff] }
 0xd97   :  { %2303 = vmatpush.msrb.mxu3 %v2257_v13  ;;  %2282 = vmatpush.msra.mxu2 %v2271_v23  ;;  %v2245_v13 = vld [vmem:[#allocation17 + $0x3e8] sm:$0xff] }
 0xd98   :  { %2228 = vmatpush.msrb.mxu0 %v2170_v37  ;;  %2209 = vmatpush.msrb.mxu1 %v2182_v53  ;;  %v2330_v53 = vld [vmem:[#allocation15 + $0x488] sm:$0xff] }
 0xd99   :  { %2304 = vmatpush.msrb.mxu3 %v2256_v20  ;;  %2283 = vmatpush.msra.mxu2 %v2270_v25 }
 0xd9a   :  { %2229 = vmatpush.msrb.mxu0 %v2169_v9  ;;  %2210 = vmatpush.msrb.mxu1 %v2181_v59  ;;  %v2325_v59 = vld [vmem:[#allocation15 + $0x460] sm:$0xff] }
 0xd9b   :  { %2305 = vmatpush.msrb.mxu3 %v2255_v24  ;;  %2284 = vmatpush.msra.mxu2 %v2269_v32 }
 0xd9c   :  { %2230 = vmatpush.msrb.mxu0 %v2168_v43  ;;  %2211 = vmatpush.msrb.mxu1 %v2180_v5 }
 0xd9d   :  { %2306 = vmatpush.msrb.mxu3 %v2254_v29  ;;  %2285 = vmatpush.msra.mxu2 %v2268_v35 }
 0xd9e   :  { %2231 = vmatpush.msrb.mxu0 %v2167_v63  ;;  %v2331_v63 = vld [vmem:[#allocation15 + $0x490] sm:$0xff] }
 0xd9f   :  { %2307 = vmatpush.msrb.mxu3 %v2253_v33  ;;  %2286 = vmatpush.msra.mxu2 %v2267_v38  ;;  %v2340_v33 = vld [vmem:[#allocation15 + $0x4d8] sm:$0xff] }
 0xda0   :  { %2232 = vmatpush.msrb.mxu0 %v2166_v54 }
 0xda1   :  { %2308 = vmatpush.msrb.mxu3 %v2252_v36  ;;  %2287 = vmatpush.msra.mxu2 %v2266_v15  ;;  %v2333_v15 = vld [vmem:[#allocation15 + $0x4a0] sm:$0xff] }
 0xda2   :  { %2233 = vmatpush.msrb.mxu0 %v2165_v60 }
 0xda3   :  { %2309 = vmatpush.msrb.mxu3 %v2251_v40  ;;  %2288 = vmatpush.msra.mxu2 %v2265_v44  ;;  %v2334_v40 = vld [vmem:[#allocation15 + $0x4a8] sm:$0xff]  ;;  %v2332_v44 = vld [vmem:[#allocation15 + $0x498] sm:$0xff] }
 0xda4   :  { %2234 = vmatpush.msrb.mxu0 %v2164_v6 }
 0xda5   :  { %2310 = vmatpush.msrb.mxu3 %v2250_v39  ;;  %2289 = vmatpush.msra.mxu2 %v2264_v50 }
 0xda7   :  { %2311 = vmatpush.msrb.mxu3 %v2249_v62  ;;  %2290 = vmatpush.msra.mxu2 %v2263_v57  ;;  %v2327_v57 = vld [vmem:[#allocation15 + $0x470] sm:$0xff] }
 0xda9   :  { %2312 = vmatpush.msrb.mxu3 %v2248_v52  ;;  %2291 = vmatpush.msra.mxu2 %v2262_v3 }
 0xdab   :  { %2313 = vmatpush.msrb.mxu3 %v2247_v58  ;;  %2292 = vmatpush.msra.mxu2 %v2261_v12  ;;  %v2326_v58 = vld [vmem:[#allocation15 + $0x468] sm:$0xff] }
 0xdad   :  { %2314 = vmatpush.msrb.mxu3 %v2246_v10 }
 0xdaf   :  { %2315 = vmatpush.msrb.mxu3 %v2245_v13 }
 0xe0f   :  { %v1972_v51 = vpop.f32.mrf.mxu2 }
 0xe10   :  { %v1975_v56 = vperm.slane %v1972_v51, 0 }
 0xe12   :  { %v1976_v7 = vmul.f32 %v1975_v56, %v5993_v1  ;;  %v1977_v8 = vmul.f32 %v1975_v56, %v5989_v0  ;;  %v2018_v1 = vpop.permute.xlu1 %2017  ;;  %v2328_v56 = vld [vmem:[#allocation15 + $0x478] sm:$0xff] }
 0xe13   :  { %v1998_v4 = vpop.f32.mrf.mxu3 }
 0xe14   :  { %v2001_v11 = vperm.slane %v1998_v4, 0 }
 0xe16   :  { %v2002_v14 = vadd.f32 %v2001_v11, %v1976_v7  ;;  %v2003_v18 = vadd.f32 %v2001_v11, %v1977_v8 }
 0xe18   :  { %vm2004_vm9 = vcmp.ge.f32.partialorder %v2002_v14, 0.0  ;;  %vm2005_vm10 = vcmp.ge.f32.partialorder %v2003_v18, 0.0  ;;  %v2006_v19 = vmul.f32 0.22916667, %v2002_v14  ;;  %v2007_v20 = vmul.f32 0.22916667, %v2003_v18 }
 0xe1a   :  { %v2008_v21 = vsel %vm2004_vm9, %v2002_v14, %v2006_v19  ;;  %v2009_v0 = vsel %vm2005_vm10, %v2003_v18, %v2007_v20  ;;  %v2342_v19 = vld [vmem:[#allocation17 + $0x4f8] sm:$0xff]  ;;  %v2341_v20 = vld [vmem:[#allocation17 + $0x4f0] sm:$0xff]  ;;  %vm74_vm9 = vcmask 916480   ;;  %vm2740_vm10 = vcmask 910336  }
 0xe1b   :  { %v2020_v22 = vmul.f32 %v2013_v55, %v2008_v21  ;;  %v2021_v23 = vmul.f32 %v2018_v1, %v2009_v0  ;;  %v2329_v55 = vld [vmem:[#allocation15 + $0x480] sm:$0xff] }
 0xe1d   :  { %2022 = vst.msk [vmem:[#allocation7 + $0x8] sm:$0xff] %vm67_vm12, %v2020_v22 }
 0xe1e   :  { %2024 = vst.msk [vmem:[#allocation7 + $0x10] sm:$0xf] %vm2023_vm11, %v2021_v23  ;;  %vm2915_vm11 = vcmask 146432  }
 0xe24   :  { %v2027_v24 = vld [vmem:[#allocation7 + $0x8] sm:$0xff] }
 0xe25   :  { %v2025_v27 = vld [vmem:[#allocation7 + $0x7] sm:$0xff]  ;;  %5423 = vmatmul.msk.f32.vlgmr.msra.gmra.mxu1 %vm67_vm12, %v2027_v24  ;;  %5429 = vmatmul.msk.f32.vlgmr.msra.gmra.mxu3 %vm67_vm12, %v2027_v24  ;;  %v2028_v25 = vld [vmem:[#allocation7 + $0x10] sm:$0xf] }
 0xe26   :  { %5425 = vmatmul.msk.f32.vlgmr.msra.gmra.mxu0 %vm67_vm12, %v2025_v27  ;;  %v2029_v28 = vld [vmem:[#allocation7 + $0x9] sm:$0xff]  ;;  %v2030_v30 = vld [vmem:[#allocation7 + $0x11] sm:$0xf] }
 0xe27   :  { %5427 = vmatmul.msk.f32.vlgmr.msrb.gmra.mxu2 %vm67_vm12, %v2029_v28  ;;  %v2026_v29 = vld [vmem:[#allocation7 + $0xf] sm:$0xf] }
 0xe28   :  { %2389 = vmatpush.msrb.mxu2 %v2340_v33 }
 0xe2a   :  { %2390 = vmatpush.msrb.mxu2 %v2339_v34 }
 0xe2c   :  { %2391 = vmatpush.msrb.mxu2 %v2338_v16 }
 0xe2d   :  { %5424 = vmatmul.msk.f32.gmra.mxu1 %vm67_vm12, %v2028_v25  ;;  %5430 = vmatmul.msk.f32.gmra.mxu3 %vm67_vm12, %v2028_v25 }
 0xe2e   :  { %5426 = vmatmul.msk.f32.gmra.mxu0 %vm67_vm12, %v2026_v29 }
 0xe2f   :  { %5428 = vmatmul.msk.f32.gmra.mxu2 %vm67_vm12, %v2030_v30 }
 0xe35   :  { %2212 = vmatmul.f32.vlgmr.msrb.gmra.mxu1 %v5970_v45  ;;  %2316 = vmatmul.f32.vlgmr.msrb.gmra.mxu3 %v5970_v45 }
 0xe36   :  { %2235 = vmatmul.f32.vlgmr.msrb.gmra.mxu0 %v5980_v47  ;;  %v2337_v47 = vld [vmem:[#allocation15 + $0x4c0] sm:$0xff] }
 0xe37   :  { %2293 = vmatmul.f32.vlgmr.msra.gmra.mxu2 %v5976_v61 }
 0xe38   :  { %2392 = vmatpush.msrb.mxu2 %v2337_v47 }
 0xe3a   :  { %2393 = vmatpush.msrb.mxu2 %v2336_v17 }
 0xe3d   :  { %2215 = vmatmul.f32.gmra.mxu1 %v5974_v46  ;;  %2319 = vmatmul.f32.gmra.mxu3 %v5974_v46 }
 0xe3e   :  { %2238 = vmatmul.f32.gmra.mxu0 %v5986_v49  ;;  %v5650_v49 = vld [vmem:[#allocation17 + $0x2e0] ss:$0 sm:$0xff] }
 0xe3f   :  { %2296 = vmatmul.f32.gmra.mxu2 %v5982_v48  ;;  %v2335_v48 = vld [vmem:[#allocation15 + $0x4b0] sm:$0xff] }
 0xe40   :  { %2394 = vmatpush.msrb.mxu2 %v2335_v48 }
 0xe42   :  { %2395 = vmatpush.msrb.mxu2 %v2334_v40 }
 0xe44   :  { %2396 = vmatpush.msrb.mxu2 %v2333_v15 }
 0xe46   :  { %2397 = vmatpush.msrb.mxu2 %v2332_v44 }
 0xe48   :  { %2398 = vmatpush.msrb.mxu2 %v2331_v63 }
 0xe4a   :  { %2399 = vmatpush.msrb.mxu2 %v2330_v53 }
 0xe4c   :  { %2400 = vmatpush.msrb.mxu2 %v2329_v55 }
 0xe4e   :  { %2401 = vmatpush.msrb.mxu2 %v2328_v56 }
 0xe50   :  { %2402 = vmatpush.msrb.mxu2 %v2327_v57 }
 0xe52   :  { %2403 = vmatpush.msrb.mxu2 %v2326_v58 }
 0xe54   :  { %2404 = vmatpush.msrb.mxu2 %v2325_v59 }
 0xea2   :  { %v2063_v31 = vpop.f32.mrf.mxu1 }
 0xea3   :  { %v2092_v32 = vpop.f32.mrf.mxu0 }
 0xea4   :  { %v2093_v37 = vadd.f32 %v2092_v32, %v2063_v31 }
 0xea6   :  { %v6032_v41 = vadd.f32 %v5650_v49, %v2093_v37  ;;  %v5651_v37 = vld [vmem:[#allocation17 + $0x4e8] ss:$0 sm:$0xff] }
 0xea8   :  { %v2155_v61 = vpop.f32.mrf.mxu3  ;;  %v2409_v54 = vmul.f32 %v6032_v41, %v6032_v41 }
 0xeaa   :  { %v2132_v35 = vpop.f32.mrf.mxu2  ;;  %v2066_v45 = vpop.f32.mrf.mxu1 }
 0xeab   :  { %v2095_v36 = vpop.f32.mrf.mxu0  ;;  %v2156_v9 = vadd.f32 %v2155_v61, %v2132_v35  ;;  %v2497_v35 = vld [vmem:[#allocation15 + $0x4e8] sm:$0x1] }
 0xeac   :  { %v2096_v38 = vadd.f32 %v2095_v36, %v2066_v45 }
 0xead   :  { %v6039_v62 = vadd.f32 %v5650_v49, %v2156_v9 }
 0xeae   :  { %v6030_v46 = vadd.f32 %v5650_v49, %v2096_v38 }
 0xeaf   :  { %v2411_v52 = vmul.f32 %v6039_v62, %v6039_v62 }
 0xeb0   :  { %5433 = vmatpush.msk.msra.mxu0 %vm1836_vm1, %v6030_v46  ;;  %v2158_v42 = vpop.f32.mrf.mxu3  ;;  %v2410_v51 = vmul.f32 %v6030_v46, %v6030_v46 }
 0xeb2   :  { %v2135_v39 = vpop.f32.mrf.mxu2  ;;  %2384 = vmatpush.msra.mxu0 %v6032_v41  ;;  %v2213_v3 = vpop.f32.mrf.mxu1 }
 0xeb3   :  { %v2159_v43 = vadd.f32 %v2158_v42, %v2135_v39  ;;  %5434 = vmatmul.msk.f32.vlgmr.msra.gmra.mxu0 %vm1832_vm4, %v5995_v2  ;;  %v2236_v60 = vpop.f32.mrf.mxu0 }
 0xeb4   :  { %2459 = vmatpush.msrb.mxu0 %v2340_v33 }
 0xeb5   :  { %v6041_v26 = vadd.f32 %v5650_v49, %v2159_v43 }
 0xeb6   :  { %2460 = vmatpush.msrb.mxu0 %v2339_v34  ;;  %v2484_v34 = vld [vmem:[#allocation15 + $0x4e0] sm:$0x1] }
 0xeb7   :  { %v2412_v50 = vmul.f32 %v6041_v26, %v6041_v26  ;;  %5431 = vmatpush.msk.msra.mxu1 %vm1836_vm1, %v6041_v26 }
 0xeb8   :  { %2461 = vmatpush.msrb.mxu0 %v2338_v16  ;;  %v2317_v10 = vpop.f32.mrf.mxu3 }
 0xeb9   :  { %2361 = vmatpush.msra.mxu1 %v6039_v62  ;;  %5435 = vmatpush.msk.msra.mxu3 %vm1836_vm1, %v2412_v50 }
 0xeba   :  { %5432 = vmatmul.msk.f32.vlgmr.msra.gmra.mxu1 %vm1832_vm4, %v5995_v2  ;;  %2462 = vmatpush.msrb.mxu0 %v2337_v47  ;;  %v2216_v5 = vpop.f32.mrf.mxu1  ;;  %v2294_v14 = vpop.f32.mrf.mxu2 }
 0xebb   :  { %5437 = vmatpush.msk.msrb.mxu1 %vm1836_vm1, %v2410_v51  ;;  %2431 = vmatpush.msra.mxu3 %v2411_v52  ;;  %v2239_v4 = vpop.f32.mrf.mxu0  ;;  %v2318_v49 = vadd.f32 %v2317_v10, %v2294_v14 }
 0xebc   :  { %5436 = vmatmul.msk.f32.vlgmr.msra.gmra.mxu3 %vm1832_vm4, %v5995_v2  ;;  %2463 = vmatpush.msrb.mxu0 %v2336_v17  ;;  %v2237_v17 = vadd.f32 %v2236_v60, %v2213_v3  ;;  %v2240_v38 = vadd.f32 %v2239_v4, %v2216_v5  ;;  %v2575_v4 = vld [vmem:[#allocation15 + $0x520] sm:$0xff]  ;;  %v2572_v5 = vld [vmem:[#allocation15 + $0x508] sm:$0xff] }
 0xebd   :  { %2454 = vmatpush.msrb.mxu1 %v2409_v54  ;;  %2517 = vmatpush.msrb.mxu3 %v2342_v19  ;;  %v2323_v50 = vadd.f32 %v5651_v37, %v2318_v49  ;;  %v2782_v49 = vld [vmem:[#allocation15 + $0x610] sm:$0xff] }
 0xebe   :  { %2464 = vmatpush.msrb.mxu0 %v2335_v48  ;;  %v2244_v51 = vadd.f32 %v5651_v37, %v2240_v38  ;;  %v2768_v38 = vld [vmem:[#allocation15 + $0x5a0] sm:$0xff] }
 0xebf   :  { %2540 = vmatpush.msra.mxu1 %v2342_v19  ;;  %2518 = vmatpush.msrb.mxu3 %v2341_v20 }
 0xec0   :  { %2465 = vmatpush.msrb.mxu0 %v2334_v40  ;;  %v2320_v6 = vpop.f32.mrf.mxu3 }
 0xec1   :  { %2541 = vmatpush.msra.mxu1 %v2341_v20  ;;  %v2711_v20 = vld [vmem:[#allocation17 + $0xa28] sm:$0xff] }
 0xec2   :  { %5438 = vmatmul.msk.f32.vlgmr.msrb.gmra.mxu1 %vm1832_vm4, %v5995_v2  ;;  %2466 = vmatpush.msrb.mxu0 %v2333_v15  ;;  %v2297_v18 = vpop.f32.mrf.mxu2 }
 0xec3   :  { %v2321_v48 = vadd.f32 %v2320_v6, %v2297_v18 }
 0xec4   :  { %2467 = vmatpush.msrb.mxu0 %v2332_v44 }
 0xec5   :  { %v2324_v52 = vadd.f32 %v5651_v37, %v2321_v48  ;;  %v2781_v48 = vld [vmem:[#allocation15 + $0x608] sm:$0xff] }
 0xec6   :  { %2468 = vmatpush.msrb.mxu0 %v2331_v63  ;;  %v2243_v63 = vadd.f32 %v5651_v37, %v2237_v17  ;;  %v2656_v17 = vld [vmem:[#allocation15 + $0xa90] sm:$0x3]  ;;  %v2696_v37 = vld [vmem:[#allocation17 + $0x9b0] sm:$0xff] }
 0xec8   :  { %2469 = vmatpush.msrb.mxu0 %v2330_v53 }
 0xeca   :  { %2470 = vmatpush.msrb.mxu0 %v2329_v55 }
 0xecc   :  { %2471 = vmatpush.msrb.mxu0 %v2328_v56 }
 0xece   :  { %2472 = vmatpush.msrb.mxu0 %v2327_v57 }
 0xed0   :  { %2473 = vmatpush.msrb.mxu0 %v2326_v58 }
 0xed2   :  { %2474 = vmatpush.msrb.mxu0 %v2325_v59 }
 0xf30   :  { %v2386_v2 = vpop.f32.mrf.mxu0 }
 0xf37   :  { %v2363_v7 = vpop.f32.mrf.mxu1 }
 0xf38   :  { %v2387_v8 = vadd.f32 %v2386_v2, %v2363_v7  ;;  %v2576_v7 = vld [vmem:[#allocation15 + $0x528] sm:$0xff] }
 0xf3a   :  { %2405 = vmatmul.f32.vlgmr.msrb.gmra.mxu2 %v2387_v8  ;;  %v2573_v8 = vld [vmem:[#allocation15 + $0x510] sm:$0xff] }
 0xf3f   :  { %v2433_v11 = vpop.f32.mrf.mxu3  ;;  %v2456_v12 = vpop.f32.mrf.mxu1 }
 0xf40   :  { %v2457_v13 = vadd.f32 %v2456_v12, %v2433_v11  ;;  %v2577_v11 = vld [vmem:[#allocation15 + $0x530] sm:$0xf]  ;;  %v2574_v12 = vld [vmem:[#allocation15 + $0x518] sm:$0xf] }
 0xf42   :  { %2475 = vmatmul.f32.vlgmr.msrb.gmra.mxu0 %v2457_v13 }
 0xfbd   :  { %v2406_v1 = vpop.f32.mrf.mxu2 }
 0xfbe   :  { %v2479_v21 = vmul.f32 0.0078125, %v2406_v1  ;;  %v2710_v1 = vld [vmem:[#allocation17 + $0xa20] sm:$0xff] }
 0xfbf   :  { %v2476_v0 = vpop.f32.mrf.mxu0 }
 0xfc0   :  { %v2481_v22 = vmul.f32 %v2479_v21, %v2479_v21  ;;  %v2480_v23 = vmul.f32 0.0078125, %v2476_v0  ;;  %v2708_v0 = vld [vmem:[#allocation17 + $0xa10] sm:$0xff] }
 0xfc2   :  { %v2482_v24 = vsub.f32 %v2480_v23, %v2481_v22  ;;  %v2707_v23 = vld [vmem:[#allocation17 + $0xa08] sm:$0xff] }
 0xfc4   :  { %v2483_v27 = vmax.f32 %v2482_v24, 0.0 }
 0xfc6   :  { %v2485_v28 = vadd.f32 1e-05, %v2483_v27  ;;  %v2706_v27 = vld [vmem:[#allocation17 + $0xa00] sm:$0xff] }
 0xfc8   :  { %5669 = vrsqrt.f32 %v2485_v28  ;;  %vm2492_vm14 = vweird.f32 %v2485_v28 }
 0xfce   :  { %v5670_v25 = vpop.eup %5669 }
 0xfcf   :  { %v2487_v29 = vmul.f32 %v5670_v25, %v2485_v28  ;;  %vm2493_vm13 = vweird.f32 %v5670_v25 }
 0xfd0   :  { %vm2494_vm15 = vmor %vm2492_vm14, %vm2493_vm13  ;;  %vm77_vm13 = vcmask 228352  }
 0xfd1   :  { %v2488_v30 = vmul.f32 %v5670_v25, %v2487_v29 }
 0xfd3   :  { %v2489_v31 = vmul.f32 0.5, %v2488_v30  ;;  %v2704_v30 = vld [vmem:[#allocation17 + $0x9f0] sm:$0xff] }
 0xfd5   :  { %v2490_v32 = vsub.f32 1.5, %v2489_v31 }
 0xfd7   :  { %v2491_v33 = vmul.f32 %v5670_v25, %v2490_v32  ;;  %v2654_v32 = vld [vmem:[#allocation15 + $0xa80] sm:$0xff] }
 0xfd9   :  { %v2495_v16 = vsel %vm2494_vm15, %v5670_v25, %v2491_v33  ;;  %v2705_v25 = vld [vmem:[#allocation17 + $0x9f8] sm:$0xff]  ;;  %v2703_v33 = vld [vmem:[#allocation17 + $0x9e8] sm:$0xff] }
 0xfda   :  { %v2496_v47 = vmul.f32 %v2495_v16, %v2484_v34  ;;  %v2702_v34 = vld [vmem:[#allocation17 + $0x9e0] sm:$0xff]  ;;  %v2701_v16 = vld [vmem:[#allocation17 + $0x9d8] sm:$0xff] }
 0xfdc   :  { %5439 = vmatmul.msk.f32.vlgmr.msrb.gmra.mxu3 %vm59_vm3, %v2496_v47  ;;  %v2498_v61 = vmul.f32 %v2496_v47, %v2479_v21  ;;  %v2709_v21 = vld [vmem:[#allocation17 + $0xa18] sm:$0xff]  ;;  %v2700_v47 = vld [vmem:[#allocation17 + $0x9d0] sm:$0xff] }
 0xfde   :  { %v2499_v45 = vsub.f32 %v2497_v35, %v2498_v61  ;;  %v2655_v35 = vld [vmem:[#allocation15 + $0xa88] sm:$0xff]  ;;  %v2699_v61 = vld [vmem:[#allocation17 + $0x9c8] sm:$0xff] }
 0xfe0   :  { %5440 = vmatmul.msk.f32.vlgmr.msra.gmra.mxu1 %vm59_vm3, %v2499_v45  ;;  %v2698_v45 = vld [vmem:[#allocation17 + $0x9c0] sm:$0xff] }
0x105d   :  { %v2543_v36 = vpop.f32.mrf.mxu1 }
0x105e   :  { %v2549_v15 = vperm.slane %v2543_v36, 0  ;;  %v2697_v36 = vld [vmem:[#allocation17 + $0x9b8] sm:$0xff] }
0x105f   :  { %v2520_v40 = vpop.f32.mrf.mxu3 }
0x1060   :  { %v2546_v9 = vperm.slane %v2520_v40, 0  ;;  %v2767_v40 = vld [vmem:[#allocation15 + $0x598] sm:$0xff] }
0x1062   :  { %v2547_v39 = vmul.f32 %v2546_v9, %v6032_v41  ;;  %v2548_v42 = vmul.f32 %v2546_v9, %v6030_v46  ;;  %v2554_v43 = vmul.f32 %v2546_v9, %v6039_v62  ;;  %v2555_v44 = vmul.f32 %v2546_v9, %v6041_v26  ;;  %v6080_v9 = vld [vmem:[#allocation6] sm:$0xff] }
0x1063   :  { %75 = vst.msk [vmem:[#allocation8] sm:$0xff] %vm74_vm9, %v6080_v9 }
0x1064   :  { %v2551_v53 = vadd.f32 %v2549_v15, %v2548_v42  ;;  %v2557_v54 = vadd.f32 %v2555_v44, %v2549_v15  ;;  %v2556_v55 = vadd.f32 %v2554_v43, %v2549_v15  ;;  %v2550_v56 = vadd.f32 %v2549_v15, %v2547_v39  ;;  %v2780_v15 = vld [vmem:[#allocation15 + $0x600] sm:$0xff]  ;;  %v2766_v39 = vld [vmem:[#allocation15 + $0x590] sm:$0xff]  ;;  %76 = vst.msk [vmem:[#allocation8 + $0x1a] sm:$0xff] %vm74_vm9, %v6080_v9  ;;  %v2779_v43 = vld [vmem:[#allocation15 + $0x5f8] sm:$0xff] }
0x1065   :  { %v2866_v42 = vld [vmem:[#allocation15 + $0x680] sm:$0xff]  ;;  %80 = vst.msk [vmem:[#allocation10] sm:$0xff] %vm74_vm9, %v6080_v9  ;;  %v2765_v44 = vld [vmem:[#allocation15 + $0x588] sm:$0xff] }
0x1066   :  { %v2559_v57 = vadd.f32 %v2557_v54, %v2324_v52  ;;  %v2553_v58 = vadd.f32 %v2551_v53, %v2244_v51  ;;  %v2558_v59 = vadd.f32 %v2556_v55, %v2323_v50  ;;  %v2552_v60 = vadd.f32 %v2550_v56, %v2243_v63  ;;  %2878 = vmatpush.msra.mxu0 %v2866_v42  ;;  %v2865_v63 = vld [vmem:[#allocation15 + $0x678] sm:$0xff]  ;;  %v2864_v50 = vld [vmem:[#allocation15 + $0x670] sm:$0xff]  ;;  %v2764_v52 = vld [vmem:[#allocation15 + $0x580] sm:$0xff] }
0x1067   :  { %81 = vst.msk [vmem:[#allocation10 + $0x28] sm:$0xff] %vm74_vm9, %v6080_v9  ;;  %v2778_v51 = vld [vmem:[#allocation15 + $0x5f0] sm:$0xff]  ;;  %v2863_v53 = vld [vmem:[#allocation15 + $0x668] sm:$0xff]  ;;  %v2763_v55 = vld [vmem:[#allocation15 + $0x578] sm:$0xff] }
0x1068   :  { %vm2567_vm3 = vcmp.ge.f32.partialorder %v2559_v57, 0.0  ;;  %v2569_v41 = vmul.f32 0.22916667, %v2559_v57  ;;  %vm2561_vm6 = vcmp.ge.f32.partialorder %v2553_v58, 0.0  ;;  %v2563_v46 = vmul.f32 0.22916667, %v2553_v58  ;;  %2879 = vmatpush.msra.mxu0 %v2865_v63 }
0x1069   :  { %vm2566_vm7 = vcmp.ge.f32.partialorder %v2558_v59, 0.0  ;;  %v2568_v62 = vmul.f32 0.22916667, %v2558_v59  ;;  %vm2560_vm8 = vcmp.ge.f32.partialorder %v2552_v60, 0.0  ;;  %v2562_v26 = vmul.f32 0.22916667, %v2552_v60 }
0x106a   :  { %v2571_v3 = vsel %vm2567_vm3, %v2559_v57, %v2569_v41  ;;  %v2565_v10 = vsel %vm2561_vm6, %v2553_v58, %v2563_v46  ;;  %84 = vst.msk [vmem:[#allocation12] sm:$0xff] %vm74_vm9, %v6080_v9  ;;  %v2777_v54 = vld [vmem:[#allocation15 + $0x5e8] sm:$0xff]  ;;  %2880 = vmatpush.msra.mxu0 %v2864_v50  ;;  %v2862_v56 = vld [vmem:[#allocation15 + $0x660] sm:$0xff]  ;;  %v2762_v58 = vld [vmem:[#allocation15 + $0x570] sm:$0xff]  ;;  %vm3038_vm6 = vcmask 31744  }
0x106b   :  { %5441 = vmatpush.msk.msra.mxu3 %vm1836_vm1, %v2571_v3  ;;  %5445 = vmatpush.msk.msrb.mxu1 %vm1836_vm1, %v2565_v10  ;;  %v2570_v2 = vsel %vm2566_vm7, %v2558_v59, %v2568_v62  ;;  %v2564_v6 = vsel %vm2560_vm8, %v2552_v60, %v2562_v26  ;;  %85 = vst.msk [vmem:[#allocation12 + $0x44] sm:$0xff] %vm74_vm9, %v6080_v9  ;;  %v2776_v57 = vld [vmem:[#allocation15 + $0x5e0] sm:$0xff]  ;;  %v2775_v59 = vld [vmem:[#allocation15 + $0x5d8] sm:$0xff]  ;;  %v2761_v60 = vld [vmem:[#allocation15 + $0x568] sm:$0xff] }
0x106c   :  { %2881 = vmatpush.msra.mxu0 %v2863_v53  ;;  %v2774_v41 = vld [vmem:[#allocation15 + $0x5d0] sm:$0xff]  ;;  %v2760_v46 = vld [vmem:[#allocation15 + $0x560] sm:$0xff]  ;;  %v2773_v10 = vld [vmem:[#allocation15 + $0x5c8] sm:$0xff]  ;;  %78 = vst.msk [vmem:[#allocation9] sm:$0xff] %vm77_vm13, %v6080_v9 }
0x106d   :  { %2605 = vmatpush.msra.mxu3 %v2570_v2  ;;  %2643 = vmatpush.msrb.mxu1 %v2564_v6  ;;  %v2772_v2 = vld [vmem:[#allocation15 + $0x5c0] sm:$0xff]  ;;  %v2758_v6 = vld [vmem:[#allocation15 + $0x550] sm:$0xff]  ;;  %79 = vst.msk [vmem:[#allocation9 + $0x1a] sm:$0xff] %vm77_vm13, %v6080_v9 }
0x106e   :  { %5442 = vmatmul.msk.f32.vlgmr.msra.gmra.mxu3 %vm1832_vm4, %v2575_v4  ;;  %5446 = vmatmul.msk.f32.vlgmr.msrb.gmra.mxu1 %vm1832_vm4, %v2572_v5  ;;  %v2759_v4 = vld [vmem:[#allocation15 + $0x558] sm:$0xff]  ;;  %82 = vst.msk [vmem:[#allocation11] sm:$0xff] %vm77_vm13, %v6080_v9 }
0x106f   :  { %2712 = vmatpush.msrb.mxu3 %v2711_v20  ;;  %2794 = vmatpush.msra.mxu1 %v2782_v49  ;;  %v2861_v5 = vld [vmem:[#allocation15 + $0x658] sm:$0xff]  ;;  %83 = vst.msk [vmem:[#allocation11 + $0x28] sm:$0xff] %vm77_vm13, %v6080_v9 }
0x1070   :  { %2882 = vmatpush.msra.mxu0 %v2862_v56  ;;  %v2755_v20 = vld [vmem:[#allocation15 + $0x538] sm:$0xff] }
0x1071   :  { %2713 = vmatpush.msrb.mxu3 %v2710_v1  ;;  %2795 = vmatpush.msra.mxu1 %v2781_v48  ;;  %v2857_v1 = vld [vmem:[#allocation15 + $0x638] sm:$0xff] }
0x1072   :  { %2883 = vmatpush.msra.mxu0 %v2861_v5 }
0x1073   :  { %2714 = vmatpush.msrb.mxu3 %v2709_v21  ;;  %2796 = vmatpush.msra.mxu1 %v2780_v15  ;;  %v2856_v21 = vld [vmem:[#allocation15 + $0x630] sm:$0xff] }
0x1075   :  { %2715 = vmatpush.msrb.mxu3 %v2708_v0  ;;  %2797 = vmatpush.msra.mxu1 %v2779_v43  ;;  %v2855_v0 = vld [vmem:[#allocation15 + $0x628] sm:$0xff] }
0x1076   :  { %5443 = vmatmul.msk.f32.gmra.mxu3 %vm1832_vm4, %v2576_v7  ;;  %5447 = vmatmul.msk.f32.gmra.mxu1 %vm1832_vm4, %v2573_v8  ;;  %v2860_v7 = vld [vmem:[#allocation15 + $0x650] sm:$0xff]  ;;  %v2771_v8 = vld [vmem:[#allocation15 + $0x5b8] sm:$0xff] }
0x1077   :  { %2716 = vmatpush.msrb.mxu3 %v2707_v23  ;;  %2798 = vmatpush.msra.mxu1 %v2778_v51  ;;  %v2853_v23 = vld [vmem:[#allocation15 + $0x618] sm:$0xff]  ;;  %v5652_v51 = vld [vmem:[#allocation15 + $0x688] ss:$0 sm:$0xff] }
0x1078   :  { %2884 = vmatpush.msra.mxu0 %v2860_v7 }
0x1079   :  { %2717 = vmatpush.msrb.mxu3 %v2706_v27  ;;  %2799 = vmatpush.msra.mxu1 %v2777_v54 }
0x107b   :  { %2718 = vmatpush.msrb.mxu3 %v2705_v25  ;;  %2800 = vmatpush.msra.mxu1 %v2776_v57 }
0x107d   :  { %2719 = vmatpush.msrb.mxu3 %v2704_v30  ;;  %2801 = vmatpush.msra.mxu1 %v2775_v59  ;;  %v6150_v59 = vld [vmem:[#allocation15 + $0x748] sm:$0x1] }
0x107e   :  { %5444 = vmatmul.msk.f32.gmra.mxu3 %vm1832_vm4, %v2577_v11  ;;  %5448 = vmatmul.msk.f32.gmra.mxu1 %vm1832_vm4, %v2574_v12  ;;  %vm2657_vm4 = vcmask 162816   ;;  %v2757_v11 = vld [vmem:[#allocation15 + $0x548] sm:$0xff] }
0x107f   :  { %2720 = vmatpush.msrb.mxu3 %v2703_v33  ;;  %2802 = vmatpush.msra.mxu1 %v2774_v41  ;;  %v2859_v12 = vld [vmem:[#allocation15 + $0x648] sm:$0xff] }
0x1080   :  { %2885 = vmatpush.msra.mxu0 %v2859_v12  ;;  %v3849_v12 = vld [vmem:[#allocation15 + $0x9c8] sm:$0xff] }
0x1081   :  { %2721 = vmatpush.msrb.mxu3 %v2702_v34  ;;  %2803 = vmatpush.msra.mxu1 %v2773_v10 }
0x1083   :  { %2722 = vmatpush.msrb.mxu3 %v2701_v16  ;;  %2804 = vmatpush.msra.mxu1 %v2772_v2  ;;  %v2752_v2 = vld [vmem:[#allocation15 + $0x750] sm:$0xff] }
0x1084   :  { %3107 = vperm.xlu2 %5641, %v2752_v2   ;;  %v3313_v2 = vld [vmem:[#allocation17 + $0x5d0] sm:$0xff] }
0x1085   :  { %2723 = vmatpush.msrb.mxu3 %v2700_v47  ;;  %2805 = vmatpush.msra.mxu1 %v2771_v8  ;;  %v2753_v8 = vld [vmem:[#allocation15 + $0x758] sm:$0xff] }
0x1087   :  { %2724 = vmatpush.msrb.mxu3 %v2699_v61  ;;  %v2913_v61 = vld [vmem:[#allocation15 + $0x6a8] sm:$0xf] }
0x1089   :  { %2725 = vmatpush.msrb.mxu3 %v2698_v45 }
0x108b   :  { %2726 = vmatpush.msrb.mxu3 %v2697_v36  ;;  %v2912_v36 = vld [vmem:[#allocation15 + $0x6a0] sm:$0xff] }
0x108c   :  { %3112 = vperm.xlu2 %5641, %v2753_v8   ;;  %v3312_v8 = vld [vmem:[#allocation17 + $0x5c8] sm:$0xff] }
0x108d   :  { %2727 = vmatpush.msrb.mxu3 %v2696_v37  ;;  %v2911_v37 = vld [vmem:[#allocation15 + $0x698] sm:$0xff] }
0x1094   :  { %4227 = vperm.xlu2 %5641, %v3849_v12   ;;  %v3396_v12 = vld [vmem:[#allocation17 + $0x6a8] sm:$0xff] }
0x10eb   :  { %v2645_v13 = vpop.f32.mrf.mxu1 }
0x10f1   :  { %v2607_v14 = vpop.f32.mrf.mxu3 }
0x10f2   :  { %v2646_v31 = vadd.f32 %v2645_v13, %v2607_v14  ;;  %v2770_v13 = vld [vmem:[#allocation15 + $0x5b0] sm:$0xff]  ;;  %v2756_v14 = vld [vmem:[#allocation15 + $0x540] sm:$0xff] }
0x10f3   :  { %v2648_v18 = vpop.f32.mrf.mxu1  ;;  %2806 = vmatpush.msra.mxu1 %v2770_v13 }
0x10f9   :  { %v2610_v19 = vpop.f32.mrf.mxu3 }
0x10fa   :  { %v2649_v29 = vadd.f32 %v2648_v18, %v2610_v19  ;;  %v2858_v18 = vld [vmem:[#allocation15 + $0x640] sm:$0xff]  ;;  %v2769_v19 = vld [vmem:[#allocation15 + $0x5a8] sm:$0xff] }
0x10fb   :  { %v2651_v22 = vpop.f32.mrf.mxu1  ;;  %2886 = vmatpush.msra.mxu0 %v2858_v18  ;;  %2807 = vmatpush.msra.mxu1 %v2769_v19 }
0x10fd   :  { %2887 = vmatpush.msra.mxu0 %v2857_v1  ;;  %5464 = vmatpush.msk.msrb.mxu1 %vm1836_vm1, %v2913_v61 }
0x10ff   :  { %2888 = vmatpush.msra.mxu0 %v2856_v21  ;;  %2961 = vmatpush.msrb.mxu1 %v2912_v36 }
0x1101   :  { %v2613_v24 = vpop.f32.mrf.mxu3  ;;  %2889 = vmatpush.msra.mxu0 %v2855_v0  ;;  %2962 = vmatpush.msrb.mxu1 %v2911_v37 }
0x1102   :  { %v2652_v28 = vadd.f32 %v2651_v22, %v2613_v24  ;;  %v2854_v22 = vld [vmem:[#allocation15 + $0x620] sm:$0xff] }
0x1103   :  { %2890 = vmatpush.msra.mxu0 %v2854_v22  ;;  %v3035_v22 = vld [vmem:[#allocation15 + $0x6c0] sm:$0x1] }
0x1104   :  { %5449 = vmatpush.msk.msra.mxu2 %vm1836_vm1, %v2652_v28 }
0x1105   :  { %2891 = vmatpush.msra.mxu0 %v2853_v23 }
0x1106   :  { %2684 = vmatpush.msra.mxu2 %v2649_v29 }
0x1108   :  { %2685 = vmatpush.msra.mxu2 %v2646_v31 }
0x1109   :  { %5450 = vmatmul.msk.f32.vlgmr.msra.gmra.mxu2 %vm2657_vm4, %v2654_v32 }
0x110a   :  { %2829 = vmatpush.msrb.mxu2 %v2768_v38 }
0x110c   :  { %2830 = vmatpush.msrb.mxu2 %v2767_v40 }
0x110e   :  { %2831 = vmatpush.msrb.mxu2 %v2766_v39 }
0x1110   :  { %2832 = vmatpush.msrb.mxu2 %v2765_v44 }
0x1111   :  { %5451 = vmatmul.msk.f32.gmra.mxu2 %vm2657_vm4, %v2655_v35 }
0x1112   :  { %2833 = vmatpush.msrb.mxu2 %v2764_v52 }
0x1114   :  { %2834 = vmatpush.msrb.mxu2 %v2763_v55 }
0x1116   :  { %2835 = vmatpush.msrb.mxu2 %v2762_v58 }
0x1118   :  { %2836 = vmatpush.msrb.mxu2 %v2761_v60  ;;  %v2910_v60 = vld [vmem:[#allocation15 + $0x690] sm:$0xff] }
0x1119   :  { %5452 = vmatmul.msk.f32.gmra.mxu2 %vm2657_vm4, %v2656_v17  ;;  %2963 = vmatpush.msrb.mxu1 %v2910_v60 }
0x111a   :  { %2837 = vmatpush.msrb.mxu2 %v2760_v46 }
0x111c   :  { %2838 = vmatpush.msrb.mxu2 %v2759_v4 }
0x111e   :  { %2839 = vmatpush.msrb.mxu2 %v2758_v6 }
0x1120   :  { %2840 = vmatpush.msrb.mxu2 %v2757_v11 }
0x1122   :  { %2841 = vmatpush.msrb.mxu2 %v2756_v14 }
0x1124   :  { %2842 = vmatpush.msrb.mxu2 %v2755_v20  ;;  %v3022_v20 = vld [vmem:[#allocation15 + $0x6b8] sm:$0x1] }
0x118c   :  { %v2687_v62 = vpop.f32.mrf.mxu2 }
0x118d   :  { %2728 = vmatmul.f32.vlgmr.msrb.gmra.mxu3 %v2687_v62 }
0x1194   :  { %v2690_v26 = vpop.f32.mrf.mxu2 }
0x1195   :  { %2731 = vmatmul.f32.gmra.mxu3 %v2690_v26 }
0x119c   :  { %v2693_v3 = vpop.f32.mrf.mxu2 }
0x119d   :  { %2734 = vmatmul.f32.gmra.mxu3 %v2693_v3  ;;  %v2914_v3 = vld [vmem:[#allocation15 + $0x6b0] sm:$0xf] }
0x119e   :  { %5472 = vmatpush.msk.msrb.mxu0 %vm1836_vm1, %v2914_v3 }
0x1210   :  { %v2729_v24 = vpop.f32.mrf.mxu3 }
0x1211   :  { %2738 = vst.msk [vmem:[#allocation8 + $0x8] sm:$0xff] %vm74_vm9, %v2729_v24 }
0x1218   :  { %v2732_v27 = vpop.f32.mrf.mxu3  ;;  %v6095_v28 = vld [vmem:[#allocation8 + $0x8] sm:$0xff] }
0x1219   :  { %v6097_v25 = vld [vmem:[#allocation8 + $0x7] sm:$0xff]  ;;  %2739 = vst.msk [vmem:[#allocation8 + $0x10] sm:$0xff] %vm74_vm9, %v2732_v27  ;;  %5453 = vmatmul.msk.f32.vlgmr.msra.gmra.mxu1 %vm74_vm9, %v6095_v28  ;;  %v3144_v27 = vld [vmem:[#allocation17 + $0x538] sm:$0xf] }
0x121a   :  { %5456 = vmatmul.msk.f32.vlgmr.msrb.gmra.mxu2 %vm74_vm9, %v6097_v25  ;;  %5470 = vmatpush.msk.msra.mxu1 %vm1836_vm1, %v2914_v3  ;;  %v3314_v3 = vld [vmem:[#allocation17 + $0x5d8] sm:$0xff] }
0x1220   :  { %v2735_v29 = vpop.f32.mrf.mxu3  ;;  %v6104_v30 = vld [vmem:[#allocation8 + $0x10] sm:$0xff] }
0x1221   :  { %v6106_v31 = vld [vmem:[#allocation8 + $0xf] sm:$0xff]  ;;  %2741 = vst.msk [vmem:[#allocation8 + $0x18] sm:$0x3] %vm2740_vm10, %v2735_v29  ;;  %5454 = vmatmul.msk.f32.gmra.mxu1 %vm74_vm9, %v6104_v30  ;;  %vm3125_vm10 = vcmask 222208  }
0x1222   :  { %v6108_v32 = vld [vmem:[#allocation8 + $0x9] sm:$0xff]  ;;  %5457 = vmatmul.msk.f32.gmra.mxu2 %vm74_vm9, %v6106_v31  ;;  %v3140_v29 = vld [vmem:[#allocation17 + $0x518] sm:$0xf] }
0x1223   :  { %5459 = vmatmul.msk.f32.vlgmr.msra.gmra.mxu0 %vm74_vm9, %v6108_v32 }
0x1228   :  { %v6116_v33 = vld [vmem:[#allocation8 + $0x18] sm:$0x3] }
0x1229   :  { %v6118_v34 = vld [vmem:[#allocation8 + $0x17] sm:$0x3]  ;;  %5455 = vmatmul.msk.f32.gmra.mxu1 %vm74_vm9, %v6116_v33  ;;  %v6128_v47 = vld [vmem:[#allocation8 + $0x19] sm:$0x3] }
0x122a   :  { %v6120_v16 = vld [vmem:[#allocation8 + $0x11] sm:$0xff]  ;;  %5458 = vmatmul.msk.f32.gmra.mxu2 %vm74_vm9, %v6118_v34 }
0x122b   :  { %5460 = vmatmul.msk.f32.gmra.mxu0 %vm74_vm9, %v6120_v16 }
0x1233   :  { %5461 = vmatmul.msk.f32.gmra.mxu0 %vm74_vm9, %v6128_v47 }
0x1296   :  { %v2809_v35 = vpop.f32.mrf.mxu1 }
0x129d   :  { %v2844_v45 = vpop.f32.mrf.mxu2 }
0x129e   :  { %v2812_v49 = vpop.f32.mrf.mxu1  ;;  %v2845_v15 = vadd.f32 %v2844_v45, %v2809_v35  ;;  %v3232_v35 = vld [vmem:[#allocation17 + $0x578] sm:$0xf]  ;;  %v3143_v45 = vld [vmem:[#allocation17 + $0x530] sm:$0xff] }
0x12a0   :  { %v2893_v17 = vpop.f32.mrf.mxu0 }
0x12a1   :  { %v2902_v50 = vadd.f32 %v2893_v17, %v2845_v15  ;;  %v3231_v17 = vld [vmem:[#allocation17 + $0x570] sm:$0xff]  ;;  %v3141_v15 = vld [vmem:[#allocation17 + $0x520] sm:$0xff] }
0x12a3   :  { %v6137_v55 = vadd.f32 %v5652_v51, %v2902_v50  ;;  %v3415_v50 = vld [vmem:[#allocation17 + $0x740] sm:$0xff] }
0x12a5   :  { %v2847_v38 = vpop.f32.mrf.mxu2  ;;  %v2968_v58 = vmul.f32 %v6137_v55, %v6137_v55 }
0x12a6   :  { %v2848_v40 = vadd.f32 %v2847_v38, %v2812_v49  ;;  %v2815_v39 = vpop.f32.mrf.mxu1  ;;  %v3142_v49 = vld [vmem:[#allocation17 + $0x528] sm:$0xff] }
0x12a7   :  { %v3138_v38 = vld [vmem:[#allocation17 + $0x508] sm:$0xff] }
0x12a8   :  { %v2896_v48 = vpop.f32.mrf.mxu0 }
0x12a9   :  { %v2903_v44 = vadd.f32 %v2896_v48, %v2848_v40  ;;  %v3230_v48 = vld [vmem:[#allocation17 + $0x568] sm:$0xff] }
0x12aa   :  { %v3226_v40 = vld [vmem:[#allocation17 + $0x548] sm:$0xff] }
0x12ab   :  { %v6133_v53 = vadd.f32 %v5652_v51, %v2903_v44  ;;  %v3331_v44 = vld [vmem:[#allocation17 + $0x660] sm:$0xff] }
0x12ad   :  { %v2850_v42 = vpop.f32.mrf.mxu2  ;;  %v2969_v57 = vmul.f32 %v6133_v53, %v6133_v53 }
0x12ae   :  { %v2851_v43 = vadd.f32 %v2850_v42, %v2815_v39  ;;  %v3137_v39 = vld [vmem:[#allocation17 + $0x500] sm:$0xff] }
0x12af   :  { %v3229_v42 = vld [vmem:[#allocation17 + $0x560] sm:$0xff] }
0x12b0   :  { %v2899_v63 = vpop.f32.mrf.mxu0 }
0x12b1   :  { %v2904_v52 = vadd.f32 %v2899_v63, %v2851_v43  ;;  %v3225_v43 = vld [vmem:[#allocation17 + $0x540] sm:$0xff]  ;;  %v3317_v63 = vld [vmem:[#allocation17 + $0x5f0] sm:$0xff] }
0x12b3   :  { %v6135_v54 = vadd.f32 %v5652_v51, %v2904_v52  ;;  %v3401_v51 = vld [vmem:[#allocation17 + $0x6d0] sm:$0xff]  ;;  %v3330_v52 = vld [vmem:[#allocation17 + $0x658] sm:$0xff] }
0x12b5   :  { %v2970_v56 = vmul.f32 %v6135_v54, %v6135_v54  ;;  %5462 = vmatpush.msk.msra.mxu3 %vm95_vm0, %v6135_v54 }
0x12b7   :  { %2936 = vmatpush.msra.mxu3 %v6133_v53  ;;  %5466 = vmatpush.msk.msra.mxu2 %vm95_vm0, %v2970_v56  ;;  %v3316_v56 = vld [vmem:[#allocation17 + $0x5e8] sm:$0xff] }
0x12b9   :  { %2937 = vmatpush.msra.mxu3 %v6137_v55  ;;  %2988 = vmatpush.msra.mxu2 %v2969_v57  ;;  %v3414_v57 = vld [vmem:[#allocation17 + $0x738] sm:$0xff] }
0x12ba   :  { %5463 = vmatmul.msk.f32.vlgmr.msra.gmra.mxu3 %vm2915_vm11, %v6150_v59 }
0x12bb   :  { %2989 = vmatpush.msra.mxu2 %v2968_v58  ;;  %5468 = vmatpush.msk.msrb.mxu3 %vm1836_vm1, %v2913_v61  ;;  %v3228_v61 = vld [vmem:[#allocation17 + $0x558] sm:$0xf]  ;;  %v3400_v58 = vld [vmem:[#allocation17 + $0x6c8] sm:$0xff] }
0x12bc   :  { %5467 = vmatmul.msk.f32.vlgmr.msra.gmra.mxu2 %vm2915_vm11, %v6150_v59  ;;  %5486 = vmatpush.msk.msra.mxu0 %vm1836_vm1, %v3228_v61  ;;  %v3407_v61 = vld [vmem:[#allocation17 + $0x700] sm:$0xff] }
0x12bd   :  { %3010 = vmatpush.msrb.mxu3 %v2912_v36  ;;  %5474 = vmatpush.msk.msrb.mxu2 %vm1836_vm1, %v3144_v27  ;;  %v3139_v36 = vld [vmem:[#allocation17 + $0x510] sm:$0xff]  ;;  %v3323_v27 = vld [vmem:[#allocation17 + $0x620] sm:$0xff] }
0x12bf   :  { %3011 = vmatpush.msrb.mxu3 %v2911_v37  ;;  %3170 = vmatpush.msrb.mxu2 %v3143_v45  ;;  %v3227_v37 = vld [vmem:[#allocation17 + $0x550] sm:$0xff] }
0x12c0   :  { %3287 = vmatpush.msra.mxu0 %v3227_v37  ;;  %v3393_v45 = vld [vmem:[#allocation17 + $0x690] sm:$0xff] }
0x12c1   :  { %3012 = vmatpush.msrb.mxu3 %v2910_v60  ;;  %3171 = vmatpush.msrb.mxu2 %v3142_v49  ;;  %v3329_v60 = vld [vmem:[#allocation17 + $0x650] sm:$0xff] }
0x12c2   :  { %3288 = vmatpush.msra.mxu0 %v3226_v40  ;;  %v3406_v40 = vld [vmem:[#allocation17 + $0x6f8] sm:$0xff] }
0x12c3   :  { %5478 = vmatpush.msk.msra.mxu3 %vm1836_vm1, %v3140_v29  ;;  %3172 = vmatpush.msrb.mxu2 %v3141_v15  ;;  %v3309_v29 = vld [vmem:[#allocation17 + $0x5b0] sm:$0xff]  ;;  %v3392_v15 = vld [vmem:[#allocation17 + $0x688] sm:$0xff] }
0x12c4   :  { %3289 = vmatpush.msra.mxu0 %v3225_v43 }
0x12c5   :  { %3208 = vmatpush.msra.mxu3 %v3139_v36  ;;  %3334 = vmatpush.msra.mxu2 %v3331_v44  ;;  %v3321_v44 = vld [vmem:[#allocation17 + $0x610] sm:$0xff] }
0x12c7   :  { %3209 = vmatpush.msra.mxu3 %v3138_v38  ;;  %3335 = vmatpush.msra.mxu2 %v3330_v52  ;;  %v3322_v38 = vld [vmem:[#allocation17 + $0x618] sm:$0xff] }
0x12c9   :  { %3210 = vmatpush.msra.mxu3 %v3137_v39  ;;  %3336 = vmatpush.msra.mxu2 %v3329_v60 }
0x133d   :  { %v2939_v41 = vpop.f32.mrf.mxu3 }
0x133e   :  { %5465 = vmatmul.msk.f32.vlgmr.msrb.gmra.mxu1 %vm77_vm13, %v2939_v41  ;;  %v3315_v41 = vld [vmem:[#allocation17 + $0x5e0] sm:$0xff] }
0x133f   :  { %v2991_v46 = vpop.f32.mrf.mxu2  ;;  %5482 = vmatpush.msk.msrb.mxu1 %vm1836_vm1, %v3232_v35 }
0x1340   :  { %5469 = vmatmul.msk.f32.vlgmr.msrb.gmra.mxu3 %vm77_vm13, %v2991_v46  ;;  %v3413_v46 = vld [vmem:[#allocation17 + $0x730] sm:$0xff] }
0x1341   :  { %3258 = vmatpush.msrb.mxu1 %v3231_v17  ;;  %3360 = vmatpush.msrb.mxu3 %v3317_v63  ;;  %v3320_v63 = vld [vmem:[#allocation17 + $0x608] sm:$0xff] }
0x1343   :  { %3259 = vmatpush.msrb.mxu1 %v3230_v48  ;;  %3361 = vmatpush.msrb.mxu3 %v3316_v56  ;;  %v3308_v48 = vld [vmem:[#allocation17 + $0x5a8] sm:$0xff] }
0x1345   :  { %3260 = vmatpush.msrb.mxu1 %v3229_v42  ;;  %3362 = vmatpush.msrb.mxu3 %v3315_v41  ;;  %v3319_v41 = vld [vmem:[#allocation17 + $0x600] sm:$0xff] }
0x1347   :  { %3363 = vmatpush.msrb.mxu3 %v3314_v3 }
0x1349   :  { %3364 = vmatpush.msrb.mxu3 %v3313_v2  ;;  %v3389_v2 = vld [vmem:[#allocation17 + $0x670] sm:$0xff] }
0x134b   :  { %3365 = vmatpush.msrb.mxu3 %v3312_v8  ;;  %v3304_v8 = vld [vmem:[#allocation17 + $0x588] sm:$0xff] }
0x13bb   :  { %v2965_v62 = vpop.f32.mrf.mxu1 }
0x13bc   :  { %v3017_v26 = vmul.f32 0.010204081, %v2965_v62  ;;  %v3399_v62 = vld [vmem:[#allocation17 + $0x6c0] sm:$0xff] }
0x13be   :  { %v3019_v10 = vmul.f32 %v3017_v26, %v3017_v26 }
0x13c3   :  { %v3014_v4 = vpop.f32.mrf.mxu3 }
0x13c4   :  { %v3018_v5 = vmul.f32 0.010204081, %v3014_v4  ;;  %v3398_v4 = vld [vmem:[#allocation17 + $0x6b8] sm:$0xff] }
0x13c6   :  { %v3020_v6 = vsub.f32 %v3018_v5, %v3019_v10  ;;  %v3412_v10 = vld [vmem:[#allocation17 + $0x728] sm:$0xff]  ;;  %v3327_v5 = vld [vmem:[#allocation17 + $0x640] sm:$0xff] }
0x13c8   :  { %v3021_v9 = vmax.f32 %v3020_v6, 0.0  ;;  %v3411_v6 = vld [vmem:[#allocation17 + $0x720] sm:$0xff] }
0x13ca   :  { %v3023_v7 = vadd.f32 1e-05, %v3021_v9  ;;  %v3397_v9 = vld [vmem:[#allocation17 + $0x6b0] sm:$0xff] }
0x13cc   :  { %5671 = vrsqrt.f32 %v3023_v7  ;;  %vm3030_vm15 = vweird.f32 %v3023_v7 }
0x13d2   :  { %v5672_v11 = vpop.eup %5671 }
0x13d3   :  { %v3025_v13 = vmul.f32 %v5672_v11, %v3023_v7  ;;  %vm3031_vm14 = vweird.f32 %v5672_v11  ;;  %v3326_v7 = vld [vmem:[#allocation17 + $0x638] sm:$0xff] }
0x13d4   :  { %vm3032_vm3 = vmor %vm3030_vm15, %vm3031_vm14 }
0x13d5   :  { %v3026_v14 = vmul.f32 %v5672_v11, %v3025_v13  ;;  %v3325_v13 = vld [vmem:[#allocation17 + $0x630] sm:$0xff] }
0x13d7   :  { %v3027_v18 = vmul.f32 0.5, %v3026_v14  ;;  %v3311_v14 = vld [vmem:[#allocation17 + $0x5c0] sm:$0xff] }
0x13d8   :  { %3366 = vmatpush.msrb.mxu3 %v3311_v14 }
0x13d9   :  { %v3028_v19 = vsub.f32 1.5, %v3027_v18 }
0x13db   :  { %v3029_v1 = vmul.f32 %v5672_v11, %v3028_v19  ;;  %v3409_v19 = vld [vmem:[#allocation17 + $0x710] sm:$0xff] }
0x13dd   :  { %v3033_v21 = vsel %vm3032_vm3, %v5672_v11, %v3029_v1  ;;  %v3410_v11 = vld [vmem:[#allocation17 + $0x718] sm:$0xff] }
0x13de   :  { %v3034_v0 = vmul.f32 %v3033_v21, %v3022_v20  ;;  %v3395_v20 = vld [vmem:[#allocation17 + $0x6a0] sm:$0xff]  ;;  %v3324_v21 = vld [vmem:[#allocation17 + $0x628] sm:$0xff] }
0x13e0   :  { %v3036_v23 = vmul.f32 %v3034_v0, %v3017_v26  ;;  %5471 = vmatmul.msk.f32.vlgmr.msra.gmra.mxu1 %vm3038_vm6, %v3034_v0  ;;  %v3328_v26 = vld [vmem:[#allocation17 + $0x648] sm:$0xff]  ;;  %v3310_v0 = vld [vmem:[#allocation17 + $0x5b8] sm:$0xff] }
0x13e1   :  { %3418 = vmatpush.msra.mxu1 %v3415_v50  ;;  %3337 = vmatpush.msra.mxu2 %v3328_v26 }
0x13e2   :  { %v3037_v24 = vsub.f32 %v3035_v22, %v3036_v23  ;;  %v3108_v22 = vpop.permute.xlu2 %3107  ;;  %v3408_v23 = vld [vmem:[#allocation17 + $0x708] sm:$0xff]  ;;  %3367 = vmatpush.msrb.mxu3 %v3310_v0 }
0x13e3   :  { %3419 = vmatpush.msra.mxu1 %v3414_v57  ;;  %3338 = vmatpush.msra.mxu2 %v3327_v5  ;;  %v3404_v57 = vld [vmem:[#allocation17 + $0x6e8] sm:$0xff]  ;;  %v3403_v5 = vld [vmem:[#allocation17 + $0x6e0] sm:$0xff] }
0x13e4   :  { %5473 = vmatmul.msk.f32.vlgmr.msrb.gmra.mxu0 %vm3038_vm6, %v3037_v24  ;;  %v3394_v24 = vld [vmem:[#allocation17 + $0x698] sm:$0xff]  ;;  %3368 = vmatpush.msrb.mxu3 %v3309_v29 }
0x13e5   :  { %3444 = vmatpush.msrb.mxu0 %v3401_v51  ;;  %3420 = vmatpush.msra.mxu1 %v3413_v46  ;;  %v3306_v51 = vld [vmem:[#allocation17 + $0x598] sm:$0xff]  ;;  %v3305_v46 = vld [vmem:[#allocation17 + $0x590] sm:$0xff] }
0x13e6   :  { %3339 = vmatpush.msra.mxu2 %v3326_v7  ;;  %3369 = vmatpush.msrb.mxu3 %v3308_v48  ;;  %v3318_v7 = vld [vmem:[#allocation17 + $0x5f8] sm:$0xff] }
0x13e7   :  { %3445 = vmatpush.msrb.mxu0 %v3400_v58  ;;  %3421 = vmatpush.msra.mxu1 %v3412_v10  ;;  %v3390_v58 = vld [vmem:[#allocation17 + $0x678] sm:$0xff] }
0x13e8   :  { %3340 = vmatpush.msra.mxu2 %v3325_v13 }
0x13e9   :  { %3446 = vmatpush.msrb.mxu0 %v3399_v62  ;;  %3422 = vmatpush.msra.mxu1 %v3411_v6  ;;  %v3118_v62 = vpop.permute.xlu0 %3117 }
0x13ea   :  { %3341 = vmatpush.msra.mxu2 %v3324_v21  ;;  %v3113_v26 = vpop.permute.xlu2 %3112 }
0x13eb   :  { %3447 = vmatpush.msrb.mxu0 %v3398_v4  ;;  %3423 = vmatpush.msra.mxu1 %v3410_v11  ;;  %v3402_v11 = vld [vmem:[#allocation17 + $0x6d8] sm:$0xff] }
0x13ec   :  { %3342 = vmatpush.msra.mxu2 %v3323_v27 }
0x13ed   :  { %3448 = vmatpush.msrb.mxu0 %v3397_v9  ;;  %3424 = vmatpush.msra.mxu1 %v3409_v19 }
0x13ee   :  { %3343 = vmatpush.msra.mxu2 %v3322_v38 }
0x13ef   :  { %3449 = vmatpush.msrb.mxu0 %v3396_v12  ;;  %3425 = vmatpush.msra.mxu1 %v3408_v23  ;;  %v3388_v12 = vld [vmem:[#allocation17 + $0x668] sm:$0xff] }
0x13f0   :  { %3344 = vmatpush.msra.mxu2 %v3321_v44 }
0x13f1   :  { %3450 = vmatpush.msrb.mxu0 %v3395_v20  ;;  %3426 = vmatpush.msra.mxu1 %v3407_v61  ;;  %v3484_v61 = vld [vmem:[#allocation15 + $0x730] sm:$0xff] }
0x13f2   :  { %3345 = vmatpush.msra.mxu2 %v3320_v63 }
0x13f3   :  { %3451 = vmatpush.msrb.mxu0 %v3394_v24  ;;  %3427 = vmatpush.msra.mxu1 %v3406_v40 }
0x13f4   :  { %3346 = vmatpush.msra.mxu2 %v3319_v41  ;;  %v3476_v41 = vld [vmem:[#allocation15 + $0x6f0] sm:$0xff] }
0x13f5   :  { %3452 = vmatpush.msrb.mxu0 %v3393_v45  ;;  %v3483_v45 = vld [vmem:[#allocation15 + $0x728] sm:$0xff] }
0x13f6   :  { %3347 = vmatpush.msra.mxu2 %v3318_v7 }
0x13f7   :  { %3453 = vmatpush.msrb.mxu0 %v3392_v15 }
0x145d   :  { %v3062_v18 = vpop.f32.mrf.mxu1 }
0x145e   :  { %v3065_v1 = vperm.slane %v3062_v18, 0 }
0x1460   :  { %v3066_v36 = vmul.f32 %v3065_v1, %v6137_v55  ;;  %v3067_v17 = vmul.f32 %v3065_v1, %v6133_v53  ;;  %v3068_v37 = vmul.f32 %v3065_v1, %v6135_v54  ;;  %v3307_v55 = vld [vmem:[#allocation17 + $0x5a0] sm:$0xff]  ;;  %v3405_v53 = vld [vmem:[#allocation17 + $0x6f0] sm:$0xff] }
0x1461   :  { %v3089_v35 = vpop.f32.mrf.mxu0  ;;  %v3391_v54 = vld [vmem:[#allocation17 + $0x680] sm:$0xff]  ;;  %3370 = vmatpush.msrb.mxu3 %v3307_v55  ;;  %3428 = vmatpush.msra.mxu1 %v3405_v53 }
0x1462   :  { %v3092_v49 = vperm.slane %v3089_v35, 0  ;;  %3454 = vmatpush.msrb.mxu0 %v3391_v54  ;;  %v3480_v54 = vld [vmem:[#allocation15 + $0x710] sm:$0xff] }
0x1463   :  { %3371 = vmatpush.msrb.mxu3 %v3306_v51  ;;  %3429 = vmatpush.msra.mxu1 %v3404_v57  ;;  %v3478_v57 = vld [vmem:[#allocation15 + $0x700] sm:$0xff] }
0x1464   :  { %v3093_v39 = vadd.f32 %v3092_v49, %v3066_v36  ;;  %v3094_v42 = vadd.f32 %v3092_v49, %v3067_v17  ;;  %v3095_v43 = vadd.f32 %v3092_v49, %v3068_v37  ;;  %3455 = vmatpush.msrb.mxu0 %v3390_v58 }
0x1465   :  { %3372 = vmatpush.msrb.mxu3 %v3305_v46  ;;  %3430 = vmatpush.msra.mxu1 %v3403_v5  ;;  %v3475_v46 = vld [vmem:[#allocation15 + $0x6e8] sm:$0xff] }
0x1466   :  { %vm3096_vm7 = vcmp.ge.f32.partialorder %v3093_v39, 0.0  ;;  %vm3097_vm8 = vcmp.ge.f32.partialorder %v3094_v42, 0.0  ;;  %vm3098_vm4 = vcmp.ge.f32.partialorder %v3095_v43, 0.0  ;;  %v3099_v50 = vmul.f32 0.22916667, %v3093_v39  ;;  %3456 = vmatpush.msrb.mxu0 %v3389_v2 }
0x1467   :  { %v3100_v52 = vmul.f32 0.22916667, %v3094_v42  ;;  %v3101_v56 = vmul.f32 0.22916667, %v3095_v43  ;;  %3373 = vmatpush.msrb.mxu3 %v3304_v8  ;;  %3431 = vmatpush.msra.mxu1 %v3402_v11 }
0x1468   :  { %v3102_v60 = vsel %vm3096_vm7, %v3093_v39, %v3099_v50  ;;  %3457 = vmatpush.msrb.mxu0 %v3388_v12  ;;  %v3481_v39 = vld [vmem:[#allocation15 + $0x718] sm:$0xff] }
0x1469   :  { %v3103_v3 = vsel %vm3097_vm8, %v3094_v42, %v3100_v52  ;;  %v3104_v10 = vsel %vm3098_vm4, %v3095_v43, %v3101_v56  ;;  %v3120_v4 = vmul.f32 %v3108_v22, %v3102_v60  ;;  %v3479_v52 = vld [vmem:[#allocation15 + $0x708] sm:$0xff]  ;;  %v3477_v60 = vld [vmem:[#allocation15 + $0x6f8] sm:$0xff] }
0x146a   :  { %v3121_v6 = vmul.f32 %v3113_v26, %v3103_v3  ;;  %v3122_v9 = vmul.f32 %v3118_v62, %v3104_v10  ;;  %v3474_v62 = vld [vmem:[#allocation15 + $0x6e0] sm:$0xff]  ;;  %v3473_v26 = vld [vmem:[#allocation15 + $0x6d8] sm:$0xff]  ;;  %v3471_v10 = vld [vmem:[#allocation15 + $0x6c8] sm:$0xff] }
0x146b   :  { %3123 = vst.msk [vmem:[#allocation9 + $0x8] sm:$0xff] %vm77_vm13, %v3120_v4 }
0x146c   :  { %3124 = vst.msk [vmem:[#allocation9 + $0x10] sm:$0xff] %vm77_vm13, %v3121_v6 }
0x146d   :  { %3126 = vst.msk [vmem:[#allocation9 + $0x18] sm:$0x3] %vm3125_vm10, %v3122_v9 }
0x1472   :  { %v3130_v13 = vld [vmem:[#allocation9 + $0x8] sm:$0xff] }
0x1473   :  { %v3127_v14 = vld [vmem:[#allocation9 + $0x7] sm:$0xff]  ;;  %5475 = vmatmul.msk.f32.vlgmr.msrb.gmra.mxu2 %vm77_vm13, %v3130_v13  ;;  %5487 = vmatmul.msk.f32.vlgmr.msra.gmra.mxu0 %vm77_vm13, %v3130_v13  ;;  %v3131_v19 = vld [vmem:[#allocation9 + $0x10] sm:$0xff] }
0x1474   :  { %5479 = vmatmul.msk.f32.vlgmr.msra.gmra.mxu3 %vm77_vm13, %v3127_v14  ;;  %v3133_v18 = vld [vmem:[#allocation9 + $0x9] sm:$0xff]  ;;  %v3134_v1 = vld [vmem:[#allocation9 + $0x11] sm:$0xff]  ;;  %v3135_v22 = vld [vmem:[#allocation9 + $0x19] sm:$0x3] }
0x1475   :  { %5483 = vmatmul.msk.f32.vlgmr.msrb.gmra.mxu1 %vm77_vm13, %v3133_v18  ;;  %v3128_v20 = vld [vmem:[#allocation9 + $0xf] sm:$0xff]  ;;  %v3132_v21 = vld [vmem:[#allocation9 + $0x18] sm:$0x3] }
0x1476   :  { %v3129_v0 = vld [vmem:[#allocation9 + $0x17] sm:$0x3]  ;;  %3537 = vmatpush.msrb.mxu1 %v3484_v61 }
0x1478   :  { %3538 = vmatpush.msrb.mxu1 %v3483_v45 }
0x147b   :  { %5476 = vmatmul.msk.f32.gmra.mxu2 %vm77_vm13, %v3131_v19  ;;  %5488 = vmatmul.msk.f32.gmra.mxu0 %vm77_vm13, %v3131_v19 }
0x147c   :  { %5480 = vmatmul.msk.f32.gmra.mxu3 %vm77_vm13, %v3128_v20 }
0x147d   :  { %5484 = vmatmul.msk.f32.gmra.mxu1 %vm77_vm13, %v3134_v1 }
0x1483   :  { %5477 = vmatmul.msk.f32.gmra.mxu2 %vm77_vm13, %v3132_v21  ;;  %5489 = vmatmul.msk.f32.gmra.mxu0 %vm77_vm13, %v3132_v21 }
0x1484   :  { %5481 = vmatmul.msk.f32.gmra.mxu3 %vm77_vm13, %v3129_v0 }
0x1485   :  { %5485 = vmatmul.msk.f32.gmra.mxu1 %vm77_vm13, %v3135_v22 }
0x148b   :  { %5490 = vmatmul.msk.f32.vlgmr.msra.gmra.mxu2 %vm74_vm9, %v6095_v28  ;;  %5499 = vmatmul.msk.f32.vlgmr.msrb.gmra.mxu0 %vm74_vm9, %v6095_v28 }
0x148c   :  { %5493 = vmatmul.msk.f32.vlgmr.msrb.gmra.mxu3 %vm74_vm9, %v6097_v25 }
0x148d   :  { %5496 = vmatmul.msk.f32.vlgmr.msra.gmra.mxu1 %vm74_vm9, %v6108_v32 }
0x1493   :  { %5491 = vmatmul.msk.f32.gmra.mxu2 %vm74_vm9, %v6104_v30  ;;  %5500 = vmatmul.msk.f32.gmra.mxu0 %vm74_vm9, %v6104_v30 }
0x1494   :  { %5494 = vmatmul.msk.f32.gmra.mxu3 %vm74_vm9, %v6106_v31 }
0x1495   :  { %5497 = vmatmul.msk.f32.gmra.mxu1 %vm74_vm9, %v6120_v16 }
0x149b   :  { %5492 = vmatmul.msk.f32.gmra.mxu2 %vm74_vm9, %v6116_v33  ;;  %5501 = vmatmul.msk.f32.gmra.mxu0 %vm74_vm9, %v6116_v33 }
0x149c   :  { %5495 = vmatmul.msk.f32.gmra.mxu3 %vm74_vm9, %v6118_v34  ;;  %v5653_v34 = vld [vmem:[#allocation17 + $0x580] ss:$0 sm:$0xff] }
0x149d   :  { %5498 = vmatmul.msk.f32.gmra.mxu1 %vm74_vm9, %v6128_v47  ;;  %v3482_v47 = vld [vmem:[#allocation15 + $0x720] sm:$0xff] }
0x149e   :  { %3539 = vmatpush.msrb.mxu1 %v3482_v47 }
0x14a0   :  { %3540 = vmatpush.msrb.mxu1 %v3481_v39 }
0x14a2   :  { %3541 = vmatpush.msrb.mxu1 %v3480_v54 }
0x14a4   :  { %3542 = vmatpush.msrb.mxu1 %v3479_v52 }
0x14a6   :  { %3543 = vmatpush.msrb.mxu1 %v3478_v57 }
0x14a8   :  { %3544 = vmatpush.msrb.mxu1 %v3477_v60 }
0x14aa   :  { %3545 = vmatpush.msrb.mxu1 %v3476_v41 }
0x14ac   :  { %3546 = vmatpush.msrb.mxu1 %v3475_v46 }
0x14ae   :  { %3547 = vmatpush.msrb.mxu1 %v3474_v62 }
0x14b0   :  { %3548 = vmatpush.msrb.mxu1 %v3473_v26 }
0x14f0   :  { %v3291_v25 = vpop.f32.mrf.mxu0 }
0x14f2   :  { %v3262_v28 = vpop.f32.mrf.mxu1 }
0x14f3   :  { %v3292_v36 = vadd.f32 %v3291_v25, %v3262_v28  ;;  %v3485_v25 = vld [vmem:[#allocation17 + $0x750] sm:$0xff] }
0x14f5   :  { %v6222_v38 = vadd.f32 %v5653_v34, %v3292_v36 }
0x14f6   :  { %v3174_v31 = vpop.f32.mrf.mxu2 }
0x14f7   :  { %v3212_v32 = vpop.f32.mrf.mxu3  ;;  %v3558_v63 = vmul.f32 %v6222_v38, %v6222_v38 }
0x14f8   :  { %v3294_v23 = vpop.f32.mrf.mxu0  ;;  %v3213_v42 = vadd.f32 %v3212_v32, %v3174_v31 }
0x14fa   :  { %v3265_v16 = vpop.f32.mrf.mxu1  ;;  %v6239_v50 = vadd.f32 %v5653_v34, %v3213_v42 }
0x14fb   :  { %v3295_v27 = vadd.f32 %v3294_v23, %v3265_v16 }
0x14fc   :  { %v3555_v58 = vmul.f32 %v6239_v50, %v6239_v50 }
0x14fd   :  { %v6218_v37 = vadd.f32 %v5653_v34, %v3295_v27 }
0x14fe   :  { %v3177_v24 = vpop.f32.mrf.mxu2 }
0x14ff   :  { %v3215_v30 = vpop.f32.mrf.mxu3  ;;  %v3559_v44 = vmul.f32 %v6218_v37, %v6218_v37 }
0x1500   :  { %v3297_v35 = vpop.f32.mrf.mxu0  ;;  %v3216_v49 = vadd.f32 %v3215_v30, %v3177_v24 }
0x1502   :  { %v3268_v29 = vpop.f32.mrf.mxu1  ;;  %v6232_v55 = vadd.f32 %v5653_v34, %v3216_v49  ;;  %v3648_v49 = vld [vmem:[#allocation15 + $0x740] sm:$0x1] }
0x1503   :  { %v3298_v17 = vadd.f32 %v3297_v35, %v3268_v29 }
0x1504   :  { %v3556_v56 = vmul.f32 %v6232_v55, %v6232_v55 }
0x1505   :  { %v6220_v33 = vadd.f32 %v5653_v34, %v3298_v17 }
0x1506   :  { %v3180_v40 = vpop.f32.mrf.mxu2 }
0x1507   :  { %v3560_v48 = vmul.f32 %v6220_v33, %v6220_v33  ;;  %5502 = vmatpush.msk.msrb.mxu2 %vm95_vm0, %v6220_v33  ;;  %v3218_v15 = vpop.f32.mrf.mxu3 }
0x1508   :  { %v3219_v43 = vadd.f32 %v3218_v15, %v3180_v40  ;;  %v3459_v5 = vpop.f32.mrf.mxu0 }
0x1509   :  { %3503 = vmatpush.msrb.mxu2 %v6218_v37  ;;  %5507 = vmatpush.msk.msra.mxu0 %vm95_vm0, %v3560_v48 }
0x150a   :  { %v6234_v53 = vadd.f32 %v5653_v34, %v3219_v43  ;;  %v3433_v1 = vpop.f32.mrf.mxu1  ;;  %v3635_v34 = vld [vmem:[#allocation15 + $0x738] sm:$0x1] }
0x150b   :  { %3504 = vmatpush.msrb.mxu2 %v6222_v38  ;;  %3578 = vmatpush.msra.mxu0 %v3559_v44  ;;  %v5654_v44 = vld [vmem:[#allocation17 + $0x748] ss:$0 sm:$0xff] }
0x150c   :  { %v3557_v51 = vmul.f32 %v6234_v53, %v6234_v53  ;;  %5503 = vmatmul.msk.f32.vlgmr.msrb.gmra.mxu2 %vm2915_vm11, %v6150_v59  ;;  %5504 = vmatpush.msk.msra.mxu3 %vm95_vm0, %v6234_v53 }
0x150d   :  { %3579 = vmatpush.msra.mxu0 %v3558_v63 }
0x150e   :  { %3526 = vmatpush.msra.mxu3 %v6232_v55  ;;  %5509 = vmatpush.msk.msra.mxu2 %vm95_vm0, %v3557_v51  ;;  %v6260_v3 = vpop.f32.mrf.mxu2  ;;  %v3460_v51 = vadd.f32 %v3459_v5, %v3433_v1 }
0x150f   :  { %5508 = vmatmul.msk.f32.vlgmr.msra.gmra.mxu0 %vm2915_vm11, %v6150_v59  ;;  %v3375_v4 = vpop.f32.mrf.mxu3 }
0x1510   :  { %3527 = vmatpush.msra.mxu3 %v6239_v50  ;;  %3601 = vmatpush.msra.mxu2 %v3556_v56  ;;  %v3462_v9 = vpop.f32.mrf.mxu0 }
0x1511   :  { %5505 = vmatmul.msk.f32.vlgmr.msra.gmra.mxu3 %vm2915_vm11, %v6150_v59  ;;  %3669 = vmatpush.msrb.mxu0 %v3485_v25 }
0x1512   :  { %3602 = vmatpush.msra.mxu2 %v3555_v58  ;;  %3612 = vmatpush.msrb.mxu3 %v3484_v61  ;;  %v3436_v21 = vpop.f32.mrf.mxu1 }
0x1514   :  { %5510 = vmatmul.msk.f32.vlgmr.msra.gmra.mxu2 %vm2915_vm11, %v6150_v59  ;;  %3613 = vmatpush.msrb.mxu3 %v3483_v45  ;;  %v3472_v59 = vld [vmem:[#allocation15 + $0x6d0] sm:$0xff] }
0x1515   :  { %3549 = vmatpush.msrb.mxu1 %v3472_v59  ;;  %3692 = vmatpush.msrb.mxu2 %v3485_v25 }
0x1516   :  { %3614 = vmatpush.msrb.mxu3 %v3482_v47  ;;  %v3352_v2 = vpop.f32.mrf.mxu2 }
0x1517   :  { %3550 = vmatpush.msrb.mxu1 %v3471_v10  ;;  %v3378_v6 = vpop.f32.mrf.mxu3 }
0x1518   :  { %3615 = vmatpush.msrb.mxu3 %v3481_v39  ;;  %v3465_v11 = vpop.f32.mrf.mxu0  ;;  %v3463_v39 = vadd.f32 %v3462_v9, %v3436_v21  ;;  %v3379_v42 = vadd.f32 %v3378_v6, %v3352_v2 }
0x151a   :  { %3616 = vmatpush.msrb.mxu3 %v3480_v54  ;;  %v3439_v0 = vpop.f32.mrf.mxu1  ;;  %v3469_v56 = vadd.f32 %v5654_v44, %v3463_v39  ;;  %v3873_v39 = vld [vmem:[#allocation15 + $0x850] sm:$0xff] }
0x151b   :  { %v3466_v54 = vadd.f32 %v3465_v11, %v3439_v0  ;;  %v3879_v0 = vld [vmem:[#allocation15 + $0x880] sm:$0xff] }
0x151c   :  { %3617 = vmatpush.msrb.mxu3 %v3479_v52  ;;  %v3376_v52 = vadd.f32 %v3375_v4, %v6260_v3  ;;  %3894 = vmatpush.msra.mxu2 %v3879_v0 }
0x151e   :  { %3618 = vmatpush.msrb.mxu3 %v3478_v57  ;;  %v3355_v7 = vpop.f32.mrf.mxu2  ;;  %v3386_v57 = vadd.f32 %v5654_v44, %v3379_v42  ;;  %v3972_v42 = vld [vmem:[#allocation15 + $0x8d8] sm:$0xff] }
0x151f   :  { %v3381_v8 = vpop.f32.mrf.mxu3 }
0x1520   :  { %3619 = vmatpush.msrb.mxu3 %v3477_v60  ;;  %v3382_v63 = vadd.f32 %v3381_v8, %v3355_v7  ;;  %v3468_v7 = vadd.f32 %v5654_v44, %v3460_v51  ;;  %v3385_v8 = vadd.f32 %v5654_v44, %v3376_v52  ;;  %v3741_v51 = vld [vmem:[#allocation15 + $0x798] sm:$0xff] }
0x1521   :  { %v3737_v52 = vld [vmem:[#allocation15 + $0x778] sm:$0xff] }
0x1522   :  { %3620 = vmatpush.msrb.mxu3 %v3476_v41 }
0x1524   :  { %3621 = vmatpush.msrb.mxu3 %v3475_v46 }
0x1526   :  { %3622 = vmatpush.msrb.mxu3 %v3474_v62 }
0x1528   :  { %3623 = vmatpush.msrb.mxu3 %v3473_v26 }
0x152a   :  { %3624 = vmatpush.msrb.mxu3 %v3472_v59  ;;  %v3470_v59 = vadd.f32 %v5654_v44, %v3466_v54  ;;  %v3859_v54 = vld [vmem:[#allocation15 + $0x7e0] sm:$0xff] }
0x152c   :  { %3625 = vmatpush.msrb.mxu3 %v3471_v10  ;;  %v3387_v10 = vadd.f32 %v5654_v44, %v3382_v63  ;;  %v3872_v44 = vld [vmem:[#allocation15 + $0x848] sm:$0xff]  ;;  %v3858_v63 = vld [vmem:[#allocation15 + $0x7d8] sm:$0xff] }
0x158c   :  { %v3581_v18 = vpop.f32.mrf.mxu0 }
0x158f   :  { %v3506_v12 = vpop.f32.mrf.mxu2 }
0x1594   :  { %v3529_v13 = vpop.f32.mrf.mxu3 }
0x1595   :  { %v3530_v14 = vadd.f32 %v3529_v13, %v3506_v12 }
0x1597   :  { %v3604_v19 = vpop.f32.mrf.mxu2  ;;  %5506 = vmatmul.msk.f32.vlgmr.msrb.gmra.mxu1 %vm74_vm9, %v3530_v14 }
0x1598   :  { %v3605_v20 = vadd.f32 %v3604_v19, %v3581_v18 }
0x159a   :  { %5511 = vmatmul.msk.f32.vlgmr.msrb.gmra.mxu3 %vm74_vm9, %v3605_v20 }
0x1614   :  { %v3552_v22 = vpop.f32.mrf.mxu1 }
0x1615   :  { %v3630_v28 = vmul.f32 0.0025510204, %v3552_v22 }
0x1617   :  { %v3632_v32 = vmul.f32 %v3630_v28, %v3630_v28 }
0x161d   :  { %v3627_v31 = vpop.f32.mrf.mxu3 }
0x161e   :  { %v3631_v16 = vmul.f32 0.0025510204, %v3627_v31 }
0x1620   :  { %v3633_v23 = vsub.f32 %v3631_v16, %v3632_v32  ;;  %v3739_v32 = vld [vmem:[#allocation15 + $0x788] sm:$0xff] }
0x1621   :  { %v3735_v16 = vld [vmem:[#allocation15 + $0x768] sm:$0xff] }
0x1622   :  { %v3634_v24 = vmax.f32 %v3633_v23, 0.0 }
0x1624   :  { %v3636_v30 = vadd.f32 1e-05, %v3634_v24 }
0x1626   :  { %5673 = vrsqrt.f32 %v3636_v30  ;;  %vm3643_vm15 = vweird.f32 %v3636_v30 }
0x162c   :  { %v5674_v27 = vpop.eup %5673 }
0x162d   :  { %v3638_v29 = vmul.f32 %v5674_v27, %v3636_v30  ;;  %vm3644_vm14 = vweird.f32 %v5674_v27  ;;  %v3865_v30 = vld [vmem:[#allocation15 + $0x810] sm:$0xff] }
0x162e   :  { %vm3645_vm3 = vmor %vm3643_vm15, %vm3644_vm14 }
0x162f   :  { %v3639_v35 = vmul.f32 %v5674_v27, %v3638_v29  ;;  %v3975_v29 = vld [vmem:[#allocation15 + $0x8f0] sm:$0xff] }
0x1631   :  { %v3640_v61 = vmul.f32 0.5, %v3639_v35  ;;  %v3864_v35 = vld [vmem:[#allocation15 + $0x808] sm:$0xff] }
0x1633   :  { %v3641_v45 = vsub.f32 1.5, %v3640_v61  ;;  %v3876_v61 = vld [vmem:[#allocation15 + $0x868] sm:$0xff] }
0x1635   :  { %v3642_v36 = vmul.f32 %v5674_v27, %v3641_v45  ;;  %v3974_v45 = vld [vmem:[#allocation15 + $0x8e8] sm:$0xff] }
0x1637   :  { %v3646_v17 = vsel %vm3645_vm3, %v5674_v27, %v3642_v36  ;;  %v3877_v27 = vld [vmem:[#allocation15 + $0x870] sm:$0xff]  ;;  %v3875_v36 = vld [vmem:[#allocation15 + $0x860] sm:$0xff] }
0x1638   :  { %v3647_v47 = vmul.f32 %v3646_v17, %v3635_v34  ;;  %v3863_v34 = vld [vmem:[#allocation15 + $0x800] sm:$0xff] }
0x1639   :  { %v3973_v17 = vld [vmem:[#allocation15 + $0x8e0] sm:$0xff] }
0x163a   :  { %v3649_v48 = vmul.f32 %v3647_v47, %v3630_v28  ;;  %5512 = vmatmul.msk.f32.vlgmr.msrb.gmra.mxu0 %vm1008_vm5, %v3647_v47  ;;  %v3878_v28 = vld [vmem:[#allocation15 + $0x878] sm:$0xff] }
0x163b   :  { %3895 = vmatpush.msra.mxu2 %v3878_v28  ;;  %v3862_v47 = vld [vmem:[#allocation15 + $0x7f8] sm:$0xff] }
0x163c   :  { %v3650_v40 = vsub.f32 %v3648_v49, %v3649_v48  ;;  %v3874_v49 = vld [vmem:[#allocation15 + $0x858] sm:$0xff]  ;;  %v3740_v48 = vld [vmem:[#allocation15 + $0x790] sm:$0xff] }
0x163d   :  { %3896 = vmatpush.msra.mxu2 %v3877_v27 }
0x163e   :  { %5513 = vmatmul.msk.f32.vlgmr.msrb.gmra.mxu2 %vm1008_vm5, %v3650_v40  ;;  %v3736_v40 = vld [vmem:[#allocation15 + $0x770] sm:$0xff] }
0x163f   :  { %3897 = vmatpush.msra.mxu2 %v3876_v61 }
0x1641   :  { %3898 = vmatpush.msra.mxu2 %v3875_v36 }
0x1643   :  { %3899 = vmatpush.msra.mxu2 %v3874_v49 }
0x1645   :  { %3900 = vmatpush.msra.mxu2 %v3873_v39 }
0x1647   :  { %3901 = vmatpush.msra.mxu2 %v3872_v44 }
0x16b7   :  { %v3671_v15 = vpop.f32.mrf.mxu0 }
0x16b8   :  { %v3697_v43 = vperm.slane %v3671_v15, 0  ;;  %v3861_v15 = vld [vmem:[#allocation15 + $0x7f0] sm:$0xff] }
0x16ba   :  { %v3710_v60 = vmul.f32 %v3697_v43, %v6220_v33  ;;  %v3700_v46 = vmul.f32 %v3697_v43, %v6234_v53  ;;  %v3709_v62 = vmul.f32 %v3697_v43, %v6218_v37  ;;  %v3699_v26 = vmul.f32 %v3697_v43, %v6232_v55 }
0x16bb   :  { %v3708_v2 = vmul.f32 %v3697_v43, %v6222_v38  ;;  %v3698_v5 = vmul.f32 %v3697_v43, %v6239_v50  ;;  %v3860_v43 = vld [vmem:[#allocation15 + $0x7e8] sm:$0xff] }
0x16c1   :  { %v3694_v58 = vpop.f32.mrf.mxu2 }
0x16c2   :  { %v3701_v41 = vperm.slane %v3694_v58, 0  ;;  %v3871_v58 = vld [vmem:[#allocation15 + $0x840] sm:$0xff] }
0x16c3   :  { %3902 = vmatpush.msra.mxu2 %v3871_v58 }
0x16c4   :  { %v3713_v6 = vadd.f32 %v3710_v60, %v3701_v41  ;;  %v3704_v3 = vadd.f32 %v3701_v41, %v3700_v46  ;;  %v3712_v4 = vadd.f32 %v3709_v62, %v3701_v41  ;;  %v3703_v9 = vadd.f32 %v3701_v41, %v3699_v26  ;;  %v3857_v60 = vld [vmem:[#allocation15 + $0x7d0] sm:$0xff]  ;;  %v3870_v46 = vld [vmem:[#allocation15 + $0x838] sm:$0xff]  ;;  %v3856_v62 = vld [vmem:[#allocation15 + $0x7c8] sm:$0xff] }
0x16c5   :  { %v3711_v33 = vadd.f32 %v3708_v2, %v3701_v41  ;;  %v3702_v11 = vadd.f32 %v3701_v41, %v3698_v5  ;;  %v3971_v41 = vld [vmem:[#allocation15 + $0x8d0] sm:$0xff]  ;;  %v3970_v26 = vld [vmem:[#allocation15 + $0x8c8] sm:$0xff]  ;;  %3903 = vmatpush.msra.mxu2 %v3870_v46  ;;  %v3969_v2 = vld [vmem:[#allocation15 + $0x8c0] sm:$0xff] }
0x16c6   :  { %v3716_v12 = vadd.f32 %v3713_v6, %v3470_v59  ;;  %v3707_v53 = vadd.f32 %v3704_v3, %v3387_v10  ;;  %v3715_v13 = vadd.f32 %v3712_v4, %v3469_v56  ;;  %v3706_v37 = vadd.f32 %v3703_v9, %v3386_v57  ;;  %v3742_v56 = vld [vmem:[#allocation15 + $0x7a0] sm:$0xff]  ;;  %v3869_v59 = vld [vmem:[#allocation15 + $0x830] sm:$0xff]  ;;  %v3868_v5 = vld [vmem:[#allocation15 + $0x828] sm:$0xff] }
0x16c7   :  { %v3714_v14 = vadd.f32 %v3711_v33, %v3468_v7  ;;  %v3705_v55 = vadd.f32 %v3702_v11, %v3385_v8  ;;  %v3738_v57 = vld [vmem:[#allocation15 + $0x780] sm:$0xff]  ;;  %v3854_v6 = vld [vmem:[#allocation15 + $0x7b8] sm:$0xff]  ;;  %3904 = vmatpush.msra.mxu2 %v3869_v59  ;;  %v3853_v9 = vld [vmem:[#allocation15 + $0x7b0] sm:$0xff] }
0x16c8   :  { %vm3728_vm5 = vcmp.ge.f32.partialorder %v3716_v12, 0.0  ;;  %v3731_v18 = vmul.f32 0.22916667, %v3716_v12  ;;  %vm3719_vm7 = vcmp.ge.f32.partialorder %v3707_v53, 0.0  ;;  %v3722_v38 = vmul.f32 0.22916667, %v3707_v53 }
0x16c9   :  { %vm3727_vm8 = vcmp.ge.f32.partialorder %v3715_v13, 0.0  ;;  %v3730_v50 = vmul.f32 0.22916667, %v3715_v13  ;;  %vm3718_vm4 = vcmp.ge.f32.partialorder %v3706_v37, 0.0  ;;  %v3721_v19 = vmul.f32 0.22916667, %v3706_v37  ;;  %3905 = vmatpush.msra.mxu2 %v3868_v5 }
0x16ca   :  { %v3734_v20 = vsel %vm3728_vm5, %v3716_v12, %v3731_v18  ;;  %v3725_v1 = vsel %vm3719_vm7, %v3707_v53, %v3722_v38  ;;  %v3729_v21 = vmul.f32 0.22916667, %v3714_v14  ;;  %vm3726_vm10 = vcmp.ge.f32.partialorder %v3714_v14, 0.0  ;;  %v3855_v10 = vld [vmem:[#allocation15 + $0x7c0] sm:$0xff]  ;;  %v3968_v3 = vld [vmem:[#allocation15 + $0x8b8] sm:$0xff]  ;;  %v3967_v7 = vld [vmem:[#allocation15 + $0x8b0] sm:$0xff] }
0x16cb   :  { %5514 = vmatpush.msk.msra.mxu1 %vm95_vm0, %v3734_v20  ;;  %5519 = vmatpush.msk.msra.mxu0 %vm95_vm0, %v3725_v1  ;;  %vm3717_vm14 = vcmp.ge.f32.partialorder %v3705_v55, 0.0  ;;  %v3720_v22 = vmul.f32 0.22916667, %v3705_v55  ;;  %v3733_v25 = vsel %vm3727_vm8, %v3715_v13, %v3730_v50  ;;  %v3724_v31 = vsel %vm3718_vm4, %v3706_v37, %v3721_v19  ;;  %v3867_v4 = vld [vmem:[#allocation15 + $0x820] sm:$0xff]  ;;  %v3866_v8 = vld [vmem:[#allocation15 + $0x818] sm:$0xff]  ;;  %v3852_v33 = vld [vmem:[#allocation15 + $0x7a8] sm:$0xff] }
0x16cc   :  { %v3732_v23 = vsel %vm3726_vm10, %v3714_v14, %v3729_v21  ;;  %3906 = vmatpush.msra.mxu2 %v3867_v4  ;;  %v3966_v11 = vld [vmem:[#allocation15 + $0x8a8] sm:$0xff]  ;;  %v3965_v12 = vld [vmem:[#allocation15 + $0x8a0] sm:$0xff]  ;;  %v3964_v53 = vld [vmem:[#allocation15 + $0x898] sm:$0xff] }
0x16cd   :  { %3772 = vmatpush.msra.mxu1 %v3733_v25  ;;  %3816 = vmatpush.msra.mxu0 %v3724_v31  ;;  %v3723_v24 = vsel %vm3717_vm14, %v3705_v55, %v3720_v22  ;;  %v3963_v13 = vld [vmem:[#allocation15 + $0x890] sm:$0xff]  ;;  %v3962_v37 = vld [vmem:[#allocation15 + $0x888] sm:$0xff] }
0x16ce   :  { %3907 = vmatpush.msra.mxu2 %v3866_v8  ;;  %v4029_v5 = vld [vmem:[#allocation15 + $0x910] sm:$0xff] }
0x16cf   :  { %3773 = vmatpush.msra.mxu1 %v3732_v23  ;;  %3817 = vmatpush.msra.mxu0 %v3723_v24 }
0x16d0   :  { %5515 = vmatmul.msk.f32.vlgmr.msra.gmra.mxu1 %vm2915_vm11, %v3739_v32  ;;  %5520 = vmatmul.msk.f32.vlgmr.msra.gmra.mxu0 %vm2915_vm11, %v3735_v16 }
0x16d1   :  { %3935 = vmatpush.msrb.mxu1 %v3865_v30  ;;  %3990 = vmatpush.msrb.mxu0 %v3975_v29 }
0x16d3   :  { %3936 = vmatpush.msrb.mxu1 %v3864_v35  ;;  %3991 = vmatpush.msrb.mxu0 %v3974_v45 }
0x16d5   :  { %3937 = vmatpush.msrb.mxu1 %v3863_v34  ;;  %3992 = vmatpush.msrb.mxu0 %v3973_v17 }
0x16d7   :  { %3938 = vmatpush.msrb.mxu1 %v3862_v47  ;;  %3993 = vmatpush.msrb.mxu0 %v3972_v42 }
0x16d8   :  { %5516 = vmatmul.msk.f32.gmra.mxu1 %vm2915_vm11, %v3740_v48  ;;  %5521 = vmatmul.msk.f32.gmra.mxu0 %vm2915_vm11, %v3736_v40 }
0x16d9   :  { %3939 = vmatpush.msrb.mxu1 %v3861_v15  ;;  %3994 = vmatpush.msrb.mxu0 %v3971_v41 }
0x16db   :  { %3940 = vmatpush.msrb.mxu1 %v3860_v43  ;;  %3995 = vmatpush.msrb.mxu0 %v3970_v26 }
0x16dd   :  { %3941 = vmatpush.msrb.mxu1 %v3859_v54  ;;  %3996 = vmatpush.msrb.mxu0 %v3969_v2  ;;  %v4030_v2 = vld [vmem:[#allocation15 + $0x918] sm:$0xf] }
0x16df   :  { %3942 = vmatpush.msrb.mxu1 %v3858_v63  ;;  %3997 = vmatpush.msrb.mxu0 %v3968_v3  ;;  %v4027_v3 = vld [vmem:[#allocation15 + $0x900] sm:$0xff] }
0x16e0   :  { %5517 = vmatmul.msk.f32.gmra.mxu1 %vm2915_vm11, %v3741_v51  ;;  %5522 = vmatmul.msk.f32.gmra.mxu0 %vm2915_vm11, %v3737_v52 }
0x16e1   :  { %3943 = vmatpush.msrb.mxu1 %v3857_v60  ;;  %3998 = vmatpush.msrb.mxu0 %v3967_v7 }
0x16e3   :  { %3944 = vmatpush.msrb.mxu1 %v3856_v62  ;;  %3999 = vmatpush.msrb.mxu0 %v3966_v11 }
0x16e5   :  { %3945 = vmatpush.msrb.mxu1 %v3855_v10  ;;  %4000 = vmatpush.msrb.mxu0 %v3965_v12  ;;  %v6346_v10 = vld [vmem:[#allocation15 + $0x9b8] sm:$0x1] }
0x16e7   :  { %3946 = vmatpush.msrb.mxu1 %v3854_v6  ;;  %4001 = vmatpush.msrb.mxu0 %v3964_v53  ;;  %v4028_v6 = vld [vmem:[#allocation15 + $0x908] sm:$0xff] }
0x16e8   :  { %5518 = vmatmul.msk.f32.gmra.mxu1 %vm2915_vm11, %v3742_v56  ;;  %5523 = vmatmul.msk.f32.gmra.mxu0 %vm2915_vm11, %v3738_v57  ;;  %v5655_v56 = vld [vmem:[#allocation15 + $0x8f8] ss:$0 sm:$0xff] }
0x16e9   :  { %3947 = vmatpush.msrb.mxu1 %v3853_v9  ;;  %4002 = vmatpush.msrb.mxu0 %v3963_v13  ;;  %v4031_v13 = vld [vmem:[#allocation15 + $0x920] sm:$0x3] }
0x16ea   :  { %5544 = vmatpush.msk.msrb.mxu2 %vm95_vm0, %v4031_v13 }
0x16eb   :  { %3948 = vmatpush.msrb.mxu1 %v3852_v33  ;;  %4003 = vmatpush.msrb.mxu0 %v3962_v37 }
0x174d   :  { %v3775_v14 = vpop.f32.mrf.mxu1  ;;  %v3819_v55 = vpop.f32.mrf.mxu0 }
0x174e   :  { %v3820_v18 = vadd.f32 %v3819_v55, %v3775_v14 }
0x1750   :  { %3831 = vst.msk [vmem:[#allocation10 + $0x8] sm:$0xff] %vm74_vm9, %v3820_v18 }
0x1755   :  { %v3778_v38 = vpop.f32.mrf.mxu1  ;;  %v3822_v50 = vpop.f32.mrf.mxu0 }
0x1756   :  { %v3823_v19 = vadd.f32 %v3822_v50, %v3778_v38 }
0x1757   :  { %v6284_v20 = vld [vmem:[#allocation10 + $0x8] sm:$0xff] }
0x1758   :  { %v6286_v1 = vld [vmem:[#allocation10 + $0x7] sm:$0xff]  ;;  %3832 = vst.msk [vmem:[#allocation10 + $0x10] sm:$0xff] %vm74_vm9, %v3823_v19  ;;  %5524 = vmatmul.msk.f32.vlgmr.msra.gmra.mxu2 %vm74_vm9, %v6284_v20 }
0x1759   :  { %5528 = vmatmul.msk.f32.vlgmr.msrb.gmra.mxu1 %vm74_vm9, %v6286_v1 }
0x175d   :  { %v3781_v21 = vpop.f32.mrf.mxu1  ;;  %v3825_v0 = vpop.f32.mrf.mxu0 }
0x175e   :  { %v3826_v22 = vadd.f32 %v3825_v0, %v3781_v21 }
0x175f   :  { %v6293_v28 = vld [vmem:[#allocation10 + $0x10] sm:$0xff] }
0x1760   :  { %v6295_v25 = vld [vmem:[#allocation10 + $0xf] sm:$0xff]  ;;  %3833 = vst.msk [vmem:[#allocation10 + $0x18] sm:$0xff] %vm74_vm9, %v3826_v22  ;;  %5525 = vmatmul.msk.f32.gmra.mxu2 %vm74_vm9, %v6293_v28 }
0x1761   :  { %v6297_v31 = vld [vmem:[#allocation10 + $0x9] sm:$0xff]  ;;  %5529 = vmatmul.msk.f32.gmra.mxu1 %vm74_vm9, %v6295_v25 }
0x1762   :  { %5532 = vmatmul.msk.f32.vlgmr.msrb.gmra.mxu0 %vm74_vm9, %v6297_v31 }
0x1765   :  { %v3784_v32 = vpop.f32.mrf.mxu1  ;;  %v3828_v16 = vpop.f32.mrf.mxu0 }
0x1766   :  { %v3829_v23 = vadd.f32 %v3828_v16, %v3784_v32  ;;  %v4133_v16 = vld [vmem:[#allocation15 + $0x928] sm:$0x1] }
0x1767   :  { %v6306_v24 = vld [vmem:[#allocation10 + $0x18] sm:$0xff] }
0x1768   :  { %v6308_v30 = vld [vmem:[#allocation10 + $0x17] sm:$0xff]  ;;  %3834 = vst.msk [vmem:[#allocation10 + $0x20] sm:$0xff] %vm74_vm9, %v3829_v23  ;;  %5526 = vmatmul.msk.f32.gmra.mxu2 %vm74_vm9, %v6306_v24 }
0x1769   :  { %v6310_v27 = vld [vmem:[#allocation10 + $0x11] sm:$0xff]  ;;  %5530 = vmatmul.msk.f32.gmra.mxu1 %vm74_vm9, %v6308_v30 }
0x176a   :  { %5533 = vmatmul.msk.f32.gmra.mxu0 %vm74_vm9, %v6310_v27 }
0x176f   :  { %v6319_v29 = vld [vmem:[#allocation10 + $0x20] sm:$0xff] }
0x1770   :  { %v6321_v35 = vld [vmem:[#allocation10 + $0x1f] sm:$0xff]  ;;  %5527 = vmatmul.msk.f32.gmra.mxu2 %vm74_vm9, %v6319_v29 }
0x1771   :  { %v6323_v61 = vld [vmem:[#allocation10 + $0x19] sm:$0xff]  ;;  %5531 = vmatmul.msk.f32.gmra.mxu1 %vm74_vm9, %v6321_v35  ;;  %v6331_v45 = vld [vmem:[#allocation10 + $0x21] sm:$0xff] }
0x1772   :  { %5534 = vmatmul.msk.f32.gmra.mxu0 %vm74_vm9, %v6323_v61 }
0x177a   :  { %5535 = vmatmul.msk.f32.gmra.mxu0 %vm74_vm9, %v6331_v45 }
0x17d6   :  { %v3950_v34 = vpop.f32.mrf.mxu1 }
0x17db   :  { %v3909_v36 = vpop.f32.mrf.mxu2 }
0x17dc   :  { %v3951_v52 = vadd.f32 %v3950_v34, %v3909_v36 }
0x17de   :  { %v3953_v47 = vpop.f32.mrf.mxu1 }
0x17df   :  { %v4005_v17 = vpop.f32.mrf.mxu0 }
0x17e0   :  { %v4017_v46 = vadd.f32 %v4005_v17, %v3951_v52  ;;  %v4146_v17 = vld [vmem:[#allocation15 + $0x930] sm:$0x1]  ;;  %v4367_v52 = vld [vmem:[#allocation17 + $0x7c0] sm:$0xff] }
0x17e2   :  { %v6343_v59 = vadd.f32 %v5655_v56, %v4017_v46  ;;  %v4362_v46 = vld [vmem:[#allocation17 + $0x798] sm:$0xff] }
0x17e3   :  { %v3912_v49 = vpop.f32.mrf.mxu2 }
0x17e4   :  { %v3954_v63 = vadd.f32 %v3953_v47, %v3912_v49  ;;  %v4081_v8 = vmul.f32 %v6343_v59, %v6343_v59 }
0x17e6   :  { %v3956_v40 = vpop.f32.mrf.mxu1 }
0x17e7   :  { %v4008_v48 = vpop.f32.mrf.mxu0 }
0x17e8   :  { %v4018_v60 = vadd.f32 %v4008_v48, %v3954_v63  ;;  %v4268_v48 = vld [vmem:[#allocation17 + $0x790] sm:$0xf]  ;;  %v4266_v63 = vld [vmem:[#allocation17 + $0x780] sm:$0xff] }
0x17ea   :  { %v6340_v26 = vadd.f32 %v5655_v56, %v4018_v60  ;;  %v4366_v60 = vld [vmem:[#allocation17 + $0x7b8] sm:$0xff] }
0x17eb   :  { %v3915_v15 = vpop.f32.mrf.mxu2 }
0x17ec   :  { %v3957_v42 = vadd.f32 %v3956_v40, %v3915_v15  ;;  %v4082_v7 = vmul.f32 %v6340_v26, %v6340_v26  ;;  %v4264_v40 = vld [vmem:[#allocation17 + $0x770] sm:$0xf] }
0x17ed   :  { %v4369_v15 = vld [vmem:[#allocation17 + $0x7d0] sm:$0xf]  ;;  %5551 = vmatpush.msk.msra.mxu1 %vm1836_vm1, %v4264_v40  ;;  %v4550_v40 = vld [vmem:[#allocation17 + $0x900] sm:$0xff] }
0x17ee   :  { %v3959_v43 = vpop.f32.mrf.mxu1  ;;  %5556 = vmatpush.msk.msra.mxu2 %vm1836_vm1, %v4369_v15 }
0x17ef   :  { %v4011_v39 = vpop.f32.mrf.mxu0 }
0x17f0   :  { %v4019_v57 = vadd.f32 %v4011_v39, %v3957_v42  ;;  %v4365_v39 = vld [vmem:[#allocation17 + $0x7b0] sm:$0xf]  ;;  %v4267_v42 = vld [vmem:[#allocation17 + $0x788] sm:$0xff] }
0x17f1   :  { %5561 = vmatpush.msk.msra.mxu0 %vm1836_vm1, %v4365_v39 }
0x17f2   :  { %v6337_v62 = vadd.f32 %v5655_v56, %v4019_v57  ;;  %v4265_v57 = vld [vmem:[#allocation17 + $0x778] sm:$0xff] }
0x17f3   :  { %v3918_v44 = vpop.f32.mrf.mxu2 }
0x17f4   :  { %v3960_v54 = vadd.f32 %v3959_v43, %v3918_v44  ;;  %v4083_v9 = vmul.f32 %v6337_v62, %v6337_v62  ;;  %v4263_v43 = vld [vmem:[#allocation17 + $0x768] sm:$0xff] }
0x17f5   :  { %v4368_v44 = vld [vmem:[#allocation17 + $0x7c8] sm:$0xff]  ;;  %4341 = vmatpush.msra.mxu1 %v4263_v43 }
0x17f6   :  { %4398 = vmatpush.msra.mxu2 %v4368_v44  ;;  %v4563_v43 = vld [vmem:[#allocation17 + $0x968] sm:$0xff]  ;;  %v4471_v44 = vld [vmem:[#allocation17 + $0x880] sm:$0xff] }
0x17f7   :  { %v4014_v51 = vpop.f32.mrf.mxu0 }
0x17f8   :  { %v4020_v58 = vadd.f32 %v4014_v51, %v3960_v54  ;;  %v4364_v54 = vld [vmem:[#allocation17 + $0x7a8] sm:$0xff]  ;;  %v4262_v51 = vld [vmem:[#allocation17 + $0x760] sm:$0xff]  ;;  %4399 = vmatpush.msra.mxu2 %v4367_v52 }
0x17f9   :  { %4430 = vmatpush.msra.mxu0 %v4364_v54  ;;  %4342 = vmatpush.msra.mxu1 %v4262_v51 }
0x17fa   :  { %v6335_v41 = vadd.f32 %v5655_v56, %v4020_v58  ;;  %v4363_v56 = vld [vmem:[#allocation17 + $0x7a0] sm:$0xff]  ;;  %v4261_v58 = vld [vmem:[#allocation17 + $0x758] sm:$0xff]  ;;  %4400 = vmatpush.msra.mxu2 %v4366_v60  ;;  %v4233_v60 = vpop.permute.xlu0 %4232 }
0x17fb   :  { %4431 = vmatpush.msra.mxu0 %v4363_v56  ;;  %4343 = vmatpush.msra.mxu1 %v4261_v58  ;;  %v4457_v56 = vld [vmem:[#allocation17 + $0x810] sm:$0xff] }
0x17fc   :  { %4047 = vmatpush.msra.mxu3 %v6335_v41  ;;  %v4084_v4 = vmul.f32 %v6335_v41, %v6335_v41  ;;  %v4548_v58 = vld [vmem:[#allocation17 + $0x8f0] sm:$0xff] }
0x17fd   :  { %4432 = vmatpush.msra.mxu0 %v4362_v46  ;;  %v4228_v46 = vpop.permute.xlu2 %4227 }
0x17fe   :  { %4048 = vmatpush.msra.mxu3 %v6337_v62 }
0x1800   :  { %4049 = vmatpush.msra.mxu3 %v6340_v26 }
0x1802   :  { %4050 = vmatpush.msra.mxu3 %v6343_v59 }
0x1803   :  { %5536 = vmatmul.msk.f32.vlgmr.msra.gmra.mxu3 %vm67_vm12, %v6346_v10 }
0x1804   :  { %5537 = vmatpush.msk.msrb.mxu3 %vm1836_vm1, %v4030_v2 }
0x1806   :  { %4074 = vmatpush.msrb.mxu3 %v4029_v5 }
0x1808   :  { %4075 = vmatpush.msrb.mxu3 %v4028_v6 }
0x180a   :  { %4076 = vmatpush.msrb.mxu3 %v4027_v3 }
0x180c   :  { %4097 = vmatpush.msra.mxu3 %v4084_v4  ;;  %v4477_v4 = vld [vmem:[#allocation17 + $0x8b0] sm:$0xff] }
0x180e   :  { %4098 = vmatpush.msra.mxu3 %v4083_v9  ;;  %v4463_v9 = vld [vmem:[#allocation17 + $0x840] sm:$0xff] }
0x1810   :  { %4099 = vmatpush.msra.mxu3 %v4082_v7  ;;  %v4568_v7 = vld [vmem:[#allocation17 + $0x990] sm:$0xff] }
0x1812   :  { %4100 = vmatpush.msra.mxu3 %v4081_v8  ;;  %v4554_v8 = vld [vmem:[#allocation17 + $0x920] sm:$0xff] }
0x1886   :  { %v4052_v33 = vpop.f32.mrf.mxu3 }
0x1887   :  { %5538 = vmatmul.msk.f32.vlgmr.msrb.gmra.mxu3 %vm77_vm13, %v4052_v33 }
0x1888   :  { %5540 = vmatpush.msk.msrb.mxu3 %vm1836_vm1, %v4030_v2  ;;  %v4478_v2 = vld [vmem:[#allocation17 + $0x8b8] sm:$0xff] }
0x188a   :  { %4121 = vmatpush.msrb.mxu3 %v4029_v5  ;;  %v4464_v5 = vld [vmem:[#allocation17 + $0x848] sm:$0xff] }
0x188b   :  { %4510 = vmatpush.msrb.mxu1 %v4464_v5 }
0x188c   :  { %4122 = vmatpush.msrb.mxu3 %v4028_v6  ;;  %v4569_v6 = vld [vmem:[#allocation17 + $0x998] sm:$0xff] }
0x188d   :  { %4511 = vmatpush.msrb.mxu1 %v4463_v9  ;;  %v4561_v9 = vld [vmem:[#allocation17 + $0x958] sm:$0xff] }
0x188e   :  { %4123 = vmatpush.msrb.mxu3 %v4027_v3  ;;  %v4555_v3 = vld [vmem:[#allocation17 + $0x928] sm:$0xff] }
0x188f   :  { %5539 = vmatmul.msk.f32.vlgmr.msra.gmra.mxu3 %vm67_vm12, %v6346_v10  ;;  %4601 = vmatpush.msrb.mxu0 %v4555_v3  ;;  %v4470_v3 = vld [vmem:[#allocation17 + $0x878] sm:$0xff] }
0x1890   :  { %5542 = vmatpush.msk.msra.mxu3 %vm95_vm0, %v4031_v13 }
0x1891   :  { %4602 = vmatpush.msrb.mxu0 %v4554_v8 }
0x190a   :  { %v4078_v11 = vpop.f32.mrf.mxu3 }
0x190b   :  { %v4128_v53 = vmul.f32 0.0025510204, %v4078_v11  ;;  %v4476_v11 = vld [vmem:[#allocation17 + $0x8a8] sm:$0xff] }
0x190d   :  { %v4130_v14 = vmul.f32 %v4128_v53, %v4128_v53 }
0x1912   :  { %v4102_v12 = vpop.f32.mrf.mxu3 }
0x1913   :  { %5541 = vmatmul.msk.f32.vlgmr.msrb.gmra.mxu3 %vm77_vm13, %v4102_v12  ;;  %v4462_v12 = vld [vmem:[#allocation17 + $0x838] sm:$0xff] }
0x1914   :  { %5546 = vmatpush.msk.msrb.mxu3 %vm1836_vm1, %v4268_v48  ;;  %4512 = vmatpush.msrb.mxu1 %v4462_v12  ;;  %v4564_v48 = vld [vmem:[#allocation17 + $0x970] sm:$0xff] }
0x1916   :  { %4297 = vmatpush.msrb.mxu3 %v4267_v42 }
0x1918   :  { %4298 = vmatpush.msrb.mxu3 %v4266_v63 }
0x191a   :  { %4299 = vmatpush.msrb.mxu3 %v4265_v57  ;;  %v4562_v57 = vld [vmem:[#allocation17 + $0x960] sm:$0xff] }
0x1996   :  { %v4125_v37 = vpop.f32.mrf.mxu3 }
0x1997   :  { %v4129_v55 = vmul.f32 0.0025510204, %v4125_v37  ;;  %v4553_v37 = vld [vmem:[#allocation17 + $0x918] sm:$0xff] }
0x1998   :  { %4603 = vmatpush.msrb.mxu0 %v4553_v37 }
0x1999   :  { %v4131_v18 = vsub.f32 %v4129_v55, %v4130_v14  ;;  %v4475_v14 = vld [vmem:[#allocation17 + $0x8a0] sm:$0xff]  ;;  %v4461_v55 = vld [vmem:[#allocation17 + $0x830] sm:$0xff] }
0x199a   :  { %4513 = vmatpush.msrb.mxu1 %v4461_v55  ;;  %v4560_v55 = vld [vmem:[#allocation17 + $0x950] sm:$0xff] }
0x199b   :  { %v4132_v38 = vmax.f32 %v4131_v18, 0.0  ;;  %v4566_v18 = vld [vmem:[#allocation17 + $0x980] sm:$0xff] }
0x199d   :  { %v4134_v50 = vadd.f32 1e-05, %v4132_v38  ;;  %v4552_v38 = vld [vmem:[#allocation17 + $0x910] sm:$0xff] }
0x199e   :  { %4604 = vmatpush.msrb.mxu0 %v4552_v38  ;;  %v4468_v38 = vld [vmem:[#allocation17 + $0x868] sm:$0xff] }
0x199f   :  { %5675 = vrsqrt.f32 %v4134_v50  ;;  %vm4141_vm15 = vweird.f32 %v4134_v50 }
0x19a5   :  { %v5676_v19 = vpop.eup %5675 }
0x19a6   :  { %v4136_v21 = vmul.f32 %v5676_v19, %v4134_v50  ;;  %vm4142_vm11 = vweird.f32 %v5676_v19  ;;  %v4474_v50 = vld [vmem:[#allocation17 + $0x898] sm:$0xff] }
0x19a7   :  { %vm4143_vm3 = vmor %vm4141_vm15, %vm4142_vm11 }
0x19a8   :  { %v4137_v0 = vmul.f32 %v5676_v19, %v4136_v21  ;;  %v4460_v21 = vld [vmem:[#allocation17 + $0x828] sm:$0xff] }
0x19a9   :  { %4514 = vmatpush.msrb.mxu1 %v4460_v21  ;;  %v4545_v21 = vld [vmem:[#allocation17 + $0x8d8] sm:$0xff] }
0x19aa   :  { %v4138_v22 = vmul.f32 0.5, %v4137_v0  ;;  %v4565_v0 = vld [vmem:[#allocation17 + $0x978] sm:$0xff] }
0x19ac   :  { %v4139_v32 = vsub.f32 1.5, %v4138_v22 }
0x19ae   :  { %v4140_v23 = vmul.f32 %v5676_v19, %v4139_v32 }
0x19b0   :  { %v4144_v34 = vsel %vm4143_vm3, %v5676_v19, %v4140_v23  ;;  %v6373_v19 = vpop.permute.xlu1 %4222 }
0x19b1   :  { %v4145_v36 = vmul.f32 %v4144_v34, %v4133_v16  ;;  %v4551_v16 = vld [vmem:[#allocation17 + $0x908] sm:$0xff] }
0x19b2   :  { %4605 = vmatpush.msrb.mxu0 %v4551_v16  ;;  %v4544_v16 = vld [vmem:[#allocation17 + $0x8d0] sm:$0xff] }
0x19b3   :  { %v4147_v47 = vmul.f32 %v4145_v36, %v4128_v53  ;;  %5543 = vmatmul.msk.f32.vlgmr.msra.gmra.mxu3 %vm120_vm2, %v4145_v36  ;;  %v4567_v53 = vld [vmem:[#allocation17 + $0x988] sm:$0xff] }
0x19b4   :  { %4481 = vmatpush.msra.mxu3 %v4478_v2  ;;  %4606 = vmatpush.msrb.mxu0 %v4550_v40  ;;  %v4465_v40 = vld [vmem:[#allocation17 + $0x850] sm:$0xff] }
0x19b5   :  { %v4148_v49 = vsub.f32 %v4146_v17, %v4147_v47  ;;  %v4473_v47 = vld [vmem:[#allocation17 + $0x890] sm:$0xff] }
0x19b6   :  { %4482 = vmatpush.msra.mxu3 %v4477_v4  ;;  %v4456_v4 = vld [vmem:[#allocation17 + $0x808] sm:$0xff] }
0x19b7   :  { %5545 = vmatmul.msk.f32.vlgmr.msrb.gmra.mxu2 %vm120_vm2, %v4148_v49  ;;  %v4459_v49 = vld [vmem:[#allocation17 + $0x820] sm:$0xff] }
0x19b8   :  { %4572 = vmatpush.msrb.mxu2 %v4569_v6  ;;  %4483 = vmatpush.msra.mxu3 %v4476_v11 }
0x19b9   :  { %4515 = vmatpush.msrb.mxu1 %v4459_v49 }
0x19ba   :  { %4573 = vmatpush.msrb.mxu2 %v4568_v7  ;;  %4484 = vmatpush.msra.mxu3 %v4475_v14  ;;  %v4238_v7 = vpop.permute.xlu1 %4237  ;;  %v4455_v14 = vld [vmem:[#allocation17 + $0x800] sm:$0xff] }
0x19bc   :  { %4574 = vmatpush.msrb.mxu2 %v4567_v53  ;;  %4485 = vmatpush.msra.mxu3 %v4474_v50  ;;  %v4547_v53 = vld [vmem:[#allocation17 + $0x8e8] sm:$0xff]  ;;  %v4454_v50 = vld [vmem:[#allocation17 + $0x7f8] sm:$0xff] }
0x19be   :  { %4575 = vmatpush.msrb.mxu2 %v4566_v18  ;;  %4486 = vmatpush.msra.mxu3 %v4473_v47  ;;  %v4546_v18 = vld [vmem:[#allocation17 + $0x8e0] sm:$0xff]  ;;  %v4557_v47 = vld [vmem:[#allocation17 + $0x938] sm:$0xff] }
0x19c0   :  { %4576 = vmatpush.msrb.mxu2 %v4565_v0  ;;  %v4467_v0 = vld [vmem:[#allocation17 + $0x860] sm:$0xff] }
0x19c2   :  { %4577 = vmatpush.msrb.mxu2 %v4564_v48  ;;  %v4543_v48 = vld [vmem:[#allocation17 + $0x8c8] sm:$0xff] }
0x19c4   :  { %4578 = vmatpush.msrb.mxu2 %v4563_v43 }
0x19c6   :  { %4579 = vmatpush.msrb.mxu2 %v4562_v57 }
0x19c8   :  { %4580 = vmatpush.msrb.mxu2 %v4561_v9 }
0x19ca   :  { %4581 = vmatpush.msrb.mxu2 %v4560_v55 }
0x1a36   :  { %v4172_v33 = vpop.f32.mrf.mxu3 }
0x1a37   :  { %v4175_v13 = vperm.slane %v4172_v33, 0 }
0x1a39   :  { %v4176_v22 = vmul.f32 %v4175_v13, %v6343_v59  ;;  %v4177_v23 = vmul.f32 %v4175_v13, %v6340_v26  ;;  %v4178_v34 = vmul.f32 %v4175_v13, %v6337_v62  ;;  %v4179_v36 = vmul.f32 %v4175_v13, %v6335_v41  ;;  %v4472_v26 = vld [vmem:[#allocation17 + $0x888] sm:$0xff]  ;;  %v4458_v62 = vld [vmem:[#allocation17 + $0x818] sm:$0xff]  ;;  %v4469_v13 = vld [vmem:[#allocation17 + $0x870] sm:$0xff] }
0x1a3a   :  { %v4200_v32 = vpop.f32.mrf.mxu2  ;;  %v4549_v41 = vld [vmem:[#allocation17 + $0x8f8] sm:$0xff]  ;;  %4487 = vmatpush.msra.mxu3 %v4472_v26  ;;  %4516 = vmatpush.msrb.mxu1 %v4458_v62 }
0x1a3b   :  { %v4203_v17 = vperm.slane %v4200_v32, 0  ;;  %4607 = vmatpush.msrb.mxu0 %v4549_v41  ;;  %v4558_v32 = vld [vmem:[#allocation17 + $0x940] sm:$0xff] }
0x1a3c   :  { %4488 = vmatpush.msra.mxu3 %v4471_v44  ;;  %4517 = vmatpush.msrb.mxu1 %v4457_v56 }
0x1a3d   :  { %v4204_v59 = vadd.f32 %v4203_v17, %v4176_v22  ;;  %v4205_v15 = vadd.f32 %v4203_v17, %v4177_v23  ;;  %v4206_v39 = vadd.f32 %v4203_v17, %v4178_v34  ;;  %v4207_v42 = vadd.f32 %v4203_v17, %v4179_v36  ;;  %4608 = vmatpush.msrb.mxu0 %v4548_v58  ;;  %v4453_v22 = vld [vmem:[#allocation17 + $0x7f0] sm:$0xff]  ;;  %v4466_v23 = vld [vmem:[#allocation17 + $0x858] sm:$0xff]  ;;  %v4452_v34 = vld [vmem:[#allocation17 + $0x7e8] sm:$0xff] }
0x1a3e   :  { %4489 = vmatpush.msra.mxu3 %v4470_v3  ;;  %4518 = vmatpush.msrb.mxu1 %v4456_v4 }
0x1a3f   :  { %vm4208_vm0 = vcmp.ge.f32.partialorder %v4204_v59, 0.0  ;;  %vm4209_vm2 = vcmp.ge.f32.partialorder %v4205_v15, 0.0  ;;  %vm4210_vm5 = vcmp.ge.f32.partialorder %v4206_v39, 0.0  ;;  %vm4211_vm7 = vcmp.ge.f32.partialorder %v4207_v42, 0.0  ;;  %4609 = vmatpush.msrb.mxu0 %v4547_v53  ;;  %v4644_v53 = vld [vmem:[#allocation15 + $0x998] sm:$0xff] }
0x1a40   :  { %v4212_v54 = vmul.f32 0.22916667, %v4204_v59  ;;  %v4213_v63 = vmul.f32 0.22916667, %v4205_v15  ;;  %v4214_v51 = vmul.f32 0.22916667, %v4206_v39  ;;  %4490 = vmatpush.msra.mxu3 %v4469_v13  ;;  %4519 = vmatpush.msrb.mxu1 %v4455_v14 }
0x1a41   :  { %v4215_v52 = vmul.f32 0.22916667, %v4207_v42  ;;  %4610 = vmatpush.msrb.mxu0 %v4546_v18 }
0x1a42   :  { %v4216_v2 = vsel %vm4208_vm0, %v4204_v59, %v4212_v54  ;;  %v4217_v5 = vsel %vm4209_vm2, %v4205_v15, %v4213_v63  ;;  %v4218_v6 = vsel %vm4210_vm5, %v4206_v39, %v4214_v51  ;;  %4491 = vmatpush.msra.mxu3 %v4468_v38  ;;  %4520 = vmatpush.msrb.mxu1 %v4454_v50  ;;  %v4451_v59 = vld [vmem:[#allocation17 + $0x7e0] sm:$0xff]  ;;  %v4556_v15 = vld [vmem:[#allocation17 + $0x930] sm:$0xff]  ;;  %v4643_v38 = vld [vmem:[#allocation15 + $0x990] sm:$0xff] }
0x1a43   :  { %v4219_v8 = vsel %vm4211_vm7, %v4207_v42, %v4215_v52  ;;  %v4240_v33 = vmul.f32 %v6373_v19, %v4216_v2  ;;  %v4241_v11 = vmul.f32 %v4228_v46, %v4217_v5  ;;  %v4242_v12 = vmul.f32 %v4233_v60, %v4218_v6  ;;  %v4559_v19 = vld [vmem:[#allocation17 + $0x948] sm:$0xff]  ;;  %4611 = vmatpush.msrb.mxu0 %v4545_v21  ;;  %v4542_v39 = vld [vmem:[#allocation17 + $0x8c0] sm:$0xff] }
0x1a44   :  { %v4243_v37 = vmul.f32 %v4238_v7, %v4219_v8  ;;  %4582 = vmatpush.msrb.mxu2 %v4559_v19  ;;  %4492 = vmatpush.msra.mxu3 %v4467_v0 }
0x1a45   :  { %4244 = vst.msk [vmem:[#allocation11 + $0x8] sm:$0xff] %vm77_vm13, %v4240_v33  ;;  %4521 = vmatpush.msrb.mxu1 %v4453_v22  ;;  %4612 = vmatpush.msrb.mxu0 %v4544_v16  ;;  %v4642_v22 = vld [vmem:[#allocation15 + $0x988] sm:$0xff] }
0x1a46   :  { %4245 = vst.msk [vmem:[#allocation11 + $0x10] sm:$0xff] %vm77_vm13, %v4241_v11  ;;  %4583 = vmatpush.msrb.mxu2 %v4558_v32  ;;  %4493 = vmatpush.msra.mxu3 %v4466_v23 }
0x1a47   :  { %4246 = vst.msk [vmem:[#allocation11 + $0x18] sm:$0xff] %vm77_vm13, %v4242_v12  ;;  %4522 = vmatpush.msrb.mxu1 %v4452_v34  ;;  %4613 = vmatpush.msrb.mxu0 %v4543_v48  ;;  %v4645_v12 = vld [vmem:[#allocation15 + $0x9a0] sm:$0xff] }
0x1a48   :  { %4247 = vst.msk [vmem:[#allocation11 + $0x20] sm:$0xff] %vm77_vm13, %v4243_v37  ;;  %4584 = vmatpush.msrb.mxu2 %v4557_v47  ;;  %4494 = vmatpush.msra.mxu3 %v4465_v40 }
0x1a49   :  { %4523 = vmatpush.msrb.mxu1 %v4451_v59  ;;  %4614 = vmatpush.msrb.mxu0 %v4542_v39  ;;  %v4640_v59 = vld [vmem:[#allocation15 + $0x978] sm:$0xff] }
0x1a4a   :  { %4585 = vmatpush.msrb.mxu2 %v4556_v15 }
0x1a4c   :  { %v4252_v36 = vld [vmem:[#allocation11 + $0x8] sm:$0xff] }
0x1a4d   :  { %v4248_v17 = vld [vmem:[#allocation11 + $0x7] sm:$0xff]  ;;  %5547 = vmatmul.msk.f32.vlgmr.msrb.gmra.mxu3 %vm77_vm13, %v4252_v36  ;;  %5562 = vmatmul.msk.f32.vlgmr.msra.gmra.mxu0 %vm77_vm13, %v4252_v36  ;;  %v4253_v42 = vld [vmem:[#allocation11 + $0x10] sm:$0xff] }
0x1a4e   :  { %5552 = vmatmul.msk.f32.vlgmr.msra.gmra.mxu1 %vm77_vm13, %v4248_v17  ;;  %v4256_v49 = vld [vmem:[#allocation11 + $0x9] sm:$0xff]  ;;  %v4257_v62 = vld [vmem:[#allocation11 + $0x11] sm:$0xff] }
0x1a4f   :  { %5557 = vmatmul.msk.f32.vlgmr.msra.gmra.mxu2 %vm77_vm13, %v4256_v49  ;;  %v4249_v26 = vld [vmem:[#allocation11 + $0xf] sm:$0xff]  ;;  %v4254_v43 = vld [vmem:[#allocation11 + $0x18] sm:$0xff]  ;;  %v4255_v54 = vld [vmem:[#allocation11 + $0x20] sm:$0xff] }
0x1a50   :  { %v4250_v41 = vld [vmem:[#allocation11 + $0x17] sm:$0xff]  ;;  %v4251_v63 = vld [vmem:[#allocation11 + $0x1f] sm:$0xff]  ;;  %4692 = vmatpush.msra.mxu2 %v4645_v12 }
0x1a51   :  { %v4258_v44 = vld [vmem:[#allocation11 + $0x19] sm:$0xff]  ;;  %v4259_v51 = vld [vmem:[#allocation11 + $0x21] sm:$0xff] }
0x1a52   :  { %4693 = vmatpush.msra.mxu2 %v4644_v53  ;;  %v4641_v49 = vld [vmem:[#allocation15 + $0x980] sm:$0xff] }
0x1a54   :  { %4694 = vmatpush.msra.mxu2 %v4643_v38 }
0x1a55   :  { %5548 = vmatmul.msk.f32.gmra.mxu3 %vm77_vm13, %v4253_v42  ;;  %5563 = vmatmul.msk.f32.gmra.mxu0 %vm77_vm13, %v4253_v42 }
0x1a56   :  { %5553 = vmatmul.msk.f32.gmra.mxu1 %vm77_vm13, %v4249_v26  ;;  %4695 = vmatpush.msra.mxu2 %v4642_v22  ;;  %v4639_v26 = vld [vmem:[#allocation15 + $0x970] sm:$0xff] }
0x1a57   :  { %5558 = vmatmul.msk.f32.gmra.mxu2 %vm77_vm13, %v4257_v62 }
0x1a58   :  { %4696 = vmatpush.msra.mxu2 %v4641_v49 }
0x1a5a   :  { %4697 = vmatpush.msra.mxu2 %v4640_v59 }
0x1a5c   :  { %4698 = vmatpush.msra.mxu2 %v4639_v26 }
0x1a5d   :  { %5549 = vmatmul.msk.f32.gmra.mxu3 %vm77_vm13, %v4254_v43  ;;  %5564 = vmatmul.msk.f32.gmra.mxu0 %vm77_vm13, %v4254_v43 }
0x1a5e   :  { %5554 = vmatmul.msk.f32.gmra.mxu1 %vm77_vm13, %v4250_v41 }
0x1a5f   :  { %5559 = vmatmul.msk.f32.gmra.mxu2 %vm77_vm13, %v4258_v44 }
0x1a65   :  { %5550 = vmatmul.msk.f32.gmra.mxu3 %vm77_vm13, %v4255_v54  ;;  %5565 = vmatmul.msk.f32.gmra.mxu0 %vm77_vm13, %v4255_v54  ;;  %v4638_v54 = vld [vmem:[#allocation15 + $0x968] sm:$0xff] }
0x1a66   :  { %5555 = vmatmul.msk.f32.gmra.mxu1 %vm77_vm13, %v4251_v63  ;;  %v4637_v63 = vld [vmem:[#allocation15 + $0x960] sm:$0xff]  ;;  %4699 = vmatpush.msra.mxu2 %v4638_v54 }
0x1a67   :  { %5560 = vmatmul.msk.f32.gmra.mxu2 %vm77_vm13, %v4259_v51  ;;  %v4636_v51 = vld [vmem:[#allocation15 + $0x958] sm:$0xff] }
0x1a68   :  { %4700 = vmatpush.msra.mxu2 %v4637_v63 }
0x1a6a   :  { %4701 = vmatpush.msra.mxu2 %v4636_v51 }
0x1a6d   :  { %5566 = vmatmul.msk.f32.vlgmr.msra.gmra.mxu3 %vm74_vm9, %v6284_v20  ;;  %5578 = vmatmul.msk.f32.vlgmr.msrb.gmra.mxu0 %vm74_vm9, %v6284_v20 }
0x1a6e   :  { %5570 = vmatmul.msk.f32.vlgmr.msrb.gmra.mxu1 %vm74_vm9, %v6286_v1 }
0x1a6f   :  { %5574 = vmatmul.msk.f32.vlgmr.msrb.gmra.mxu2 %vm74_vm9, %v6297_v31 }
0x1a75   :  { %5567 = vmatmul.msk.f32.gmra.mxu3 %vm74_vm9, %v6293_v28  ;;  %5579 = vmatmul.msk.f32.gmra.mxu0 %vm74_vm9, %v6293_v28 }
0x1a76   :  { %5571 = vmatmul.msk.f32.gmra.mxu1 %vm74_vm9, %v6295_v25 }
0x1a77   :  { %5575 = vmatmul.msk.f32.gmra.mxu2 %vm74_vm9, %v6310_v27 }
0x1a7d   :  { %5568 = vmatmul.msk.f32.gmra.mxu3 %vm74_vm9, %v6306_v24  ;;  %5580 = vmatmul.msk.f32.gmra.mxu0 %vm74_vm9, %v6306_v24 }
0x1a7e   :  { %5572 = vmatmul.msk.f32.gmra.mxu1 %vm74_vm9, %v6308_v30 }
0x1a7f   :  { %5576 = vmatmul.msk.f32.gmra.mxu2 %vm74_vm9, %v6323_v61 }
0x1a85   :  { %5569 = vmatmul.msk.f32.gmra.mxu3 %vm74_vm9, %v6319_v29  ;;  %5581 = vmatmul.msk.f32.gmra.mxu0 %vm74_vm9, %v6319_v29 }
0x1a86   :  { %5573 = vmatmul.msk.f32.gmra.mxu1 %vm74_vm9, %v6321_v35 }
0x1a87   :  { %5577 = vmatmul.msk.f32.gmra.mxu2 %vm74_vm9, %v6331_v45  ;;  %v5656_v45 = vld [vmem:[#allocation17 + $0x7d8] ss:$0 sm:$0xff] }
0x1aca   :  { %v4434_v1 = vpop.f32.mrf.mxu0 }
0x1acb   :  { %v4345_v20 = vpop.f32.mrf.mxu1 }
0x1ad0   :  { %v4301_v28 = vpop.f32.mrf.mxu3 }
0x1ad1   :  { %v4346_v13 = vadd.f32 %v4345_v20, %v4301_v28  ;;  %v4635_v28 = vld [vmem:[#allocation15 + $0x950] sm:$0xff] }
0x1ad2   :  { %v4402_v25 = vpop.f32.mrf.mxu2  ;;  %v4437_v30 = vpop.f32.mrf.mxu0  ;;  %4702 = vmatpush.msra.mxu2 %v4635_v28 }
0x1ad3   :  { %v4348_v31 = vpop.f32.mrf.mxu1  ;;  %v4435_v7 = vadd.f32 %v4434_v1, %v4402_v25  ;;  %v6458_v32 = vadd.f32 %v5656_v45, %v4346_v13 }
0x1ad5   :  { %v6453_v19 = vadd.f32 %v5656_v45, %v4435_v7  ;;  %v4710_v44 = vmul.f32 %v6458_v32, %v6458_v32 }
0x1ad7   :  { %v4714_v47 = vmul.f32 %v6453_v19, %v6453_v19 }
0x1ad8   :  { %v4304_v27 = vpop.f32.mrf.mxu3 }
0x1ad9   :  { %v4349_v4 = vadd.f32 %v4348_v31, %v4304_v27 }
0x1ada   :  { %v4405_v24 = vpop.f32.mrf.mxu2  ;;  %v4440_v52 = vpop.f32.mrf.mxu0 }
0x1adb   :  { %v4351_v61 = vpop.f32.mrf.mxu1  ;;  %v4438_v6 = vadd.f32 %v4437_v30, %v4405_v24  ;;  %v6450_v50 = vadd.f32 %v5656_v45, %v4349_v4  ;;  %v4634_v24 = vld [vmem:[#allocation15 + $0x948] sm:$0xff] }
0x1adc   :  { %4703 = vmatpush.msra.mxu2 %v4634_v24 }
0x1add   :  { %v6445_v55 = vadd.f32 %v5656_v45, %v4438_v6  ;;  %v4711_v42 = vmul.f32 %v6450_v50, %v6450_v50  ;;  %v4646_v6 = vld [vmem:[#allocation17 + $0x9a8] sm:$0xf] }
0x1adf   :  { %v4715_v36 = vmul.f32 %v6445_v55, %v6445_v55 }
0x1ae0   :  { %v4307_v56 = vpop.f32.mrf.mxu3 }
0x1ae1   :  { %v4352_v2 = vadd.f32 %v4351_v61, %v4307_v56  ;;  %v4632_v61 = vld [vmem:[#allocation15 + $0x938] sm:$0xff] }
0x1ae2   :  { %v4408_v57 = vpop.f32.mrf.mxu2  ;;  %v4443_v35 = vpop.f32.mrf.mxu0 }
0x1ae3   :  { %v4354_v58 = vpop.f32.mrf.mxu1  ;;  %v4441_v60 = vadd.f32 %v4440_v52, %v4408_v57  ;;  %v6442_v37 = vadd.f32 %v5656_v45, %v4352_v2 }
0x1ae5   :  { %v6438_v8 = vadd.f32 %v5656_v45, %v4441_v60  ;;  %v4712_v40 = vmul.f32 %v6442_v37, %v6442_v37 }
0x1ae7   :  { %v4716_v0 = vmul.f32 %v6438_v8, %v6438_v8 }
0x1ae8   :  { %v4310_v46 = vpop.f32.mrf.mxu3 }
0x1ae9   :  { %v4355_v5 = vadd.f32 %v4354_v58, %v4310_v46 }
0x1aea   :  { %v4411_v29 = vpop.f32.mrf.mxu2  ;;  %v4616_v14 = vpop.f32.mrf.mxu0 }
0x1aeb   :  { %v4444_v3 = vadd.f32 %v4443_v35, %v4411_v29  ;;  %v6436_v9 = vadd.f32 %v5656_v45, %v4355_v5  ;;  %v4525_v11 = vpop.f32.mrf.mxu1 }
0x1aed   :  { %v6440_v33 = vadd.f32 %v5656_v45, %v4444_v3  ;;  %4679 = vmatpush.msra.mxu1 %v6436_v9  ;;  %v4713_v17 = vmul.f32 %v6436_v9, %v6436_v9 }
0x1aef   :  { %v4717_v18 = vmul.f32 %v6440_v33, %v6440_v33  ;;  %4659 = vmatpush.msrb.mxu3 %v6440_v33  ;;  %4680 = vmatpush.msra.mxu1 %v6442_v37 }
0x1af0   :  { %v4496_v21 = vpop.f32.mrf.mxu3 }
0x1af1   :  { %4660 = vmatpush.msrb.mxu3 %v6438_v8  ;;  %4730 = vmatpush.msra.mxu0 %v4717_v18  ;;  %v6460_v16 = vadd.f32 %v4525_v11, %v4496_v21 }
0x1af2   :  { %v4587_v23 = vpop.f32.mrf.mxu2  ;;  %4681 = vmatpush.msra.mxu1 %v6450_v50  ;;  %v4619_v15 = vpop.f32.mrf.mxu0 }
0x1af3   :  { %v6463_v34 = vadd.f32 %v4616_v14, %v4587_v23  ;;  %4661 = vmatpush.msrb.mxu3 %v6445_v55  ;;  %4731 = vmatpush.msra.mxu0 %v4716_v0  ;;  %v4528_v48 = vpop.f32.mrf.mxu1 }
0x1af4   :  { %4682 = vmatpush.msra.mxu1 %v6458_v32 }
0x1af5   :  { %4662 = vmatpush.msrb.mxu3 %v6453_v19  ;;  %4732 = vmatpush.msra.mxu0 %v4715_v36 }
0x1af6   :  { %5582 = vmatmul.msk.f32.vlgmr.msrb.gmra.mxu3 %vm67_vm12, %v6346_v10  ;;  %5583 = vmatmul.msk.f32.vlgmr.msra.gmra.mxu1 %vm67_vm12, %v6346_v10 }
0x1af7   :  { %4750 = vmatpush.msra.mxu3 %v4713_v17  ;;  %4733 = vmatpush.msra.mxu0 %v4714_v47  ;;  %v4799_v47 = vld [vmem:[#allocation15 + $0x9b0] sm:$0x1] }
0x1af8   :  { %5585 = vmatmul.msk.f32.vlgmr.msra.gmra.mxu0 %vm67_vm12, %v6346_v10  ;;  %v4499_v39 = vpop.f32.mrf.mxu3  ;;  %4763 = vmatpush.msrb.mxu1 %v4645_v12 }
0x1af9   :  { %4751 = vmatpush.msra.mxu3 %v4712_v40  ;;  %v6484_v62 = vadd.f32 %v4528_v48, %v4499_v39  ;;  %5590 = vmatpush.msk.msrb.mxu0 %vm1836_vm1, %v4646_v6  ;;  %v5657_v40 = vld [vmem:[#allocation17 + $0x9a0] ss:$0 sm:$0xff] }
0x1afa   :  { %v4590_v43 = vpop.f32.mrf.mxu2  ;;  %4764 = vmatpush.msrb.mxu1 %v4644_v53  ;;  %v4622_v25 = vpop.f32.mrf.mxu0 }
0x1afb   :  { %v6486_v41 = vadd.f32 %v4619_v15, %v4590_v43  ;;  %4752 = vmatpush.msra.mxu3 %v4711_v42  ;;  %v4531_v20 = vpop.f32.mrf.mxu1  ;;  %v4538_v42 = vadd.f32 %v5657_v40, %v6460_v16 }
0x1afc   :  { %4765 = vmatpush.msrb.mxu1 %v4643_v38 }
0x1afd   :  { %4753 = vmatpush.msra.mxu3 %v4710_v44  ;;  %v4539_v44 = vadd.f32 %v5657_v40, %v6484_v62 }
0x1afe   :  { %5586 = vmatmul.msk.f32.vlgmr.msra.gmra.mxu3 %vm67_vm12, %v6346_v10  ;;  %4766 = vmatpush.msrb.mxu1 %v4642_v22  ;;  %v4633_v10 = vld [vmem:[#allocation15 + $0x940] sm:$0xff]  ;;  %v4786_v22 = vld [vmem:[#allocation15 + $0x9a8] sm:$0x1] }
0x1aff   :  { %4704 = vmatpush.msra.mxu2 %v4633_v10 }
0x1b00   :  { %v4502_v1 = vpop.f32.mrf.mxu3  ;;  %4767 = vmatpush.msrb.mxu1 %v4641_v49 }
0x1b01   :  { %v6492_v31 = vadd.f32 %v4531_v20, %v4502_v1  ;;  %4705 = vmatpush.msra.mxu2 %v4632_v61 }
0x1b02   :  { %v4593_v30 = vpop.f32.mrf.mxu2  ;;  %4768 = vmatpush.msrb.mxu1 %v4640_v59  ;;  %v4625_v57 = vpop.f32.mrf.mxu0 }
0x1b03   :  { %v6494_v27 = vadd.f32 %v4622_v25, %v4593_v30  ;;  %v4534_v52 = vpop.f32.mrf.mxu1  ;;  %5588 = vmatpush.msk.msrb.mxu2 %vm1836_vm1, %v4646_v6 }
0x1b04   :  { %4769 = vmatpush.msrb.mxu1 %v4639_v26  ;;  %v4628_v26 = vadd.f32 %v5657_v40, %v6463_v34 }
0x1b05   :  { %v4630_v20 = vadd.f32 %v5657_v40, %v6494_v27 }
0x1b06   :  { %4770 = vmatpush.msrb.mxu1 %v4638_v54  ;;  %v4629_v54 = vadd.f32 %v5657_v40, %v6486_v41 }
0x1b08   :  { %4771 = vmatpush.msrb.mxu1 %v4637_v63  ;;  %v4505_v56 = vpop.f32.mrf.mxu3  ;;  %v4540_v63 = vadd.f32 %v5657_v40, %v6492_v31 }
0x1b09   :  { %v4535_v59 = vadd.f32 %v4534_v52, %v4505_v56 }
0x1b0a   :  { %4772 = vmatpush.msrb.mxu1 %v4636_v51  ;;  %v4596_v5 = vpop.f32.mrf.mxu2 }
0x1b0b   :  { %v4626_v15 = vadd.f32 %v4625_v57, %v4596_v5  ;;  %v4541_v1 = vadd.f32 %v5657_v40, %v4535_v59  ;;  %v5249_v59 = vld [vmem:[#allocation17 + $0xb68] sm:$0xff] }
0x1b0c   :  { %4773 = vmatpush.msrb.mxu1 %v4635_v28 }
0x1b0d   :  { %v4631_v28 = vadd.f32 %v5657_v40, %v4626_v15  ;;  %v5250_v40 = vld [vmem:[#allocation17 + $0xb70] sm:$0xff]  ;;  %v5107_v15 = vld [vmem:[#allocation17 + $0xb08] sm:$0xff] }
0x1b0e   :  { %4774 = vmatpush.msrb.mxu1 %v4634_v24  ;;  %5134 = vmatpush.msra.mxu0 %v5107_v15 }
0x1b10   :  { %4775 = vmatpush.msrb.mxu1 %v4633_v10 }
0x1b12   :  { %4776 = vmatpush.msrb.mxu1 %v4632_v61 }
0x1b73   :  { %v4684_v58 = vpop.f32.mrf.mxu1 }
0x1b75   :  { %v4735_v46 = vpop.f32.mrf.mxu0 }
0x1b79   :  { %v4664_v35 = vpop.f32.mrf.mxu3 }
0x1b7a   :  { %v4685_v60 = vadd.f32 %v4684_v58, %v4664_v35 }
0x1b7c   :  { %5584 = vmatmul.msk.f32.vlgmr.msra.gmra.mxu2 %vm74_vm9, %v4685_v60 }
0x1b81   :  { %v4755_v45 = vpop.f32.mrf.mxu3 }
0x1b82   :  { %v4756_v2 = vadd.f32 %v4755_v45, %v4735_v46 }
0x1b84   :  { %5587 = vmatmul.msk.f32.vlgmr.msrb.gmra.mxu1 %vm74_vm9, %v4756_v2 }
0x1bff   :  { %v4707_v29 = vpop.f32.mrf.mxu2 }
0x1c00   :  { %v4781_v3 = vmul.f32 0.0006377551, %v4707_v29 }
0x1c01   :  { %v4778_v4 = vpop.f32.mrf.mxu1 }
0x1c02   :  { %v4783_v7 = vmul.f32 %v4781_v3, %v4781_v3  ;;  %v4782_v11 = vmul.f32 0.0006377551, %v4778_v4 }
0x1c04   :  { %v4784_v12 = vsub.f32 %v4782_v11, %v4783_v7 }
0x1c06   :  { %v4785_v53 = vmax.f32 %v4784_v12, 0.0 }
0x1c08   :  { %v4787_v13 = vadd.f32 1e-05, %v4785_v53 }
0x1c0a   :  { %5677 = vrsqrt.f32 %v4787_v13  ;;  %vm4794_vm8 = vweird.f32 %v4787_v13 }
0x1c10   :  { %v5678_v14 = vpop.eup %5677 }
0x1c11   :  { %v4789_v18 = vmul.f32 %v5678_v14, %v4787_v13  ;;  %vm4795_vm13 = vweird.f32 %v5678_v14 }
0x1c12   :  { %vm4796_vm4 = vmor %vm4794_vm8, %vm4795_vm13 }
0x1c13   :  { %v4790_v38 = vmul.f32 %v5678_v14, %v4789_v18  ;;  %v4909_v18 = vld [vmem:[#allocation15 + $0xa20] sm:$0xff] }
0x1c15   :  { %v4791_v21 = vmul.f32 0.5, %v4790_v38  ;;  %v4901_v38 = vld [vmem:[#allocation15 + $0x9e0] sm:$0xff] }
0x1c17   :  { %v4792_v0 = vsub.f32 1.5, %v4791_v21 }
0x1c19   :  { %v4793_v23 = vmul.f32 %v5678_v14, %v4792_v0 }
0x1c1b   :  { %v4797_v36 = vsel %vm4796_vm4, %v5678_v14, %v4793_v23  ;;  %v4902_v23 = vld [vmem:[#allocation15 + $0x9e8] sm:$0xff] }
0x1c1c   :  { %v4798_v17 = vmul.f32 %v4797_v36, %v4786_v22  ;;  %v4910_v22 = vld [vmem:[#allocation15 + $0xa28] sm:$0xff]  ;;  %v4911_v36 = vld [vmem:[#allocation15 + $0xa30] sm:$0xff] }
0x1c1e   :  { %v4800_v49 = vmul.f32 %v4798_v17, %v4781_v3  ;;  %5589 = vmatmul.msk.f32.vlgmr.msrb.gmra.mxu2 %vm3038_vm6, %v4798_v17  ;;  %v4903_v17 = vld [vmem:[#allocation15 + $0x9f0] sm:$0xff] }
0x1c20   :  { %v4801_v48 = vsub.f32 %v4799_v47, %v4800_v49  ;;  %v4912_v47 = vld [vmem:[#allocation15 + $0xa38] sm:$0xff] }
0x1c21   :  { %v4904_v49 = vld [vmem:[#allocation15 + $0x9f8] sm:$0xff] }
0x1c22   :  { %5591 = vmatmul.msk.f32.vlgmr.msrb.gmra.mxu0 %vm3038_vm6, %v4801_v48  ;;  %v5251_v48 = vld [vmem:[#allocation17 + $0xb78] sm:$0xff] }
0x1c9f   :  { %v4848_v39 = vpop.f32.mrf.mxu0 }
0x1ca0   :  { %v4856_v25 = vperm.slane %v4848_v39, 0  ;;  %v5093_v39 = vld [vmem:[#allocation17 + $0xa98] sm:$0xff] }
0x1ca1   :  { %v4825_v43 = vpop.f32.mrf.mxu2  ;;  %5199 = vmatpush.msra.mxu1 %v5093_v39 }
0x1ca2   :  { %v4851_v51 = vperm.slane %v4825_v43, 0  ;;  %v5248_v43 = vld [vmem:[#allocation17 + $0xb60] sm:$0xff] }
0x1ca4   :  { %v4868_v30 = vmul.f32 %v4851_v51, %v6440_v33  ;;  %v4855_v24 = vmul.f32 %v4851_v51, %v6436_v9  ;;  %v4867_v16 = vmul.f32 %v4851_v51, %v6438_v8  ;;  %v4854_v34 = vmul.f32 %v4851_v51, %v6442_v37 }
0x1ca5   :  { %v4866_v62 = vmul.f32 %v4851_v51, %v6445_v55  ;;  %v4853_v41 = vmul.f32 %v4851_v51, %v6450_v50  ;;  %v4865_v31 = vmul.f32 %v4851_v51, %v6453_v19  ;;  %v4852_v10 = vmul.f32 %v4851_v51, %v6458_v32  ;;  %v5246_v51 = vld [vmem:[#allocation17 + $0xb50] sm:$0xff] }
0x1ca6   :  { %v4872_v27 = vadd.f32 %v4868_v30, %v4856_v25  ;;  %v4860_v61 = vadd.f32 %v4856_v25, %v4855_v24  ;;  %v4871_v52 = vadd.f32 %v4867_v16, %v4856_v25  ;;  %v4859_v56 = vadd.f32 %v4856_v25, %v4854_v34  ;;  %v4916_v30 = vld [vmem:[#allocation15 + $0xa58] sm:$0xf]  ;;  %v5105_v16 = vld [vmem:[#allocation17 + $0xaf8] sm:$0xff]  ;;  %v5091_v34 = vld [vmem:[#allocation17 + $0xa88] sm:$0xff] }
0x1ca7   :  { %v4870_v57 = vadd.f32 %v4866_v62, %v4856_v25  ;;  %v4858_v33 = vadd.f32 %v4856_v25, %v4853_v41  ;;  %v4869_v58 = vadd.f32 %v4865_v31, %v4856_v25  ;;  %v4857_v9 = vadd.f32 %v4856_v25, %v4852_v10  ;;  %v4907_v25 = vld [vmem:[#allocation15 + $0xa10] sm:$0xff]  ;;  %v4908_v24 = vld [vmem:[#allocation15 + $0xa18] sm:$0xf]  ;;  %v5104_v62 = vld [vmem:[#allocation17 + $0xaf0] sm:$0xff] }
0x1ca8   :  { %v4876_v35 = vadd.f32 %v4872_v27, %v4631_v28  ;;  %v4864_v8 = vadd.f32 %v4860_v61, %v4541_v1  ;;  %v4875_v60 = vadd.f32 %v4871_v52, %v4630_v20  ;;  %v4863_v37 = vadd.f32 %v4859_v56, %v4540_v63  ;;  %v5247_v63 = vld [vmem:[#allocation17 + $0xb58] sm:$0xff]  ;;  %v4914_v20 = vld [vmem:[#allocation15 + $0xa48] sm:$0xff]  ;;  %v5090_v41 = vld [vmem:[#allocation17 + $0xa80] sm:$0xff] }
0x1ca9   :  { %v4874_v46 = vadd.f32 %v4870_v57, %v4629_v54  ;;  %v4862_v55 = vadd.f32 %v4858_v33, %v4539_v44  ;;  %v4873_v45 = vadd.f32 %v4869_v58, %v4628_v26  ;;  %v4861_v50 = vadd.f32 %v4857_v9, %v4538_v42  ;;  %v5106_v42 = vld [vmem:[#allocation17 + $0xb00] sm:$0xff]  ;;  %v5092_v26 = vld [vmem:[#allocation17 + $0xa90] sm:$0xff]  ;;  %v4913_v44 = vld [vmem:[#allocation15 + $0xa40] sm:$0xff] }
0x1caa   :  { %vm4892_vm1 = vcmp.ge.f32.partialorder %v4876_v35, 0.0  ;;  %v4896_v19 = vmul.f32 0.22916667, %v4876_v35  ;;  %vm4880_vm6 = vcmp.ge.f32.partialorder %v4864_v8, 0.0  ;;  %v4884_v32 = vmul.f32 0.22916667, %v4864_v8  ;;  %5135 = vmatpush.msra.mxu0 %v5106_v42  ;;  %5200 = vmatpush.msra.mxu1 %v5092_v26 }
0x1cab   :  { %vm4891_vm10 = vcmp.ge.f32.partialorder %v4875_v60, 0.0  ;;  %v4895_v2 = vmul.f32 0.22916667, %v4875_v60  ;;  %vm4879_vm14 = vcmp.ge.f32.partialorder %v4863_v37, 0.0  ;;  %v4883_v5 = vmul.f32 0.22916667, %v4863_v37 }
0x1cac   :  { %v4900_v29 = vsel %vm4892_vm1, %v4876_v35, %v4896_v19  ;;  %v4888_v6 = vsel %vm4880_vm6, %v4864_v8, %v4884_v32  ;;  %v4894_v3 = vmul.f32 0.22916667, %v4874_v46  ;;  %vm4890_vm11 = vcmp.ge.f32.partialorder %v4874_v46, 0.0  ;;  %v4905_v54 = vld [vmem:[#allocation15 + $0xa00] sm:$0xff]  ;;  %v4906_v1 = vld [vmem:[#allocation15 + $0xa08] sm:$0xff]  ;;  %v4915_v28 = vld [vmem:[#allocation15 + $0xa50] sm:$0xff]  ;;  %5136 = vmatpush.msra.mxu0 %v5105_v16  ;;  %5201 = vmatpush.msra.mxu1 %v5091_v34 }
0x1cad   :  { %4953 = vmatpush.msrb.mxu3 %v4900_v29  ;;  %5018 = vmatpush.msra.mxu2 %v4888_v6  ;;  %vm4878_vm15 = vcmp.ge.f32.partialorder %v4862_v55, 0.0  ;;  %v4882_v4 = vmul.f32 0.22916667, %v4862_v55  ;;  %v4899_v7 = vsel %vm4891_vm10, %v4875_v60, %v4895_v2  ;;  %v4887_v11 = vsel %vm4879_vm14, %v4863_v37, %v4883_v5  ;;  %v5103_v31 = vld [vmem:[#allocation17 + $0xae8] sm:$0xff]  ;;  %v5089_v10 = vld [vmem:[#allocation17 + $0xa78] sm:$0xff]  ;;  %v5102_v27 = vld [vmem:[#allocation17 + $0xae0] sm:$0xff] }
0x1cae   :  { %v4893_v12 = vmul.f32 0.22916667, %v4873_v45  ;;  %vm4889_vm3 = vcmp.ge.f32.partialorder %v4873_v45, 0.0  ;;  %vm4877_vm0 = vcmp.ge.f32.partialorder %v4861_v50, 0.0  ;;  %v4881_v53 = vmul.f32 0.22916667, %v4861_v50  ;;  %5137 = vmatpush.msra.mxu0 %v5104_v62  ;;  %5202 = vmatpush.msra.mxu1 %v5090_v41 }
0x1caf   :  { %4954 = vmatpush.msrb.mxu3 %v4899_v7  ;;  %5019 = vmatpush.msra.mxu2 %v4887_v11  ;;  %v4898_v13 = vsel %vm4890_vm11, %v4874_v46, %v4894_v3  ;;  %v4886_v14 = vsel %vm4878_vm15, %v4862_v55, %v4882_v4  ;;  %v5088_v61 = vld [vmem:[#allocation17 + $0xa70] sm:$0xff]  ;;  %v5101_v52 = vld [vmem:[#allocation17 + $0xad8] sm:$0xff]  ;;  %v5087_v56 = vld [vmem:[#allocation17 + $0xa68] sm:$0xff] }
0x1cb0   :  { %v4897_v21 = vsel %vm4889_vm3, %v4873_v45, %v4893_v12  ;;  %v4885_v0 = vsel %vm4877_vm0, %v4861_v50, %v4881_v53  ;;  %5138 = vmatpush.msra.mxu0 %v5103_v31  ;;  %5203 = vmatpush.msra.mxu1 %v5089_v10  ;;  %v5100_v57 = vld [vmem:[#allocation17 + $0xad0] sm:$0xff]  ;;  %v5086_v33 = vld [vmem:[#allocation17 + $0xa60] sm:$0xff]  ;;  %v5245_v58 = vld [vmem:[#allocation17 + $0xb48] sm:$0xff] }
0x1cb1   :  { %4955 = vmatpush.msrb.mxu3 %v4898_v13  ;;  %5020 = vmatpush.msra.mxu2 %v4886_v14  ;;  %v5244_v9 = vld [vmem:[#allocation17 + $0xb40] sm:$0xff]  ;;  %v5099_v35 = vld [vmem:[#allocation17 + $0xac8] sm:$0xff]  ;;  %v5085_v8 = vld [vmem:[#allocation17 + $0xa58] sm:$0xff] }
0x1cb2   :  { %5139 = vmatpush.msra.mxu0 %v5102_v27  ;;  %5204 = vmatpush.msra.mxu1 %v5088_v61  ;;  %v5098_v60 = vld [vmem:[#allocation17 + $0xac0] sm:$0xff]  ;;  %v5084_v37 = vld [vmem:[#allocation17 + $0xa50] sm:$0xff]  ;;  %v5097_v46 = vld [vmem:[#allocation17 + $0xab8] sm:$0xff] }
0x1cb3   :  { %4956 = vmatpush.msrb.mxu3 %v4897_v21  ;;  %5021 = vmatpush.msra.mxu2 %v4885_v0  ;;  %v5083_v55 = vld [vmem:[#allocation17 + $0xa48] sm:$0xff]  ;;  %v5096_v45 = vld [vmem:[#allocation17 + $0xab0] sm:$0xff]  ;;  %v5082_v50 = vld [vmem:[#allocation17 + $0xa40] sm:$0xff] }
0x1cb4   :  { %5592 = vmatmul.msk.f32.vlgmr.msrb.gmra.mxu3 %vm67_vm12, %v4909_v18  ;;  %5600 = vmatmul.msk.f32.vlgmr.msra.gmra.mxu2 %vm67_vm12, %v4901_v38  ;;  %v5243_v19 = vld [vmem:[#allocation17 + $0xb38] sm:$0xff]  ;;  %v5242_v32 = vld [vmem:[#allocation17 + $0xb30] sm:$0xff]  ;;  %v5095_v2 = vld [vmem:[#allocation17 + $0xaa8] sm:$0xff] }
0x1cb5   :  { %5278 = vmatpush.msra.mxu3 %v5251_v48  ;;  %5140 = vmatpush.msra.mxu0 %v5101_v52  ;;  %v5081_v5 = vld [vmem:[#allocation17 + $0xa38] sm:$0xff]  ;;  %v5241_v29 = vld [vmem:[#allocation17 + $0xb28] sm:$0xff]  ;;  %v5094_v6 = vld [vmem:[#allocation17 + $0xaa0] sm:$0xff] }
0x1cb6   :  { %5205 = vmatpush.msra.mxu1 %v5087_v56  ;;  %v5080_v3 = vld [vmem:[#allocation17 + $0xa30] sm:$0xff]  ;;  %v5240_v4 = vld [vmem:[#allocation17 + $0xb20] sm:$0xff]  ;;  %v5239_v7 = vld [vmem:[#allocation17 + $0xb18] sm:$0xff] }
0x1cb7   :  { %5279 = vmatpush.msra.mxu3 %v5250_v40  ;;  %5141 = vmatpush.msra.mxu0 %v5100_v57  ;;  %v5238_v11 = vld [vmem:[#allocation17 + $0xb10] sm:$0xff] }
0x1cb8   :  { %5206 = vmatpush.msra.mxu1 %v5086_v33 }
0x1cb9   :  { %5280 = vmatpush.msra.mxu3 %v5249_v59  ;;  %5142 = vmatpush.msra.mxu0 %v5099_v35 }
0x1cba   :  { %5207 = vmatpush.msra.mxu1 %v5085_v8 }
0x1cbb   :  { %5281 = vmatpush.msra.mxu3 %v5248_v43  ;;  %5143 = vmatpush.msra.mxu0 %v5098_v60 }
0x1cbc   :  { %5593 = vmatmul.msk.f32.gmra.mxu3 %vm67_vm12, %v4910_v22  ;;  %5601 = vmatmul.msk.f32.gmra.mxu2 %vm67_vm12, %v4902_v23 }
0x1cbd   :  { %5282 = vmatpush.msra.mxu3 %v5247_v63  ;;  %5208 = vmatpush.msra.mxu1 %v5084_v37 }
0x1cbe   :  { %5144 = vmatpush.msra.mxu0 %v5097_v46 }
0x1cbf   :  { %5283 = vmatpush.msra.mxu3 %v5246_v51  ;;  %5209 = vmatpush.msra.mxu1 %v5083_v55 }
0x1cc0   :  { %5145 = vmatpush.msra.mxu0 %v5096_v45 }
0x1cc1   :  { %5284 = vmatpush.msra.mxu3 %v5245_v58  ;;  %5210 = vmatpush.msra.mxu1 %v5082_v50  ;;  %v5658_v50 = vld [vmem:[#allocation17 + $0xb80] ss:$0 sm:$0xff] }
0x1cc2   :  { %5146 = vmatpush.msra.mxu0 %v5095_v2 }
0x1cc3   :  { %5285 = vmatpush.msra.mxu3 %v5244_v9  ;;  %5211 = vmatpush.msra.mxu1 %v5081_v5 }
0x1cc4   :  { %5594 = vmatmul.msk.f32.gmra.mxu3 %vm67_vm12, %v4911_v36  ;;  %5602 = vmatmul.msk.f32.gmra.mxu2 %vm67_vm12, %v4903_v17 }
0x1cc5   :  { %5286 = vmatpush.msra.mxu3 %v5243_v19  ;;  %5147 = vmatpush.msra.mxu0 %v5094_v6 }
0x1cc6   :  { %5212 = vmatpush.msra.mxu1 %v5080_v3 }
0x1cc7   :  { %5287 = vmatpush.msra.mxu3 %v5242_v32 }
0x1cc9   :  { %5288 = vmatpush.msra.mxu3 %v5241_v29 }
0x1ccb   :  { %5289 = vmatpush.msra.mxu3 %v5240_v4 }
0x1ccc   :  { %5595 = vmatmul.msk.f32.gmra.mxu3 %vm67_vm12, %v4912_v47  ;;  %5603 = vmatmul.msk.f32.gmra.mxu2 %vm67_vm12, %v4904_v49 }
0x1ccd   :  { %5290 = vmatpush.msra.mxu3 %v5239_v7 }
0x1ccf   :  { %5291 = vmatpush.msra.mxu3 %v5238_v11 }
0x1cd4   :  { %5596 = vmatmul.msk.f32.gmra.mxu3 %vm67_vm12, %v4913_v44  ;;  %5604 = vmatmul.msk.f32.gmra.mxu2 %vm67_vm12, %v4905_v54 }
0x1cdc   :  { %5597 = vmatmul.msk.f32.gmra.mxu3 %vm67_vm12, %v4914_v20  ;;  %5605 = vmatmul.msk.f32.gmra.mxu2 %vm67_vm12, %v4906_v1 }
0x1ce4   :  { %5598 = vmatmul.msk.f32.gmra.mxu3 %vm67_vm12, %v4915_v28  ;;  %5606 = vmatmul.msk.f32.gmra.mxu2 %vm67_vm12, %v4907_v25 }
0x1cec   :  { %5599 = vmatmul.msk.f32.gmra.mxu3 %vm67_vm12, %v4916_v30  ;;  %5607 = vmatmul.msk.f32.gmra.mxu2 %vm67_vm12, %v4908_v24  ;;  %vm5054_vm12 = vcmask 912384  }
0x1d37   :  { %v4958_v12 = vpop.f32.mrf.mxu3  ;;  %v5023_v53 = vpop.f32.mrf.mxu2 }
0x1d38   :  { %v5024_v13 = vadd.f32 %v5023_v53, %v4958_v12 }
0x1d3a   :  { %5047 = vst.msk [vmem:[#allocation12 + $0x8] sm:$0xff] %vm74_vm9, %v5024_v13 }
0x1d3f   :  { %v4961_v14 = vpop.f32.mrf.mxu3  ;;  %v5026_v18 = vpop.f32.mrf.mxu2 }
0x1d40   :  { %v5027_v38 = vadd.f32 %v5026_v18, %v4961_v14 }
0x1d41   :  { %v5064_v21 = vld [vmem:[#allocation12 + $0x8] sm:$0xff] }
0x1d42   :  { %v5056_v0 = vld [vmem:[#allocation12 + $0x7] sm:$0xff]  ;;  %5048 = vst.msk [vmem:[#allocation12 + $0x10] sm:$0xff] %vm74_vm9, %v5027_v38  ;;  %5608 = vmatmul.msk.f32.vlgmr.msra.gmra.mxu0 %vm74_vm9, %v5064_v21 }
0x1d43   :  { %5616 = vmatmul.msk.f32.vlgmr.msra.gmra.mxu1 %vm74_vm9, %v5056_v0 }
0x1d47   :  { %v4964_v22 = vpop.f32.mrf.mxu3  ;;  %v5029_v23 = vpop.f32.mrf.mxu2 }
0x1d48   :  { %v5030_v36 = vadd.f32 %v5029_v23, %v4964_v22 }
0x1d49   :  { %v5072_v17 = vld [vmem:[#allocation12 + $0x9] sm:$0xff] }
0x1d4a   :  { %v5065_v47 = vld [vmem:[#allocation12 + $0x10] sm:$0xff]  ;;  %5049 = vst.msk [vmem:[#allocation12 + $0x18] sm:$0xff] %vm74_vm9, %v5030_v36  ;;  %5624 = vmatmul.msk.f32.vlgmr.msra.gmra.mxu3 %vm74_vm9, %v5072_v17 }
0x1d4b   :  { %v5057_v49 = vld [vmem:[#allocation12 + $0xf] sm:$0xff]  ;;  %5609 = vmatmul.msk.f32.gmra.mxu0 %vm74_vm9, %v5065_v47 }
0x1d4c   :  { %5617 = vmatmul.msk.f32.gmra.mxu1 %vm74_vm9, %v5057_v49 }
0x1d4f   :  { %v4967_v48 = vpop.f32.mrf.mxu3  ;;  %v5032_v40 = vpop.f32.mrf.mxu2 }
0x1d50   :  { %v5033_v59 = vadd.f32 %v5032_v40, %v4967_v48 }
0x1d51   :  { %v5073_v15 = vld [vmem:[#allocation12 + $0x11] sm:$0xff] }
0x1d52   :  { %v5066_v39 = vld [vmem:[#allocation12 + $0x18] sm:$0xff]  ;;  %5050 = vst.msk [vmem:[#allocation12 + $0x20] sm:$0xff] %vm74_vm9, %v5033_v59  ;;  %5625 = vmatmul.msk.f32.gmra.mxu3 %vm74_vm9, %v5073_v15 }
0x1d53   :  { %v5058_v42 = vld [vmem:[#allocation12 + $0x17] sm:$0xff]  ;;  %5610 = vmatmul.msk.f32.gmra.mxu0 %vm74_vm9, %v5066_v39 }
0x1d54   :  { %5618 = vmatmul.msk.f32.gmra.mxu1 %vm74_vm9, %v5058_v42 }
0x1d57   :  { %v4970_v26 = vpop.f32.mrf.mxu3  ;;  %v5035_v43 = vpop.f32.mrf.mxu2 }
0x1d58   :  { %v5036_v44 = vadd.f32 %v5035_v43, %v4970_v26 }
0x1d59   :  { %v5074_v54 = vld [vmem:[#allocation12 + $0x19] sm:$0xff] }
0x1d5a   :  { %v5067_v63 = vld [vmem:[#allocation12 + $0x20] sm:$0xff]  ;;  %5051 = vst.msk [vmem:[#allocation12 + $0x28] sm:$0xff] %vm74_vm9, %v5036_v44  ;;  %5626 = vmatmul.msk.f32.gmra.mxu3 %vm74_vm9, %v5074_v54 }
0x1d5b   :  { %v5059_v51 = vld [vmem:[#allocation12 + $0x1f] sm:$0xff]  ;;  %5611 = vmatmul.msk.f32.gmra.mxu0 %vm74_vm9, %v5067_v63 }
0x1d5c   :  { %5619 = vmatmul.msk.f32.gmra.mxu1 %vm74_vm9, %v5059_v51 }
0x1d5f   :  { %v4973_v20 = vpop.f32.mrf.mxu3  ;;  %v5038_v1 = vpop.f32.mrf.mxu2 }
0x1d60   :  { %v5039_v28 = vadd.f32 %v5038_v1, %v4973_v20 }
0x1d61   :  { %v5075_v25 = vld [vmem:[#allocation12 + $0x21] sm:$0xff] }
0x1d62   :  { %v5068_v30 = vld [vmem:[#allocation12 + $0x28] sm:$0xff]  ;;  %5052 = vst.msk [vmem:[#allocation12 + $0x30] sm:$0xff] %vm74_vm9, %v5039_v28  ;;  %5627 = vmatmul.msk.f32.gmra.mxu3 %vm74_vm9, %v5075_v25 }
0x1d63   :  { %v5060_v24 = vld [vmem:[#allocation12 + $0x27] sm:$0xff]  ;;  %5612 = vmatmul.msk.f32.gmra.mxu0 %vm74_vm9, %v5068_v30 }
0x1d64   :  { %5620 = vmatmul.msk.f32.gmra.mxu1 %vm74_vm9, %v5060_v24 }
0x1d67   :  { %v4976_v16 = vpop.f32.mrf.mxu3  ;;  %v5041_v34 = vpop.f32.mrf.mxu2 }
0x1d68   :  { %v5042_v62 = vadd.f32 %v5041_v34, %v4976_v16 }
0x1d69   :  { %v5076_v41 = vld [vmem:[#allocation12 + $0x29] sm:$0xff] }
0x1d6a   :  { %v5069_v31 = vld [vmem:[#allocation12 + $0x30] sm:$0xff]  ;;  %5053 = vst.msk [vmem:[#allocation12 + $0x38] sm:$0xff] %vm74_vm9, %v5042_v62  ;;  %5628 = vmatmul.msk.f32.gmra.mxu3 %vm74_vm9, %v5076_v41 }
0x1d6b   :  { %v5061_v10 = vld [vmem:[#allocation12 + $0x2f] sm:$0xff]  ;;  %5613 = vmatmul.msk.f32.gmra.mxu0 %vm74_vm9, %v5069_v31 }
0x1d6c   :  { %5621 = vmatmul.msk.f32.gmra.mxu1 %vm74_vm9, %v5061_v10 }
0x1d6f   :  { %v4979_v27 = vpop.f32.mrf.mxu3  ;;  %v5044_v61 = vpop.f32.mrf.mxu2 }
0x1d70   :  { %v5045_v52 = vadd.f32 %v5044_v61, %v4979_v27 }
0x1d71   :  { %v5077_v56 = vld [vmem:[#allocation12 + $0x31] sm:$0xff] }
0x1d72   :  { %v5070_v57 = vld [vmem:[#allocation12 + $0x38] sm:$0xff]  ;;  %5055 = vst.msk [vmem:[#allocation12 + $0x40] sm:$0xf] %vm5054_vm12, %v5045_v52  ;;  %5629 = vmatmul.msk.f32.gmra.mxu3 %vm74_vm9, %v5077_v56 }
0x1d73   :  { %v5062_v33 = vld [vmem:[#allocation12 + $0x37] sm:$0xff]  ;;  %5614 = vmatmul.msk.f32.gmra.mxu0 %vm74_vm9, %v5070_v57 }
0x1d74   :  { %5622 = vmatmul.msk.f32.gmra.mxu1 %vm74_vm9, %v5062_v33 }
0x1d79   :  { %v5078_v58 = vld [vmem:[#allocation12 + $0x39] sm:$0xff]  ;;  %v5079_v8 = vld [vmem:[#allocation12 + $0x41] sm:$0xf] }
0x1d7a   :  { %v5071_v9 = vld [vmem:[#allocation12 + $0x40] sm:$0xf]  ;;  %5630 = vmatmul.msk.f32.gmra.mxu3 %vm74_vm9, %v5078_v58 }
0x1d7b   :  { %5615 = vmatmul.msk.f32.gmra.mxu0 %vm74_vm9, %v5071_v9  ;;  %v5063_v35 = vld [vmem:[#allocation12 + $0x3f] sm:$0xf] }
0x1d7c   :  { %5623 = vmatmul.msk.f32.gmra.mxu1 %vm74_vm9, %v5063_v35 }
0x1d82   :  { %5631 = vmatmul.msk.f32.gmra.mxu3 %vm74_vm9, %v5079_v8 }
0x1dbf   :  { %v5149_v60 = vpop.f32.mrf.mxu0 }
0x1dc0   :  { %v5214_v37 = vpop.f32.mrf.mxu1 }
0x1dc1   :  { %v5215_v45 = vadd.f32 %v5214_v37, %v5149_v60 }
0x1dc8   :  { %v5152_v46 = vpop.f32.mrf.mxu0 }
0x1dc9   :  { %v5217_v55 = vpop.f32.mrf.mxu1 }
0x1dca   :  { %v5218_v6 = vadd.f32 %v5217_v55, %v5152_v46 }
0x1dcd   :  { %v5293_v19 = vpop.f32.mrf.mxu3 }
0x1dce   :  { %v5317_v32 = vadd.f32 %v5293_v19, %v5215_v45 }
0x1dd0   :  { %v5155_v2 = vpop.f32.mrf.mxu0  ;;  %v5327_v5 = vadd.f32 %v5658_v50, %v5317_v32 }
0x1dd1   :  { %v5220_v29 = vpop.f32.mrf.mxu1 }
0x1dd2   :  { %5335 = vst [vmem:[%s6590_s3] sm:$0xff] %v5327_v5  ;;  %v5221_v53 = vadd.f32 %v5220_v29, %v5155_v2 }
0x1dd5   :  { %v5296_v3 = vpop.f32.mrf.mxu3 }
0x1dd6   :  { %v5318_v4 = vadd.f32 %v5296_v3, %v5218_v6 }
0x1dd8   :  { %v5328_v7 = vadd.f32 %v5658_v50, %v5318_v4  ;;  %v5158_v11 = vpop.f32.mrf.mxu0 }
0x1dd9   :  { %v5223_v12 = vpop.f32.mrf.mxu1 }
0x1dda   :  { %5336 = vst [vmem:[%s6590_s3 + $0x8] sm:$0xff] %v5328_v7  ;;  %v5224_v0 = vadd.f32 %v5223_v12, %v5158_v11 }
0x1ddd   :  { %v5299_v13 = vpop.f32.mrf.mxu3 }
0x1dde   :  { %v5319_v14 = vadd.f32 %v5299_v13, %v5221_v53 }
0x1de0   :  { %v5329_v18 = vadd.f32 %v5658_v50, %v5319_v14  ;;  %v5161_v38 = vpop.f32.mrf.mxu0 }
0x1de1   :  { %v5226_v21 = vpop.f32.mrf.mxu1 }
0x1de2   :  { %5337 = vst [vmem:[%s6590_s3 + $0x10] sm:$0xff] %v5329_v18  ;;  %v5227_v17 = vadd.f32 %v5226_v21, %v5161_v38 }
0x1de5   :  { %v5302_v22 = vpop.f32.mrf.mxu3 }
0x1de6   :  { %v5320_v23 = vadd.f32 %v5302_v22, %v5224_v0 }
0x1de8   :  { %v5330_v36 = vadd.f32 %v5658_v50, %v5320_v23  ;;  %v5164_v47 = vpop.f32.mrf.mxu0 }
0x1de9   :  { %v5229_v48 = vpop.f32.mrf.mxu1 }
0x1dea   :  { %5338 = vst [vmem:[%s6590_s3 + $0x18] sm:$0xff] %v5330_v36  ;;  %v5230_v15 = vadd.f32 %v5229_v48, %v5164_v47 }
0x1ded   :  { %v5305_v49 = vpop.f32.mrf.mxu3 }
0x1dee   :  { %v5321_v40 = vadd.f32 %v5305_v49, %v5227_v17 }
0x1df0   :  { %v5331_v59 = vadd.f32 %v5658_v50, %v5321_v40  ;;  %v5167_v26 = vpop.f32.mrf.mxu0 }
0x1df1   :  { %v5232_v43 = vpop.f32.mrf.mxu1 }
0x1df2   :  { %5339 = vst [vmem:[%s6590_s3 + $0x20] sm:$0xff] %v5331_v59  ;;  %v5233_v54 = vadd.f32 %v5232_v43, %v5167_v26 }
0x1df5   :  { %v5308_v39 = vpop.f32.mrf.mxu3 }
0x1df6   :  { %v5322_v42 = vadd.f32 %v5308_v39, %v5230_v15 }
0x1df8   :  { %v5332_v44 = vadd.f32 %v5658_v50, %v5322_v42  ;;  %v5170_v1 = vpop.f32.mrf.mxu0 }
0x1df9   :  { %v5235_v28 = vpop.f32.mrf.mxu1 }
0x1dfa   :  { %5340 = vst [vmem:[%s6590_s3 + $0x28] sm:$0xff] %v5332_v44  ;;  %v5236_v25 = vadd.f32 %v5235_v28, %v5170_v1 }
0x1dfd   :  { %v5311_v63 = vpop.f32.mrf.mxu3 }
0x1dfe   :  { %v5323_v51 = vadd.f32 %v5311_v63, %v5233_v54 }
0x1e00   :  { %v5333_v20 = vadd.f32 %v5658_v50, %v5323_v51 }
0x1e02   :  { %5341 = vst [vmem:[%s6590_s3 + $0x30] sm:$0xff] %v5333_v20 }
0x1e05   :  { %v5314_v30 = vpop.f32.mrf.mxu3 }
0x1e06   :  { %v5324_v24 = vadd.f32 %v5314_v30, %v5236_v25 }
0x1e08   :  { %v5334_v16 = vadd.f32 %v5658_v50, %v5324_v24 }
0x1e0a   :  { %5342 = vst [vmem:[%s6590_s3 + $0x38] sm:$0xf] %v5334_v16 }
0x1e0b   :  { %5347 = vsyncpa [#allocation14], 1 }
0x1e0c   :  { %5348 = vsyncpa [#allocation16], 1 }

</bundles_post_ra>
